<compile_context>
chip_gen: v5e
topology: v5e:2x2
jax: 0.10.0
libtpu: 0.0.40
codegen_flags: <defaults>
</compile_context>

<pallas_src>
import functools

import jax
import jax.numpy as jnp
from jax.experimental import pallas as pl
from jax.experimental.pallas import tpu as pltpu

# ----------------------------- model sizes ---------------------------------
BATCH = 2          # batch size
V = 8              # varible_num (graph nodes) -> GRU input size
F = 16             # in_features  -> GRU sequence length after transpose(1,2)
HID = 32           # GRU hidden_features
NUM_LAYERS = 2     # GRU layers
OUT = 4            # out_features of the final head

VMEM_SPEC = pl.BlockSpec(memory_space=pltpu.MemorySpace.VMEM)


# ========================= fused forward kernel =============================
def _make_fused_kernel(B, T, H, num_layers):
    """Build the fused GCN+GRU+FC kernel (all sizes static / unrolled)."""

    def kernel(*refs):
        aT_ref, xT_ref, g1w_ref, g1b_ref, g2w_ref, g2b_ref = refs[0:6]
        gru_refs = refs[6:6 + 4 * num_layers]
        idx = 6 + 4 * num_layers
        h0_ref = refs[idx]
        fc1w_ref, fc1b_ref, fc2w_ref, fc2b_ref, fc3w_ref, fc3b_ref = refs[idx + 1: idx + 7]
        out_ref = refs[idx + 7]
        fcin_sc = refs[idx + 8]            # (B*T, H) VMEM scratch, FC input rows

        f32 = jnp.float32
        aT = aT_ref[...]                   # (V, V)  = A_norm^T
        g1w = g1w_ref[...]                 # (2F, F) PyTorch layout (out, in)
        g1b = g1b_ref[...]                 # (2F, 1)
        g2w = g2w_ref[...]                 # (F, 2F)
        g2b = g2b_ref[...]                 # (F, 1)
        gru_w = [(gru_refs[4 * l][...],     # wih  (Din, 3H)  cols = [r | z | n]
                  gru_refs[4 * l + 1][...], # whh  (H,   3H)
                  gru_refs[4 * l + 2][...], # bih  (1,   3H)
                  gru_refs[4 * l + 3][...]) # bhh  (1,   3H)
                 for l in range(num_layers)]

        def cell(gi, h_prev, whh, bhh):
            # gi already contains x_t @ W_ih + b_ih (hoisted).
            gh = jnp.dot(h_prev, whh, preferred_element_type=f32) + bhh     # (1, 3H)
            r = jax.nn.sigmoid(gi[:, 0:H] + gh[:, 0:H])
            z = jax.nn.sigmoid(gi[:, H:2 * H] + gh[:, H:2 * H])
            n = jnp.tanh(gi[:, 2 * H:3 * H] + r * gh[:, 2 * H:3 * H])
            return (1.0 - z) * n + z * h_prev

        for b in range(B):                 # B=2, fully unrolled (independent chains)
            # ---- GCN x2, carried in transposed (feature-major) space --------
            # xtb = Xb^T (T=F, V);  (A @ Xb)^T = Xb^T @ A^T, etc.  No transposes.
            xtb = xT_ref[b]                                                   # (T, V)
            ax1 = jnp.dot(xtb, aT, preferred_element_type=f32)                # (F, V)
            h1 = jnp.maximum(jnp.dot(g1w, ax1, preferred_element_type=f32) + g1b, 0.0)   # (2F, V)
            ax2 = jnp.dot(h1, aT, preferred_element_type=f32)                 # (2F, V)
            seq = jnp.maximum(jnp.dot(g2w, ax2, preferred_element_type=f32) + g2b, 0.0)  # (T, V)

            # ---- hoisted GRU layer-0 input projection: one (T,V)x(V,3H) -----
            wih0, _, bih0, _ = gru_w[0]
            gi0 = jnp.dot(seq, wih0, preferred_element_type=f32) + bih0       # (T, 3H)
            gi_list = [gi0[t:t + 1, :] for t in range(T)]

            # ---- GRU layers, time loop fully unrolled ------------------------
            for l in range(num_layers):
                _, whh, _, bhh = gru_w[l]
                h = h0_ref[l][b:b + 1, :]                                     # (1, H)
                nxt = []
                for t in range(T):
                    h = cell(gi_list[t], h, whh, bhh)
                    if l + 1 < num_layers:
                        # next layer's input projection: off the recurrent
                        # critical path, overlaps with this layer's gate math.
                        wih_n, _, bih_n, _ = gru_w[l + 1]
                        nxt.append(jnp.dot(h, wih_n, preferred_element_type=f32) + bih_n)
                    else:
                        # final layer: row order matches PyTorch reshape(-1, H)
                        fcin_sc[pl.ds(b * T + t, 1), :] = h
                gi_list = nxt

        # ---- FC head on all B*T rows at once ---------------------------------
        flat = fcin_sc[...]                                                   # (B*T, H)
        z1 = jnp.maximum(jnp.dot(flat, fc1w_ref[...], preferred_element_type=f32) + fc1b_ref[...], 0.0)
        z2 = jnp.maximum(jnp.dot(z1, fc2w_ref[...], preferred_element_type=f32) + fc2b_ref[...], 0.0)
        out_ref[...] = jnp.dot(z2, fc3w_ref[...], preferred_element_type=f32) + fc3b_ref[...]

    return kernel


# ============================ param preparation ==============================
def prepare_params(p, num_layers=NUM_LAYERS):
    """One-time conversion to kernel layouts (transposes / bias reshapes)."""
    kp = {
        "aT": p["a_norm"].T,
        "g1w": p["gcn1_w"], "g1b": p["gcn1_b"].reshape(-1, 1),
        "g2w": p["gcn2_w"], "g2b": p["gcn2_b"].reshape(-1, 1),
        "fc1w": p["fc1_w"].T, "fc1b": p["fc1_b"].reshape(1, -1),
        "fc2w": p["fc2_w"].T, "fc2b": p["fc2_b"].reshape(1, -1),
        "fc3w": p["fc3_w"].T, "fc3b": p["fc3_b"].reshape(1, -1),
    }
    for l in range(num_layers):
        # PyTorch (3H, Din) rows [r; z; n]  ->  (Din, 3H) cols [r | z | n]
        kp[f"wih{l}"] = p[f"gru_wih_{l}"].T
        kp[f"whh{l}"] = p[f"gru_whh_{l}"].T
        kp[f"bih{l}"] = p[f"gru_bih_{l}"].reshape(1, -1)
        kp[f"bhh{l}"] = p[f"gru_bhh_{l}"].reshape(1, -1)
    return jax.tree_util.tree_map(lambda a: jnp.asarray(a, jnp.float32), kp)


def gcngru_forward(kp, x, states, num_layers=NUM_LAYERS):
    """x: (B, V, F) float32, states: (num_layers, B, H). Returns (B*F, OUT)."""
    B, Vn, Fdim = x.shape
    T = Fdim
    H = states.shape[-1]
    n_out = kp["fc3w"].shape[1]
    xT = jnp.transpose(x, (0, 2, 1))       # (B, T, V): tiny, done once, outside kernel

    inputs = [kp["aT"], xT, kp["g1w"], kp["g1b"], kp["g2w"], kp["g2b"]]
    for l in range(num_layers):
        inputs += [kp[f"wih{l}"], kp[f"whh{l}"], kp[f"bih{l}"], kp[f"bhh{l}"]]
    inputs += [states, kp["fc1w"], kp["fc1b"], kp["fc2w"], kp["fc2b"],
               kp["fc3w"], kp["fc3b"]]

    return pl.pallas_call(
        _make_fused_kernel(B, T, H, num_layers),
        out_shape=jax.ShapeDtypeStruct((B * T, n_out), jnp.float32),
        in_specs=[VMEM_SPEC] * len(inputs),
        out_specs=VMEM_SPEC,
        scratch_shapes=[pltpu.VMEM((B * T, H), jnp.float32)],
    )(*inputs)


# ================================ glue ======================================
def normalize_adj(adj):
    """D^{-1/2} A D^{-1/2}, with inf (zero-degree) -> 0, as in graphcov()."""
    deg = adj.sum(axis=1)
    d_inv_sqrt = jnp.where(deg > 0, 1.0 / jnp.sqrt(deg), 0.0)
    return adj * d_inv_sqrt[:, None] * d_inv_sqrt[None, :]


# ======================= pure-JAX reference (check) =========================
def reference_forward(params, x, states, num_layers):
    with jax.default_matmul_precision("highest"):
        a = params["a_norm"]

        def gcn(xx, w, b):
            y = jnp.einsum("uv,bvd->bud", a, xx)
            return jax.nn.relu(jnp.einsum("bvd,od->bvo", y, w) + b)

        y = gcn(x, params["gcn1_w"], params["gcn1_b"])
        y = gcn(y, params["gcn2_w"], params["gcn2_b"])
        inp = jnp.transpose(y, (0, 2, 1))                 # (B, T, V)
        B, T, _ = inp.shape
        for l in range(num_layers):
            wih = params[f"gru_wih_{l}"]; whh = params[f"gru_whh_{l}"]
            bih = params[f"gru_bih_{l}"]; bhh = params[f"gru_bhh_{l}"]
            h = states[l]
            outs = []
            for t in range(T):
                x_t = inp[:, t, :]
                gi = x_t @ wih.T + bih
                gh = h @ whh.T + bhh
                i_r, i_z, i_n = jnp.split(gi, 3, axis=-1)
                h_r, h_z, h_n = jnp.split(gh, 3, axis=-1)
                r = jax.nn.sigmoid(i_r + h_r)
                z = jax.nn.sigmoid(i_z + h_z)
                n = jnp.tanh(i_n + r * h_n)
                h = (1.0 - z) * n + z * h
                outs.append(h)
            inp = jnp.stack(outs, axis=1)
        flat = inp.reshape(-1, inp.shape[-1])
        h1 = jax.nn.relu(flat @ params["fc1_w"].T + params["fc1_b"])
        h2 = jax.nn.relu(h1 @ params["fc2_w"].T + params["fc2_b"])
        return h2 @ params["fc3_w"].T + params["fc3_b"]


# ============================== param setup =================================
def init_params(key):
    def linear(k, out_f, in_f, scale=0.1):
        k1, k2 = jax.random.split(k)
        return (scale * jax.random.normal(k1, (out_f, in_f), jnp.float32),
                scale * jax.random.normal(k2, (out_f,), jnp.float32))

    keys = jax.random.split(key, 16)
    p = {}
    # adjacency (symmetric 0/1 with self loops), then normalized
    a = jax.random.bernoulli(keys[0], 0.4, (V, V)).astype(jnp.float32)
    adj = jnp.maximum(a, a.T).at[jnp.arange(V), jnp.arange(V)].set(1.0)
    p["a_norm"] = normalize_adj(adj)
    # GCN blocks
    p["gcn1_w"], p["gcn1_b"] = linear(keys[1], 2 * F, F)
    p["gcn2_w"], p["gcn2_b"] = linear(keys[2], F, 2 * F)
    # GRU layers (PyTorch layout: (3H, D_in), (3H, H), (3H,), (3H,))
    for l in range(NUM_LAYERS):
        d_in = V if l == 0 else HID
        p[f"gru_wih_{l}"], p[f"gru_bih_{l}"] = linear(keys[3 + 2 * l], 3 * HID, d_in)
        p[f"gru_whh_{l}"], p[f"gru_bhh_{l}"] = linear(keys[4 + 2 * l], 3 * HID, HID)
    # FC head: H -> 128 -> 32 -> OUT
    p["fc1_w"], p["fc1_b"] = linear(keys[10], 128, HID)
    p["fc2_w"], p["fc2_b"] = linear(keys[11], 32, 128)
    p["fc3_w"], p["fc3_b"] = linear(keys[12], OUT, 32)
    return p


if __name__ == "__main__":
    root = jax.random.PRNGKey(0)
    k_param, k_x = jax.random.split(root)
    params = init_params(k_param)
    kparams = prepare_params(params)          # one-time kernel-layout weights

    x = jax.random.normal(k_x, (BATCH, V, F), jnp.float32)
    states = jnp.zeros((NUM_LAYERS, BATCH, HID), jnp.float32)   # init_states()

    fwd = jax.jit(functools.partial(gcngru_forward, num_layers=NUM_LAYERS))
    out = fwd(kparams, x, states)
    out = jax.block_until_ready(out)

    ref = reference_forward(params, x, states, NUM_LAYERS)
    assert out.shape == (BATCH * F, OUT), out.shape
    assert jnp.allclose(out, ref, atol=1e-3, rtol=1e-3), (
        float(jnp.max(jnp.abs(out - ref))))
    print("KERNEL_OK")
</pallas_src>

<mosaic_0001>
module attributes {stable_mosaic.version = 11 : i64} {
  func.func @kernel(%arg0: memref<8x8xf32, #tpu.memory_space<vmem>>, %arg1: memref<2x16x8xf32, #tpu.memory_space<vmem>>, %arg2: memref<32x16xf32, #tpu.memory_space<vmem>>, %arg3: memref<32x1xf32, #tpu.memory_space<vmem>>, %arg4: memref<16x32xf32, #tpu.memory_space<vmem>>, %arg5: memref<16x1xf32, #tpu.memory_space<vmem>>, %arg6: memref<8x96xf32, #tpu.memory_space<vmem>>, %arg7: memref<32x96xf32, #tpu.memory_space<vmem>>, %arg8: memref<1x96xf32, #tpu.memory_space<vmem>>, %arg9: memref<1x96xf32, #tpu.memory_space<vmem>>, %arg10: memref<32x96xf32, #tpu.memory_space<vmem>>, %arg11: memref<32x96xf32, #tpu.memory_space<vmem>>, %arg12: memref<1x96xf32, #tpu.memory_space<vmem>>, %arg13: memref<1x96xf32, #tpu.memory_space<vmem>>, %arg14: memref<2x2x32xf32, #tpu.memory_space<vmem>>, %arg15: memref<32x128xf32, #tpu.memory_space<vmem>>, %arg16: memref<1x128xf32, #tpu.memory_space<vmem>>, %arg17: memref<128x32xf32, #tpu.memory_space<vmem>>, %arg18: memref<1x32xf32, #tpu.memory_space<vmem>>, %arg19: memref<32x4xf32, #tpu.memory_space<vmem>>, %arg20: memref<1x4xf32, #tpu.memory_space<vmem>>, %arg21: memref<32x4xf32, #tpu.memory_space<vmem>>, %arg22: memref<32x32xf32, #tpu.memory_space<vmem>>) attributes {dimension_semantics = [], scalar_prefetch = 0 : i64, scratch_operands = 1 : i64, tpu.core_type = #tpu.core_type<tc>} {
    %c0 = arith.constant 0 : index
    %c0_0 = arith.constant 0 : index
    %0 = vector.load %arg0[%c0, %c0_0] : memref<8x8xf32, #tpu.memory_space<vmem>>, vector<8x8xf32>
    %c0_1 = arith.constant 0 : index
    %c0_2 = arith.constant 0 : index
    %1 = vector.load %arg2[%c0_1, %c0_2] : memref<32x16xf32, #tpu.memory_space<vmem>>, vector<32x16xf32>
    %c0_3 = arith.constant 0 : index
    %c0_4 = arith.constant 0 : index
    %2 = vector.load %arg3[%c0_3, %c0_4] : memref<32x1xf32, #tpu.memory_space<vmem>>, vector<32x1xf32>
    %c0_5 = arith.constant 0 : index
    %c0_6 = arith.constant 0 : index
    %3 = vector.load %arg4[%c0_5, %c0_6] : memref<16x32xf32, #tpu.memory_space<vmem>>, vector<16x32xf32>
    %c0_7 = arith.constant 0 : index
    %c0_8 = arith.constant 0 : index
    %4 = vector.load %arg5[%c0_7, %c0_8] : memref<16x1xf32, #tpu.memory_space<vmem>>, vector<16x1xf32>
    %c0_9 = arith.constant 0 : index
    %c0_10 = arith.constant 0 : index
    %5 = vector.load %arg6[%c0_9, %c0_10] : memref<8x96xf32, #tpu.memory_space<vmem>>, vector<8x96xf32>
    %c0_11 = arith.constant 0 : index
    %c0_12 = arith.constant 0 : index
    %6 = vector.load %arg7[%c0_11, %c0_12] : memref<32x96xf32, #tpu.memory_space<vmem>>, vector<32x96xf32>
    %c0_13 = arith.constant 0 : index
    %c0_14 = arith.constant 0 : index
    %7 = vector.load %arg8[%c0_13, %c0_14] : memref<1x96xf32, #tpu.memory_space<vmem>>, vector<1x96xf32>
    %c0_15 = arith.constant 0 : index
    %c0_16 = arith.constant 0 : index
    %8 = vector.load %arg9[%c0_15, %c0_16] : memref<1x96xf32, #tpu.memory_space<vmem>>, vector<1x96xf32>
    %c0_17 = arith.constant 0 : index
    %c0_18 = arith.constant 0 : index
    %9 = vector.load %arg10[%c0_17, %c0_18] : memref<32x96xf32, #tpu.memory_space<vmem>>, vector<32x96xf32>
    %c0_19 = arith.constant 0 : index
    %c0_20 = arith.constant 0 : index
    %10 = vector.load %arg11[%c0_19, %c0_20] : memref<32x96xf32, #tpu.memory_space<vmem>>, vector<32x96xf32>
    %c0_21 = arith.constant 0 : index
    %c0_22 = arith.constant 0 : index
    %11 = vector.load %arg12[%c0_21, %c0_22] : memref<1x96xf32, #tpu.memory_space<vmem>>, vector<1x96xf32>
    %c0_23 = arith.constant 0 : index
    %c0_24 = arith.constant 0 : index
    %12 = vector.load %arg13[%c0_23, %c0_24] : memref<1x96xf32, #tpu.memory_space<vmem>>, vector<1x96xf32>
    %c0_25 = arith.constant 0 : index
    %c0_26 = arith.constant 0 : index
    %c0_27 = arith.constant 0 : index
    %13 = vector.load %arg1[%c0_25, %c0_26, %c0_27] : memref<2x16x8xf32, #tpu.memory_space<vmem>>, vector<1x16x8xf32>
    %14 = vector.shape_cast %13 : vector<1x16x8xf32> to vector<16x8xf32>
    %cst = arith.constant dense<0.000000e+00> : vector<16x8xf32>
    %15 = tpu.matmul %14, %0, %cst {dimension_numbers = #tpu.dot_dimension_numbers<[1], [0], [0], [1], [0, 0, 1, 1], [], []>} : vector<16x8xf32>, vector<8x8xf32>, vector<16x8xf32> -> vector<16x8xf32>
    %cst_28 = arith.constant dense<0.000000e+00> : vector<32x8xf32>
    %16 = tpu.matmul %1, %15, %cst_28 {dimension_numbers = #tpu.dot_dimension_numbers<[1], [0], [0], [1], [0, 0, 1, 1], [], []>} : vector<32x16xf32>, vector<16x8xf32>, vector<32x8xf32> -> vector<32x8xf32>
    %17 = vector.broadcast %2 : vector<32x1xf32> to vector<32x8xf32>
    %18 = arith.addf %16, %17 : vector<32x8xf32>
    %cst_29 = arith.constant 0.000000e+00 : f32
    %19 = vector.broadcast %cst_29 : f32 to vector<32x8xf32>
    %20 = arith.maximumf %18, %19 : vector<32x8xf32>
    %cst_30 = arith.constant dense<0.000000e+00> : vector<32x8xf32>
    %21 = tpu.matmul %20, %0, %cst_30 {dimension_numbers = #tpu.dot_dimension_numbers<[1], [0], [0], [1], [0, 0, 1, 1], [], []>} : vector<32x8xf32>, vector<8x8xf32>, vector<32x8xf32> -> vector<32x8xf32>
    %cst_31 = arith.constant dense<0.000000e+00> : vector<16x8xf32>
    %22 = tpu.matmul %3, %21, %cst_31 {dimension_numbers = #tpu.dot_dimension_numbers<[1], [0], [0], [1], [0, 0, 1, 1], [], []>} : vector<16x32xf32>, vector<32x8xf32>, vector<16x8xf32> -> vector<16x8xf32>
    %23 = vector.broadcast %4 : vector<16x1xf32> to vector<16x8xf32>
    %24 = arith.addf %22, %23 : vector<16x8xf32>
    %cst_32 = arith.constant 0.000000e+00 : f32
    %25 = vector.broadcast %cst_32 : f32 to vector<16x8xf32>
    %26 = arith.maximumf %24, %25 : vector<16x8xf32>
    %cst_33 = arith.constant dense<0.000000e+00> : vector<16x96xf32>
    %27 = tpu.matmul %26, %5, %cst_33 {dimension_numbers = #tpu.dot_dimension_numbers<[1], [0], [0], [1], [0, 0, 1, 1], [], []>} : vector<16x8xf32>, vector<8x96xf32>, vector<16x96xf32> -> vector<16x96xf32>
    %28 = vector.broadcast %7 : vector<1x96xf32> to vector<16x96xf32>
    %29 = arith.addf %27, %28 : vector<16x96xf32>
    %30 = vector.extract_strided_slice %29 {offsets = [0, 0], sizes = [1, 96], strides = [1, 1]} : vector<16x96xf32> to vector<1x96xf32>
    %31 = vector.extract_strided_slice %29 {offsets = [1, 0], sizes = [1, 96], strides = [1, 1]} : vector<16x96xf32> to vector<1x96xf32>
    %32 = vector.extract_strided_slice %29 {offsets = [2, 0], sizes = [1, 96], strides = [1, 1]} : vector<16x96xf32> to vector<1x96xf32>
    %33 = vector.extract_strided_slice %29 {offsets = [3, 0], sizes = [1, 96], strides = [1, 1]} : vector<16x96xf32> to vector<1x96xf32>
    %34 = vector.extract_strided_slice %29 {offsets = [4, 0], sizes = [1, 96], strides = [1, 1]} : vector<16x96xf32> to vector<1x96xf32>
    %35 = vector.extract_strided_slice %29 {offsets = [5, 0], sizes = [1, 96], strides = [1, 1]} : vector<16x96xf32> to vector<1x96xf32>
    %36 = vector.extract_strided_slice %29 {offsets = [6, 0], sizes = [1, 96], strides = [1, 1]} : vector<16x96xf32> to vector<1x96xf32>
    %37 = vector.extract_strided_slice %29 {offsets = [7, 0], sizes = [1, 96], strides = [1, 1]} : vector<16x96xf32> to vector<1x96xf32>
    %38 = vector.extract_strided_slice %29 {offsets = [8, 0], sizes = [1, 96], strides = [1, 1]} : vector<16x96xf32> to vector<1x96xf32>
    %39 = vector.extract_strided_slice %29 {offsets = [9, 0], sizes = [1, 96], strides = [1, 1]} : vector<16x96xf32> to vector<1x96xf32>
    %40 = vector.extract_strided_slice %29 {offsets = [10, 0], sizes = [1, 96], strides = [1, 1]} : vector<16x96xf32> to vector<1x96xf32>
    %41 = vector.extract_strided_slice %29 {offsets = [11, 0], sizes = [1, 96], strides = [1, 1]} : vector<16x96xf32> to vector<1x96xf32>
    %42 = vector.extract_strided_slice %29 {offsets = [12, 0], sizes = [1, 96], strides = [1, 1]} : vector<16x96xf32> to vector<1x96xf32>
    %43 = vector.extract_strided_slice %29 {offsets = [13, 0], sizes = [1, 96], strides = [1, 1]} : vector<16x96xf32> to vector<1x96xf32>
    %44 = vector.extract_strided_slice %29 {offsets = [14, 0], sizes = [1, 96], strides = [1, 1]} : vector<16x96xf32> to vector<1x96xf32>
    %45 = vector.extract_strided_slice %29 {offsets = [15, 0], sizes = [1, 96], strides = [1, 1]} : vector<16x96xf32> to vector<1x96xf32>
    %c0_34 = arith.constant 0 : index
    %c0_35 = arith.constant 0 : index
    %c0_36 = arith.constant 0 : index
    %46 = vector.load %arg14[%c0_34, %c0_35, %c0_36] : memref<2x2x32xf32, #tpu.memory_space<vmem>>, vector<1x2x32xf32>
    %47 = vector.shape_cast %46 : vector<1x2x32xf32> to vector<2x32xf32>
    %48 = vector.extract_strided_slice %47 {offsets = [0, 0], sizes = [1, 32], strides = [1, 1]} : vector<2x32xf32> to vector<1x32xf32>
    %cst_37 = arith.constant dense<0.000000e+00> : vector<1x96xf32>
    %49 = tpu.matmul %48, %6, %cst_37 {dimension_numbers = #tpu.dot_dimension_numbers<[1], [0], [0], [1], [0, 0, 1, 1], [], []>} : vector<1x32xf32>, vector<32x96xf32>, vector<1x96xf32> -> vector<1x96xf32>
    %50 = arith.addf %49, %8 : vector<1x96xf32>
    %51 = vector.extract_strided_slice %30 {offsets = [0, 0], sizes = [1, 32], strides = [1, 1]} : vector<1x96xf32> to vector<1x32xf32>
    %52 = vector.extract_strided_slice %50 {offsets = [0, 0], sizes = [1, 32], strides = [1, 1]} : vector<1x96xf32> to vector<1x32xf32>
    %53 = arith.addf %51, %52 : vector<1x32xf32>
    %54 = arith.negf %53 : vector<1x32xf32>
    %55 = math.exp %54 : vector<1x32xf32>
    %cst_38 = arith.constant 1.000000e+00 : f32
    %56 = vector.broadcast %cst_38 : f32 to vector<1x32xf32>
    %57 = arith.addf %56, %55 : vector<1x32xf32>
    %58 = arith.divf %56, %57 : vector<1x32xf32>
    %59 = vector.extract_strided_slice %30 {offsets = [0, 32], sizes = [1, 32], strides = [1, 1]} : vector<1x96xf32> to vector<1x32xf32>
    %60 = vector.extract_strided_slice %50 {offsets = [0, 32], sizes = [1, 32], strides = [1, 1]} : vector<1x96xf32> to vector<1x32xf32>
    %61 = arith.addf %59, %60 : vector<1x32xf32>
    %62 = arith.negf %61 : vector<1x32xf32>
    %63 = math.exp %62 : vector<1x32xf32>
    %cst_39 = arith.constant 1.000000e+00 : f32
    %64 = vector.broadcast %cst_39 : f32 to vector<1x32xf32>
    %65 = arith.addf %64, %63 : vector<1x32xf32>
    %66 = arith.divf %64, %65 : vector<1x32xf32>
    %67 = vector.extract_strided_slice %30 {offsets = [0, 64], sizes = [1, 32], strides = [1, 1]} : vector<1x96xf32> to vector<1x32xf32>
    %68 = vector.extract_strided_slice %50 {offsets = [0, 64], sizes = [1, 32], strides = [1, 1]} : vector<1x96xf32> to vector<1x32xf32>
    %69 = arith.mulf %58, %68 : vector<1x32xf32>
    %70 = arith.addf %67, %69 : vector<1x32xf32>
    %71 = math.tanh %70 : vector<1x32xf32>
    %cst_40 = arith.constant 1.000000e+00 : f32
    %72 = vector.broadcast %cst_40 : f32 to vector<1x32xf32>
    %73 = arith.subf %72, %66 : vector<1x32xf32>
    %74 = arith.mulf %73, %71 : vector<1x32xf32>
    %75 = arith.mulf %66, %48 : vector<1x32xf32>
    %76 = arith.addf %74, %75 : vector<1x32xf32>
    %cst_41 = arith.constant dense<0.000000e+00> : vector<1x96xf32>
    %77 = tpu.matmul %76, %9, %cst_41 {dimension_numbers = #tpu.dot_dimension_numbers<[1], [0], [0], [1], [0, 0, 1, 1], [], []>} : vector<1x32xf32>, vector<32x96xf32>, vector<1x96xf32> -> vector<1x96xf32>
    %78 = arith.addf %77, %11 : vector<1x96xf32>
    %cst_42 = arith.constant dense<0.000000e+00> : vector<1x96xf32>
    %79 = tpu.matmul %76, %6, %cst_42 {dimension_numbers = #tpu.dot_dimension_numbers<[1], [0], [0], [1], [0, 0, 1, 1], [], []>} : vector<1x32xf32>, vector<32x96xf32>, vector<1x96xf32> -> vector<1x96xf32>
    %80 = arith.addf %79, %8 : vector<1x96xf32>
    %81 = vector.extract_strided_slice %31 {offsets = [0, 0], sizes = [1, 32], strides = [1, 1]} : vector<1x96xf32> to vector<1x32xf32>
    %82 = vector.extract_strided_slice %80 {offsets = [0, 0], sizes = [1, 32], strides = [1, 1]} : vector<1x96xf32> to vector<1x32xf32>
    %83 = arith.addf %81, %82 : vector<1x32xf32>
    %84 = arith.negf %83 : vector<1x32xf32>
    %85 = math.exp %84 : vector<1x32xf32>
    %cst_43 = arith.constant 1.000000e+00 : f32
    %86 = vector.broadcast %cst_43 : f32 to vector<1x32xf32>
    %87 = arith.addf %86, %85 : vector<1x32xf32>
    %88 = arith.divf %86, %87 : vector<1x32xf32>
    %89 = vector.extract_strided_slice %31 {offsets = [0, 32], sizes = [1, 32], strides = [1, 1]} : vector<1x96xf32> to vector<1x32xf32>
    %90 = vector.extract_strided_slice %80 {offsets = [0, 32], sizes = [1, 32], strides = [1, 1]} : vector<1x96xf32> to vector<1x32xf32>
    %91 = arith.addf %89, %90 : vector<1x32xf32>
    %92 = arith.negf %91 : vector<1x32xf32>
    %93 = math.exp %92 : vector<1x32xf32>
    %cst_44 = arith.constant 1.000000e+00 : f32
    %94 = vector.broadcast %cst_44 : f32 to vector<1x32xf32>
    %95 = arith.addf %94, %93 : vector<1x32xf32>
    %96 = arith.divf %94, %95 : vector<1x32xf32>
    %97 = vector.extract_strided_slice %31 {offsets = [0, 64], sizes = [1, 32], strides = [1, 1]} : vector<1x96xf32> to vector<1x32xf32>
    %98 = vector.extract_strided_slice %80 {offsets = [0, 64], sizes = [1, 32], strides = [1, 1]} : vector<1x96xf32> to vector<1x32xf32>
    %99 = arith.mulf %88, %98 : vector<1x32xf32>
    %100 = arith.addf %97, %99 : vector<1x32xf32>
    %101 = math.tanh %100 : vector<1x32xf32>
    %cst_45 = arith.constant 1.000000e+00 : f32
    %102 = vector.broadcast %cst_45 : f32 to vector<1x32xf32>
    %103 = arith.subf %102, %96 : vector<1x32xf32>
    %104 = arith.mulf %103, %101 : vector<1x32xf32>
    %105 = arith.mulf %96, %76 : vector<1x32xf32>
    %106 = arith.addf %104, %105 : vector<1x32xf32>
    %cst_46 = arith.constant dense<0.000000e+00> : vector<1x96xf32>
    %107 = tpu.matmul %106, %9, %cst_46 {dimension_numbers = #tpu.dot_dimension_numbers<[1], [0], [0], [1], [0, 0, 1, 1], [], []>} : vector<1x32xf32>, vector<32x96xf32>, vector<1x96xf32> -> vector<1x96xf32>
    %108 = arith.addf %107, %11 : vector<1x96xf32>
    %cst_47 = arith.constant dense<0.000000e+00> : vector<1x96xf32>
    %109 = tpu.matmul %106, %6, %cst_47 {dimension_numbers = #tpu.dot_dimension_numbers<[1], [0], [0], [1], [0, 0, 1, 1], [], []>} : vector<1x32xf32>, vector<32x96xf32>, vector<1x96xf32> -> vector<1x96xf32>
    %110 = arith.addf %109, %8 : vector<1x96xf32>
    %111 = vector.extract_strided_slice %32 {offsets = [0, 0], sizes = [1, 32], strides = [1, 1]} : vector<1x96xf32> to vector<1x32xf32>
    %112 = vector.extract_strided_slice %110 {offsets = [0, 0], sizes = [1, 32], strides = [1, 1]} : vector<1x96xf32> to vector<1x32xf32>
    %113 = arith.addf %111, %112 : vector<1x32xf32>
    %114 = arith.negf %113 : vector<1x32xf32>
    %115 = math.exp %114 : vector<1x32xf32>
    %cst_48 = arith.constant 1.000000e+00 : f32
    %116 = vector.broadcast %cst_48 : f32 to vector<1x32xf32>
    %117 = arith.addf %116, %115 : vector<1x32xf32>
    %118 = arith.divf %116, %117 : vector<1x32xf32>
    %119 = vector.extract_strided_slice %32 {offsets = [0, 32], sizes = [1, 32], strides = [1, 1]} : vector<1x96xf32> to vector<1x32xf32>
    %120 = vector.extract_strided_slice %110 {offsets = [0, 32], sizes = [1, 32], strides = [1, 1]} : vector<1x96xf32> to vector<1x32xf32>
    %121 = arith.addf %119, %120 : vector<1x32xf32>
    %122 = arith.negf %121 : vector<1x32xf32>
    %123 = math.exp %122 : vector<1x32xf32>
    %cst_49 = arith.constant 1.000000e+00 : f32
    %124 = vector.broadcast %cst_49 : f32 to vector<1x32xf32>
    %125 = arith.addf %124, %123 : vector<1x32xf32>
    %126 = arith.divf %124, %125 : vector<1x32xf32>
    %127 = vector.extract_strided_slice %32 {offsets = [0, 64], sizes = [1, 32], strides = [1, 1]} : vector<1x96xf32> to vector<1x32xf32>
    %128 = vector.extract_strided_slice %110 {offsets = [0, 64], sizes = [1, 32], strides = [1, 1]} : vector<1x96xf32> to vector<1x32xf32>
    %129 = arith.mulf %118, %128 : vector<1x32xf32>
    %130 = arith.addf %127, %129 : vector<1x32xf32>
    %131 = math.tanh %130 : vector<1x32xf32>
    %cst_50 = arith.constant 1.000000e+00 : f32
    %132 = vector.broadcast %cst_50 : f32 to vector<1x32xf32>
    %133 = arith.subf %132, %126 : vector<1x32xf32>
    %134 = arith.mulf %133, %131 : vector<1x32xf32>
    %135 = arith.mulf %126, %106 : vector<1x32xf32>
    %136 = arith.addf %134, %135 : vector<1x32xf32>
    %cst_51 = arith.constant dense<0.000000e+00> : vector<1x96xf32>
    %137 = tpu.matmul %136, %9, %cst_51 {dimension_numbers = #tpu.dot_dimension_numbers<[1], [0], [0], [1], [0, 0, 1, 1], [], []>} : vector<1x32xf32>, vector<32x96xf32>, vector<1x96xf32> -> vector<1x96xf32>
    %138 = arith.addf %137, %11 : vector<1x96xf32>
    %cst_52 = arith.constant dense<0.000000e+00> : vector<1x96xf32>
    %139 = tpu.matmul %136, %6, %cst_52 {dimension_numbers = #tpu.dot_dimension_numbers<[1], [0], [0], [1], [0, 0, 1, 1], [], []>} : vector<1x32xf32>, vector<32x96xf32>, vector<1x96xf32> -> vector<1x96xf32>
    %140 = arith.addf %139, %8 : vector<1x96xf32>
    %141 = vector.extract_strided_slice %33 {offsets = [0, 0], sizes = [1, 32], strides = [1, 1]} : vector<1x96xf32> to vector<1x32xf32>
    %142 = vector.extract_strided_slice %140 {offsets = [0, 0], sizes = [1, 32], strides = [1, 1]} : vector<1x96xf32> to vector<1x32xf32>
    %143 = arith.addf %141, %142 : vector<1x32xf32>
    %144 = arith.negf %143 : vector<1x32xf32>
    %145 = math.exp %144 : vector<1x32xf32>
    %cst_53 = arith.constant 1.000000e+00 : f32
    %146 = vector.broadcast %cst_53 : f32 to vector<1x32xf32>
    %147 = arith.addf %146, %145 : vector<1x32xf32>
    %148 = arith.divf %146, %147 : vector<1x32xf32>
    %149 = vector.extract_strided_slice %33 {offsets = [0, 32], sizes = [1, 32], strides = [1, 1]} : vector<1x96xf32> to vector<1x32xf32>
    %150 = vector.extract_strided_slice %140 {offsets = [0, 32], sizes = [1, 32], strides = [1, 1]} : vector<1x96xf32> to vector<1x32xf32>
    %151 = arith.addf %149, %150 : vector<1x32xf32>
    %152 = arith.negf %151 : vector<1x32xf32>
    %153 = math.exp %152 : vector<1x32xf32>
    %cst_54 = arith.constant 1.000000e+00 : f32
    %154 = vector.broadcast %cst_54 : f32 to vector<1x32xf32>
    %155 = arith.addf %154, %153 : vector<1x32xf32>
    %156 = arith.divf %154, %155 : vector<1x32xf32>
    %157 = vector.extract_strided_slice %33 {offsets = [0, 64], sizes = [1, 32], strides = [1, 1]} : vector<1x96xf32> to vector<1x32xf32>
    %158 = vector.extract_strided_slice %140 {offsets = [0, 64], sizes = [1, 32], strides = [1, 1]} : vector<1x96xf32> to vector<1x32xf32>
    %159 = arith.mulf %148, %158 : vector<1x32xf32>
    %160 = arith.addf %157, %159 : vector<1x32xf32>
    %161 = math.tanh %160 : vector<1x32xf32>
    %cst_55 = arith.constant 1.000000e+00 : f32
    %162 = vector.broadcast %cst_55 : f32 to vector<1x32xf32>
    %163 = arith.subf %162, %156 : vector<1x32xf32>
    %164 = arith.mulf %163, %161 : vector<1x32xf32>
    %165 = arith.mulf %156, %136 : vector<1x32xf32>
    %166 = arith.addf %164, %165 : vector<1x32xf32>
    %cst_56 = arith.constant dense<0.000000e+00> : vector<1x96xf32>
    %167 = tpu.matmul %166, %9, %cst_56 {dimension_numbers = #tpu.dot_dimension_numbers<[1], [0], [0], [1], [0, 0, 1, 1], [], []>} : vector<1x32xf32>, vector<32x96xf32>, vector<1x96xf32> -> vector<1x96xf32>
    %168 = arith.addf %167, %11 : vector<1x96xf32>
    %cst_57 = arith.constant dense<0.000000e+00> : vector<1x96xf32>
    %169 = tpu.matmul %166, %6, %cst_57 {dimension_numbers = #tpu.dot_dimension_numbers<[1], [0], [0], [1], [0, 0, 1, 1], [], []>} : vector<1x32xf32>, vector<32x96xf32>, vector<1x96xf32> -> vector<1x96xf32>
    %170 = arith.addf %169, %8 : vector<1x96xf32>
    %171 = vector.extract_strided_slice %34 {offsets = [0, 0], sizes = [1, 32], strides = [1, 1]} : vector<1x96xf32> to vector<1x32xf32>
    %172 = vector.extract_strided_slice %170 {offsets = [0, 0], sizes = [1, 32], strides = [1, 1]} : vector<1x96xf32> to vector<1x32xf32>
    %173 = arith.addf %171, %172 : vector<1x32xf32>
    %174 = arith.negf %173 : vector<1x32xf32>
    %175 = math.exp %174 : vector<1x32xf32>
    %cst_58 = arith.constant 1.000000e+00 : f32
    %176 = vector.broadcast %cst_58 : f32 to vector<1x32xf32>
    %177 = arith.addf %176, %175 : vector<1x32xf32>
    %178 = arith.divf %176, %177 : vector<1x32xf32>
    %179 = vector.extract_strided_slice %34 {offsets = [0, 32], sizes = [1, 32], strides = [1, 1]} : vector<1x96xf32> to vector<1x32xf32>
    %180 = vector.extract_strided_slice %170 {offsets = [0, 32], sizes = [1, 32], strides = [1, 1]} : vector<1x96xf32> to vector<1x32xf32>
    %181 = arith.addf %179, %180 : vector<1x32xf32>
    %182 = arith.negf %181 : vector<1x32xf32>
    %183 = math.exp %182 : vector<1x32xf32>
    %cst_59 = arith.constant 1.000000e+00 : f32
    %184 = vector.broadcast %cst_59 : f32 to vector<1x32xf32>
    %185 = arith.addf %184, %183 : vector<1x32xf32>
    %186 = arith.divf %184, %185 : vector<1x32xf32>
    %187 = vector.extract_strided_slice %34 {offsets = [0, 64], sizes = [1, 32], strides = [1, 1]} : vector<1x96xf32> to vector<1x32xf32>
    %188 = vector.extract_strided_slice %170 {offsets = [0, 64], sizes = [1, 32], strides = [1, 1]} : vector<1x96xf32> to vector<1x32xf32>
    %189 = arith.mulf %178, %188 : vector<1x32xf32>
    %190 = arith.addf %187, %189 : vector<1x32xf32>
    %191 = math.tanh %190 : vector<1x32xf32>
    %cst_60 = arith.constant 1.000000e+00 : f32
    %192 = vector.broadcast %cst_60 : f32 to vector<1x32xf32>
    %193 = arith.subf %192, %186 : vector<1x32xf32>
    %194 = arith.mulf %193, %191 : vector<1x32xf32>
    %195 = arith.mulf %186, %166 : vector<1x32xf32>
    %196 = arith.addf %194, %195 : vector<1x32xf32>
    %cst_61 = arith.constant dense<0.000000e+00> : vector<1x96xf32>
    %197 = tpu.matmul %196, %9, %cst_61 {dimension_numbers = #tpu.dot_dimension_numbers<[1], [0], [0], [1], [0, 0, 1, 1], [], []>} : vector<1x32xf32>, vector<32x96xf32>, vector<1x96xf32> -> vector<1x96xf32>
    %198 = arith.addf %197, %11 : vector<1x96xf32>
    %cst_62 = arith.constant dense<0.000000e+00> : vector<1x96xf32>
    %199 = tpu.matmul %196, %6, %cst_62 {dimension_numbers = #tpu.dot_dimension_numbers<[1], [0], [0], [1], [0, 0, 1, 1], [], []>} : vector<1x32xf32>, vector<32x96xf32>, vector<1x96xf32> -> vector<1x96xf32>
    %200 = arith.addf %199, %8 : vector<1x96xf32>
    %201 = vector.extract_strided_slice %35 {offsets = [0, 0], sizes = [1, 32], strides = [1, 1]} : vector<1x96xf32> to vector<1x32xf32>
    %202 = vector.extract_strided_slice %200 {offsets = [0, 0], sizes = [1, 32], strides = [1, 1]} : vector<1x96xf32> to vector<1x32xf32>
    %203 = arith.addf %201, %202 : vector<1x32xf32>
    %204 = arith.negf %203 : vector<1x32xf32>
    %205 = math.exp %204 : vector<1x32xf32>
    %cst_63 = arith.constant 1.000000e+00 : f32
    %206 = vector.broadcast %cst_63 : f32 to vector<1x32xf32>
    %207 = arith.addf %206, %205 : vector<1x32xf32>
    %208 = arith.divf %206, %207 : vector<1x32xf32>
    %209 = vector.extract_strided_slice %35 {offsets = [0, 32], sizes = [1, 32], strides = [1, 1]} : vector<1x96xf32> to vector<1x32xf32>
    %210 = vector.extract_strided_slice %200 {offsets = [0, 32], sizes = [1, 32], strides = [1, 1]} : vector<1x96xf32> to vector<1x32xf32>
    %211 = arith.addf %209, %210 : vector<1x32xf32>
    %212 = arith.negf %211 : vector<1x32xf32>
    %213 = math.exp %212 : vector<1x32xf32>
    %cst_64 = arith.constant 1.000000e+00 : f32
    %214 = vector.broadcast %cst_64 : f32 to vector<1x32xf32>
    %215 = arith.addf %214, %213 : vector<1x32xf32>
    %216 = arith.divf %214, %215 : vector<1x32xf32>
    %217 = vector.extract_strided_slice %35 {offsets = [0, 64], sizes = [1, 32], strides = [1, 1]} : vector<1x96xf32> to vector<1x32xf32>
    %218 = vector.extract_strided_slice %200 {offsets = [0, 64], sizes = [1, 32], strides = [1, 1]} : vector<1x96xf32> to vector<1x32xf32>
    %219 = arith.mulf %208, %218 : vector<1x32xf32>
    %220 = arith.addf %217, %219 : vector<1x32xf32>
    %221 = math.tanh %220 : vector<1x32xf32>
    %cst_65 = arith.constant 1.000000e+00 : f32
    %222 = vector.broadcast %cst_65 : f32 to vector<1x32xf32>
    %223 = arith.subf %222, %216 : vector<1x32xf32>
    %224 = arith.mulf %223, %221 : vector<1x32xf32>
    %225 = arith.mulf %216, %196 : vector<1x32xf32>
    %226 = arith.addf %224, %225 : vector<1x32xf32>
    %cst_66 = arith.constant dense<0.000000e+00> : vector<1x96xf32>
    %227 = tpu.matmul %226, %9, %cst_66 {dimension_numbers = #tpu.dot_dimension_numbers<[1], [0], [0], [1], [0, 0, 1, 1], [], []>} : vector<1x32xf32>, vector<32x96xf32>, vector<1x96xf32> -> vector<1x96xf32>
    %228 = arith.addf %227, %11 : vector<1x96xf32>
    %cst_67 = arith.constant dense<0.000000e+00> : vector<1x96xf32>
    %229 = tpu.matmul %226, %6, %cst_67 {dimension_numbers = #tpu.dot_dimension_numbers<[1], [0], [0], [1], [0, 0, 1, 1], [], []>} : vector<1x32xf32>, vector<32x96xf32>, vector<1x96xf32> -> vector<1x96xf32>
    %230 = arith.addf %229, %8 : vector<1x96xf32>
    %231 = vector.extract_strided_slice %36 {offsets = [0, 0], sizes = [1, 32], strides = [1, 1]} : vector<1x96xf32> to vector<1x32xf32>
    %232 = vector.extract_strided_slice %230 {offsets = [0, 0], sizes = [1, 32], strides = [1, 1]} : vector<1x96xf32> to vector<1x32xf32>
    %233 = arith.addf %231, %232 : vector<1x32xf32>
    %234 = arith.negf %233 : vector<1x32xf32>
    %235 = math.exp %234 : vector<1x32xf32>
    %cst_68 = arith.constant 1.000000e+00 : f32
    %236 = vector.broadcast %cst_68 : f32 to vector<1x32xf32>
    %237 = arith.addf %236, %235 : vector<1x32xf32>
    %238 = arith.divf %236, %237 : vector<1x32xf32>
    %239 = vector.extract_strided_slice %36 {offsets = [0, 32], sizes = [1, 32], strides = [1, 1]} : vector<1x96xf32> to vector<1x32xf32>
    %240 = vector.extract_strided_slice %230 {offsets = [0, 32], sizes = [1, 32], strides = [1, 1]} : vector<1x96xf32> to vector<1x32xf32>
    %241 = arith.addf %239, %240 : vector<1x32xf32>
    %242 = arith.negf %241 : vector<1x32xf32>
    %243 = math.exp %242 : vector<1x32xf32>
    %cst_69 = arith.constant 1.000000e+00 : f32
    %244 = vector.broadcast %cst_69 : f32 to vector<1x32xf32>
    %245 = arith.addf %244, %243 : vector<1x32xf32>
    %246 = arith.divf %244, %245 : vector<1x32xf32>
    %247 = vector.extract_strided_slice %36 {offsets = [0, 64], sizes = [1, 32], strides = [1, 1]} : vector<1x96xf32> to vector<1x32xf32>
    %248 = vector.extract_strided_slice %230 {offsets = [0, 64], sizes = [1, 32], strides = [1, 1]} : vector<1x96xf32> to vector<1x32xf32>
    %249 = arith.mulf %238, %248 : vector<1x32xf32>
    %250 = arith.addf %247, %249 : vector<1x32xf32>
    %251 = math.tanh %250 : vector<1x32xf32>
    %cst_70 = arith.constant 1.000000e+00 : f32
    %252 = vector.broadcast %cst_70 : f32 to vector<1x32xf32>
    %253 = arith.subf %252, %246 : vector<1x32xf32>
    %254 = arith.mulf %253, %251 : vector<1x32xf32>
    %255 = arith.mulf %246, %226 : vector<1x32xf32>
    %256 = arith.addf %254, %255 : vector<1x32xf32>
    %cst_71 = arith.constant dense<0.000000e+00> : vector<1x96xf32>
    %257 = tpu.matmul %256, %9, %cst_71 {dimension_numbers = #tpu.dot_dimension_numbers<[1], [0], [0], [1], [0, 0, 1, 1], [], []>} : vector<1x32xf32>, vector<32x96xf32>, vector<1x96xf32> -> vector<1x96xf32>
    %258 = arith.addf %257, %11 : vector<1x96xf32>
    %cst_72 = arith.constant dense<0.000000e+00> : vector<1x96xf32>
    %259 = tpu.matmul %256, %6, %cst_72 {dimension_numbers = #tpu.dot_dimension_numbers<[1], [0], [0], [1], [0, 0, 1, 1], [], []>} : vector<1x32xf32>, vector<32x96xf32>, vector<1x96xf32> -> vector<1x96xf32>
    %260 = arith.addf %259, %8 : vector<1x96xf32>
    %261 = vector.extract_strided_slice %37 {offsets = [0, 0], sizes = [1, 32], strides = [1, 1]} : vector<1x96xf32> to vector<1x32xf32>
    %262 = vector.extract_strided_slice %260 {offsets = [0, 0], sizes = [1, 32], strides = [1, 1]} : vector<1x96xf32> to vector<1x32xf32>
    %263 = arith.addf %261, %262 : vector<1x32xf32>
    %264 = arith.negf %263 : vector<1x32xf32>
    %265 = math.exp %264 : vector<1x32xf32>
    %cst_73 = arith.constant 1.000000e+00 : f32
    %266 = vector.broadcast %cst_73 : f32 to vector<1x32xf32>
    %267 = arith.addf %266, %265 : vector<1x32xf32>
    %268 = arith.divf %266, %267 : vector<1x32xf32>
    %269 = vector.extract_strided_slice %37 {offsets = [0, 32], sizes = [1, 32], strides = [1, 1]} : vector<1x96xf32> to vector<1x32xf32>
    %270 = vector.extract_strided_slice %260 {offsets = [0, 32], sizes = [1, 32], strides = [1, 1]} : vector<1x96xf32> to vector<1x32xf32>
    %271 = arith.addf %269, %270 : vector<1x32xf32>
    %272 = arith.negf %271 : vector<1x32xf32>
    %273 = math.exp %272 : vector<1x32xf32>
    %cst_74 = arith.constant 1.000000e+00 : f32
    %274 = vector.broadcast %cst_74 : f32 to vector<1x32xf32>
    %275 = arith.addf %274, %273 : vector<1x32xf32>
    %276 = arith.divf %274, %275 : vector<1x32xf32>
    %277 = vector.extract_strided_slice %37 {offsets = [0, 64], sizes = [1, 32], strides = [1, 1]} : vector<1x96xf32> to vector<1x32xf32>
    %278 = vector.extract_strided_slice %260 {offsets = [0, 64], sizes = [1, 32], strides = [1, 1]} : vector<1x96xf32> to vector<1x32xf32>
    %279 = arith.mulf %268, %278 : vector<1x32xf32>
    %280 = arith.addf %277, %279 : vector<1x32xf32>
    %281 = math.tanh %280 : vector<1x32xf32>
    %cst_75 = arith.constant 1.000000e+00 : f32
    %282 = vector.broadcast %cst_75 : f32 to vector<1x32xf32>
    %283 = arith.subf %282, %276 : vector<1x32xf32>
    %284 = arith.mulf %283, %281 : vector<1x32xf32>
    %285 = arith.mulf %276, %256 : vector<1x32xf32>
    %286 = arith.addf %284, %285 : vector<1x32xf32>
    %cst_76 = arith.constant dense<0.000000e+00> : vector<1x96xf32>
    %287 = tpu.matmul %286, %9, %cst_76 {dimension_numbers = #tpu.dot_dimension_numbers<[1], [0], [0], [1], [0, 0, 1, 1], [], []>} : vector<1x32xf32>, vector<32x96xf32>, vector<1x96xf32> -> vector<1x96xf32>
    %288 = arith.addf %287, %11 : vector<1x96xf32>
    %cst_77 = arith.constant dense<0.000000e+00> : vector<1x96xf32>
    %289 = tpu.matmul %286, %6, %cst_77 {dimension_numbers = #tpu.dot_dimension_numbers<[1], [0], [0], [1], [0, 0, 1, 1], [], []>} : vector<1x32xf32>, vector<32x96xf32>, vector<1x96xf32> -> vector<1x96xf32>
    %290 = arith.addf %289, %8 : vector<1x96xf32>
    %291 = vector.extract_strided_slice %38 {offsets = [0, 0], sizes = [1, 32], strides = [1, 1]} : vector<1x96xf32> to vector<1x32xf32>
    %292 = vector.extract_strided_slice %290 {offsets = [0, 0], sizes = [1, 32], strides = [1, 1]} : vector<1x96xf32> to vector<1x32xf32>
    %293 = arith.addf %291, %292 : vector<1x32xf32>
    %294 = arith.negf %293 : vector<1x32xf32>
    %295 = math.exp %294 : vector<1x32xf32>
    %cst_78 = arith.constant 1.000000e+00 : f32
    %296 = vector.broadcast %cst_78 : f32 to vector<1x32xf32>
    %297 = arith.addf %296, %295 : vector<1x32xf32>
    %298 = arith.divf %296, %297 : vector<1x32xf32>
    %299 = vector.extract_strided_slice %38 {offsets = [0, 32], sizes = [1, 32], strides = [1, 1]} : vector<1x96xf32> to vector<1x32xf32>
    %300 = vector.extract_strided_slice %290 {offsets = [0, 32], sizes = [1, 32], strides = [1, 1]} : vector<1x96xf32> to vector<1x32xf32>
    %301 = arith.addf %299, %300 : vector<1x32xf32>
    %302 = arith.negf %301 : vector<1x32xf32>
    %303 = math.exp %302 : vector<1x32xf32>
    %cst_79 = arith.constant 1.000000e+00 : f32
    %304 = vector.broadcast %cst_79 : f32 to vector<1x32xf32>
    %305 = arith.addf %304, %303 : vector<1x32xf32>
    %306 = arith.divf %304, %305 : vector<1x32xf32>
    %307 = vector.extract_strided_slice %38 {offsets = [0, 64], sizes = [1, 32], strides = [1, 1]} : vector<1x96xf32> to vector<1x32xf32>
    %308 = vector.extract_strided_slice %290 {offsets = [0, 64], sizes = [1, 32], strides = [1, 1]} : vector<1x96xf32> to vector<1x32xf32>
    %309 = arith.mulf %298, %308 : vector<1x32xf32>
    %310 = arith.addf %307, %309 : vector<1x32xf32>
    %311 = math.tanh %310 : vector<1x32xf32>
    %cst_80 = arith.constant 1.000000e+00 : f32
    %312 = vector.broadcast %cst_80 : f32 to vector<1x32xf32>
    %313 = arith.subf %312, %306 : vector<1x32xf32>
    %314 = arith.mulf %313, %311 : vector<1x32xf32>
    %315 = arith.mulf %306, %286 : vector<1x32xf32>
    %316 = arith.addf %314, %315 : vector<1x32xf32>
    %cst_81 = arith.constant dense<0.000000e+00> : vector<1x96xf32>
    %317 = tpu.matmul %316, %9, %cst_81 {dimension_numbers = #tpu.dot_dimension_numbers<[1], [0], [0], [1], [0, 0, 1, 1], [], []>} : vector<1x32xf32>, vector<32x96xf32>, vector<1x96xf32> -> vector<1x96xf32>
    %318 = arith.addf %317, %11 : vector<1x96xf32>
    %cst_82 = arith.constant dense<0.000000e+00> : vector<1x96xf32>
    %319 = tpu.matmul %316, %6, %cst_82 {dimension_numbers = #tpu.dot_dimension_numbers<[1], [0], [0], [1], [0, 0, 1, 1], [], []>} : vector<1x32xf32>, vector<32x96xf32>, vector<1x96xf32> -> vector<1x96xf32>
    %320 = arith.addf %319, %8 : vector<1x96xf32>
    %321 = vector.extract_strided_slice %39 {offsets = [0, 0], sizes = [1, 32], strides = [1, 1]} : vector<1x96xf32> to vector<1x32xf32>
    %322 = vector.extract_strided_slice %320 {offsets = [0, 0], sizes = [1, 32], strides = [1, 1]} : vector<1x96xf32> to vector<1x32xf32>
    %323 = arith.addf %321, %322 : vector<1x32xf32>
    %324 = arith.negf %323 : vector<1x32xf32>
    %325 = math.exp %324 : vector<1x32xf32>
    %cst_83 = arith.constant 1.000000e+00 : f32
    %326 = vector.broadcast %cst_83 : f32 to vector<1x32xf32>
    %327 = arith.addf %326, %325 : vector<1x32xf32>
    %328 = arith.divf %326, %327 : vector<1x32xf32>
    %329 = vector.extract_strided_slice %39 {offsets = [0, 32], sizes = [1, 32], strides = [1, 1]} : vector<1x96xf32> to vector<1x32xf32>
    %330 = vector.extract_strided_slice %320 {offsets = [0, 32], sizes = [1, 32], strides = [1, 1]} : vector<1x96xf32> to vector<1x32xf32>
    %331 = arith.addf %329, %330 : vector<1x32xf32>
    %332 = arith.negf %331 : vector<1x32xf32>
    %333 = math.exp %332 : vector<1x32xf32>
    %cst_84 = arith.constant 1.000000e+00 : f32
    %334 = vector.broadcast %cst_84 : f32 to vector<1x32xf32>
    %335 = arith.addf %334, %333 : vector<1x32xf32>
    %336 = arith.divf %334, %335 : vector<1x32xf32>
    %337 = vector.extract_strided_slice %39 {offsets = [0, 64], sizes = [1, 32], strides = [1, 1]} : vector<1x96xf32> to vector<1x32xf32>
    %338 = vector.extract_strided_slice %320 {offsets = [0, 64], sizes = [1, 32], strides = [1, 1]} : vector<1x96xf32> to vector<1x32xf32>
    %339 = arith.mulf %328, %338 : vector<1x32xf32>
    %340 = arith.addf %337, %339 : vector<1x32xf32>
    %341 = math.tanh %340 : vector<1x32xf32>
    %cst_85 = arith.constant 1.000000e+00 : f32
    %342 = vector.broadcast %cst_85 : f32 to vector<1x32xf32>
    %343 = arith.subf %342, %336 : vector<1x32xf32>
    %344 = arith.mulf %343, %341 : vector<1x32xf32>
    %345 = arith.mulf %336, %316 : vector<1x32xf32>
    %346 = arith.addf %344, %345 : vector<1x32xf32>
    %cst_86 = arith.constant dense<0.000000e+00> : vector<1x96xf32>
    %347 = tpu.matmul %346, %9, %cst_86 {dimension_numbers = #tpu.dot_dimension_numbers<[1], [0], [0], [1], [0, 0, 1, 1], [], []>} : vector<1x32xf32>, vector<32x96xf32>, vector<1x96xf32> -> vector<1x96xf32>
    %348 = arith.addf %347, %11 : vector<1x96xf32>
    %cst_87 = arith.constant dense<0.000000e+00> : vector<1x96xf32>
    %349 = tpu.matmul %346, %6, %cst_87 {dimension_numbers = #tpu.dot_dimension_numbers<[1], [0], [0], [1], [0, 0, 1, 1], [], []>} : vector<1x32xf32>, vector<32x96xf32>, vector<1x96xf32> -> vector<1x96xf32>
    %350 = arith.addf %349, %8 : vector<1x96xf32>
    %351 = vector.extract_strided_slice %40 {offsets = [0, 0], sizes = [1, 32], strides = [1, 1]} : vector<1x96xf32> to vector<1x32xf32>
    %352 = vector.extract_strided_slice %350 {offsets = [0, 0], sizes = [1, 32], strides = [1, 1]} : vector<1x96xf32> to vector<1x32xf32>
    %353 = arith.addf %351, %352 : vector<1x32xf32>
    %354 = arith.negf %353 : vector<1x32xf32>
    %355 = math.exp %354 : vector<1x32xf32>
    %cst_88 = arith.constant 1.000000e+00 : f32
    %356 = vector.broadcast %cst_88 : f32 to vector<1x32xf32>
    %357 = arith.addf %356, %355 : vector<1x32xf32>
    %358 = arith.divf %356, %357 : vector<1x32xf32>
    %359 = vector.extract_strided_slice %40 {offsets = [0, 32], sizes = [1, 32], strides = [1, 1]} : vector<1x96xf32> to vector<1x32xf32>
    %360 = vector.extract_strided_slice %350 {offsets = [0, 32], sizes = [1, 32], strides = [1, 1]} : vector<1x96xf32> to vector<1x32xf32>
    %361 = arith.addf %359, %360 : vector<1x32xf32>
    %362 = arith.negf %361 : vector<1x32xf32>
    %363 = math.exp %362 : vector<1x32xf32>
    %cst_89 = arith.constant 1.000000e+00 : f32
    %364 = vector.broadcast %cst_89 : f32 to vector<1x32xf32>
    %365 = arith.addf %364, %363 : vector<1x32xf32>
    %366 = arith.divf %364, %365 : vector<1x32xf32>
    %367 = vector.extract_strided_slice %40 {offsets = [0, 64], sizes = [1, 32], strides = [1, 1]} : vector<1x96xf32> to vector<1x32xf32>
    %368 = vector.extract_strided_slice %350 {offsets = [0, 64], sizes = [1, 32], strides = [1, 1]} : vector<1x96xf32> to vector<1x32xf32>
    %369 = arith.mulf %358, %368 : vector<1x32xf32>
    %370 = arith.addf %367, %369 : vector<1x32xf32>
    %371 = math.tanh %370 : vector<1x32xf32>
    %cst_90 = arith.constant 1.000000e+00 : f32
    %372 = vector.broadcast %cst_90 : f32 to vector<1x32xf32>
    %373 = arith.subf %372, %366 : vector<1x32xf32>
    %374 = arith.mulf %373, %371 : vector<1x32xf32>
    %375 = arith.mulf %366, %346 : vector<1x32xf32>
    %376 = arith.addf %374, %375 : vector<1x32xf32>
    %cst_91 = arith.constant dense<0.000000e+00> : vector<1x96xf32>
    %377 = tpu.matmul %376, %9, %cst_91 {dimension_numbers = #tpu.dot_dimension_numbers<[1], [0], [0], [1], [0, 0, 1, 1], [], []>} : vector<1x32xf32>, vector<32x96xf32>, vector<1x96xf32> -> vector<1x96xf32>
    %378 = arith.addf %377, %11 : vector<1x96xf32>
    %cst_92 = arith.constant dense<0.000000e+00> : vector<1x96xf32>
    %379 = tpu.matmul %376, %6, %cst_92 {dimension_numbers = #tpu.dot_dimension_numbers<[1], [0], [0], [1], [0, 0, 1, 1], [], []>} : vector<1x32xf32>, vector<32x96xf32>, vector<1x96xf32> -> vector<1x96xf32>
    %380 = arith.addf %379, %8 : vector<1x96xf32>
    %381 = vector.extract_strided_slice %41 {offsets = [0, 0], sizes = [1, 32], strides = [1, 1]} : vector<1x96xf32> to vector<1x32xf32>
    %382 = vector.extract_strided_slice %380 {offsets = [0, 0], sizes = [1, 32], strides = [1, 1]} : vector<1x96xf32> to vector<1x32xf32>
    %383 = arith.addf %381, %382 : vector<1x32xf32>
    %384 = arith.negf %383 : vector<1x32xf32>
    %385 = math.exp %384 : vector<1x32xf32>
    %cst_93 = arith.constant 1.000000e+00 : f32
    %386 = vector.broadcast %cst_93 : f32 to vector<1x32xf32>
    %387 = arith.addf %386, %385 : vector<1x32xf32>
    %388 = arith.divf %386, %387 : vector<1x32xf32>
    %389 = vector.extract_strided_slice %41 {offsets = [0, 32], sizes = [1, 32], strides = [1, 1]} : vector<1x96xf32> to vector<1x32xf32>
    %390 = vector.extract_strided_slice %380 {offsets = [0, 32], sizes = [1, 32], strides = [1, 1]} : vector<1x96xf32> to vector<1x32xf32>
    %391 = arith.addf %389, %390 : vector<1x32xf32>
    %392 = arith.negf %391 : vector<1x32xf32>
    %393 = math.exp %392 : vector<1x32xf32>
    %cst_94 = arith.constant 1.000000e+00 : f32
    %394 = vector.broadcast %cst_94 : f32 to vector<1x32xf32>
    %395 = arith.addf %394, %393 : vector<1x32xf32>
    %396 = arith.divf %394, %395 : vector<1x32xf32>
    %397 = vector.extract_strided_slice %41 {offsets = [0, 64], sizes = [1, 32], strides = [1, 1]} : vector<1x96xf32> to vector<1x32xf32>
    %398 = vector.extract_strided_slice %380 {offsets = [0, 64], sizes = [1, 32], strides = [1, 1]} : vector<1x96xf32> to vector<1x32xf32>
    %399 = arith.mulf %388, %398 : vector<1x32xf32>
    %400 = arith.addf %397, %399 : vector<1x32xf32>
    %401 = math.tanh %400 : vector<1x32xf32>
    %cst_95 = arith.constant 1.000000e+00 : f32
    %402 = vector.broadcast %cst_95 : f32 to vector<1x32xf32>
    %403 = arith.subf %402, %396 : vector<1x32xf32>
    %404 = arith.mulf %403, %401 : vector<1x32xf32>
    %405 = arith.mulf %396, %376 : vector<1x32xf32>
    %406 = arith.addf %404, %405 : vector<1x32xf32>
    %cst_96 = arith.constant dense<0.000000e+00> : vector<1x96xf32>
    %407 = tpu.matmul %406, %9, %cst_96 {dimension_numbers = #tpu.dot_dimension_numbers<[1], [0], [0], [1], [0, 0, 1, 1], [], []>} : vector<1x32xf32>, vector<32x96xf32>, vector<1x96xf32> -> vector<1x96xf32>
    %408 = arith.addf %407, %11 : vector<1x96xf32>
    %cst_97 = arith.constant dense<0.000000e+00> : vector<1x96xf32>
    %409 = tpu.matmul %406, %6, %cst_97 {dimension_numbers = #tpu.dot_dimension_numbers<[1], [0], [0], [1], [0, 0, 1, 1], [], []>} : vector<1x32xf32>, vector<32x96xf32>, vector<1x96xf32> -> vector<1x96xf32>
    %410 = arith.addf %409, %8 : vector<1x96xf32>
    %411 = vector.extract_strided_slice %42 {offsets = [0, 0], sizes = [1, 32], strides = [1, 1]} : vector<1x96xf32> to vector<1x32xf32>
    %412 = vector.extract_strided_slice %410 {offsets = [0, 0], sizes = [1, 32], strides = [1, 1]} : vector<1x96xf32> to vector<1x32xf32>
    %413 = arith.addf %411, %412 : vector<1x32xf32>
    %414 = arith.negf %413 : vector<1x32xf32>
    %415 = math.exp %414 : vector<1x32xf32>
    %cst_98 = arith.constant 1.000000e+00 : f32
    %416 = vector.broadcast %cst_98 : f32 to vector<1x32xf32>
    %417 = arith.addf %416, %415 : vector<1x32xf32>
    %418 = arith.divf %416, %417 : vector<1x32xf32>
    %419 = vector.extract_strided_slice %42 {offsets = [0, 32], sizes = [1, 32], strides = [1, 1]} : vector<1x96xf32> to vector<1x32xf32>
    %420 = vector.extract_strided_slice %410 {offsets = [0, 32], sizes = [1, 32], strides = [1, 1]} : vector<1x96xf32> to vector<1x32xf32>
    %421 = arith.addf %419, %420 : vector<1x32xf32>
    %422 = arith.negf %421 : vector<1x32xf32>
    %423 = math.exp %422 : vector<1x32xf32>
    %cst_99 = arith.constant 1.000000e+00 : f32
    %424 = vector.broadcast %cst_99 : f32 to vector<1x32xf32>
    %425 = arith.addf %424, %423 : vector<1x32xf32>
    %426 = arith.divf %424, %425 : vector<1x32xf32>
    %427 = vector.extract_strided_slice %42 {offsets = [0, 64], sizes = [1, 32], strides = [1, 1]} : vector<1x96xf32> to vector<1x32xf32>
    %428 = vector.extract_strided_slice %410 {offsets = [0, 64], sizes = [1, 32], strides = [1, 1]} : vector<1x96xf32> to vector<1x32xf32>
    %429 = arith.mulf %418, %428 : vector<1x32xf32>
    %430 = arith.addf %427, %429 : vector<1x32xf32>
    %431 = math.tanh %430 : vector<1x32xf32>
    %cst_100 = arith.constant 1.000000e+00 : f32
    %432 = vector.broadcast %cst_100 : f32 to vector<1x32xf32>
    %433 = arith.subf %432, %426 : vector<1x32xf32>
    %434 = arith.mulf %433, %431 : vector<1x32xf32>
    %435 = arith.mulf %426, %406 : vector<1x32xf32>
    %436 = arith.addf %434, %435 : vector<1x32xf32>
    %cst_101 = arith.constant dense<0.000000e+00> : vector<1x96xf32>
    %437 = tpu.matmul %436, %9, %cst_101 {dimension_numbers = #tpu.dot_dimension_numbers<[1], [0], [0], [1], [0, 0, 1, 1], [], []>} : vector<1x32xf32>, vector<32x96xf32>, vector<1x96xf32> -> vector<1x96xf32>
    %438 = arith.addf %437, %11 : vector<1x96xf32>
    %cst_102 = arith.constant dense<0.000000e+00> : vector<1x96xf32>
    %439 = tpu.matmul %436, %6, %cst_102 {dimension_numbers = #tpu.dot_dimension_numbers<[1], [0], [0], [1], [0, 0, 1, 1], [], []>} : vector<1x32xf32>, vector<32x96xf32>, vector<1x96xf32> -> vector<1x96xf32>
    %440 = arith.addf %439, %8 : vector<1x96xf32>
    %441 = vector.extract_strided_slice %43 {offsets = [0, 0], sizes = [1, 32], strides = [1, 1]} : vector<1x96xf32> to vector<1x32xf32>
    %442 = vector.extract_strided_slice %440 {offsets = [0, 0], sizes = [1, 32], strides = [1, 1]} : vector<1x96xf32> to vector<1x32xf32>
    %443 = arith.addf %441, %442 : vector<1x32xf32>
    %444 = arith.negf %443 : vector<1x32xf32>
    %445 = math.exp %444 : vector<1x32xf32>
    %cst_103 = arith.constant 1.000000e+00 : f32
    %446 = vector.broadcast %cst_103 : f32 to vector<1x32xf32>
    %447 = arith.addf %446, %445 : vector<1x32xf32>
    %448 = arith.divf %446, %447 : vector<1x32xf32>
    %449 = vector.extract_strided_slice %43 {offsets = [0, 32], sizes = [1, 32], strides = [1, 1]} : vector<1x96xf32> to vector<1x32xf32>
    %450 = vector.extract_strided_slice %440 {offsets = [0, 32], sizes = [1, 32], strides = [1, 1]} : vector<1x96xf32> to vector<1x32xf32>
    %451 = arith.addf %449, %450 : vector<1x32xf32>
    %452 = arith.negf %451 : vector<1x32xf32>
    %453 = math.exp %452 : vector<1x32xf32>
    %cst_104 = arith.constant 1.000000e+00 : f32
    %454 = vector.broadcast %cst_104 : f32 to vector<1x32xf32>
    %455 = arith.addf %454, %453 : vector<1x32xf32>
    %456 = arith.divf %454, %455 : vector<1x32xf32>
    %457 = vector.extract_strided_slice %43 {offsets = [0, 64], sizes = [1, 32], strides = [1, 1]} : vector<1x96xf32> to vector<1x32xf32>
    %458 = vector.extract_strided_slice %440 {offsets = [0, 64], sizes = [1, 32], strides = [1, 1]} : vector<1x96xf32> to vector<1x32xf32>
    %459 = arith.mulf %448, %458 : vector<1x32xf32>
    %460 = arith.addf %457, %459 : vector<1x32xf32>
    %461 = math.tanh %460 : vector<1x32xf32>
    %cst_105 = arith.constant 1.000000e+00 : f32
    %462 = vector.broadcast %cst_105 : f32 to vector<1x32xf32>
    %463 = arith.subf %462, %456 : vector<1x32xf32>
    %464 = arith.mulf %463, %461 : vector<1x32xf32>
    %465 = arith.mulf %456, %436 : vector<1x32xf32>
    %466 = arith.addf %464, %465 : vector<1x32xf32>
    %cst_106 = arith.constant dense<0.000000e+00> : vector<1x96xf32>
    %467 = tpu.matmul %466, %9, %cst_106 {dimension_numbers = #tpu.dot_dimension_numbers<[1], [0], [0], [1], [0, 0, 1, 1], [], []>} : vector<1x32xf32>, vector<32x96xf32>, vector<1x96xf32> -> vector<1x96xf32>
    %468 = arith.addf %467, %11 : vector<1x96xf32>
    %cst_107 = arith.constant dense<0.000000e+00> : vector<1x96xf32>
    %469 = tpu.matmul %466, %6, %cst_107 {dimension_numbers = #tpu.dot_dimension_numbers<[1], [0], [0], [1], [0, 0, 1, 1], [], []>} : vector<1x32xf32>, vector<32x96xf32>, vector<1x96xf32> -> vector<1x96xf32>
    %470 = arith.addf %469, %8 : vector<1x96xf32>
    %471 = vector.extract_strided_slice %44 {offsets = [0, 0], sizes = [1, 32], strides = [1, 1]} : vector<1x96xf32> to vector<1x32xf32>
    %472 = vector.extract_strided_slice %470 {offsets = [0, 0], sizes = [1, 32], strides = [1, 1]} : vector<1x96xf32> to vector<1x32xf32>
    %473 = arith.addf %471, %472 : vector<1x32xf32>
    %474 = arith.negf %473 : vector<1x32xf32>
    %475 = math.exp %474 : vector<1x32xf32>
    %cst_108 = arith.constant 1.000000e+00 : f32
    %476 = vector.broadcast %cst_108 : f32 to vector<1x32xf32>
    %477 = arith.addf %476, %475 : vector<1x32xf32>
    %478 = arith.divf %476, %477 : vector<1x32xf32>
    %479 = vector.extract_strided_slice %44 {offsets = [0, 32], sizes = [1, 32], strides = [1, 1]} : vector<1x96xf32> to vector<1x32xf32>
    %480 = vector.extract_strided_slice %470 {offsets = [0, 32], sizes = [1, 32], strides = [1, 1]} : vector<1x96xf32> to vector<1x32xf32>
    %481 = arith.addf %479, %480 : vector<1x32xf32>
    %482 = arith.negf %481 : vector<1x32xf32>
    %483 = math.exp %482 : vector<1x32xf32>
    %cst_109 = arith.constant 1.000000e+00 : f32
    %484 = vector.broadcast %cst_109 : f32 to vector<1x32xf32>
    %485 = arith.addf %484, %483 : vector<1x32xf32>
    %486 = arith.divf %484, %485 : vector<1x32xf32>
    %487 = vector.extract_strided_slice %44 {offsets = [0, 64], sizes = [1, 32], strides = [1, 1]} : vector<1x96xf32> to vector<1x32xf32>
    %488 = vector.extract_strided_slice %470 {offsets = [0, 64], sizes = [1, 32], strides = [1, 1]} : vector<1x96xf32> to vector<1x32xf32>
    %489 = arith.mulf %478, %488 : vector<1x32xf32>
    %490 = arith.addf %487, %489 : vector<1x32xf32>
    %491 = math.tanh %490 : vector<1x32xf32>
    %cst_110 = arith.constant 1.000000e+00 : f32
    %492 = vector.broadcast %cst_110 : f32 to vector<1x32xf32>
    %493 = arith.subf %492, %486 : vector<1x32xf32>
    %494 = arith.mulf %493, %491 : vector<1x32xf32>
    %495 = arith.mulf %486, %466 : vector<1x32xf32>
    %496 = arith.addf %494, %495 : vector<1x32xf32>
    %cst_111 = arith.constant dense<0.000000e+00> : vector<1x96xf32>
    %497 = tpu.matmul %496, %9, %cst_111 {dimension_numbers = #tpu.dot_dimension_numbers<[1], [0], [0], [1], [0, 0, 1, 1], [], []>} : vector<1x32xf32>, vector<32x96xf32>, vector<1x96xf32> -> vector<1x96xf32>
    %498 = arith.addf %497, %11 : vector<1x96xf32>
    %cst_112 = arith.constant dense<0.000000e+00> : vector<1x96xf32>
    %499 = tpu.matmul %496, %6, %cst_112 {dimension_numbers = #tpu.dot_dimension_numbers<[1], [0], [0], [1], [0, 0, 1, 1], [], []>} : vector<1x32xf32>, vector<32x96xf32>, vector<1x96xf32> -> vector<1x96xf32>
    %500 = arith.addf %499, %8 : vector<1x96xf32>
    %501 = vector.extract_strided_slice %45 {offsets = [0, 0], sizes = [1, 32], strides = [1, 1]} : vector<1x96xf32> to vector<1x32xf32>
    %502 = vector.extract_strided_slice %500 {offsets = [0, 0], sizes = [1, 32], strides = [1, 1]} : vector<1x96xf32> to vector<1x32xf32>
    %503 = arith.addf %501, %502 : vector<1x32xf32>
    %504 = arith.negf %503 : vector<1x32xf32>
    %505 = math.exp %504 : vector<1x32xf32>
    %cst_113 = arith.constant 1.000000e+00 : f32
    %506 = vector.broadcast %cst_113 : f32 to vector<1x32xf32>
    %507 = arith.addf %506, %505 : vector<1x32xf32>
    %508 = arith.divf %506, %507 : vector<1x32xf32>
    %509 = vector.extract_strided_slice %45 {offsets = [0, 32], sizes = [1, 32], strides = [1, 1]} : vector<1x96xf32> to vector<1x32xf32>
    %510 = vector.extract_strided_slice %500 {offsets = [0, 32], sizes = [1, 32], strides = [1, 1]} : vector<1x96xf32> to vector<1x32xf32>
    %511 = arith.addf %509, %510 : vector<1x32xf32>
    %512 = arith.negf %511 : vector<1x32xf32>
    %513 = math.exp %512 : vector<1x32xf32>
    %cst_114 = arith.constant 1.000000e+00 : f32
    %514 = vector.broadcast %cst_114 : f32 to vector<1x32xf32>
    %515 = arith.addf %514, %513 : vector<1x32xf32>
    %516 = arith.divf %514, %515 : vector<1x32xf32>
    %517 = vector.extract_strided_slice %45 {offsets = [0, 64], sizes = [1, 32], strides = [1, 1]} : vector<1x96xf32> to vector<1x32xf32>
    %518 = vector.extract_strided_slice %500 {offsets = [0, 64], sizes = [1, 32], strides = [1, 1]} : vector<1x96xf32> to vector<1x32xf32>
    %519 = arith.mulf %508, %518 : vector<1x32xf32>
    %520 = arith.addf %517, %519 : vector<1x32xf32>
    %521 = math.tanh %520 : vector<1x32xf32>
    %cst_115 = arith.constant 1.000000e+00 : f32
    %522 = vector.broadcast %cst_115 : f32 to vector<1x32xf32>
    %523 = arith.subf %522, %516 : vector<1x32xf32>
    %524 = arith.mulf %523, %521 : vector<1x32xf32>
    %525 = arith.mulf %516, %496 : vector<1x32xf32>
    %526 = arith.addf %524, %525 : vector<1x32xf32>
    %cst_116 = arith.constant dense<0.000000e+00> : vector<1x96xf32>
    %527 = tpu.matmul %526, %9, %cst_116 {dimension_numbers = #tpu.dot_dimension_numbers<[1], [0], [0], [1], [0, 0, 1, 1], [], []>} : vector<1x32xf32>, vector<32x96xf32>, vector<1x96xf32> -> vector<1x96xf32>
    %528 = arith.addf %527, %11 : vector<1x96xf32>
    %c1 = arith.constant 1 : index
    %c0_117 = arith.constant 0 : index
    %c0_118 = arith.constant 0 : index
    %529 = vector.load %arg14[%c1, %c0_117, %c0_118] : memref<2x2x32xf32, #tpu.memory_space<vmem>>, vector<1x2x32xf32>
    %530 = vector.shape_cast %529 : vector<1x2x32xf32> to vector<2x32xf32>
    %531 = vector.extract_strided_slice %530 {offsets = [0, 0], sizes = [1, 32], strides = [1, 1]} : vector<2x32xf32> to vector<1x32xf32>
    %cst_119 = arith.constant dense<0.000000e+00> : vector<1x96xf32>
    %532 = tpu.matmul %531, %10, %cst_119 {dimension_numbers = #tpu.dot_dimension_numbers<[1], [0], [0], [1], [0, 0, 1, 1], [], []>} : vector<1x32xf32>, vector<32x96xf32>, vector<1x96xf32> -> vector<1x96xf32>
    %533 = arith.addf %532, %12 : vector<1x96xf32>
    %534 = vector.extract_strided_slice %78 {offsets = [0, 0], sizes = [1, 32], strides = [1, 1]} : vector<1x96xf32> to vector<1x32xf32>
    %535 = vector.extract_strided_slice %533 {offsets = [0, 0], sizes = [1, 32], strides = [1, 1]} : vector<1x96xf32> to vector<1x32xf32>
    %536 = arith.addf %534, %535 : vector<1x32xf32>
    %537 = arith.negf %536 : vector<1x32xf32>
    %538 = math.exp %537 : vector<1x32xf32>
    %cst_120 = arith.constant 1.000000e+00 : f32
    %539 = vector.broadcast %cst_120 : f32 to vector<1x32xf32>
    %540 = arith.addf %539, %538 : vector<1x32xf32>
    %541 = arith.divf %539, %540 : vector<1x32xf32>
    %542 = vector.extract_strided_slice %78 {offsets = [0, 32], sizes = [1, 32], strides = [1, 1]} : vector<1x96xf32> to vector<1x32xf32>
    %543 = vector.extract_strided_slice %533 {offsets = [0, 32], sizes = [1, 32], strides = [1, 1]} : vector<1x96xf32> to vector<1x32xf32>
    %544 = arith.addf %542, %543 : vector<1x32xf32>
    %545 = arith.negf %544 : vector<1x32xf32>
    %546 = math.exp %545 : vector<1x32xf32>
    %cst_121 = arith.constant 1.000000e+00 : f32
    %547 = vector.broadcast %cst_121 : f32 to vector<1x32xf32>
    %548 = arith.addf %547, %546 : vector<1x32xf32>
    %549 = arith.divf %547, %548 : vector<1x32xf32>
    %550 = vector.extract_strided_slice %78 {offsets = [0, 64], sizes = [1, 32], strides = [1, 1]} : vector<1x96xf32> to vector<1x32xf32>
    %551 = vector.extract_strided_slice %533 {offsets = [0, 64], sizes = [1, 32], strides = [1, 1]} : vector<1x96xf32> to vector<1x32xf32>
    %552 = arith.mulf %541, %551 : vector<1x32xf32>
    %553 = arith.addf %550, %552 : vector<1x32xf32>
    %554 = math.tanh %553 : vector<1x32xf32>
    %cst_122 = arith.constant 1.000000e+00 : f32
    %555 = vector.broadcast %cst_122 : f32 to vector<1x32xf32>
    %556 = arith.subf %555, %549 : vector<1x32xf32>
    %557 = arith.mulf %556, %554 : vector<1x32xf32>
    %558 = arith.mulf %549, %531 : vector<1x32xf32>
    %559 = arith.addf %557, %558 : vector<1x32xf32>
    %c0_123 = arith.constant 0 : index
    %c0_124 = arith.constant 0 : index
    %560 = vector.load %arg22[%c0_123, %c0_124] : memref<32x32xf32, #tpu.memory_space<vmem>>, vector<1x32xf32>
    tpu.vector_store %arg22[%c0_123, %c0_124], %559 {strides = array<i32>} : memref<32x32xf32, #tpu.memory_space<vmem>>, vector<1x32xf32>,
    %cst_125 = arith.constant dense<0.000000e+00> : vector<1x96xf32>
    %561 = tpu.matmul %559, %10, %cst_125 {dimension_numbers = #tpu.dot_dimension_numbers<[1], [0], [0], [1], [0, 0, 1, 1], [], []>} : vector<1x32xf32>, vector<32x96xf32>, vector<1x96xf32> -> vector<1x96xf32>
    %562 = arith.addf %561, %12 : vector<1x96xf32>
    %563 = vector.extract_strided_slice %108 {offsets = [0, 0], sizes = [1, 32], strides = [1, 1]} : vector<1x96xf32> to vector<1x32xf32>
    %564 = vector.extract_strided_slice %562 {offsets = [0, 0], sizes = [1, 32], strides = [1, 1]} : vector<1x96xf32> to vector<1x32xf32>
    %565 = arith.addf %563, %564 : vector<1x32xf32>
    %566 = arith.negf %565 : vector<1x32xf32>
    %567 = math.exp %566 : vector<1x32xf32>
    %cst_126 = arith.constant 1.000000e+00 : f32
    %568 = vector.broadcast %cst_126 : f32 to vector<1x32xf32>
    %569 = arith.addf %568, %567 : vector<1x32xf32>
    %570 = arith.divf %568, %569 : vector<1x32xf32>
    %571 = vector.extract_strided_slice %108 {offsets = [0, 32], sizes = [1, 32], strides = [1, 1]} : vector<1x96xf32> to vector<1x32xf32>
    %572 = vector.extract_strided_slice %562 {offsets = [0, 32], sizes = [1, 32], strides = [1, 1]} : vector<1x96xf32> to vector<1x32xf32>
    %573 = arith.addf %571, %572 : vector<1x32xf32>
    %574 = arith.negf %573 : vector<1x32xf32>
    %575 = math.exp %574 : vector<1x32xf32>
    %cst_127 = arith.constant 1.000000e+00 : f32
    %576 = vector.broadcast %cst_127 : f32 to vector<1x32xf32>
    %577 = arith.addf %576, %575 : vector<1x32xf32>
    %578 = arith.divf %576, %577 : vector<1x32xf32>
    %579 = vector.extract_strided_slice %108 {offsets = [0, 64], sizes = [1, 32], strides = [1, 1]} : vector<1x96xf32> to vector<1x32xf32>
    %580 = vector.extract_strided_slice %562 {offsets = [0, 64], sizes = [1, 32], strides = [1, 1]} : vector<1x96xf32> to vector<1x32xf32>
    %581 = arith.mulf %570, %580 : vector<1x32xf32>
    %582 = arith.addf %579, %581 : vector<1x32xf32>
    %583 = math.tanh %582 : vector<1x32xf32>
    %cst_128 = arith.constant 1.000000e+00 : f32
    %584 = vector.broadcast %cst_128 : f32 to vector<1x32xf32>
    %585 = arith.subf %584, %578 : vector<1x32xf32>
    %586 = arith.mulf %585, %583 : vector<1x32xf32>
    %587 = arith.mulf %578, %559 : vector<1x32xf32>
    %588 = arith.addf %586, %587 : vector<1x32xf32>
    %c1_129 = arith.constant 1 : index
    %c0_130 = arith.constant 0 : index
    %589 = vector.load %arg22[%c1_129, %c0_130] : memref<32x32xf32, #tpu.memory_space<vmem>>, vector<1x32xf32>
    tpu.vector_store %arg22[%c1_129, %c0_130], %588 {strides = array<i32>} : memref<32x32xf32, #tpu.memory_space<vmem>>, vector<1x32xf32>,
    %cst_131 = arith.constant dense<0.000000e+00> : vector<1x96xf32>
    %590 = tpu.matmul %588, %10, %cst_131 {dimension_numbers = #tpu.dot_dimension_numbers<[1], [0], [0], [1], [0, 0, 1, 1], [], []>} : vector<1x32xf32>, vector<32x96xf32>, vector<1x96xf32> -> vector<1x96xf32>
    %591 = arith.addf %590, %12 : vector<1x96xf32>
    %592 = vector.extract_strided_slice %138 {offsets = [0, 0], sizes = [1, 32], strides = [1, 1]} : vector<1x96xf32> to vector<1x32xf32>
    %593 = vector.extract_strided_slice %591 {offsets = [0, 0], sizes = [1, 32], strides = [1, 1]} : vector<1x96xf32> to vector<1x32xf32>
    %594 = arith.addf %592, %593 : vector<1x32xf32>
    %595 = arith.negf %594 : vector<1x32xf32>
    %596 = math.exp %595 : vector<1x32xf32>
    %cst_132 = arith.constant 1.000000e+00 : f32
    %597 = vector.broadcast %cst_132 : f32 to vector<1x32xf32>
    %598 = arith.addf %597, %596 : vector<1x32xf32>
    %599 = arith.divf %597, %598 : vector<1x32xf32>
    %600 = vector.extract_strided_slice %138 {offsets = [0, 32], sizes = [1, 32], strides = [1, 1]} : vector<1x96xf32> to vector<1x32xf32>
    %601 = vector.extract_strided_slice %591 {offsets = [0, 32], sizes = [1, 32], strides = [1, 1]} : vector<1x96xf32> to vector<1x32xf32>
    %602 = arith.addf %600, %601 : vector<1x32xf32>
    %603 = arith.negf %602 : vector<1x32xf32>
    %604 = math.exp %603 : vector<1x32xf32>
    %cst_133 = arith.constant 1.000000e+00 : f32
    %605 = vector.broadcast %cst_133 : f32 to vector<1x32xf32>
    %606 = arith.addf %605, %604 : vector<1x32xf32>
    %607 = arith.divf %605, %606 : vector<1x32xf32>
    %608 = vector.extract_strided_slice %138 {offsets = [0, 64], sizes = [1, 32], strides = [1, 1]} : vector<1x96xf32> to vector<1x32xf32>
    %609 = vector.extract_strided_slice %591 {offsets = [0, 64], sizes = [1, 32], strides = [1, 1]} : vector<1x96xf32> to vector<1x32xf32>
    %610 = arith.mulf %599, %609 : vector<1x32xf32>
    %611 = arith.addf %608, %610 : vector<1x32xf32>
    %612 = math.tanh %611 : vector<1x32xf32>
    %cst_134 = arith.constant 1.000000e+00 : f32
    %613 = vector.broadcast %cst_134 : f32 to vector<1x32xf32>
    %614 = arith.subf %613, %607 : vector<1x32xf32>
    %615 = arith.mulf %614, %612 : vector<1x32xf32>
    %616 = arith.mulf %607, %588 : vector<1x32xf32>
    %617 = arith.addf %615, %616 : vector<1x32xf32>
    %c2 = arith.constant 2 : index
    %c0_135 = arith.constant 0 : index
    %618 = vector.load %arg22[%c2, %c0_135] : memref<32x32xf32, #tpu.memory_space<vmem>>, vector<1x32xf32>
    tpu.vector_store %arg22[%c2, %c0_135], %617 {strides = array<i32>} : memref<32x32xf32, #tpu.memory_space<vmem>>, vector<1x32xf32>,
    %cst_136 = arith.constant dense<0.000000e+00> : vector<1x96xf32>
    %619 = tpu.matmul %617, %10, %cst_136 {dimension_numbers = #tpu.dot_dimension_numbers<[1], [0], [0], [1], [0, 0, 1, 1], [], []>} : vector<1x32xf32>, vector<32x96xf32>, vector<1x96xf32> -> vector<1x96xf32>
    %620 = arith.addf %619, %12 : vector<1x96xf32>
    %621 = vector.extract_strided_slice %168 {offsets = [0, 0], sizes = [1, 32], strides = [1, 1]} : vector<1x96xf32> to vector<1x32xf32>
    %622 = vector.extract_strided_slice %620 {offsets = [0, 0], sizes = [1, 32], strides = [1, 1]} : vector<1x96xf32> to vector<1x32xf32>
    %623 = arith.addf %621, %622 : vector<1x32xf32>
    %624 = arith.negf %623 : vector<1x32xf32>
    %625 = math.exp %624 : vector<1x32xf32>
    %cst_137 = arith.constant 1.000000e+00 : f32
    %626 = vector.broadcast %cst_137 : f32 to vector<1x32xf32>
    %627 = arith.addf %626, %625 : vector<1x32xf32>
    %628 = arith.divf %626, %627 : vector<1x32xf32>
    %629 = vector.extract_strided_slice %168 {offsets = [0, 32], sizes = [1, 32], strides = [1, 1]} : vector<1x96xf32> to vector<1x32xf32>
    %630 = vector.extract_strided_slice %620 {offsets = [0, 32], sizes = [1, 32], strides = [1, 1]} : vector<1x96xf32> to vector<1x32xf32>
    %631 = arith.addf %629, %630 : vector<1x32xf32>
    %632 = arith.negf %631 : vector<1x32xf32>
    %633 = math.exp %632 : vector<1x32xf32>
    %cst_138 = arith.constant 1.000000e+00 : f32
    %634 = vector.broadcast %cst_138 : f32 to vector<1x32xf32>
    %635 = arith.addf %634, %633 : vector<1x32xf32>
    %636 = arith.divf %634, %635 : vector<1x32xf32>
    %637 = vector.extract_strided_slice %168 {offsets = [0, 64], sizes = [1, 32], strides = [1, 1]} : vector<1x96xf32> to vector<1x32xf32>
    %638 = vector.extract_strided_slice %620 {offsets = [0, 64], sizes = [1, 32], strides = [1, 1]} : vector<1x96xf32> to vector<1x32xf32>
    %639 = arith.mulf %628, %638 : vector<1x32xf32>
    %640 = arith.addf %637, %639 : vector<1x32xf32>
    %641 = math.tanh %640 : vector<1x32xf32>
    %cst_139 = arith.constant 1.000000e+00 : f32
    %642 = vector.broadcast %cst_139 : f32 to vector<1x32xf32>
    %643 = arith.subf %642, %636 : vector<1x32xf32>
    %644 = arith.mulf %643, %641 : vector<1x32xf32>
    %645 = arith.mulf %636, %617 : vector<1x32xf32>
    %646 = arith.addf %644, %645 : vector<1x32xf32>
    %c3 = arith.constant 3 : index
    %c0_140 = arith.constant 0 : index
    %647 = vector.load %arg22[%c3, %c0_140] : memref<32x32xf32, #tpu.memory_space<vmem>>, vector<1x32xf32>
    tpu.vector_store %arg22[%c3, %c0_140], %646 {strides = array<i32>} : memref<32x32xf32, #tpu.memory_space<vmem>>, vector<1x32xf32>,
    %cst_141 = arith.constant dense<0.000000e+00> : vector<1x96xf32>
    %648 = tpu.matmul %646, %10, %cst_141 {dimension_numbers = #tpu.dot_dimension_numbers<[1], [0], [0], [1], [0, 0, 1, 1], [], []>} : vector<1x32xf32>, vector<32x96xf32>, vector<1x96xf32> -> vector<1x96xf32>
    %649 = arith.addf %648, %12 : vector<1x96xf32>
    %650 = vector.extract_strided_slice %198 {offsets = [0, 0], sizes = [1, 32], strides = [1, 1]} : vector<1x96xf32> to vector<1x32xf32>
    %651 = vector.extract_strided_slice %649 {offsets = [0, 0], sizes = [1, 32], strides = [1, 1]} : vector<1x96xf32> to vector<1x32xf32>
    %652 = arith.addf %650, %651 : vector<1x32xf32>
    %653 = arith.negf %652 : vector<1x32xf32>
    %654 = math.exp %653 : vector<1x32xf32>
    %cst_142 = arith.constant 1.000000e+00 : f32
    %655 = vector.broadcast %cst_142 : f32 to vector<1x32xf32>
    %656 = arith.addf %655, %654 : vector<1x32xf32>
    %657 = arith.divf %655, %656 : vector<1x32xf32>
    %658 = vector.extract_strided_slice %198 {offsets = [0, 32], sizes = [1, 32], strides = [1, 1]} : vector<1x96xf32> to vector<1x32xf32>
    %659 = vector.extract_strided_slice %649 {offsets = [0, 32], sizes = [1, 32], strides = [1, 1]} : vector<1x96xf32> to vector<1x32xf32>
    %660 = arith.addf %658, %659 : vector<1x32xf32>
    %661 = arith.negf %660 : vector<1x32xf32>
    %662 = math.exp %661 : vector<1x32xf32>
    %cst_143 = arith.constant 1.000000e+00 : f32
    %663 = vector.broadcast %cst_143 : f32 to vector<1x32xf32>
    %664 = arith.addf %663, %662 : vector<1x32xf32>
    %665 = arith.divf %663, %664 : vector<1x32xf32>
    %666 = vector.extract_strided_slice %198 {offsets = [0, 64], sizes = [1, 32], strides = [1, 1]} : vector<1x96xf32> to vector<1x32xf32>
    %667 = vector.extract_strided_slice %649 {offsets = [0, 64], sizes = [1, 32], strides = [1, 1]} : vector<1x96xf32> to vector<1x32xf32>
    %668 = arith.mulf %657, %667 : vector<1x32xf32>
    %669 = arith.addf %666, %668 : vector<1x32xf32>
    %670 = math.tanh %669 : vector<1x32xf32>
    %cst_144 = arith.constant 1.000000e+00 : f32
    %671 = vector.broadcast %cst_144 : f32 to vector<1x32xf32>
    %672 = arith.subf %671, %665 : vector<1x32xf32>
    %673 = arith.mulf %672, %670 : vector<1x32xf32>
    %674 = arith.mulf %665, %646 : vector<1x32xf32>
    %675 = arith.addf %673, %674 : vector<1x32xf32>
    %c4 = arith.constant 4 : index
    %c0_145 = arith.constant 0 : index
    %676 = vector.load %arg22[%c4, %c0_145] : memref<32x32xf32, #tpu.memory_space<vmem>>, vector<1x32xf32>
    tpu.vector_store %arg22[%c4, %c0_145], %675 {strides = array<i32>} : memref<32x32xf32, #tpu.memory_space<vmem>>, vector<1x32xf32>,
    %cst_146 = arith.constant dense<0.000000e+00> : vector<1x96xf32>
    %677 = tpu.matmul %675, %10, %cst_146 {dimension_numbers = #tpu.dot_dimension_numbers<[1], [0], [0], [1], [0, 0, 1, 1], [], []>} : vector<1x32xf32>, vector<32x96xf32>, vector<1x96xf32> -> vector<1x96xf32>
    %678 = arith.addf %677, %12 : vector<1x96xf32>
    %679 = vector.extract_strided_slice %228 {offsets = [0, 0], sizes = [1, 32], strides = [1, 1]} : vector<1x96xf32> to vector<1x32xf32>
    %680 = vector.extract_strided_slice %678 {offsets = [0, 0], sizes = [1, 32], strides = [1, 1]} : vector<1x96xf32> to vector<1x32xf32>
    %681 = arith.addf %679, %680 : vector<1x32xf32>
    %682 = arith.negf %681 : vector<1x32xf32>
    %683 = math.exp %682 : vector<1x32xf32>
    %cst_147 = arith.constant 1.000000e+00 : f32
    %684 = vector.broadcast %cst_147 : f32 to vector<1x32xf32>
    %685 = arith.addf %684, %683 : vector<1x32xf32>
    %686 = arith.divf %684, %685 : vector<1x32xf32>
    %687 = vector.extract_strided_slice %228 {offsets = [0, 32], sizes = [1, 32], strides = [1, 1]} : vector<1x96xf32> to vector<1x32xf32>
    %688 = vector.extract_strided_slice %678 {offsets = [0, 32], sizes = [1, 32], strides = [1, 1]} : vector<1x96xf32> to vector<1x32xf32>
    %689 = arith.addf %687, %688 : vector<1x32xf32>
    %690 = arith.negf %689 : vector<1x32xf32>
    %691 = math.exp %690 : vector<1x32xf32>
    %cst_148 = arith.constant 1.000000e+00 : f32
    %692 = vector.broadcast %cst_148 : f32 to vector<1x32xf32>
    %693 = arith.addf %692, %691 : vector<1x32xf32>
    %694 = arith.divf %692, %693 : vector<1x32xf32>
    %695 = vector.extract_strided_slice %228 {offsets = [0, 64], sizes = [1, 32], strides = [1, 1]} : vector<1x96xf32> to vector<1x32xf32>
    %696 = vector.extract_strided_slice %678 {offsets = [0, 64], sizes = [1, 32], strides = [1, 1]} : vector<1x96xf32> to vector<1x32xf32>
    %697 = arith.mulf %686, %696 : vector<1x32xf32>
    %698 = arith.addf %695, %697 : vector<1x32xf32>
    %699 = math.tanh %698 : vector<1x32xf32>
    %cst_149 = arith.constant 1.000000e+00 : f32
    %700 = vector.broadcast %cst_149 : f32 to vector<1x32xf32>
    %701 = arith.subf %700, %694 : vector<1x32xf32>
    %702 = arith.mulf %701, %699 : vector<1x32xf32>
    %703 = arith.mulf %694, %675 : vector<1x32xf32>
    %704 = arith.addf %702, %703 : vector<1x32xf32>
    %c5 = arith.constant 5 : index
    %c0_150 = arith.constant 0 : index
    %705 = vector.load %arg22[%c5, %c0_150] : memref<32x32xf32, #tpu.memory_space<vmem>>, vector<1x32xf32>
    tpu.vector_store %arg22[%c5, %c0_150], %704 {strides = array<i32>} : memref<32x32xf32, #tpu.memory_space<vmem>>, vector<1x32xf32>,
    %cst_151 = arith.constant dense<0.000000e+00> : vector<1x96xf32>
    %706 = tpu.matmul %704, %10, %cst_151 {dimension_numbers = #tpu.dot_dimension_numbers<[1], [0], [0], [1], [0, 0, 1, 1], [], []>} : vector<1x32xf32>, vector<32x96xf32>, vector<1x96xf32> -> vector<1x96xf32>
    %707 = arith.addf %706, %12 : vector<1x96xf32>
    %708 = vector.extract_strided_slice %258 {offsets = [0, 0], sizes = [1, 32], strides = [1, 1]} : vector<1x96xf32> to vector<1x32xf32>
    %709 = vector.extract_strided_slice %707 {offsets = [0, 0], sizes = [1, 32], strides = [1, 1]} : vector<1x96xf32> to vector<1x32xf32>
    %710 = arith.addf %708, %709 : vector<1x32xf32>
    %711 = arith.negf %710 : vector<1x32xf32>
    %712 = math.exp %711 : vector<1x32xf32>
    %cst_152 = arith.constant 1.000000e+00 : f32
    %713 = vector.broadcast %cst_152 : f32 to vector<1x32xf32>
    %714 = arith.addf %713, %712 : vector<1x32xf32>
    %715 = arith.divf %713, %714 : vector<1x32xf32>
    %716 = vector.extract_strided_slice %258 {offsets = [0, 32], sizes = [1, 32], strides = [1, 1]} : vector<1x96xf32> to vector<1x32xf32>
    %717 = vector.extract_strided_slice %707 {offsets = [0, 32], sizes = [1, 32], strides = [1, 1]} : vector<1x96xf32> to vector<1x32xf32>
    %718 = arith.addf %716, %717 : vector<1x32xf32>
    %719 = arith.negf %718 : vector<1x32xf32>
    %720 = math.exp %719 : vector<1x32xf32>
    %cst_153 = arith.constant 1.000000e+00 : f32
    %721 = vector.broadcast %cst_153 : f32 to vector<1x32xf32>
    %722 = arith.addf %721, %720 : vector<1x32xf32>
    %723 = arith.divf %721, %722 : vector<1x32xf32>
    %724 = vector.extract_strided_slice %258 {offsets = [0, 64], sizes = [1, 32], strides = [1, 1]} : vector<1x96xf32> to vector<1x32xf32>
    %725 = vector.extract_strided_slice %707 {offsets = [0, 64], sizes = [1, 32], strides = [1, 1]} : vector<1x96xf32> to vector<1x32xf32>
    %726 = arith.mulf %715, %725 : vector<1x32xf32>
    %727 = arith.addf %724, %726 : vector<1x32xf32>
    %728 = math.tanh %727 : vector<1x32xf32>
    %cst_154 = arith.constant 1.000000e+00 : f32
    %729 = vector.broadcast %cst_154 : f32 to vector<1x32xf32>
    %730 = arith.subf %729, %723 : vector<1x32xf32>
    %731 = arith.mulf %730, %728 : vector<1x32xf32>
    %732 = arith.mulf %723, %704 : vector<1x32xf32>
    %733 = arith.addf %731, %732 : vector<1x32xf32>
    %c6 = arith.constant 6 : index
    %c0_155 = arith.constant 0 : index
    %734 = vector.load %arg22[%c6, %c0_155] : memref<32x32xf32, #tpu.memory_space<vmem>>, vector<1x32xf32>
    tpu.vector_store %arg22[%c6, %c0_155], %733 {strides = array<i32>} : memref<32x32xf32, #tpu.memory_space<vmem>>, vector<1x32xf32>,
    %cst_156 = arith.constant dense<0.000000e+00> : vector<1x96xf32>
    %735 = tpu.matmul %733, %10, %cst_156 {dimension_numbers = #tpu.dot_dimension_numbers<[1], [0], [0], [1], [0, 0, 1, 1], [], []>} : vector<1x32xf32>, vector<32x96xf32>, vector<1x96xf32> -> vector<1x96xf32>
    %736 = arith.addf %735, %12 : vector<1x96xf32>
    %737 = vector.extract_strided_slice %288 {offsets = [0, 0], sizes = [1, 32], strides = [1, 1]} : vector<1x96xf32> to vector<1x32xf32>
    %738 = vector.extract_strided_slice %736 {offsets = [0, 0], sizes = [1, 32], strides = [1, 1]} : vector<1x96xf32> to vector<1x32xf32>
    %739 = arith.addf %737, %738 : vector<1x32xf32>
    %740 = arith.negf %739 : vector<1x32xf32>
    %741 = math.exp %740 : vector<1x32xf32>
    %cst_157 = arith.constant 1.000000e+00 : f32
    %742 = vector.broadcast %cst_157 : f32 to vector<1x32xf32>
    %743 = arith.addf %742, %741 : vector<1x32xf32>
    %744 = arith.divf %742, %743 : vector<1x32xf32>
    %745 = vector.extract_strided_slice %288 {offsets = [0, 32], sizes = [1, 32], strides = [1, 1]} : vector<1x96xf32> to vector<1x32xf32>
    %746 = vector.extract_strided_slice %736 {offsets = [0, 32], sizes = [1, 32], strides = [1, 1]} : vector<1x96xf32> to vector<1x32xf32>
    %747 = arith.addf %745, %746 : vector<1x32xf32>
    %748 = arith.negf %747 : vector<1x32xf32>
    %749 = math.exp %748 : vector<1x32xf32>
    %cst_158 = arith.constant 1.000000e+00 : f32
    %750 = vector.broadcast %cst_158 : f32 to vector<1x32xf32>
    %751 = arith.addf %750, %749 : vector<1x32xf32>
    %752 = arith.divf %750, %751 : vector<1x32xf32>
    %753 = vector.extract_strided_slice %288 {offsets = [0, 64], sizes = [1, 32], strides = [1, 1]} : vector<1x96xf32> to vector<1x32xf32>
    %754 = vector.extract_strided_slice %736 {offsets = [0, 64], sizes = [1, 32], strides = [1, 1]} : vector<1x96xf32> to vector<1x32xf32>
    %755 = arith.mulf %744, %754 : vector<1x32xf32>
    %756 = arith.addf %753, %755 : vector<1x32xf32>
    %757 = math.tanh %756 : vector<1x32xf32>
    %cst_159 = arith.constant 1.000000e+00 : f32
    %758 = vector.broadcast %cst_159 : f32 to vector<1x32xf32>
    %759 = arith.subf %758, %752 : vector<1x32xf32>
    %760 = arith.mulf %759, %757 : vector<1x32xf32>
    %761 = arith.mulf %752, %733 : vector<1x32xf32>
    %762 = arith.addf %760, %761 : vector<1x32xf32>
    %c7 = arith.constant 7 : index
    %c0_160 = arith.constant 0 : index
    %763 = vector.load %arg22[%c7, %c0_160] : memref<32x32xf32, #tpu.memory_space<vmem>>, vector<1x32xf32>
    tpu.vector_store %arg22[%c7, %c0_160], %762 {strides = array<i32>} : memref<32x32xf32, #tpu.memory_space<vmem>>, vector<1x32xf32>,
    %cst_161 = arith.constant dense<0.000000e+00> : vector<1x96xf32>
    %764 = tpu.matmul %762, %10, %cst_161 {dimension_numbers = #tpu.dot_dimension_numbers<[1], [0], [0], [1], [0, 0, 1, 1], [], []>} : vector<1x32xf32>, vector<32x96xf32>, vector<1x96xf32> -> vector<1x96xf32>
    %765 = arith.addf %764, %12 : vector<1x96xf32>
    %766 = vector.extract_strided_slice %318 {offsets = [0, 0], sizes = [1, 32], strides = [1, 1]} : vector<1x96xf32> to vector<1x32xf32>
    %767 = vector.extract_strided_slice %765 {offsets = [0, 0], sizes = [1, 32], strides = [1, 1]} : vector<1x96xf32> to vector<1x32xf32>
    %768 = arith.addf %766, %767 : vector<1x32xf32>
    %769 = arith.negf %768 : vector<1x32xf32>
    %770 = math.exp %769 : vector<1x32xf32>
    %cst_162 = arith.constant 1.000000e+00 : f32
    %771 = vector.broadcast %cst_162 : f32 to vector<1x32xf32>
    %772 = arith.addf %771, %770 : vector<1x32xf32>
    %773 = arith.divf %771, %772 : vector<1x32xf32>
    %774 = vector.extract_strided_slice %318 {offsets = [0, 32], sizes = [1, 32], strides = [1, 1]} : vector<1x96xf32> to vector<1x32xf32>
    %775 = vector.extract_strided_slice %765 {offsets = [0, 32], sizes = [1, 32], strides = [1, 1]} : vector<1x96xf32> to vector<1x32xf32>
    %776 = arith.addf %774, %775 : vector<1x32xf32>
    %777 = arith.negf %776 : vector<1x32xf32>
    %778 = math.exp %777 : vector<1x32xf32>
    %cst_163 = arith.constant 1.000000e+00 : f32
    %779 = vector.broadcast %cst_163 : f32 to vector<1x32xf32>
    %780 = arith.addf %779, %778 : vector<1x32xf32>
    %781 = arith.divf %779, %780 : vector<1x32xf32>
    %782 = vector.extract_strided_slice %318 {offsets = [0, 64], sizes = [1, 32], strides = [1, 1]} : vector<1x96xf32> to vector<1x32xf32>
    %783 = vector.extract_strided_slice %765 {offsets = [0, 64], sizes = [1, 32], strides = [1, 1]} : vector<1x96xf32> to vector<1x32xf32>
    %784 = arith.mulf %773, %783 : vector<1x32xf32>
    %785 = arith.addf %782, %784 : vector<1x32xf32>
    %786 = math.tanh %785 : vector<1x32xf32>
    %cst_164 = arith.constant 1.000000e+00 : f32
    %787 = vector.broadcast %cst_164 : f32 to vector<1x32xf32>
    %788 = arith.subf %787, %781 : vector<1x32xf32>
    %789 = arith.mulf %788, %786 : vector<1x32xf32>
    %790 = arith.mulf %781, %762 : vector<1x32xf32>
    %791 = arith.addf %789, %790 : vector<1x32xf32>
    %c8 = arith.constant 8 : index
    %c0_165 = arith.constant 0 : index
    %792 = vector.load %arg22[%c8, %c0_165] : memref<32x32xf32, #tpu.memory_space<vmem>>, vector<1x32xf32>
    tpu.vector_store %arg22[%c8, %c0_165], %791 {strides = array<i32>} : memref<32x32xf32, #tpu.memory_space<vmem>>, vector<1x32xf32>,
    %cst_166 = arith.constant dense<0.000000e+00> : vector<1x96xf32>
    %793 = tpu.matmul %791, %10, %cst_166 {dimension_numbers = #tpu.dot_dimension_numbers<[1], [0], [0], [1], [0, 0, 1, 1], [], []>} : vector<1x32xf32>, vector<32x96xf32>, vector<1x96xf32> -> vector<1x96xf32>
    %794 = arith.addf %793, %12 : vector<1x96xf32>
    %795 = vector.extract_strided_slice %348 {offsets = [0, 0], sizes = [1, 32], strides = [1, 1]} : vector<1x96xf32> to vector<1x32xf32>
    %796 = vector.extract_strided_slice %794 {offsets = [0, 0], sizes = [1, 32], strides = [1, 1]} : vector<1x96xf32> to vector<1x32xf32>
    %797 = arith.addf %795, %796 : vector<1x32xf32>
    %798 = arith.negf %797 : vector<1x32xf32>
    %799 = math.exp %798 : vector<1x32xf32>
    %cst_167 = arith.constant 1.000000e+00 : f32
    %800 = vector.broadcast %cst_167 : f32 to vector<1x32xf32>
    %801 = arith.addf %800, %799 : vector<1x32xf32>
    %802 = arith.divf %800, %801 : vector<1x32xf32>
    %803 = vector.extract_strided_slice %348 {offsets = [0, 32], sizes = [1, 32], strides = [1, 1]} : vector<1x96xf32> to vector<1x32xf32>
    %804 = vector.extract_strided_slice %794 {offsets = [0, 32], sizes = [1, 32], strides = [1, 1]} : vector<1x96xf32> to vector<1x32xf32>
    %805 = arith.addf %803, %804 : vector<1x32xf32>
    %806 = arith.negf %805 : vector<1x32xf32>
    %807 = math.exp %806 : vector<1x32xf32>
    %cst_168 = arith.constant 1.000000e+00 : f32
    %808 = vector.broadcast %cst_168 : f32 to vector<1x32xf32>
    %809 = arith.addf %808, %807 : vector<1x32xf32>
    %810 = arith.divf %808, %809 : vector<1x32xf32>
    %811 = vector.extract_strided_slice %348 {offsets = [0, 64], sizes = [1, 32], strides = [1, 1]} : vector<1x96xf32> to vector<1x32xf32>
    %812 = vector.extract_strided_slice %794 {offsets = [0, 64], sizes = [1, 32], strides = [1, 1]} : vector<1x96xf32> to vector<1x32xf32>
    %813 = arith.mulf %802, %812 : vector<1x32xf32>
    %814 = arith.addf %811, %813 : vector<1x32xf32>
    %815 = math.tanh %814 : vector<1x32xf32>
    %cst_169 = arith.constant 1.000000e+00 : f32
    %816 = vector.broadcast %cst_169 : f32 to vector<1x32xf32>
    %817 = arith.subf %816, %810 : vector<1x32xf32>
    %818 = arith.mulf %817, %815 : vector<1x32xf32>
    %819 = arith.mulf %810, %791 : vector<1x32xf32>
    %820 = arith.addf %818, %819 : vector<1x32xf32>
    %c9 = arith.constant 9 : index
    %c0_170 = arith.constant 0 : index
    %821 = vector.load %arg22[%c9, %c0_170] : memref<32x32xf32, #tpu.memory_space<vmem>>, vector<1x32xf32>
    tpu.vector_store %arg22[%c9, %c0_170], %820 {strides = array<i32>} : memref<32x32xf32, #tpu.memory_space<vmem>>, vector<1x32xf32>,
    %cst_171 = arith.constant dense<0.000000e+00> : vector<1x96xf32>
    %822 = tpu.matmul %820, %10, %cst_171 {dimension_numbers = #tpu.dot_dimension_numbers<[1], [0], [0], [1], [0, 0, 1, 1], [], []>} : vector<1x32xf32>, vector<32x96xf32>, vector<1x96xf32> -> vector<1x96xf32>
    %823 = arith.addf %822, %12 : vector<1x96xf32>
    %824 = vector.extract_strided_slice %378 {offsets = [0, 0], sizes = [1, 32], strides = [1, 1]} : vector<1x96xf32> to vector<1x32xf32>
    %825 = vector.extract_strided_slice %823 {offsets = [0, 0], sizes = [1, 32], strides = [1, 1]} : vector<1x96xf32> to vector<1x32xf32>
    %826 = arith.addf %824, %825 : vector<1x32xf32>
    %827 = arith.negf %826 : vector<1x32xf32>
    %828 = math.exp %827 : vector<1x32xf32>
    %cst_172 = arith.constant 1.000000e+00 : f32
    %829 = vector.broadcast %cst_172 : f32 to vector<1x32xf32>
    %830 = arith.addf %829, %828 : vector<1x32xf32>
    %831 = arith.divf %829, %830 : vector<1x32xf32>
    %832 = vector.extract_strided_slice %378 {offsets = [0, 32], sizes = [1, 32], strides = [1, 1]} : vector<1x96xf32> to vector<1x32xf32>
    %833 = vector.extract_strided_slice %823 {offsets = [0, 32], sizes = [1, 32], strides = [1, 1]} : vector<1x96xf32> to vector<1x32xf32>
    %834 = arith.addf %832, %833 : vector<1x32xf32>
    %835 = arith.negf %834 : vector<1x32xf32>
    %836 = math.exp %835 : vector<1x32xf32>
    %cst_173 = arith.constant 1.000000e+00 : f32
    %837 = vector.broadcast %cst_173 : f32 to vector<1x32xf32>
    %838 = arith.addf %837, %836 : vector<1x32xf32>
    %839 = arith.divf %837, %838 : vector<1x32xf32>
    %840 = vector.extract_strided_slice %378 {offsets = [0, 64], sizes = [1, 32], strides = [1, 1]} : vector<1x96xf32> to vector<1x32xf32>
    %841 = vector.extract_strided_slice %823 {offsets = [0, 64], sizes = [1, 32], strides = [1, 1]} : vector<1x96xf32> to vector<1x32xf32>
    %842 = arith.mulf %831, %841 : vector<1x32xf32>
    %843 = arith.addf %840, %842 : vector<1x32xf32>
    %844 = math.tanh %843 : vector<1x32xf32>
    %cst_174 = arith.constant 1.000000e+00 : f32
    %845 = vector.broadcast %cst_174 : f32 to vector<1x32xf32>
    %846 = arith.subf %845, %839 : vector<1x32xf32>
    %847 = arith.mulf %846, %844 : vector<1x32xf32>
    %848 = arith.mulf %839, %820 : vector<1x32xf32>
    %849 = arith.addf %847, %848 : vector<1x32xf32>
    %c10 = arith.constant 10 : index
    %c0_175 = arith.constant 0 : index
    %850 = vector.load %arg22[%c10, %c0_175] : memref<32x32xf32, #tpu.memory_space<vmem>>, vector<1x32xf32>
    tpu.vector_store %arg22[%c10, %c0_175], %849 {strides = array<i32>} : memref<32x32xf32, #tpu.memory_space<vmem>>, vector<1x32xf32>,
    %cst_176 = arith.constant dense<0.000000e+00> : vector<1x96xf32>
    %851 = tpu.matmul %849, %10, %cst_176 {dimension_numbers = #tpu.dot_dimension_numbers<[1], [0], [0], [1], [0, 0, 1, 1], [], []>} : vector<1x32xf32>, vector<32x96xf32>, vector<1x96xf32> -> vector<1x96xf32>
    %852 = arith.addf %851, %12 : vector<1x96xf32>
    %853 = vector.extract_strided_slice %408 {offsets = [0, 0], sizes = [1, 32], strides = [1, 1]} : vector<1x96xf32> to vector<1x32xf32>
    %854 = vector.extract_strided_slice %852 {offsets = [0, 0], sizes = [1, 32], strides = [1, 1]} : vector<1x96xf32> to vector<1x32xf32>
    %855 = arith.addf %853, %854 : vector<1x32xf32>
    %856 = arith.negf %855 : vector<1x32xf32>
    %857 = math.exp %856 : vector<1x32xf32>
    %cst_177 = arith.constant 1.000000e+00 : f32
    %858 = vector.broadcast %cst_177 : f32 to vector<1x32xf32>
    %859 = arith.addf %858, %857 : vector<1x32xf32>
    %860 = arith.divf %858, %859 : vector<1x32xf32>
    %861 = vector.extract_strided_slice %408 {offsets = [0, 32], sizes = [1, 32], strides = [1, 1]} : vector<1x96xf32> to vector<1x32xf32>
    %862 = vector.extract_strided_slice %852 {offsets = [0, 32], sizes = [1, 32], strides = [1, 1]} : vector<1x96xf32> to vector<1x32xf32>
    %863 = arith.addf %861, %862 : vector<1x32xf32>
    %864 = arith.negf %863 : vector<1x32xf32>
    %865 = math.exp %864 : vector<1x32xf32>
    %cst_178 = arith.constant 1.000000e+00 : f32
    %866 = vector.broadcast %cst_178 : f32 to vector<1x32xf32>
    %867 = arith.addf %866, %865 : vector<1x32xf32>
    %868 = arith.divf %866, %867 : vector<1x32xf32>
    %869 = vector.extract_strided_slice %408 {offsets = [0, 64], sizes = [1, 32], strides = [1, 1]} : vector<1x96xf32> to vector<1x32xf32>
    %870 = vector.extract_strided_slice %852 {offsets = [0, 64], sizes = [1, 32], strides = [1, 1]} : vector<1x96xf32> to vector<1x32xf32>
    %871 = arith.mulf %860, %870 : vector<1x32xf32>
    %872 = arith.addf %869, %871 : vector<1x32xf32>
    %873 = math.tanh %872 : vector<1x32xf32>
    %cst_179 = arith.constant 1.000000e+00 : f32
    %874 = vector.broadcast %cst_179 : f32 to vector<1x32xf32>
    %875 = arith.subf %874, %868 : vector<1x32xf32>
    %876 = arith.mulf %875, %873 : vector<1x32xf32>
    %877 = arith.mulf %868, %849 : vector<1x32xf32>
    %878 = arith.addf %876, %877 : vector<1x32xf32>
    %c11 = arith.constant 11 : index
    %c0_180 = arith.constant 0 : index
    %879 = vector.load %arg22[%c11, %c0_180] : memref<32x32xf32, #tpu.memory_space<vmem>>, vector<1x32xf32>
    tpu.vector_store %arg22[%c11, %c0_180], %878 {strides = array<i32>} : memref<32x32xf32, #tpu.memory_space<vmem>>, vector<1x32xf32>,
    %cst_181 = arith.constant dense<0.000000e+00> : vector<1x96xf32>
    %880 = tpu.matmul %878, %10, %cst_181 {dimension_numbers = #tpu.dot_dimension_numbers<[1], [0], [0], [1], [0, 0, 1, 1], [], []>} : vector<1x32xf32>, vector<32x96xf32>, vector<1x96xf32> -> vector<1x96xf32>
    %881 = arith.addf %880, %12 : vector<1x96xf32>
    %882 = vector.extract_strided_slice %438 {offsets = [0, 0], sizes = [1, 32], strides = [1, 1]} : vector<1x96xf32> to vector<1x32xf32>
    %883 = vector.extract_strided_slice %881 {offsets = [0, 0], sizes = [1, 32], strides = [1, 1]} : vector<1x96xf32> to vector<1x32xf32>
    %884 = arith.addf %882, %883 : vector<1x32xf32>
    %885 = arith.negf %884 : vector<1x32xf32>
    %886 = math.exp %885 : vector<1x32xf32>
    %cst_182 = arith.constant 1.000000e+00 : f32
    %887 = vector.broadcast %cst_182 : f32 to vector<1x32xf32>
    %888 = arith.addf %887, %886 : vector<1x32xf32>
    %889 = arith.divf %887, %888 : vector<1x32xf32>
    %890 = vector.extract_strided_slice %438 {offsets = [0, 32], sizes = [1, 32], strides = [1, 1]} : vector<1x96xf32> to vector<1x32xf32>
    %891 = vector.extract_strided_slice %881 {offsets = [0, 32], sizes = [1, 32], strides = [1, 1]} : vector<1x96xf32> to vector<1x32xf32>
    %892 = arith.addf %890, %891 : vector<1x32xf32>
    %893 = arith.negf %892 : vector<1x32xf32>
    %894 = math.exp %893 : vector<1x32xf32>
    %cst_183 = arith.constant 1.000000e+00 : f32
    %895 = vector.broadcast %cst_183 : f32 to vector<1x32xf32>
    %896 = arith.addf %895, %894 : vector<1x32xf32>
    %897 = arith.divf %895, %896 : vector<1x32xf32>
    %898 = vector.extract_strided_slice %438 {offsets = [0, 64], sizes = [1, 32], strides = [1, 1]} : vector<1x96xf32> to vector<1x32xf32>
    %899 = vector.extract_strided_slice %881 {offsets = [0, 64], sizes = [1, 32], strides = [1, 1]} : vector<1x96xf32> to vector<1x32xf32>
    %900 = arith.mulf %889, %899 : vector<1x32xf32>
    %901 = arith.addf %898, %900 : vector<1x32xf32>
    %902 = math.tanh %901 : vector<1x32xf32>
    %cst_184 = arith.constant 1.000000e+00 : f32
    %903 = vector.broadcast %cst_184 : f32 to vector<1x32xf32>
    %904 = arith.subf %903, %897 : vector<1x32xf32>
    %905 = arith.mulf %904, %902 : vector<1x32xf32>
    %906 = arith.mulf %897, %878 : vector<1x32xf32>
    %907 = arith.addf %905, %906 : vector<1x32xf32>
    %c12 = arith.constant 12 : index
    %c0_185 = arith.constant 0 : index
    %908 = vector.load %arg22[%c12, %c0_185] : memref<32x32xf32, #tpu.memory_space<vmem>>, vector<1x32xf32>
    tpu.vector_store %arg22[%c12, %c0_185], %907 {strides = array<i32>} : memref<32x32xf32, #tpu.memory_space<vmem>>, vector<1x32xf32>,
    %cst_186 = arith.constant dense<0.000000e+00> : vector<1x96xf32>
    %909 = tpu.matmul %907, %10, %cst_186 {dimension_numbers = #tpu.dot_dimension_numbers<[1], [0], [0], [1], [0, 0, 1, 1], [], []>} : vector<1x32xf32>, vector<32x96xf32>, vector<1x96xf32> -> vector<1x96xf32>
    %910 = arith.addf %909, %12 : vector<1x96xf32>
    %911 = vector.extract_strided_slice %468 {offsets = [0, 0], sizes = [1, 32], strides = [1, 1]} : vector<1x96xf32> to vector<1x32xf32>
    %912 = vector.extract_strided_slice %910 {offsets = [0, 0], sizes = [1, 32], strides = [1, 1]} : vector<1x96xf32> to vector<1x32xf32>
    %913 = arith.addf %911, %912 : vector<1x32xf32>
    %914 = arith.negf %913 : vector<1x32xf32>
    %915 = math.exp %914 : vector<1x32xf32>
    %cst_187 = arith.constant 1.000000e+00 : f32
    %916 = vector.broadcast %cst_187 : f32 to vector<1x32xf32>
    %917 = arith.addf %916, %915 : vector<1x32xf32>
    %918 = arith.divf %916, %917 : vector<1x32xf32>
    %919 = vector.extract_strided_slice %468 {offsets = [0, 32], sizes = [1, 32], strides = [1, 1]} : vector<1x96xf32> to vector<1x32xf32>
    %920 = vector.extract_strided_slice %910 {offsets = [0, 32], sizes = [1, 32], strides = [1, 1]} : vector<1x96xf32> to vector<1x32xf32>
    %921 = arith.addf %919, %920 : vector<1x32xf32>
    %922 = arith.negf %921 : vector<1x32xf32>
    %923 = math.exp %922 : vector<1x32xf32>
    %cst_188 = arith.constant 1.000000e+00 : f32
    %924 = vector.broadcast %cst_188 : f32 to vector<1x32xf32>
    %925 = arith.addf %924, %923 : vector<1x32xf32>
    %926 = arith.divf %924, %925 : vector<1x32xf32>
    %927 = vector.extract_strided_slice %468 {offsets = [0, 64], sizes = [1, 32], strides = [1, 1]} : vector<1x96xf32> to vector<1x32xf32>
    %928 = vector.extract_strided_slice %910 {offsets = [0, 64], sizes = [1, 32], strides = [1, 1]} : vector<1x96xf32> to vector<1x32xf32>
    %929 = arith.mulf %918, %928 : vector<1x32xf32>
    %930 = arith.addf %927, %929 : vector<1x32xf32>
    %931 = math.tanh %930 : vector<1x32xf32>
    %cst_189 = arith.constant 1.000000e+00 : f32
    %932 = vector.broadcast %cst_189 : f32 to vector<1x32xf32>
    %933 = arith.subf %932, %926 : vector<1x32xf32>
    %934 = arith.mulf %933, %931 : vector<1x32xf32>
    %935 = arith.mulf %926, %907 : vector<1x32xf32>
    %936 = arith.addf %934, %935 : vector<1x32xf32>
    %c13 = arith.constant 13 : index
    %c0_190 = arith.constant 0 : index
    %937 = vector.load %arg22[%c13, %c0_190] : memref<32x32xf32, #tpu.memory_space<vmem>>, vector<1x32xf32>
    tpu.vector_store %arg22[%c13, %c0_190], %936 {strides = array<i32>} : memref<32x32xf32, #tpu.memory_space<vmem>>, vector<1x32xf32>,
    %cst_191 = arith.constant dense<0.000000e+00> : vector<1x96xf32>
    %938 = tpu.matmul %936, %10, %cst_191 {dimension_numbers = #tpu.dot_dimension_numbers<[1], [0], [0], [1], [0, 0, 1, 1], [], []>} : vector<1x32xf32>, vector<32x96xf32>, vector<1x96xf32> -> vector<1x96xf32>
    %939 = arith.addf %938, %12 : vector<1x96xf32>
    %940 = vector.extract_strided_slice %498 {offsets = [0, 0], sizes = [1, 32], strides = [1, 1]} : vector<1x96xf32> to vector<1x32xf32>
    %941 = vector.extract_strided_slice %939 {offsets = [0, 0], sizes = [1, 32], strides = [1, 1]} : vector<1x96xf32> to vector<1x32xf32>
    %942 = arith.addf %940, %941 : vector<1x32xf32>
    %943 = arith.negf %942 : vector<1x32xf32>
    %944 = math.exp %943 : vector<1x32xf32>
    %cst_192 = arith.constant 1.000000e+00 : f32
    %945 = vector.broadcast %cst_192 : f32 to vector<1x32xf32>
    %946 = arith.addf %945, %944 : vector<1x32xf32>
    %947 = arith.divf %945, %946 : vector<1x32xf32>
    %948 = vector.extract_strided_slice %498 {offsets = [0, 32], sizes = [1, 32], strides = [1, 1]} : vector<1x96xf32> to vector<1x32xf32>
    %949 = vector.extract_strided_slice %939 {offsets = [0, 32], sizes = [1, 32], strides = [1, 1]} : vector<1x96xf32> to vector<1x32xf32>
    %950 = arith.addf %948, %949 : vector<1x32xf32>
    %951 = arith.negf %950 : vector<1x32xf32>
    %952 = math.exp %951 : vector<1x32xf32>
    %cst_193 = arith.constant 1.000000e+00 : f32
    %953 = vector.broadcast %cst_193 : f32 to vector<1x32xf32>
    %954 = arith.addf %953, %952 : vector<1x32xf32>
    %955 = arith.divf %953, %954 : vector<1x32xf32>
    %956 = vector.extract_strided_slice %498 {offsets = [0, 64], sizes = [1, 32], strides = [1, 1]} : vector<1x96xf32> to vector<1x32xf32>
    %957 = vector.extract_strided_slice %939 {offsets = [0, 64], sizes = [1, 32], strides = [1, 1]} : vector<1x96xf32> to vector<1x32xf32>
    %958 = arith.mulf %947, %957 : vector<1x32xf32>
    %959 = arith.addf %956, %958 : vector<1x32xf32>
    %960 = math.tanh %959 : vector<1x32xf32>
    %cst_194 = arith.constant 1.000000e+00 : f32
    %961 = vector.broadcast %cst_194 : f32 to vector<1x32xf32>
    %962 = arith.subf %961, %955 : vector<1x32xf32>
    %963 = arith.mulf %962, %960 : vector<1x32xf32>
    %964 = arith.mulf %955, %936 : vector<1x32xf32>
    %965 = arith.addf %963, %964 : vector<1x32xf32>
    %c14 = arith.constant 14 : index
    %c0_195 = arith.constant 0 : index
    %966 = vector.load %arg22[%c14, %c0_195] : memref<32x32xf32, #tpu.memory_space<vmem>>, vector<1x32xf32>
    tpu.vector_store %arg22[%c14, %c0_195], %965 {strides = array<i32>} : memref<32x32xf32, #tpu.memory_space<vmem>>, vector<1x32xf32>,
    %cst_196 = arith.constant dense<0.000000e+00> : vector<1x96xf32>
    %967 = tpu.matmul %965, %10, %cst_196 {dimension_numbers = #tpu.dot_dimension_numbers<[1], [0], [0], [1], [0, 0, 1, 1], [], []>} : vector<1x32xf32>, vector<32x96xf32>, vector<1x96xf32> -> vector<1x96xf32>
    %968 = arith.addf %967, %12 : vector<1x96xf32>
    %969 = vector.extract_strided_slice %528 {offsets = [0, 0], sizes = [1, 32], strides = [1, 1]} : vector<1x96xf32> to vector<1x32xf32>
    %970 = vector.extract_strided_slice %968 {offsets = [0, 0], sizes = [1, 32], strides = [1, 1]} : vector<1x96xf32> to vector<1x32xf32>
    %971 = arith.addf %969, %970 : vector<1x32xf32>
    %972 = arith.negf %971 : vector<1x32xf32>
    %973 = math.exp %972 : vector<1x32xf32>
    %cst_197 = arith.constant 1.000000e+00 : f32
    %974 = vector.broadcast %cst_197 : f32 to vector<1x32xf32>
    %975 = arith.addf %974, %973 : vector<1x32xf32>
    %976 = arith.divf %974, %975 : vector<1x32xf32>
    %977 = vector.extract_strided_slice %528 {offsets = [0, 32], sizes = [1, 32], strides = [1, 1]} : vector<1x96xf32> to vector<1x32xf32>
    %978 = vector.extract_strided_slice %968 {offsets = [0, 32], sizes = [1, 32], strides = [1, 1]} : vector<1x96xf32> to vector<1x32xf32>
    %979 = arith.addf %977, %978 : vector<1x32xf32>
    %980 = arith.negf %979 : vector<1x32xf32>
    %981 = math.exp %980 : vector<1x32xf32>
    %cst_198 = arith.constant 1.000000e+00 : f32
    %982 = vector.broadcast %cst_198 : f32 to vector<1x32xf32>
    %983 = arith.addf %982, %981 : vector<1x32xf32>
    %984 = arith.divf %982, %983 : vector<1x32xf32>
    %985 = vector.extract_strided_slice %528 {offsets = [0, 64], sizes = [1, 32], strides = [1, 1]} : vector<1x96xf32> to vector<1x32xf32>
    %986 = vector.extract_strided_slice %968 {offsets = [0, 64], sizes = [1, 32], strides = [1, 1]} : vector<1x96xf32> to vector<1x32xf32>
    %987 = arith.mulf %976, %986 : vector<1x32xf32>
    %988 = arith.addf %985, %987 : vector<1x32xf32>
    %989 = math.tanh %988 : vector<1x32xf32>
    %cst_199 = arith.constant 1.000000e+00 : f32
    %990 = vector.broadcast %cst_199 : f32 to vector<1x32xf32>
    %991 = arith.subf %990, %984 : vector<1x32xf32>
    %992 = arith.mulf %991, %989 : vector<1x32xf32>
    %993 = arith.mulf %984, %965 : vector<1x32xf32>
    %994 = arith.addf %992, %993 : vector<1x32xf32>
    %c15 = arith.constant 15 : index
    %c0_200 = arith.constant 0 : index
    %995 = vector.load %arg22[%c15, %c0_200] : memref<32x32xf32, #tpu.memory_space<vmem>>, vector<1x32xf32>
    tpu.vector_store %arg22[%c15, %c0_200], %994 {strides = array<i32>} : memref<32x32xf32, #tpu.memory_space<vmem>>, vector<1x32xf32>,
    %c1_201 = arith.constant 1 : index
    %c0_202 = arith.constant 0 : index
    %c0_203 = arith.constant 0 : index
    %996 = vector.load %arg1[%c1_201, %c0_202, %c0_203] : memref<2x16x8xf32, #tpu.memory_space<vmem>>, vector<1x16x8xf32>
    %997 = vector.shape_cast %996 : vector<1x16x8xf32> to vector<16x8xf32>
    %cst_204 = arith.constant dense<0.000000e+00> : vector<16x8xf32>
    %998 = tpu.matmul %997, %0, %cst_204 {dimension_numbers = #tpu.dot_dimension_numbers<[1], [0], [0], [1], [0, 0, 1, 1], [], []>} : vector<16x8xf32>, vector<8x8xf32>, vector<16x8xf32> -> vector<16x8xf32>
    %cst_205 = arith.constant dense<0.000000e+00> : vector<32x8xf32>
    %999 = tpu.matmul %1, %998, %cst_205 {dimension_numbers = #tpu.dot_dimension_numbers<[1], [0], [0], [1], [0, 0, 1, 1], [], []>} : vector<32x16xf32>, vector<16x8xf32>, vector<32x8xf32> -> vector<32x8xf32>
    %1000 = vector.broadcast %2 : vector<32x1xf32> to vector<32x8xf32>
    %1001 = arith.addf %999, %1000 : vector<32x8xf32>
    %cst_206 = arith.constant 0.000000e+00 : f32
    %1002 = vector.broadcast %cst_206 : f32 to vector<32x8xf32>
    %1003 = arith.maximumf %1001, %1002 : vector<32x8xf32>
    %cst_207 = arith.constant dense<0.000000e+00> : vector<32x8xf32>
    %1004 = tpu.matmul %1003, %0, %cst_207 {dimension_numbers = #tpu.dot_dimension_numbers<[1], [0], [0], [1], [0, 0, 1, 1], [], []>} : vector<32x8xf32>, vector<8x8xf32>, vector<32x8xf32> -> vector<32x8xf32>
    %cst_208 = arith.constant dense<0.000000e+00> : vector<16x8xf32>
    %1005 = tpu.matmul %3, %1004, %cst_208 {dimension_numbers = #tpu.dot_dimension_numbers<[1], [0], [0], [1], [0, 0, 1, 1], [], []>} : vector<16x32xf32>, vector<32x8xf32>, vector<16x8xf32> -> vector<16x8xf32>
    %1006 = vector.broadcast %4 : vector<16x1xf32> to vector<16x8xf32>
    %1007 = arith.addf %1005, %1006 : vector<16x8xf32>
    %cst_209 = arith.constant 0.000000e+00 : f32
    %1008 = vector.broadcast %cst_209 : f32 to vector<16x8xf32>
    %1009 = arith.maximumf %1007, %1008 : vector<16x8xf32>
    %cst_210 = arith.constant dense<0.000000e+00> : vector<16x96xf32>
    %1010 = tpu.matmul %1009, %5, %cst_210 {dimension_numbers = #tpu.dot_dimension_numbers<[1], [0], [0], [1], [0, 0, 1, 1], [], []>} : vector<16x8xf32>, vector<8x96xf32>, vector<16x96xf32> -> vector<16x96xf32>
    %1011 = vector.broadcast %7 : vector<1x96xf32> to vector<16x96xf32>
    %1012 = arith.addf %1010, %1011 : vector<16x96xf32>
    %1013 = vector.extract_strided_slice %1012 {offsets = [0, 0], sizes = [1, 96], strides = [1, 1]} : vector<16x96xf32> to vector<1x96xf32>
    %1014 = vector.extract_strided_slice %1012 {offsets = [1, 0], sizes = [1, 96], strides = [1, 1]} : vector<16x96xf32> to vector<1x96xf32>
    %1015 = vector.extract_strided_slice %1012 {offsets = [2, 0], sizes = [1, 96], strides = [1, 1]} : vector<16x96xf32> to vector<1x96xf32>
    %1016 = vector.extract_strided_slice %1012 {offsets = [3, 0], sizes = [1, 96], strides = [1, 1]} : vector<16x96xf32> to vector<1x96xf32>
    %1017 = vector.extract_strided_slice %1012 {offsets = [4, 0], sizes = [1, 96], strides = [1, 1]} : vector<16x96xf32> to vector<1x96xf32>
    %1018 = vector.extract_strided_slice %1012 {offsets = [5, 0], sizes = [1, 96], strides = [1, 1]} : vector<16x96xf32> to vector<1x96xf32>
    %1019 = vector.extract_strided_slice %1012 {offsets = [6, 0], sizes = [1, 96], strides = [1, 1]} : vector<16x96xf32> to vector<1x96xf32>
    %1020 = vector.extract_strided_slice %1012 {offsets = [7, 0], sizes = [1, 96], strides = [1, 1]} : vector<16x96xf32> to vector<1x96xf32>
    %1021 = vector.extract_strided_slice %1012 {offsets = [8, 0], sizes = [1, 96], strides = [1, 1]} : vector<16x96xf32> to vector<1x96xf32>
    %1022 = vector.extract_strided_slice %1012 {offsets = [9, 0], sizes = [1, 96], strides = [1, 1]} : vector<16x96xf32> to vector<1x96xf32>
    %1023 = vector.extract_strided_slice %1012 {offsets = [10, 0], sizes = [1, 96], strides = [1, 1]} : vector<16x96xf32> to vector<1x96xf32>
    %1024 = vector.extract_strided_slice %1012 {offsets = [11, 0], sizes = [1, 96], strides = [1, 1]} : vector<16x96xf32> to vector<1x96xf32>
    %1025 = vector.extract_strided_slice %1012 {offsets = [12, 0], sizes = [1, 96], strides = [1, 1]} : vector<16x96xf32> to vector<1x96xf32>
    %1026 = vector.extract_strided_slice %1012 {offsets = [13, 0], sizes = [1, 96], strides = [1, 1]} : vector<16x96xf32> to vector<1x96xf32>
    %1027 = vector.extract_strided_slice %1012 {offsets = [14, 0], sizes = [1, 96], strides = [1, 1]} : vector<16x96xf32> to vector<1x96xf32>
    %1028 = vector.extract_strided_slice %1012 {offsets = [15, 0], sizes = [1, 96], strides = [1, 1]} : vector<16x96xf32> to vector<1x96xf32>
    %c0_211 = arith.constant 0 : index
    %c0_212 = arith.constant 0 : index
    %c0_213 = arith.constant 0 : index
    %1029 = vector.load %arg14[%c0_211, %c0_212, %c0_213] : memref<2x2x32xf32, #tpu.memory_space<vmem>>, vector<1x2x32xf32>
    %1030 = vector.shape_cast %1029 : vector<1x2x32xf32> to vector<2x32xf32>
    %1031 = vector.extract_strided_slice %1030 {offsets = [1, 0], sizes = [1, 32], strides = [1, 1]} : vector<2x32xf32> to vector<1x32xf32>
    %cst_214 = arith.constant dense<0.000000e+00> : vector<1x96xf32>
    %1032 = tpu.matmul %1031, %6, %cst_214 {dimension_numbers = #tpu.dot_dimension_numbers<[1], [0], [0], [1], [0, 0, 1, 1], [], []>} : vector<1x32xf32>, vector<32x96xf32>, vector<1x96xf32> -> vector<1x96xf32>
    %1033 = arith.addf %1032, %8 : vector<1x96xf32>
    %1034 = vector.extract_strided_slice %1013 {offsets = [0, 0], sizes = [1, 32], strides = [1, 1]} : vector<1x96xf32> to vector<1x32xf32>
    %1035 = vector.extract_strided_slice %1033 {offsets = [0, 0], sizes = [1, 32], strides = [1, 1]} : vector<1x96xf32> to vector<1x32xf32>
    %1036 = arith.addf %1034, %1035 : vector<1x32xf32>
    %1037 = arith.negf %1036 : vector<1x32xf32>
    %1038 = math.exp %1037 : vector<1x32xf32>
    %cst_215 = arith.constant 1.000000e+00 : f32
    %1039 = vector.broadcast %cst_215 : f32 to vector<1x32xf32>
    %1040 = arith.addf %1039, %1038 : vector<1x32xf32>
    %1041 = arith.divf %1039, %1040 : vector<1x32xf32>
    %1042 = vector.extract_strided_slice %1013 {offsets = [0, 32], sizes = [1, 32], strides = [1, 1]} : vector<1x96xf32> to vector<1x32xf32>
    %1043 = vector.extract_strided_slice %1033 {offsets = [0, 32], sizes = [1, 32], strides = [1, 1]} : vector<1x96xf32> to vector<1x32xf32>
    %1044 = arith.addf %1042, %1043 : vector<1x32xf32>
    %1045 = arith.negf %1044 : vector<1x32xf32>
    %1046 = math.exp %1045 : vector<1x32xf32>
    %cst_216 = arith.constant 1.000000e+00 : f32
    %1047 = vector.broadcast %cst_216 : f32 to vector<1x32xf32>
    %1048 = arith.addf %1047, %1046 : vector<1x32xf32>
    %1049 = arith.divf %1047, %1048 : vector<1x32xf32>
    %1050 = vector.extract_strided_slice %1013 {offsets = [0, 64], sizes = [1, 32], strides = [1, 1]} : vector<1x96xf32> to vector<1x32xf32>
    %1051 = vector.extract_strided_slice %1033 {offsets = [0, 64], sizes = [1, 32], strides = [1, 1]} : vector<1x96xf32> to vector<1x32xf32>
    %1052 = arith.mulf %1041, %1051 : vector<1x32xf32>
    %1053 = arith.addf %1050, %1052 : vector<1x32xf32>
    %1054 = math.tanh %1053 : vector<1x32xf32>
    %cst_217 = arith.constant 1.000000e+00 : f32
    %1055 = vector.broadcast %cst_217 : f32 to vector<1x32xf32>
    %1056 = arith.subf %1055, %1049 : vector<1x32xf32>
    %1057 = arith.mulf %1056, %1054 : vector<1x32xf32>
    %1058 = arith.mulf %1049, %1031 : vector<1x32xf32>
    %1059 = arith.addf %1057, %1058 : vector<1x32xf32>
    %cst_218 = arith.constant dense<0.000000e+00> : vector<1x96xf32>
    %1060 = tpu.matmul %1059, %9, %cst_218 {dimension_numbers = #tpu.dot_dimension_numbers<[1], [0], [0], [1], [0, 0, 1, 1], [], []>} : vector<1x32xf32>, vector<32x96xf32>, vector<1x96xf32> -> vector<1x96xf32>
    %1061 = arith.addf %1060, %11 : vector<1x96xf32>
    %cst_219 = arith.constant dense<0.000000e+00> : vector<1x96xf32>
    %1062 = tpu.matmul %1059, %6, %cst_219 {dimension_numbers = #tpu.dot_dimension_numbers<[1], [0], [0], [1], [0, 0, 1, 1], [], []>} : vector<1x32xf32>, vector<32x96xf32>, vector<1x96xf32> -> vector<1x96xf32>
    %1063 = arith.addf %1062, %8 : vector<1x96xf32>
    %1064 = vector.extract_strided_slice %1014 {offsets = [0, 0], sizes = [1, 32], strides = [1, 1]} : vector<1x96xf32> to vector<1x32xf32>
    %1065 = vector.extract_strided_slice %1063 {offsets = [0, 0], sizes = [1, 32], strides = [1, 1]} : vector<1x96xf32> to vector<1x32xf32>
    %1066 = arith.addf %1064, %1065 : vector<1x32xf32>
    %1067 = arith.negf %1066 : vector<1x32xf32>
    %1068 = math.exp %1067 : vector<1x32xf32>
    %cst_220 = arith.constant 1.000000e+00 : f32
    %1069 = vector.broadcast %cst_220 : f32 to vector<1x32xf32>
    %1070 = arith.addf %1069, %1068 : vector<1x32xf32>
    %1071 = arith.divf %1069, %1070 : vector<1x32xf32>
    %1072 = vector.extract_strided_slice %1014 {offsets = [0, 32], sizes = [1, 32], strides = [1, 1]} : vector<1x96xf32> to vector<1x32xf32>
    %1073 = vector.extract_strided_slice %1063 {offsets = [0, 32], sizes = [1, 32], strides = [1, 1]} : vector<1x96xf32> to vector<1x32xf32>
    %1074 = arith.addf %1072, %1073 : vector<1x32xf32>
    %1075 = arith.negf %1074 : vector<1x32xf32>
    %1076 = math.exp %1075 : vector<1x32xf32>
    %cst_221 = arith.constant 1.000000e+00 : f32
    %1077 = vector.broadcast %cst_221 : f32 to vector<1x32xf32>
    %1078 = arith.addf %1077, %1076 : vector<1x32xf32>
    %1079 = arith.divf %1077, %1078 : vector<1x32xf32>
    %1080 = vector.extract_strided_slice %1014 {offsets = [0, 64], sizes = [1, 32], strides = [1, 1]} : vector<1x96xf32> to vector<1x32xf32>
    %1081 = vector.extract_strided_slice %1063 {offsets = [0, 64], sizes = [1, 32], strides = [1, 1]} : vector<1x96xf32> to vector<1x32xf32>
    %1082 = arith.mulf %1071, %1081 : vector<1x32xf32>
    %1083 = arith.addf %1080, %1082 : vector<1x32xf32>
    %1084 = math.tanh %1083 : vector<1x32xf32>
    %cst_222 = arith.constant 1.000000e+00 : f32
    %1085 = vector.broadcast %cst_222 : f32 to vector<1x32xf32>
    %1086 = arith.subf %1085, %1079 : vector<1x32xf32>
    %1087 = arith.mulf %1086, %1084 : vector<1x32xf32>
    %1088 = arith.mulf %1079, %1059 : vector<1x32xf32>
    %1089 = arith.addf %1087, %1088 : vector<1x32xf32>
    %cst_223 = arith.constant dense<0.000000e+00> : vector<1x96xf32>
    %1090 = tpu.matmul %1089, %9, %cst_223 {dimension_numbers = #tpu.dot_dimension_numbers<[1], [0], [0], [1], [0, 0, 1, 1], [], []>} : vector<1x32xf32>, vector<32x96xf32>, vector<1x96xf32> -> vector<1x96xf32>
    %1091 = arith.addf %1090, %11 : vector<1x96xf32>
    %cst_224 = arith.constant dense<0.000000e+00> : vector<1x96xf32>
    %1092 = tpu.matmul %1089, %6, %cst_224 {dimension_numbers = #tpu.dot_dimension_numbers<[1], [0], [0], [1], [0, 0, 1, 1], [], []>} : vector<1x32xf32>, vector<32x96xf32>, vector<1x96xf32> -> vector<1x96xf32>
    %1093 = arith.addf %1092, %8 : vector<1x96xf32>
    %1094 = vector.extract_strided_slice %1015 {offsets = [0, 0], sizes = [1, 32], strides = [1, 1]} : vector<1x96xf32> to vector<1x32xf32>
    %1095 = vector.extract_strided_slice %1093 {offsets = [0, 0], sizes = [1, 32], strides = [1, 1]} : vector<1x96xf32> to vector<1x32xf32>
    %1096 = arith.addf %1094, %1095 : vector<1x32xf32>
    %1097 = arith.negf %1096 : vector<1x32xf32>
    %1098 = math.exp %1097 : vector<1x32xf32>
    %cst_225 = arith.constant 1.000000e+00 : f32
    %1099 = vector.broadcast %cst_225 : f32 to vector<1x32xf32>
    %1100 = arith.addf %1099, %1098 : vector<1x32xf32>
    %1101 = arith.divf %1099, %1100 : vector<1x32xf32>
    %1102 = vector.extract_strided_slice %1015 {offsets = [0, 32], sizes = [1, 32], strides = [1, 1]} : vector<1x96xf32> to vector<1x32xf32>
    %1103 = vector.extract_strided_slice %1093 {offsets = [0, 32], sizes = [1, 32], strides = [1, 1]} : vector<1x96xf32> to vector<1x32xf32>
    %1104 = arith.addf %1102, %1103 : vector<1x32xf32>
    %1105 = arith.negf %1104 : vector<1x32xf32>
    %1106 = math.exp %1105 : vector<1x32xf32>
    %cst_226 = arith.constant 1.000000e+00 : f32
    %1107 = vector.broadcast %cst_226 : f32 to vector<1x32xf32>
    %1108 = arith.addf %1107, %1106 : vector<1x32xf32>
    %1109 = arith.divf %1107, %1108 : vector<1x32xf32>
    %1110 = vector.extract_strided_slice %1015 {offsets = [0, 64], sizes = [1, 32], strides = [1, 1]} : vector<1x96xf32> to vector<1x32xf32>
    %1111 = vector.extract_strided_slice %1093 {offsets = [0, 64], sizes = [1, 32], strides = [1, 1]} : vector<1x96xf32> to vector<1x32xf32>
    %1112 = arith.mulf %1101, %1111 : vector<1x32xf32>
    %1113 = arith.addf %1110, %1112 : vector<1x32xf32>
    %1114 = math.tanh %1113 : vector<1x32xf32>
    %cst_227 = arith.constant 1.000000e+00 : f32
    %1115 = vector.broadcast %cst_227 : f32 to vector<1x32xf32>
    %1116 = arith.subf %1115, %1109 : vector<1x32xf32>
    %1117 = arith.mulf %1116, %1114 : vector<1x32xf32>
    %1118 = arith.mulf %1109, %1089 : vector<1x32xf32>
    %1119 = arith.addf %1117, %1118 : vector<1x32xf32>
    %cst_228 = arith.constant dense<0.000000e+00> : vector<1x96xf32>
    %1120 = tpu.matmul %1119, %9, %cst_228 {dimension_numbers = #tpu.dot_dimension_numbers<[1], [0], [0], [1], [0, 0, 1, 1], [], []>} : vector<1x32xf32>, vector<32x96xf32>, vector<1x96xf32> -> vector<1x96xf32>
    %1121 = arith.addf %1120, %11 : vector<1x96xf32>
    %cst_229 = arith.constant dense<0.000000e+00> : vector<1x96xf32>
    %1122 = tpu.matmul %1119, %6, %cst_229 {dimension_numbers = #tpu.dot_dimension_numbers<[1], [0], [0], [1], [0, 0, 1, 1], [], []>} : vector<1x32xf32>, vector<32x96xf32>, vector<1x96xf32> -> vector<1x96xf32>
    %1123 = arith.addf %1122, %8 : vector<1x96xf32>
    %1124 = vector.extract_strided_slice %1016 {offsets = [0, 0], sizes = [1, 32], strides = [1, 1]} : vector<1x96xf32> to vector<1x32xf32>
    %1125 = vector.extract_strided_slice %1123 {offsets = [0, 0], sizes = [1, 32], strides = [1, 1]} : vector<1x96xf32> to vector<1x32xf32>
    %1126 = arith.addf %1124, %1125 : vector<1x32xf32>
    %1127 = arith.negf %1126 : vector<1x32xf32>
    %1128 = math.exp %1127 : vector<1x32xf32>
    %cst_230 = arith.constant 1.000000e+00 : f32
    %1129 = vector.broadcast %cst_230 : f32 to vector<1x32xf32>
    %1130 = arith.addf %1129, %1128 : vector<1x32xf32>
    %1131 = arith.divf %1129, %1130 : vector<1x32xf32>
    %1132 = vector.extract_strided_slice %1016 {offsets = [0, 32], sizes = [1, 32], strides = [1, 1]} : vector<1x96xf32> to vector<1x32xf32>
    %1133 = vector.extract_strided_slice %1123 {offsets = [0, 32], sizes = [1, 32], strides = [1, 1]} : vector<1x96xf32> to vector<1x32xf32>
    %1134 = arith.addf %1132, %1133 : vector<1x32xf32>
    %1135 = arith.negf %1134 : vector<1x32xf32>
    %1136 = math.exp %1135 : vector<1x32xf32>
    %cst_231 = arith.constant 1.000000e+00 : f32
    %1137 = vector.broadcast %cst_231 : f32 to vector<1x32xf32>
    %1138 = arith.addf %1137, %1136 : vector<1x32xf32>
    %1139 = arith.divf %1137, %1138 : vector<1x32xf32>
    %1140 = vector.extract_strided_slice %1016 {offsets = [0, 64], sizes = [1, 32], strides = [1, 1]} : vector<1x96xf32> to vector<1x32xf32>
    %1141 = vector.extract_strided_slice %1123 {offsets = [0, 64], sizes = [1, 32], strides = [1, 1]} : vector<1x96xf32> to vector<1x32xf32>
    %1142 = arith.mulf %1131, %1141 : vector<1x32xf32>
    %1143 = arith.addf %1140, %1142 : vector<1x32xf32>
    %1144 = math.tanh %1143 : vector<1x32xf32>
    %cst_232 = arith.constant 1.000000e+00 : f32
    %1145 = vector.broadcast %cst_232 : f32 to vector<1x32xf32>
    %1146 = arith.subf %1145, %1139 : vector<1x32xf32>
    %1147 = arith.mulf %1146, %1144 : vector<1x32xf32>
    %1148 = arith.mulf %1139, %1119 : vector<1x32xf32>
    %1149 = arith.addf %1147, %1148 : vector<1x32xf32>
    %cst_233 = arith.constant dense<0.000000e+00> : vector<1x96xf32>
    %1150 = tpu.matmul %1149, %9, %cst_233 {dimension_numbers = #tpu.dot_dimension_numbers<[1], [0], [0], [1], [0, 0, 1, 1], [], []>} : vector<1x32xf32>, vector<32x96xf32>, vector<1x96xf32> -> vector<1x96xf32>
    %1151 = arith.addf %1150, %11 : vector<1x96xf32>
    %cst_234 = arith.constant dense<0.000000e+00> : vector<1x96xf32>
    %1152 = tpu.matmul %1149, %6, %cst_234 {dimension_numbers = #tpu.dot_dimension_numbers<[1], [0], [0], [1], [0, 0, 1, 1], [], []>} : vector<1x32xf32>, vector<32x96xf32>, vector<1x96xf32> -> vector<1x96xf32>
    %1153 = arith.addf %1152, %8 : vector<1x96xf32>
    %1154 = vector.extract_strided_slice %1017 {offsets = [0, 0], sizes = [1, 32], strides = [1, 1]} : vector<1x96xf32> to vector<1x32xf32>
    %1155 = vector.extract_strided_slice %1153 {offsets = [0, 0], sizes = [1, 32], strides = [1, 1]} : vector<1x96xf32> to vector<1x32xf32>
    %1156 = arith.addf %1154, %1155 : vector<1x32xf32>
    %1157 = arith.negf %1156 : vector<1x32xf32>
    %1158 = math.exp %1157 : vector<1x32xf32>
    %cst_235 = arith.constant 1.000000e+00 : f32
    %1159 = vector.broadcast %cst_235 : f32 to vector<1x32xf32>
    %1160 = arith.addf %1159, %1158 : vector<1x32xf32>
    %1161 = arith.divf %1159, %1160 : vector<1x32xf32>
    %1162 = vector.extract_strided_slice %1017 {offsets = [0, 32], sizes = [1, 32], strides = [1, 1]} : vector<1x96xf32> to vector<1x32xf32>
    %1163 = vector.extract_strided_slice %1153 {offsets = [0, 32], sizes = [1, 32], strides = [1, 1]} : vector<1x96xf32> to vector<1x32xf32>
    %1164 = arith.addf %1162, %1163 : vector<1x32xf32>
    %1165 = arith.negf %1164 : vector<1x32xf32>
    %1166 = math.exp %1165 : vector<1x32xf32>
    %cst_236 = arith.constant 1.000000e+00 : f32
    %1167 = vector.broadcast %cst_236 : f32 to vector<1x32xf32>
    %1168 = arith.addf %1167, %1166 : vector<1x32xf32>
    %1169 = arith.divf %1167, %1168 : vector<1x32xf32>
    %1170 = vector.extract_strided_slice %1017 {offsets = [0, 64], sizes = [1, 32], strides = [1, 1]} : vector<1x96xf32> to vector<1x32xf32>
    %1171 = vector.extract_strided_slice %1153 {offsets = [0, 64], sizes = [1, 32], strides = [1, 1]} : vector<1x96xf32> to vector<1x32xf32>
    %1172 = arith.mulf %1161, %1171 : vector<1x32xf32>
    %1173 = arith.addf %1170, %1172 : vector<1x32xf32>
    %1174 = math.tanh %1173 : vector<1x32xf32>
    %cst_237 = arith.constant 1.000000e+00 : f32
    %1175 = vector.broadcast %cst_237 : f32 to vector<1x32xf32>
    %1176 = arith.subf %1175, %1169 : vector<1x32xf32>
    %1177 = arith.mulf %1176, %1174 : vector<1x32xf32>
    %1178 = arith.mulf %1169, %1149 : vector<1x32xf32>
    %1179 = arith.addf %1177, %1178 : vector<1x32xf32>
    %cst_238 = arith.constant dense<0.000000e+00> : vector<1x96xf32>
    %1180 = tpu.matmul %1179, %9, %cst_238 {dimension_numbers = #tpu.dot_dimension_numbers<[1], [0], [0], [1], [0, 0, 1, 1], [], []>} : vector<1x32xf32>, vector<32x96xf32>, vector<1x96xf32> -> vector<1x96xf32>
    %1181 = arith.addf %1180, %11 : vector<1x96xf32>
    %cst_239 = arith.constant dense<0.000000e+00> : vector<1x96xf32>
    %1182 = tpu.matmul %1179, %6, %cst_239 {dimension_numbers = #tpu.dot_dimension_numbers<[1], [0], [0], [1], [0, 0, 1, 1], [], []>} : vector<1x32xf32>, vector<32x96xf32>, vector<1x96xf32> -> vector<1x96xf32>
    %1183 = arith.addf %1182, %8 : vector<1x96xf32>
    %1184 = vector.extract_strided_slice %1018 {offsets = [0, 0], sizes = [1, 32], strides = [1, 1]} : vector<1x96xf32> to vector<1x32xf32>
    %1185 = vector.extract_strided_slice %1183 {offsets = [0, 0], sizes = [1, 32], strides = [1, 1]} : vector<1x96xf32> to vector<1x32xf32>
    %1186 = arith.addf %1184, %1185 : vector<1x32xf32>
    %1187 = arith.negf %1186 : vector<1x32xf32>
    %1188 = math.exp %1187 : vector<1x32xf32>
    %cst_240 = arith.constant 1.000000e+00 : f32
    %1189 = vector.broadcast %cst_240 : f32 to vector<1x32xf32>
    %1190 = arith.addf %1189, %1188 : vector<1x32xf32>
    %1191 = arith.divf %1189, %1190 : vector<1x32xf32>
    %1192 = vector.extract_strided_slice %1018 {offsets = [0, 32], sizes = [1, 32], strides = [1, 1]} : vector<1x96xf32> to vector<1x32xf32>
    %1193 = vector.extract_strided_slice %1183 {offsets = [0, 32], sizes = [1, 32], strides = [1, 1]} : vector<1x96xf32> to vector<1x32xf32>
    %1194 = arith.addf %1192, %1193 : vector<1x32xf32>
    %1195 = arith.negf %1194 : vector<1x32xf32>
    %1196 = math.exp %1195 : vector<1x32xf32>
    %cst_241 = arith.constant 1.000000e+00 : f32
    %1197 = vector.broadcast %cst_241 : f32 to vector<1x32xf32>
    %1198 = arith.addf %1197, %1196 : vector<1x32xf32>
    %1199 = arith.divf %1197, %1198 : vector<1x32xf32>
    %1200 = vector.extract_strided_slice %1018 {offsets = [0, 64], sizes = [1, 32], strides = [1, 1]} : vector<1x96xf32> to vector<1x32xf32>
    %1201 = vector.extract_strided_slice %1183 {offsets = [0, 64], sizes = [1, 32], strides = [1, 1]} : vector<1x96xf32> to vector<1x32xf32>
    %1202 = arith.mulf %1191, %1201 : vector<1x32xf32>
    %1203 = arith.addf %1200, %1202 : vector<1x32xf32>
    %1204 = math.tanh %1203 : vector<1x32xf32>
    %cst_242 = arith.constant 1.000000e+00 : f32
    %1205 = vector.broadcast %cst_242 : f32 to vector<1x32xf32>
    %1206 = arith.subf %1205, %1199 : vector<1x32xf32>
    %1207 = arith.mulf %1206, %1204 : vector<1x32xf32>
    %1208 = arith.mulf %1199, %1179 : vector<1x32xf32>
    %1209 = arith.addf %1207, %1208 : vector<1x32xf32>
    %cst_243 = arith.constant dense<0.000000e+00> : vector<1x96xf32>
    %1210 = tpu.matmul %1209, %9, %cst_243 {dimension_numbers = #tpu.dot_dimension_numbers<[1], [0], [0], [1], [0, 0, 1, 1], [], []>} : vector<1x32xf32>, vector<32x96xf32>, vector<1x96xf32> -> vector<1x96xf32>
    %1211 = arith.addf %1210, %11 : vector<1x96xf32>
    %cst_244 = arith.constant dense<0.000000e+00> : vector<1x96xf32>
    %1212 = tpu.matmul %1209, %6, %cst_244 {dimension_numbers = #tpu.dot_dimension_numbers<[1], [0], [0], [1], [0, 0, 1, 1], [], []>} : vector<1x32xf32>, vector<32x96xf32>, vector<1x96xf32> -> vector<1x96xf32>
    %1213 = arith.addf %1212, %8 : vector<1x96xf32>
    %1214 = vector.extract_strided_slice %1019 {offsets = [0, 0], sizes = [1, 32], strides = [1, 1]} : vector<1x96xf32> to vector<1x32xf32>
    %1215 = vector.extract_strided_slice %1213 {offsets = [0, 0], sizes = [1, 32], strides = [1, 1]} : vector<1x96xf32> to vector<1x32xf32>
    %1216 = arith.addf %1214, %1215 : vector<1x32xf32>
    %1217 = arith.negf %1216 : vector<1x32xf32>
    %1218 = math.exp %1217 : vector<1x32xf32>
    %cst_245 = arith.constant 1.000000e+00 : f32
    %1219 = vector.broadcast %cst_245 : f32 to vector<1x32xf32>
    %1220 = arith.addf %1219, %1218 : vector<1x32xf32>
    %1221 = arith.divf %1219, %1220 : vector<1x32xf32>
    %1222 = vector.extract_strided_slice %1019 {offsets = [0, 32], sizes = [1, 32], strides = [1, 1]} : vector<1x96xf32> to vector<1x32xf32>
    %1223 = vector.extract_strided_slice %1213 {offsets = [0, 32], sizes = [1, 32], strides = [1, 1]} : vector<1x96xf32> to vector<1x32xf32>
    %1224 = arith.addf %1222, %1223 : vector<1x32xf32>
    %1225 = arith.negf %1224 : vector<1x32xf32>
    %1226 = math.exp %1225 : vector<1x32xf32>
    %cst_246 = arith.constant 1.000000e+00 : f32
    %1227 = vector.broadcast %cst_246 : f32 to vector<1x32xf32>
    %1228 = arith.addf %1227, %1226 : vector<1x32xf32>
    %1229 = arith.divf %1227, %1228 : vector<1x32xf32>
    %1230 = vector.extract_strided_slice %1019 {offsets = [0, 64], sizes = [1, 32], strides = [1, 1]} : vector<1x96xf32> to vector<1x32xf32>
    %1231 = vector.extract_strided_slice %1213 {offsets = [0, 64], sizes = [1, 32], strides = [1, 1]} : vector<1x96xf32> to vector<1x32xf32>
    %1232 = arith.mulf %1221, %1231 : vector<1x32xf32>
    %1233 = arith.addf %1230, %1232 : vector<1x32xf32>
    %1234 = math.tanh %1233 : vector<1x32xf32>
    %cst_247 = arith.constant 1.000000e+00 : f32
    %1235 = vector.broadcast %cst_247 : f32 to vector<1x32xf32>
    %1236 = arith.subf %1235, %1229 : vector<1x32xf32>
    %1237 = arith.mulf %1236, %1234 : vector<1x32xf32>
    %1238 = arith.mulf %1229, %1209 : vector<1x32xf32>
    %1239 = arith.addf %1237, %1238 : vector<1x32xf32>
    %cst_248 = arith.constant dense<0.000000e+00> : vector<1x96xf32>
    %1240 = tpu.matmul %1239, %9, %cst_248 {dimension_numbers = #tpu.dot_dimension_numbers<[1], [0], [0], [1], [0, 0, 1, 1], [], []>} : vector<1x32xf32>, vector<32x96xf32>, vector<1x96xf32> -> vector<1x96xf32>
    %1241 = arith.addf %1240, %11 : vector<1x96xf32>
    %cst_249 = arith.constant dense<0.000000e+00> : vector<1x96xf32>
    %1242 = tpu.matmul %1239, %6, %cst_249 {dimension_numbers = #tpu.dot_dimension_numbers<[1], [0], [0], [1], [0, 0, 1, 1], [], []>} : vector<1x32xf32>, vector<32x96xf32>, vector<1x96xf32> -> vector<1x96xf32>
    %1243 = arith.addf %1242, %8 : vector<1x96xf32>
    %1244 = vector.extract_strided_slice %1020 {offsets = [0, 0], sizes = [1, 32], strides = [1, 1]} : vector<1x96xf32> to vector<1x32xf32>
    %1245 = vector.extract_strided_slice %1243 {offsets = [0, 0], sizes = [1, 32], strides = [1, 1]} : vector<1x96xf32> to vector<1x32xf32>
    %1246 = arith.addf %1244, %1245 : vector<1x32xf32>
    %1247 = arith.negf %1246 : vector<1x32xf32>
    %1248 = math.exp %1247 : vector<1x32xf32>
    %cst_250 = arith.constant 1.000000e+00 : f32
    %1249 = vector.broadcast %cst_250 : f32 to vector<1x32xf32>
    %1250 = arith.addf %1249, %1248 : vector<1x32xf32>
    %1251 = arith.divf %1249, %1250 : vector<1x32xf32>
    %1252 = vector.extract_strided_slice %1020 {offsets = [0, 32], sizes = [1, 32], strides = [1, 1]} : vector<1x96xf32> to vector<1x32xf32>
    %1253 = vector.extract_strided_slice %1243 {offsets = [0, 32], sizes = [1, 32], strides = [1, 1]} : vector<1x96xf32> to vector<1x32xf32>
    %1254 = arith.addf %1252, %1253 : vector<1x32xf32>
    %1255 = arith.negf %1254 : vector<1x32xf32>
    %1256 = math.exp %1255 : vector<1x32xf32>
    %cst_251 = arith.constant 1.000000e+00 : f32
    %1257 = vector.broadcast %cst_251 : f32 to vector<1x32xf32>
    %1258 = arith.addf %1257, %1256 : vector<1x32xf32>
    %1259 = arith.divf %1257, %1258 : vector<1x32xf32>
    %1260 = vector.extract_strided_slice %1020 {offsets = [0, 64], sizes = [1, 32], strides = [1, 1]} : vector<1x96xf32> to vector<1x32xf32>
    %1261 = vector.extract_strided_slice %1243 {offsets = [0, 64], sizes = [1, 32], strides = [1, 1]} : vector<1x96xf32> to vector<1x32xf32>
    %1262 = arith.mulf %1251, %1261 : vector<1x32xf32>
    %1263 = arith.addf %1260, %1262 : vector<1x32xf32>
    %1264 = math.tanh %1263 : vector<1x32xf32>
    %cst_252 = arith.constant 1.000000e+00 : f32
    %1265 = vector.broadcast %cst_252 : f32 to vector<1x32xf32>
    %1266 = arith.subf %1265, %1259 : vector<1x32xf32>
    %1267 = arith.mulf %1266, %1264 : vector<1x32xf32>
    %1268 = arith.mulf %1259, %1239 : vector<1x32xf32>
    %1269 = arith.addf %1267, %1268 : vector<1x32xf32>
    %cst_253 = arith.constant dense<0.000000e+00> : vector<1x96xf32>
    %1270 = tpu.matmul %1269, %9, %cst_253 {dimension_numbers = #tpu.dot_dimension_numbers<[1], [0], [0], [1], [0, 0, 1, 1], [], []>} : vector<1x32xf32>, vector<32x96xf32>, vector<1x96xf32> -> vector<1x96xf32>
    %1271 = arith.addf %1270, %11 : vector<1x96xf32>
    %cst_254 = arith.constant dense<0.000000e+00> : vector<1x96xf32>
    %1272 = tpu.matmul %1269, %6, %cst_254 {dimension_numbers = #tpu.dot_dimension_numbers<[1], [0], [0], [1], [0, 0, 1, 1], [], []>} : vector<1x32xf32>, vector<32x96xf32>, vector<1x96xf32> -> vector<1x96xf32>
    %1273 = arith.addf %1272, %8 : vector<1x96xf32>
    %1274 = vector.extract_strided_slice %1021 {offsets = [0, 0], sizes = [1, 32], strides = [1, 1]} : vector<1x96xf32> to vector<1x32xf32>
    %1275 = vector.extract_strided_slice %1273 {offsets = [0, 0], sizes = [1, 32], strides = [1, 1]} : vector<1x96xf32> to vector<1x32xf32>
    %1276 = arith.addf %1274, %1275 : vector<1x32xf32>
    %1277 = arith.negf %1276 : vector<1x32xf32>
    %1278 = math.exp %1277 : vector<1x32xf32>
    %cst_255 = arith.constant 1.000000e+00 : f32
    %1279 = vector.broadcast %cst_255 : f32 to vector<1x32xf32>
    %1280 = arith.addf %1279, %1278 : vector<1x32xf32>
    %1281 = arith.divf %1279, %1280 : vector<1x32xf32>
    %1282 = vector.extract_strided_slice %1021 {offsets = [0, 32], sizes = [1, 32], strides = [1, 1]} : vector<1x96xf32> to vector<1x32xf32>
    %1283 = vector.extract_strided_slice %1273 {offsets = [0, 32], sizes = [1, 32], strides = [1, 1]} : vector<1x96xf32> to vector<1x32xf32>
    %1284 = arith.addf %1282, %1283 : vector<1x32xf32>
    %1285 = arith.negf %1284 : vector<1x32xf32>
    %1286 = math.exp %1285 : vector<1x32xf32>
    %cst_256 = arith.constant 1.000000e+00 : f32
    %1287 = vector.broadcast %cst_256 : f32 to vector<1x32xf32>
    %1288 = arith.addf %1287, %1286 : vector<1x32xf32>
    %1289 = arith.divf %1287, %1288 : vector<1x32xf32>
    %1290 = vector.extract_strided_slice %1021 {offsets = [0, 64], sizes = [1, 32], strides = [1, 1]} : vector<1x96xf32> to vector<1x32xf32>
    %1291 = vector.extract_strided_slice %1273 {offsets = [0, 64], sizes = [1, 32], strides = [1, 1]} : vector<1x96xf32> to vector<1x32xf32>
    %1292 = arith.mulf %1281, %1291 : vector<1x32xf32>
    %1293 = arith.addf %1290, %1292 : vector<1x32xf32>
    %1294 = math.tanh %1293 : vector<1x32xf32>
    %cst_257 = arith.constant 1.000000e+00 : f32
    %1295 = vector.broadcast %cst_257 : f32 to vector<1x32xf32>
    %1296 = arith.subf %1295, %1289 : vector<1x32xf32>
    %1297 = arith.mulf %1296, %1294 : vector<1x32xf32>
    %1298 = arith.mulf %1289, %1269 : vector<1x32xf32>
    %1299 = arith.addf %1297, %1298 : vector<1x32xf32>
    %cst_258 = arith.constant dense<0.000000e+00> : vector<1x96xf32>
    %1300 = tpu.matmul %1299, %9, %cst_258 {dimension_numbers = #tpu.dot_dimension_numbers<[1], [0], [0], [1], [0, 0, 1, 1], [], []>} : vector<1x32xf32>, vector<32x96xf32>, vector<1x96xf32> -> vector<1x96xf32>
    %1301 = arith.addf %1300, %11 : vector<1x96xf32>
    %cst_259 = arith.constant dense<0.000000e+00> : vector<1x96xf32>
    %1302 = tpu.matmul %1299, %6, %cst_259 {dimension_numbers = #tpu.dot_dimension_numbers<[1], [0], [0], [1], [0, 0, 1, 1], [], []>} : vector<1x32xf32>, vector<32x96xf32>, vector<1x96xf32> -> vector<1x96xf32>
    %1303 = arith.addf %1302, %8 : vector<1x96xf32>
    %1304 = vector.extract_strided_slice %1022 {offsets = [0, 0], sizes = [1, 32], strides = [1, 1]} : vector<1x96xf32> to vector<1x32xf32>
    %1305 = vector.extract_strided_slice %1303 {offsets = [0, 0], sizes = [1, 32], strides = [1, 1]} : vector<1x96xf32> to vector<1x32xf32>
    %1306 = arith.addf %1304, %1305 : vector<1x32xf32>
    %1307 = arith.negf %1306 : vector<1x32xf32>
    %1308 = math.exp %1307 : vector<1x32xf32>
    %cst_260 = arith.constant 1.000000e+00 : f32
    %1309 = vector.broadcast %cst_260 : f32 to vector<1x32xf32>
    %1310 = arith.addf %1309, %1308 : vector<1x32xf32>
    %1311 = arith.divf %1309, %1310 : vector<1x32xf32>
    %1312 = vector.extract_strided_slice %1022 {offsets = [0, 32], sizes = [1, 32], strides = [1, 1]} : vector<1x96xf32> to vector<1x32xf32>
    %1313 = vector.extract_strided_slice %1303 {offsets = [0, 32], sizes = [1, 32], strides = [1, 1]} : vector<1x96xf32> to vector<1x32xf32>
    %1314 = arith.addf %1312, %1313 : vector<1x32xf32>
    %1315 = arith.negf %1314 : vector<1x32xf32>
    %1316 = math.exp %1315 : vector<1x32xf32>
    %cst_261 = arith.constant 1.000000e+00 : f32
    %1317 = vector.broadcast %cst_261 : f32 to vector<1x32xf32>
    %1318 = arith.addf %1317, %1316 : vector<1x32xf32>
    %1319 = arith.divf %1317, %1318 : vector<1x32xf32>
    %1320 = vector.extract_strided_slice %1022 {offsets = [0, 64], sizes = [1, 32], strides = [1, 1]} : vector<1x96xf32> to vector<1x32xf32>
    %1321 = vector.extract_strided_slice %1303 {offsets = [0, 64], sizes = [1, 32], strides = [1, 1]} : vector<1x96xf32> to vector<1x32xf32>
    %1322 = arith.mulf %1311, %1321 : vector<1x32xf32>
    %1323 = arith.addf %1320, %1322 : vector<1x32xf32>
    %1324 = math.tanh %1323 : vector<1x32xf32>
    %cst_262 = arith.constant 1.000000e+00 : f32
    %1325 = vector.broadcast %cst_262 : f32 to vector<1x32xf32>
    %1326 = arith.subf %1325, %1319 : vector<1x32xf32>
    %1327 = arith.mulf %1326, %1324 : vector<1x32xf32>
    %1328 = arith.mulf %1319, %1299 : vector<1x32xf32>
    %1329 = arith.addf %1327, %1328 : vector<1x32xf32>
    %cst_263 = arith.constant dense<0.000000e+00> : vector<1x96xf32>
    %1330 = tpu.matmul %1329, %9, %cst_263 {dimension_numbers = #tpu.dot_dimension_numbers<[1], [0], [0], [1], [0, 0, 1, 1], [], []>} : vector<1x32xf32>, vector<32x96xf32>, vector<1x96xf32> -> vector<1x96xf32>
    %1331 = arith.addf %1330, %11 : vector<1x96xf32>
    %cst_264 = arith.constant dense<0.000000e+00> : vector<1x96xf32>
    %1332 = tpu.matmul %1329, %6, %cst_264 {dimension_numbers = #tpu.dot_dimension_numbers<[1], [0], [0], [1], [0, 0, 1, 1], [], []>} : vector<1x32xf32>, vector<32x96xf32>, vector<1x96xf32> -> vector<1x96xf32>
    %1333 = arith.addf %1332, %8 : vector<1x96xf32>
    %1334 = vector.extract_strided_slice %1023 {offsets = [0, 0], sizes = [1, 32], strides = [1, 1]} : vector<1x96xf32> to vector<1x32xf32>
    %1335 = vector.extract_strided_slice %1333 {offsets = [0, 0], sizes = [1, 32], strides = [1, 1]} : vector<1x96xf32> to vector<1x32xf32>
    %1336 = arith.addf %1334, %1335 : vector<1x32xf32>
    %1337 = arith.negf %1336 : vector<1x32xf32>
    %1338 = math.exp %1337 : vector<1x32xf32>
    %cst_265 = arith.constant 1.000000e+00 : f32
    %1339 = vector.broadcast %cst_265 : f32 to vector<1x32xf32>
    %1340 = arith.addf %1339, %1338 : vector<1x32xf32>
    %1341 = arith.divf %1339, %1340 : vector<1x32xf32>
    %1342 = vector.extract_strided_slice %1023 {offsets = [0, 32], sizes = [1, 32], strides = [1, 1]} : vector<1x96xf32> to vector<1x32xf32>
    %1343 = vector.extract_strided_slice %1333 {offsets = [0, 32], sizes = [1, 32], strides = [1, 1]} : vector<1x96xf32> to vector<1x32xf32>
    %1344 = arith.addf %1342, %1343 : vector<1x32xf32>
    %1345 = arith.negf %1344 : vector<1x32xf32>
    %1346 = math.exp %1345 : vector<1x32xf32>
    %cst_266 = arith.constant 1.000000e+00 : f32
    %1347 = vector.broadcast %cst_266 : f32 to vector<1x32xf32>
    %1348 = arith.addf %1347, %1346 : vector<1x32xf32>
    %1349 = arith.divf %1347, %1348 : vector<1x32xf32>
    %1350 = vector.extract_strided_slice %1023 {offsets = [0, 64], sizes = [1, 32], strides = [1, 1]} : vector<1x96xf32> to vector<1x32xf32>
    %1351 = vector.extract_strided_slice %1333 {offsets = [0, 64], sizes = [1, 32], strides = [1, 1]} : vector<1x96xf32> to vector<1x32xf32>
    %1352 = arith.mulf %1341, %1351 : vector<1x32xf32>
    %1353 = arith.addf %1350, %1352 : vector<1x32xf32>
    %1354 = math.tanh %1353 : vector<1x32xf32>
    %cst_267 = arith.constant 1.000000e+00 : f32
    %1355 = vector.broadcast %cst_267 : f32 to vector<1x32xf32>
    %1356 = arith.subf %1355, %1349 : vector<1x32xf32>
    %1357 = arith.mulf %1356, %1354 : vector<1x32xf32>
    %1358 = arith.mulf %1349, %1329 : vector<1x32xf32>
    %1359 = arith.addf %1357, %1358 : vector<1x32xf32>
    %cst_268 = arith.constant dense<0.000000e+00> : vector<1x96xf32>
    %1360 = tpu.matmul %1359, %9, %cst_268 {dimension_numbers = #tpu.dot_dimension_numbers<[1], [0], [0], [1], [0, 0, 1, 1], [], []>} : vector<1x32xf32>, vector<32x96xf32>, vector<1x96xf32> -> vector<1x96xf32>
    %1361 = arith.addf %1360, %11 : vector<1x96xf32>
    %cst_269 = arith.constant dense<0.000000e+00> : vector<1x96xf32>
    %1362 = tpu.matmul %1359, %6, %cst_269 {dimension_numbers = #tpu.dot_dimension_numbers<[1], [0], [0], [1], [0, 0, 1, 1], [], []>} : vector<1x32xf32>, vector<32x96xf32>, vector<1x96xf32> -> vector<1x96xf32>
    %1363 = arith.addf %1362, %8 : vector<1x96xf32>
    %1364 = vector.extract_strided_slice %1024 {offsets = [0, 0], sizes = [1, 32], strides = [1, 1]} : vector<1x96xf32> to vector<1x32xf32>
    %1365 = vector.extract_strided_slice %1363 {offsets = [0, 0], sizes = [1, 32], strides = [1, 1]} : vector<1x96xf32> to vector<1x32xf32>
    %1366 = arith.addf %1364, %1365 : vector<1x32xf32>
    %1367 = arith.negf %1366 : vector<1x32xf32>
    %1368 = math.exp %1367 : vector<1x32xf32>
    %cst_270 = arith.constant 1.000000e+00 : f32
    %1369 = vector.broadcast %cst_270 : f32 to vector<1x32xf32>
    %1370 = arith.addf %1369, %1368 : vector<1x32xf32>
    %1371 = arith.divf %1369, %1370 : vector<1x32xf32>
    %1372 = vector.extract_strided_slice %1024 {offsets = [0, 32], sizes = [1, 32], strides = [1, 1]} : vector<1x96xf32> to vector<1x32xf32>
    %1373 = vector.extract_strided_slice %1363 {offsets = [0, 32], sizes = [1, 32], strides = [1, 1]} : vector<1x96xf32> to vector<1x32xf32>
    %1374 = arith.addf %1372, %1373 : vector<1x32xf32>
    %1375 = arith.negf %1374 : vector<1x32xf32>
    %1376 = math.exp %1375 : vector<1x32xf32>
    %cst_271 = arith.constant 1.000000e+00 : f32
    %1377 = vector.broadcast %cst_271 : f32 to vector<1x32xf32>
    %1378 = arith.addf %1377, %1376 : vector<1x32xf32>
    %1379 = arith.divf %1377, %1378 : vector<1x32xf32>
    %1380 = vector.extract_strided_slice %1024 {offsets = [0, 64], sizes = [1, 32], strides = [1, 1]} : vector<1x96xf32> to vector<1x32xf32>
    %1381 = vector.extract_strided_slice %1363 {offsets = [0, 64], sizes = [1, 32], strides = [1, 1]} : vector<1x96xf32> to vector<1x32xf32>
    %1382 = arith.mulf %1371, %1381 : vector<1x32xf32>
    %1383 = arith.addf %1380, %1382 : vector<1x32xf32>
    %1384 = math.tanh %1383 : vector<1x32xf32>
    %cst_272 = arith.constant 1.000000e+00 : f32
    %1385 = vector.broadcast %cst_272 : f32 to vector<1x32xf32>
    %1386 = arith.subf %1385, %1379 : vector<1x32xf32>
    %1387 = arith.mulf %1386, %1384 : vector<1x32xf32>
    %1388 = arith.mulf %1379, %1359 : vector<1x32xf32>
    %1389 = arith.addf %1387, %1388 : vector<1x32xf32>
    %cst_273 = arith.constant dense<0.000000e+00> : vector<1x96xf32>
    %1390 = tpu.matmul %1389, %9, %cst_273 {dimension_numbers = #tpu.dot_dimension_numbers<[1], [0], [0], [1], [0, 0, 1, 1], [], []>} : vector<1x32xf32>, vector<32x96xf32>, vector<1x96xf32> -> vector<1x96xf32>
    %1391 = arith.addf %1390, %11 : vector<1x96xf32>
    %cst_274 = arith.constant dense<0.000000e+00> : vector<1x96xf32>
    %1392 = tpu.matmul %1389, %6, %cst_274 {dimension_numbers = #tpu.dot_dimension_numbers<[1], [0], [0], [1], [0, 0, 1, 1], [], []>} : vector<1x32xf32>, vector<32x96xf32>, vector<1x96xf32> -> vector<1x96xf32>
    %1393 = arith.addf %1392, %8 : vector<1x96xf32>
    %1394 = vector.extract_strided_slice %1025 {offsets = [0, 0], sizes = [1, 32], strides = [1, 1]} : vector<1x96xf32> to vector<1x32xf32>
    %1395 = vector.extract_strided_slice %1393 {offsets = [0, 0], sizes = [1, 32], strides = [1, 1]} : vector<1x96xf32> to vector<1x32xf32>
    %1396 = arith.addf %1394, %1395 : vector<1x32xf32>
    %1397 = arith.negf %1396 : vector<1x32xf32>
    %1398 = math.exp %1397 : vector<1x32xf32>
    %cst_275 = arith.constant 1.000000e+00 : f32
    %1399 = vector.broadcast %cst_275 : f32 to vector<1x32xf32>
    %1400 = arith.addf %1399, %1398 : vector<1x32xf32>
    %1401 = arith.divf %1399, %1400 : vector<1x32xf32>
    %1402 = vector.extract_strided_slice %1025 {offsets = [0, 32], sizes = [1, 32], strides = [1, 1]} : vector<1x96xf32> to vector<1x32xf32>
    %1403 = vector.extract_strided_slice %1393 {offsets = [0, 32], sizes = [1, 32], strides = [1, 1]} : vector<1x96xf32> to vector<1x32xf32>
    %1404 = arith.addf %1402, %1403 : vector<1x32xf32>
    %1405 = arith.negf %1404 : vector<1x32xf32>
    %1406 = math.exp %1405 : vector<1x32xf32>
    %cst_276 = arith.constant 1.000000e+00 : f32
    %1407 = vector.broadcast %cst_276 : f32 to vector<1x32xf32>
    %1408 = arith.addf %1407, %1406 : vector<1x32xf32>
    %1409 = arith.divf %1407, %1408 : vector<1x32xf32>
    %1410 = vector.extract_strided_slice %1025 {offsets = [0, 64], sizes = [1, 32], strides = [1, 1]} : vector<1x96xf32> to vector<1x32xf32>
    %1411 = vector.extract_strided_slice %1393 {offsets = [0, 64], sizes = [1, 32], strides = [1, 1]} : vector<1x96xf32> to vector<1x32xf32>
    %1412 = arith.mulf %1401, %1411 : vector<1x32xf32>
    %1413 = arith.addf %1410, %1412 : vector<1x32xf32>
    %1414 = math.tanh %1413 : vector<1x32xf32>
    %cst_277 = arith.constant 1.000000e+00 : f32
    %1415 = vector.broadcast %cst_277 : f32 to vector<1x32xf32>
    %1416 = arith.subf %1415, %1409 : vector<1x32xf32>
    %1417 = arith.mulf %1416, %1414 : vector<1x32xf32>
    %1418 = arith.mulf %1409, %1389 : vector<1x32xf32>
    %1419 = arith.addf %1417, %1418 : vector<1x32xf32>
    %cst_278 = arith.constant dense<0.000000e+00> : vector<1x96xf32>
    %1420 = tpu.matmul %1419, %9, %cst_278 {dimension_numbers = #tpu.dot_dimension_numbers<[1], [0], [0], [1], [0, 0, 1, 1], [], []>} : vector<1x32xf32>, vector<32x96xf32>, vector<1x96xf32> -> vector<1x96xf32>
    %1421 = arith.addf %1420, %11 : vector<1x96xf32>
    %cst_279 = arith.constant dense<0.000000e+00> : vector<1x96xf32>
    %1422 = tpu.matmul %1419, %6, %cst_279 {dimension_numbers = #tpu.dot_dimension_numbers<[1], [0], [0], [1], [0, 0, 1, 1], [], []>} : vector<1x32xf32>, vector<32x96xf32>, vector<1x96xf32> -> vector<1x96xf32>
    %1423 = arith.addf %1422, %8 : vector<1x96xf32>
    %1424 = vector.extract_strided_slice %1026 {offsets = [0, 0], sizes = [1, 32], strides = [1, 1]} : vector<1x96xf32> to vector<1x32xf32>
    %1425 = vector.extract_strided_slice %1423 {offsets = [0, 0], sizes = [1, 32], strides = [1, 1]} : vector<1x96xf32> to vector<1x32xf32>
    %1426 = arith.addf %1424, %1425 : vector<1x32xf32>
    %1427 = arith.negf %1426 : vector<1x32xf32>
    %1428 = math.exp %1427 : vector<1x32xf32>
    %cst_280 = arith.constant 1.000000e+00 : f32
    %1429 = vector.broadcast %cst_280 : f32 to vector<1x32xf32>
    %1430 = arith.addf %1429, %1428 : vector<1x32xf32>
    %1431 = arith.divf %1429, %1430 : vector<1x32xf32>
    %1432 = vector.extract_strided_slice %1026 {offsets = [0, 32], sizes = [1, 32], strides = [1, 1]} : vector<1x96xf32> to vector<1x32xf32>
    %1433 = vector.extract_strided_slice %1423 {offsets = [0, 32], sizes = [1, 32], strides = [1, 1]} : vector<1x96xf32> to vector<1x32xf32>
    %1434 = arith.addf %1432, %1433 : vector<1x32xf32>
    %1435 = arith.negf %1434 : vector<1x32xf32>
    %1436 = math.exp %1435 : vector<1x32xf32>
    %cst_281 = arith.constant 1.000000e+00 : f32
    %1437 = vector.broadcast %cst_281 : f32 to vector<1x32xf32>
    %1438 = arith.addf %1437, %1436 : vector<1x32xf32>
    %1439 = arith.divf %1437, %1438 : vector<1x32xf32>
    %1440 = vector.extract_strided_slice %1026 {offsets = [0, 64], sizes = [1, 32], strides = [1, 1]} : vector<1x96xf32> to vector<1x32xf32>
    %1441 = vector.extract_strided_slice %1423 {offsets = [0, 64], sizes = [1, 32], strides = [1, 1]} : vector<1x96xf32> to vector<1x32xf32>
    %1442 = arith.mulf %1431, %1441 : vector<1x32xf32>
    %1443 = arith.addf %1440, %1442 : vector<1x32xf32>
    %1444 = math.tanh %1443 : vector<1x32xf32>
    %cst_282 = arith.constant 1.000000e+00 : f32
    %1445 = vector.broadcast %cst_282 : f32 to vector<1x32xf32>
    %1446 = arith.subf %1445, %1439 : vector<1x32xf32>
    %1447 = arith.mulf %1446, %1444 : vector<1x32xf32>
    %1448 = arith.mulf %1439, %1419 : vector<1x32xf32>
    %1449 = arith.addf %1447, %1448 : vector<1x32xf32>
    %cst_283 = arith.constant dense<0.000000e+00> : vector<1x96xf32>
    %1450 = tpu.matmul %1449, %9, %cst_283 {dimension_numbers = #tpu.dot_dimension_numbers<[1], [0], [0], [1], [0, 0, 1, 1], [], []>} : vector<1x32xf32>, vector<32x96xf32>, vector<1x96xf32> -> vector<1x96xf32>
    %1451 = arith.addf %1450, %11 : vector<1x96xf32>
    %cst_284 = arith.constant dense<0.000000e+00> : vector<1x96xf32>
    %1452 = tpu.matmul %1449, %6, %cst_284 {dimension_numbers = #tpu.dot_dimension_numbers<[1], [0], [0], [1], [0, 0, 1, 1], [], []>} : vector<1x32xf32>, vector<32x96xf32>, vector<1x96xf32> -> vector<1x96xf32>
    %1453 = arith.addf %1452, %8 : vector<1x96xf32>
    %1454 = vector.extract_strided_slice %1027 {offsets = [0, 0], sizes = [1, 32], strides = [1, 1]} : vector<1x96xf32> to vector<1x32xf32>
    %1455 = vector.extract_strided_slice %1453 {offsets = [0, 0], sizes = [1, 32], strides = [1, 1]} : vector<1x96xf32> to vector<1x32xf32>
    %1456 = arith.addf %1454, %1455 : vector<1x32xf32>
    %1457 = arith.negf %1456 : vector<1x32xf32>
    %1458 = math.exp %1457 : vector<1x32xf32>
    %cst_285 = arith.constant 1.000000e+00 : f32
    %1459 = vector.broadcast %cst_285 : f32 to vector<1x32xf32>
    %1460 = arith.addf %1459, %1458 : vector<1x32xf32>
    %1461 = arith.divf %1459, %1460 : vector<1x32xf32>
    %1462 = vector.extract_strided_slice %1027 {offsets = [0, 32], sizes = [1, 32], strides = [1, 1]} : vector<1x96xf32> to vector<1x32xf32>
    %1463 = vector.extract_strided_slice %1453 {offsets = [0, 32], sizes = [1, 32], strides = [1, 1]} : vector<1x96xf32> to vector<1x32xf32>
    %1464 = arith.addf %1462, %1463 : vector<1x32xf32>
    %1465 = arith.negf %1464 : vector<1x32xf32>
    %1466 = math.exp %1465 : vector<1x32xf32>
    %cst_286 = arith.constant 1.000000e+00 : f32
    %1467 = vector.broadcast %cst_286 : f32 to vector<1x32xf32>
    %1468 = arith.addf %1467, %1466 : vector<1x32xf32>
    %1469 = arith.divf %1467, %1468 : vector<1x32xf32>
    %1470 = vector.extract_strided_slice %1027 {offsets = [0, 64], sizes = [1, 32], strides = [1, 1]} : vector<1x96xf32> to vector<1x32xf32>
    %1471 = vector.extract_strided_slice %1453 {offsets = [0, 64], sizes = [1, 32], strides = [1, 1]} : vector<1x96xf32> to vector<1x32xf32>
    %1472 = arith.mulf %1461, %1471 : vector<1x32xf32>
    %1473 = arith.addf %1470, %1472 : vector<1x32xf32>
    %1474 = math.tanh %1473 : vector<1x32xf32>
    %cst_287 = arith.constant 1.000000e+00 : f32
    %1475 = vector.broadcast %cst_287 : f32 to vector<1x32xf32>
    %1476 = arith.subf %1475, %1469 : vector<1x32xf32>
    %1477 = arith.mulf %1476, %1474 : vector<1x32xf32>
    %1478 = arith.mulf %1469, %1449 : vector<1x32xf32>
    %1479 = arith.addf %1477, %1478 : vector<1x32xf32>
    %cst_288 = arith.constant dense<0.000000e+00> : vector<1x96xf32>
    %1480 = tpu.matmul %1479, %9, %cst_288 {dimension_numbers = #tpu.dot_dimension_numbers<[1], [0], [0], [1], [0, 0, 1, 1], [], []>} : vector<1x32xf32>, vector<32x96xf32>, vector<1x96xf32> -> vector<1x96xf32>
    %1481 = arith.addf %1480, %11 : vector<1x96xf32>
    %cst_289 = arith.constant dense<0.000000e+00> : vector<1x96xf32>
    %1482 = tpu.matmul %1479, %6, %cst_289 {dimension_numbers = #tpu.dot_dimension_numbers<[1], [0], [0], [1], [0, 0, 1, 1], [], []>} : vector<1x32xf32>, vector<32x96xf32>, vector<1x96xf32> -> vector<1x96xf32>
    %1483 = arith.addf %1482, %8 : vector<1x96xf32>
    %1484 = vector.extract_strided_slice %1028 {offsets = [0, 0], sizes = [1, 32], strides = [1, 1]} : vector<1x96xf32> to vector<1x32xf32>
    %1485 = vector.extract_strided_slice %1483 {offsets = [0, 0], sizes = [1, 32], strides = [1, 1]} : vector<1x96xf32> to vector<1x32xf32>
    %1486 = arith.addf %1484, %1485 : vector<1x32xf32>
    %1487 = arith.negf %1486 : vector<1x32xf32>
    %1488 = math.exp %1487 : vector<1x32xf32>
    %cst_290 = arith.constant 1.000000e+00 : f32
    %1489 = vector.broadcast %cst_290 : f32 to vector<1x32xf32>
    %1490 = arith.addf %1489, %1488 : vector<1x32xf32>
    %1491 = arith.divf %1489, %1490 : vector<1x32xf32>
    %1492 = vector.extract_strided_slice %1028 {offsets = [0, 32], sizes = [1, 32], strides = [1, 1]} : vector<1x96xf32> to vector<1x32xf32>
    %1493 = vector.extract_strided_slice %1483 {offsets = [0, 32], sizes = [1, 32], strides = [1, 1]} : vector<1x96xf32> to vector<1x32xf32>
    %1494 = arith.addf %1492, %1493 : vector<1x32xf32>
    %1495 = arith.negf %1494 : vector<1x32xf32>
    %1496 = math.exp %1495 : vector<1x32xf32>
    %cst_291 = arith.constant 1.000000e+00 : f32
    %1497 = vector.broadcast %cst_291 : f32 to vector<1x32xf32>
    %1498 = arith.addf %1497, %1496 : vector<1x32xf32>
    %1499 = arith.divf %1497, %1498 : vector<1x32xf32>
    %1500 = vector.extract_strided_slice %1028 {offsets = [0, 64], sizes = [1, 32], strides = [1, 1]} : vector<1x96xf32> to vector<1x32xf32>
    %1501 = vector.extract_strided_slice %1483 {offsets = [0, 64], sizes = [1, 32], strides = [1, 1]} : vector<1x96xf32> to vector<1x32xf32>
    %1502 = arith.mulf %1491, %1501 : vector<1x32xf32>
    %1503 = arith.addf %1500, %1502 : vector<1x32xf32>
    %1504 = math.tanh %1503 : vector<1x32xf32>
    %cst_292 = arith.constant 1.000000e+00 : f32
    %1505 = vector.broadcast %cst_292 : f32 to vector<1x32xf32>
    %1506 = arith.subf %1505, %1499 : vector<1x32xf32>
    %1507 = arith.mulf %1506, %1504 : vector<1x32xf32>
    %1508 = arith.mulf %1499, %1479 : vector<1x32xf32>
    %1509 = arith.addf %1507, %1508 : vector<1x32xf32>
    %cst_293 = arith.constant dense<0.000000e+00> : vector<1x96xf32>
    %1510 = tpu.matmul %1509, %9, %cst_293 {dimension_numbers = #tpu.dot_dimension_numbers<[1], [0], [0], [1], [0, 0, 1, 1], [], []>} : vector<1x32xf32>, vector<32x96xf32>, vector<1x96xf32> -> vector<1x96xf32>
    %1511 = arith.addf %1510, %11 : vector<1x96xf32>
    %c1_294 = arith.constant 1 : index
    %c0_295 = arith.constant 0 : index
    %c0_296 = arith.constant 0 : index
    %1512 = vector.load %arg14[%c1_294, %c0_295, %c0_296] : memref<2x2x32xf32, #tpu.memory_space<vmem>>, vector<1x2x32xf32>
    %1513 = vector.shape_cast %1512 : vector<1x2x32xf32> to vector<2x32xf32>
    %1514 = vector.extract_strided_slice %1513 {offsets = [1, 0], sizes = [1, 32], strides = [1, 1]} : vector<2x32xf32> to vector<1x32xf32>
    %cst_297 = arith.constant dense<0.000000e+00> : vector<1x96xf32>
    %1515 = tpu.matmul %1514, %10, %cst_297 {dimension_numbers = #tpu.dot_dimension_numbers<[1], [0], [0], [1], [0, 0, 1, 1], [], []>} : vector<1x32xf32>, vector<32x96xf32>, vector<1x96xf32> -> vector<1x96xf32>
    %1516 = arith.addf %1515, %12 : vector<1x96xf32>
    %1517 = vector.extract_strided_slice %1061 {offsets = [0, 0], sizes = [1, 32], strides = [1, 1]} : vector<1x96xf32> to vector<1x32xf32>
    %1518 = vector.extract_strided_slice %1516 {offsets = [0, 0], sizes = [1, 32], strides = [1, 1]} : vector<1x96xf32> to vector<1x32xf32>
    %1519 = arith.addf %1517, %1518 : vector<1x32xf32>
    %1520 = arith.negf %1519 : vector<1x32xf32>
    %1521 = math.exp %1520 : vector<1x32xf32>
    %cst_298 = arith.constant 1.000000e+00 : f32
    %1522 = vector.broadcast %cst_298 : f32 to vector<1x32xf32>
    %1523 = arith.addf %1522, %1521 : vector<1x32xf32>
    %1524 = arith.divf %1522, %1523 : vector<1x32xf32>
    %1525 = vector.extract_strided_slice %1061 {offsets = [0, 32], sizes = [1, 32], strides = [1, 1]} : vector<1x96xf32> to vector<1x32xf32>
    %1526 = vector.extract_strided_slice %1516 {offsets = [0, 32], sizes = [1, 32], strides = [1, 1]} : vector<1x96xf32> to vector<1x32xf32>
    %1527 = arith.addf %1525, %1526 : vector<1x32xf32>
    %1528 = arith.negf %1527 : vector<1x32xf32>
    %1529 = math.exp %1528 : vector<1x32xf32>
    %cst_299 = arith.constant 1.000000e+00 : f32
    %1530 = vector.broadcast %cst_299 : f32 to vector<1x32xf32>
    %1531 = arith.addf %1530, %1529 : vector<1x32xf32>
    %1532 = arith.divf %1530, %1531 : vector<1x32xf32>
    %1533 = vector.extract_strided_slice %1061 {offsets = [0, 64], sizes = [1, 32], strides = [1, 1]} : vector<1x96xf32> to vector<1x32xf32>
    %1534 = vector.extract_strided_slice %1516 {offsets = [0, 64], sizes = [1, 32], strides = [1, 1]} : vector<1x96xf32> to vector<1x32xf32>
    %1535 = arith.mulf %1524, %1534 : vector<1x32xf32>
    %1536 = arith.addf %1533, %1535 : vector<1x32xf32>
    %1537 = math.tanh %1536 : vector<1x32xf32>
    %cst_300 = arith.constant 1.000000e+00 : f32
    %1538 = vector.broadcast %cst_300 : f32 to vector<1x32xf32>
    %1539 = arith.subf %1538, %1532 : vector<1x32xf32>
    %1540 = arith.mulf %1539, %1537 : vector<1x32xf32>
    %1541 = arith.mulf %1532, %1514 : vector<1x32xf32>
    %1542 = arith.addf %1540, %1541 : vector<1x32xf32>
    %c16 = arith.constant 16 : index
    %c0_301 = arith.constant 0 : index
    %1543 = vector.load %arg22[%c16, %c0_301] : memref<32x32xf32, #tpu.memory_space<vmem>>, vector<1x32xf32>
    tpu.vector_store %arg22[%c16, %c0_301], %1542 {strides = array<i32>} : memref<32x32xf32, #tpu.memory_space<vmem>>, vector<1x32xf32>,
    %cst_302 = arith.constant dense<0.000000e+00> : vector<1x96xf32>
    %1544 = tpu.matmul %1542, %10, %cst_302 {dimension_numbers = #tpu.dot_dimension_numbers<[1], [0], [0], [1], [0, 0, 1, 1], [], []>} : vector<1x32xf32>, vector<32x96xf32>, vector<1x96xf32> -> vector<1x96xf32>
    %1545 = arith.addf %1544, %12 : vector<1x96xf32>
    %1546 = vector.extract_strided_slice %1091 {offsets = [0, 0], sizes = [1, 32], strides = [1, 1]} : vector<1x96xf32> to vector<1x32xf32>
    %1547 = vector.extract_strided_slice %1545 {offsets = [0, 0], sizes = [1, 32], strides = [1, 1]} : vector<1x96xf32> to vector<1x32xf32>
    %1548 = arith.addf %1546, %1547 : vector<1x32xf32>
    %1549 = arith.negf %1548 : vector<1x32xf32>
    %1550 = math.exp %1549 : vector<1x32xf32>
    %cst_303 = arith.constant 1.000000e+00 : f32
    %1551 = vector.broadcast %cst_303 : f32 to vector<1x32xf32>
    %1552 = arith.addf %1551, %1550 : vector<1x32xf32>
    %1553 = arith.divf %1551, %1552 : vector<1x32xf32>
    %1554 = vector.extract_strided_slice %1091 {offsets = [0, 32], sizes = [1, 32], strides = [1, 1]} : vector<1x96xf32> to vector<1x32xf32>
    %1555 = vector.extract_strided_slice %1545 {offsets = [0, 32], sizes = [1, 32], strides = [1, 1]} : vector<1x96xf32> to vector<1x32xf32>
    %1556 = arith.addf %1554, %1555 : vector<1x32xf32>
    %1557 = arith.negf %1556 : vector<1x32xf32>
    %1558 = math.exp %1557 : vector<1x32xf32>
    %cst_304 = arith.constant 1.000000e+00 : f32
    %1559 = vector.broadcast %cst_304 : f32 to vector<1x32xf32>
    %1560 = arith.addf %1559, %1558 : vector<1x32xf32>
    %1561 = arith.divf %1559, %1560 : vector<1x32xf32>
    %1562 = vector.extract_strided_slice %1091 {offsets = [0, 64], sizes = [1, 32], strides = [1, 1]} : vector<1x96xf32> to vector<1x32xf32>
    %1563 = vector.extract_strided_slice %1545 {offsets = [0, 64], sizes = [1, 32], strides = [1, 1]} : vector<1x96xf32> to vector<1x32xf32>
    %1564 = arith.mulf %1553, %1563 : vector<1x32xf32>
    %1565 = arith.addf %1562, %1564 : vector<1x32xf32>
    %1566 = math.tanh %1565 : vector<1x32xf32>
    %cst_305 = arith.constant 1.000000e+00 : f32
    %1567 = vector.broadcast %cst_305 : f32 to vector<1x32xf32>
    %1568 = arith.subf %1567, %1561 : vector<1x32xf32>
    %1569 = arith.mulf %1568, %1566 : vector<1x32xf32>
    %1570 = arith.mulf %1561, %1542 : vector<1x32xf32>
    %1571 = arith.addf %1569, %1570 : vector<1x32xf32>
    %c17 = arith.constant 17 : index
    %c0_306 = arith.constant 0 : index
    %1572 = vector.load %arg22[%c17, %c0_306] : memref<32x32xf32, #tpu.memory_space<vmem>>, vector<1x32xf32>
    tpu.vector_store %arg22[%c17, %c0_306], %1571 {strides = array<i32>} : memref<32x32xf32, #tpu.memory_space<vmem>>, vector<1x32xf32>,
    %cst_307 = arith.constant dense<0.000000e+00> : vector<1x96xf32>
    %1573 = tpu.matmul %1571, %10, %cst_307 {dimension_numbers = #tpu.dot_dimension_numbers<[1], [0], [0], [1], [0, 0, 1, 1], [], []>} : vector<1x32xf32>, vector<32x96xf32>, vector<1x96xf32> -> vector<1x96xf32>
    %1574 = arith.addf %1573, %12 : vector<1x96xf32>
    %1575 = vector.extract_strided_slice %1121 {offsets = [0, 0], sizes = [1, 32], strides = [1, 1]} : vector<1x96xf32> to vector<1x32xf32>
    %1576 = vector.extract_strided_slice %1574 {offsets = [0, 0], sizes = [1, 32], strides = [1, 1]} : vector<1x96xf32> to vector<1x32xf32>
    %1577 = arith.addf %1575, %1576 : vector<1x32xf32>
    %1578 = arith.negf %1577 : vector<1x32xf32>
    %1579 = math.exp %1578 : vector<1x32xf32>
    %cst_308 = arith.constant 1.000000e+00 : f32
    %1580 = vector.broadcast %cst_308 : f32 to vector<1x32xf32>
    %1581 = arith.addf %1580, %1579 : vector<1x32xf32>
    %1582 = arith.divf %1580, %1581 : vector<1x32xf32>
    %1583 = vector.extract_strided_slice %1121 {offsets = [0, 32], sizes = [1, 32], strides = [1, 1]} : vector<1x96xf32> to vector<1x32xf32>
    %1584 = vector.extract_strided_slice %1574 {offsets = [0, 32], sizes = [1, 32], strides = [1, 1]} : vector<1x96xf32> to vector<1x32xf32>
    %1585 = arith.addf %1583, %1584 : vector<1x32xf32>
    %1586 = arith.negf %1585 : vector<1x32xf32>
    %1587 = math.exp %1586 : vector<1x32xf32>
    %cst_309 = arith.constant 1.000000e+00 : f32
    %1588 = vector.broadcast %cst_309 : f32 to vector<1x32xf32>
    %1589 = arith.addf %1588, %1587 : vector<1x32xf32>
    %1590 = arith.divf %1588, %1589 : vector<1x32xf32>
    %1591 = vector.extract_strided_slice %1121 {offsets = [0, 64], sizes = [1, 32], strides = [1, 1]} : vector<1x96xf32> to vector<1x32xf32>
    %1592 = vector.extract_strided_slice %1574 {offsets = [0, 64], sizes = [1, 32], strides = [1, 1]} : vector<1x96xf32> to vector<1x32xf32>
    %1593 = arith.mulf %1582, %1592 : vector<1x32xf32>
    %1594 = arith.addf %1591, %1593 : vector<1x32xf32>
    %1595 = math.tanh %1594 : vector<1x32xf32>
    %cst_310 = arith.constant 1.000000e+00 : f32
    %1596 = vector.broadcast %cst_310 : f32 to vector<1x32xf32>
    %1597 = arith.subf %1596, %1590 : vector<1x32xf32>
    %1598 = arith.mulf %1597, %1595 : vector<1x32xf32>
    %1599 = arith.mulf %1590, %1571 : vector<1x32xf32>
    %1600 = arith.addf %1598, %1599 : vector<1x32xf32>
    %c18 = arith.constant 18 : index
    %c0_311 = arith.constant 0 : index
    %1601 = vector.load %arg22[%c18, %c0_311] : memref<32x32xf32, #tpu.memory_space<vmem>>, vector<1x32xf32>
    tpu.vector_store %arg22[%c18, %c0_311], %1600 {strides = array<i32>} : memref<32x32xf32, #tpu.memory_space<vmem>>, vector<1x32xf32>,
    %cst_312 = arith.constant dense<0.000000e+00> : vector<1x96xf32>
    %1602 = tpu.matmul %1600, %10, %cst_312 {dimension_numbers = #tpu.dot_dimension_numbers<[1], [0], [0], [1], [0, 0, 1, 1], [], []>} : vector<1x32xf32>, vector<32x96xf32>, vector<1x96xf32> -> vector<1x96xf32>
    %1603 = arith.addf %1602, %12 : vector<1x96xf32>
    %1604 = vector.extract_strided_slice %1151 {offsets = [0, 0], sizes = [1, 32], strides = [1, 1]} : vector<1x96xf32> to vector<1x32xf32>
    %1605 = vector.extract_strided_slice %1603 {offsets = [0, 0], sizes = [1, 32], strides = [1, 1]} : vector<1x96xf32> to vector<1x32xf32>
    %1606 = arith.addf %1604, %1605 : vector<1x32xf32>
    %1607 = arith.negf %1606 : vector<1x32xf32>
    %1608 = math.exp %1607 : vector<1x32xf32>
    %cst_313 = arith.constant 1.000000e+00 : f32
    %1609 = vector.broadcast %cst_313 : f32 to vector<1x32xf32>
    %1610 = arith.addf %1609, %1608 : vector<1x32xf32>
    %1611 = arith.divf %1609, %1610 : vector<1x32xf32>
    %1612 = vector.extract_strided_slice %1151 {offsets = [0, 32], sizes = [1, 32], strides = [1, 1]} : vector<1x96xf32> to vector<1x32xf32>
    %1613 = vector.extract_strided_slice %1603 {offsets = [0, 32], sizes = [1, 32], strides = [1, 1]} : vector<1x96xf32> to vector<1x32xf32>
    %1614 = arith.addf %1612, %1613 : vector<1x32xf32>
    %1615 = arith.negf %1614 : vector<1x32xf32>
    %1616 = math.exp %1615 : vector<1x32xf32>
    %cst_314 = arith.constant 1.000000e+00 : f32
    %1617 = vector.broadcast %cst_314 : f32 to vector<1x32xf32>
    %1618 = arith.addf %1617, %1616 : vector<1x32xf32>
    %1619 = arith.divf %1617, %1618 : vector<1x32xf32>
    %1620 = vector.extract_strided_slice %1151 {offsets = [0, 64], sizes = [1, 32], strides = [1, 1]} : vector<1x96xf32> to vector<1x32xf32>
    %1621 = vector.extract_strided_slice %1603 {offsets = [0, 64], sizes = [1, 32], strides = [1, 1]} : vector<1x96xf32> to vector<1x32xf32>
    %1622 = arith.mulf %1611, %1621 : vector<1x32xf32>
    %1623 = arith.addf %1620, %1622 : vector<1x32xf32>
    %1624 = math.tanh %1623 : vector<1x32xf32>
    %cst_315 = arith.constant 1.000000e+00 : f32
    %1625 = vector.broadcast %cst_315 : f32 to vector<1x32xf32>
    %1626 = arith.subf %1625, %1619 : vector<1x32xf32>
    %1627 = arith.mulf %1626, %1624 : vector<1x32xf32>
    %1628 = arith.mulf %1619, %1600 : vector<1x32xf32>
    %1629 = arith.addf %1627, %1628 : vector<1x32xf32>
    %c19 = arith.constant 19 : index
    %c0_316 = arith.constant 0 : index
    %1630 = vector.load %arg22[%c19, %c0_316] : memref<32x32xf32, #tpu.memory_space<vmem>>, vector<1x32xf32>
    tpu.vector_store %arg22[%c19, %c0_316], %1629 {strides = array<i32>} : memref<32x32xf32, #tpu.memory_space<vmem>>, vector<1x32xf32>,
    %cst_317 = arith.constant dense<0.000000e+00> : vector<1x96xf32>
    %1631 = tpu.matmul %1629, %10, %cst_317 {dimension_numbers = #tpu.dot_dimension_numbers<[1], [0], [0], [1], [0, 0, 1, 1], [], []>} : vector<1x32xf32>, vector<32x96xf32>, vector<1x96xf32> -> vector<1x96xf32>
    %1632 = arith.addf %1631, %12 : vector<1x96xf32>
    %1633 = vector.extract_strided_slice %1181 {offsets = [0, 0], sizes = [1, 32], strides = [1, 1]} : vector<1x96xf32> to vector<1x32xf32>
    %1634 = vector.extract_strided_slice %1632 {offsets = [0, 0], sizes = [1, 32], strides = [1, 1]} : vector<1x96xf32> to vector<1x32xf32>
    %1635 = arith.addf %1633, %1634 : vector<1x32xf32>
    %1636 = arith.negf %1635 : vector<1x32xf32>
    %1637 = math.exp %1636 : vector<1x32xf32>
    %cst_318 = arith.constant 1.000000e+00 : f32
    %1638 = vector.broadcast %cst_318 : f32 to vector<1x32xf32>
    %1639 = arith.addf %1638, %1637 : vector<1x32xf32>
    %1640 = arith.divf %1638, %1639 : vector<1x32xf32>
    %1641 = vector.extract_strided_slice %1181 {offsets = [0, 32], sizes = [1, 32], strides = [1, 1]} : vector<1x96xf32> to vector<1x32xf32>
    %1642 = vector.extract_strided_slice %1632 {offsets = [0, 32], sizes = [1, 32], strides = [1, 1]} : vector<1x96xf32> to vector<1x32xf32>
    %1643 = arith.addf %1641, %1642 : vector<1x32xf32>
    %1644 = arith.negf %1643 : vector<1x32xf32>
    %1645 = math.exp %1644 : vector<1x32xf32>
    %cst_319 = arith.constant 1.000000e+00 : f32
    %1646 = vector.broadcast %cst_319 : f32 to vector<1x32xf32>
    %1647 = arith.addf %1646, %1645 : vector<1x32xf32>
    %1648 = arith.divf %1646, %1647 : vector<1x32xf32>
    %1649 = vector.extract_strided_slice %1181 {offsets = [0, 64], sizes = [1, 32], strides = [1, 1]} : vector<1x96xf32> to vector<1x32xf32>
    %1650 = vector.extract_strided_slice %1632 {offsets = [0, 64], sizes = [1, 32], strides = [1, 1]} : vector<1x96xf32> to vector<1x32xf32>
    %1651 = arith.mulf %1640, %1650 : vector<1x32xf32>
    %1652 = arith.addf %1649, %1651 : vector<1x32xf32>
    %1653 = math.tanh %1652 : vector<1x32xf32>
    %cst_320 = arith.constant 1.000000e+00 : f32
    %1654 = vector.broadcast %cst_320 : f32 to vector<1x32xf32>
    %1655 = arith.subf %1654, %1648 : vector<1x32xf32>
    %1656 = arith.mulf %1655, %1653 : vector<1x32xf32>
    %1657 = arith.mulf %1648, %1629 : vector<1x32xf32>
    %1658 = arith.addf %1656, %1657 : vector<1x32xf32>
    %c20 = arith.constant 20 : index
    %c0_321 = arith.constant 0 : index
    %1659 = vector.load %arg22[%c20, %c0_321] : memref<32x32xf32, #tpu.memory_space<vmem>>, vector<1x32xf32>
    tpu.vector_store %arg22[%c20, %c0_321], %1658 {strides = array<i32>} : memref<32x32xf32, #tpu.memory_space<vmem>>, vector<1x32xf32>,
    %cst_322 = arith.constant dense<0.000000e+00> : vector<1x96xf32>
    %1660 = tpu.matmul %1658, %10, %cst_322 {dimension_numbers = #tpu.dot_dimension_numbers<[1], [0], [0], [1], [0, 0, 1, 1], [], []>} : vector<1x32xf32>, vector<32x96xf32>, vector<1x96xf32> -> vector<1x96xf32>
    %1661 = arith.addf %1660, %12 : vector<1x96xf32>
    %1662 = vector.extract_strided_slice %1211 {offsets = [0, 0], sizes = [1, 32], strides = [1, 1]} : vector<1x96xf32> to vector<1x32xf32>
    %1663 = vector.extract_strided_slice %1661 {offsets = [0, 0], sizes = [1, 32], strides = [1, 1]} : vector<1x96xf32> to vector<1x32xf32>
    %1664 = arith.addf %1662, %1663 : vector<1x32xf32>
    %1665 = arith.negf %1664 : vector<1x32xf32>
    %1666 = math.exp %1665 : vector<1x32xf32>
    %cst_323 = arith.constant 1.000000e+00 : f32
    %1667 = vector.broadcast %cst_323 : f32 to vector<1x32xf32>
    %1668 = arith.addf %1667, %1666 : vector<1x32xf32>
    %1669 = arith.divf %1667, %1668 : vector<1x32xf32>
    %1670 = vector.extract_strided_slice %1211 {offsets = [0, 32], sizes = [1, 32], strides = [1, 1]} : vector<1x96xf32> to vector<1x32xf32>
    %1671 = vector.extract_strided_slice %1661 {offsets = [0, 32], sizes = [1, 32], strides = [1, 1]} : vector<1x96xf32> to vector<1x32xf32>
    %1672 = arith.addf %1670, %1671 : vector<1x32xf32>
    %1673 = arith.negf %1672 : vector<1x32xf32>
    %1674 = math.exp %1673 : vector<1x32xf32>
    %cst_324 = arith.constant 1.000000e+00 : f32
    %1675 = vector.broadcast %cst_324 : f32 to vector<1x32xf32>
    %1676 = arith.addf %1675, %1674 : vector<1x32xf32>
    %1677 = arith.divf %1675, %1676 : vector<1x32xf32>
    %1678 = vector.extract_strided_slice %1211 {offsets = [0, 64], sizes = [1, 32], strides = [1, 1]} : vector<1x96xf32> to vector<1x32xf32>
    %1679 = vector.extract_strided_slice %1661 {offsets = [0, 64], sizes = [1, 32], strides = [1, 1]} : vector<1x96xf32> to vector<1x32xf32>
    %1680 = arith.mulf %1669, %1679 : vector<1x32xf32>
    %1681 = arith.addf %1678, %1680 : vector<1x32xf32>
    %1682 = math.tanh %1681 : vector<1x32xf32>
    %cst_325 = arith.constant 1.000000e+00 : f32
    %1683 = vector.broadcast %cst_325 : f32 to vector<1x32xf32>
    %1684 = arith.subf %1683, %1677 : vector<1x32xf32>
    %1685 = arith.mulf %1684, %1682 : vector<1x32xf32>
    %1686 = arith.mulf %1677, %1658 : vector<1x32xf32>
    %1687 = arith.addf %1685, %1686 : vector<1x32xf32>
    %c21 = arith.constant 21 : index
    %c0_326 = arith.constant 0 : index
    %1688 = vector.load %arg22[%c21, %c0_326] : memref<32x32xf32, #tpu.memory_space<vmem>>, vector<1x32xf32>
    tpu.vector_store %arg22[%c21, %c0_326], %1687 {strides = array<i32>} : memref<32x32xf32, #tpu.memory_space<vmem>>, vector<1x32xf32>,
    %cst_327 = arith.constant dense<0.000000e+00> : vector<1x96xf32>
    %1689 = tpu.matmul %1687, %10, %cst_327 {dimension_numbers = #tpu.dot_dimension_numbers<[1], [0], [0], [1], [0, 0, 1, 1], [], []>} : vector<1x32xf32>, vector<32x96xf32>, vector<1x96xf32> -> vector<1x96xf32>
    %1690 = arith.addf %1689, %12 : vector<1x96xf32>
    %1691 = vector.extract_strided_slice %1241 {offsets = [0, 0], sizes = [1, 32], strides = [1, 1]} : vector<1x96xf32> to vector<1x32xf32>
    %1692 = vector.extract_strided_slice %1690 {offsets = [0, 0], sizes = [1, 32], strides = [1, 1]} : vector<1x96xf32> to vector<1x32xf32>
    %1693 = arith.addf %1691, %1692 : vector<1x32xf32>
    %1694 = arith.negf %1693 : vector<1x32xf32>
    %1695 = math.exp %1694 : vector<1x32xf32>
    %cst_328 = arith.constant 1.000000e+00 : f32
    %1696 = vector.broadcast %cst_328 : f32 to vector<1x32xf32>
    %1697 = arith.addf %1696, %1695 : vector<1x32xf32>
    %1698 = arith.divf %1696, %1697 : vector<1x32xf32>
    %1699 = vector.extract_strided_slice %1241 {offsets = [0, 32], sizes = [1, 32], strides = [1, 1]} : vector<1x96xf32> to vector<1x32xf32>
    %1700 = vector.extract_strided_slice %1690 {offsets = [0, 32], sizes = [1, 32], strides = [1, 1]} : vector<1x96xf32> to vector<1x32xf32>
    %1701 = arith.addf %1699, %1700 : vector<1x32xf32>
    %1702 = arith.negf %1701 : vector<1x32xf32>
    %1703 = math.exp %1702 : vector<1x32xf32>
    %cst_329 = arith.constant 1.000000e+00 : f32
    %1704 = vector.broadcast %cst_329 : f32 to vector<1x32xf32>
    %1705 = arith.addf %1704, %1703 : vector<1x32xf32>
    %1706 = arith.divf %1704, %1705 : vector<1x32xf32>
    %1707 = vector.extract_strided_slice %1241 {offsets = [0, 64], sizes = [1, 32], strides = [1, 1]} : vector<1x96xf32> to vector<1x32xf32>
    %1708 = vector.extract_strided_slice %1690 {offsets = [0, 64], sizes = [1, 32], strides = [1, 1]} : vector<1x96xf32> to vector<1x32xf32>
    %1709 = arith.mulf %1698, %1708 : vector<1x32xf32>
    %1710 = arith.addf %1707, %1709 : vector<1x32xf32>
    %1711 = math.tanh %1710 : vector<1x32xf32>
    %cst_330 = arith.constant 1.000000e+00 : f32
    %1712 = vector.broadcast %cst_330 : f32 to vector<1x32xf32>
    %1713 = arith.subf %1712, %1706 : vector<1x32xf32>
    %1714 = arith.mulf %1713, %1711 : vector<1x32xf32>
    %1715 = arith.mulf %1706, %1687 : vector<1x32xf32>
    %1716 = arith.addf %1714, %1715 : vector<1x32xf32>
    %c22 = arith.constant 22 : index
    %c0_331 = arith.constant 0 : index
    %1717 = vector.load %arg22[%c22, %c0_331] : memref<32x32xf32, #tpu.memory_space<vmem>>, vector<1x32xf32>
    tpu.vector_store %arg22[%c22, %c0_331], %1716 {strides = array<i32>} : memref<32x32xf32, #tpu.memory_space<vmem>>, vector<1x32xf32>,
    %cst_332 = arith.constant dense<0.000000e+00> : vector<1x96xf32>
    %1718 = tpu.matmul %1716, %10, %cst_332 {dimension_numbers = #tpu.dot_dimension_numbers<[1], [0], [0], [1], [0, 0, 1, 1], [], []>} : vector<1x32xf32>, vector<32x96xf32>, vector<1x96xf32> -> vector<1x96xf32>
    %1719 = arith.addf %1718, %12 : vector<1x96xf32>
    %1720 = vector.extract_strided_slice %1271 {offsets = [0, 0], sizes = [1, 32], strides = [1, 1]} : vector<1x96xf32> to vector<1x32xf32>
    %1721 = vector.extract_strided_slice %1719 {offsets = [0, 0], sizes = [1, 32], strides = [1, 1]} : vector<1x96xf32> to vector<1x32xf32>
    %1722 = arith.addf %1720, %1721 : vector<1x32xf32>
    %1723 = arith.negf %1722 : vector<1x32xf32>
    %1724 = math.exp %1723 : vector<1x32xf32>
    %cst_333 = arith.constant 1.000000e+00 : f32
    %1725 = vector.broadcast %cst_333 : f32 to vector<1x32xf32>
    %1726 = arith.addf %1725, %1724 : vector<1x32xf32>
    %1727 = arith.divf %1725, %1726 : vector<1x32xf32>
    %1728 = vector.extract_strided_slice %1271 {offsets = [0, 32], sizes = [1, 32], strides = [1, 1]} : vector<1x96xf32> to vector<1x32xf32>
    %1729 = vector.extract_strided_slice %1719 {offsets = [0, 32], sizes = [1, 32], strides = [1, 1]} : vector<1x96xf32> to vector<1x32xf32>
    %1730 = arith.addf %1728, %1729 : vector<1x32xf32>
    %1731 = arith.negf %1730 : vector<1x32xf32>
    %1732 = math.exp %1731 : vector<1x32xf32>
    %cst_334 = arith.constant 1.000000e+00 : f32
    %1733 = vector.broadcast %cst_334 : f32 to vector<1x32xf32>
    %1734 = arith.addf %1733, %1732 : vector<1x32xf32>
    %1735 = arith.divf %1733, %1734 : vector<1x32xf32>
    %1736 = vector.extract_strided_slice %1271 {offsets = [0, 64], sizes = [1, 32], strides = [1, 1]} : vector<1x96xf32> to vector<1x32xf32>
    %1737 = vector.extract_strided_slice %1719 {offsets = [0, 64], sizes = [1, 32], strides = [1, 1]} : vector<1x96xf32> to vector<1x32xf32>
    %1738 = arith.mulf %1727, %1737 : vector<1x32xf32>
    %1739 = arith.addf %1736, %1738 : vector<1x32xf32>
    %1740 = math.tanh %1739 : vector<1x32xf32>
    %cst_335 = arith.constant 1.000000e+00 : f32
    %1741 = vector.broadcast %cst_335 : f32 to vector<1x32xf32>
    %1742 = arith.subf %1741, %1735 : vector<1x32xf32>
    %1743 = arith.mulf %1742, %1740 : vector<1x32xf32>
    %1744 = arith.mulf %1735, %1716 : vector<1x32xf32>
    %1745 = arith.addf %1743, %1744 : vector<1x32xf32>
    %c23 = arith.constant 23 : index
    %c0_336 = arith.constant 0 : index
    %1746 = vector.load %arg22[%c23, %c0_336] : memref<32x32xf32, #tpu.memory_space<vmem>>, vector<1x32xf32>
    tpu.vector_store %arg22[%c23, %c0_336], %1745 {strides = array<i32>} : memref<32x32xf32, #tpu.memory_space<vmem>>, vector<1x32xf32>,
    %cst_337 = arith.constant dense<0.000000e+00> : vector<1x96xf32>
    %1747 = tpu.matmul %1745, %10, %cst_337 {dimension_numbers = #tpu.dot_dimension_numbers<[1], [0], [0], [1], [0, 0, 1, 1], [], []>} : vector<1x32xf32>, vector<32x96xf32>, vector<1x96xf32> -> vector<1x96xf32>
    %1748 = arith.addf %1747, %12 : vector<1x96xf32>
    %1749 = vector.extract_strided_slice %1301 {offsets = [0, 0], sizes = [1, 32], strides = [1, 1]} : vector<1x96xf32> to vector<1x32xf32>
    %1750 = vector.extract_strided_slice %1748 {offsets = [0, 0], sizes = [1, 32], strides = [1, 1]} : vector<1x96xf32> to vector<1x32xf32>
    %1751 = arith.addf %1749, %1750 : vector<1x32xf32>
    %1752 = arith.negf %1751 : vector<1x32xf32>
    %1753 = math.exp %1752 : vector<1x32xf32>
    %cst_338 = arith.constant 1.000000e+00 : f32
    %1754 = vector.broadcast %cst_338 : f32 to vector<1x32xf32>
    %1755 = arith.addf %1754, %1753 : vector<1x32xf32>
    %1756 = arith.divf %1754, %1755 : vector<1x32xf32>
    %1757 = vector.extract_strided_slice %1301 {offsets = [0, 32], sizes = [1, 32], strides = [1, 1]} : vector<1x96xf32> to vector<1x32xf32>
    %1758 = vector.extract_strided_slice %1748 {offsets = [0, 32], sizes = [1, 32], strides = [1, 1]} : vector<1x96xf32> to vector<1x32xf32>
    %1759 = arith.addf %1757, %1758 : vector<1x32xf32>
    %1760 = arith.negf %1759 : vector<1x32xf32>
    %1761 = math.exp %1760 : vector<1x32xf32>
    %cst_339 = arith.constant 1.000000e+00 : f32
    %1762 = vector.broadcast %cst_339 : f32 to vector<1x32xf32>
    %1763 = arith.addf %1762, %1761 : vector<1x32xf32>
    %1764 = arith.divf %1762, %1763 : vector<1x32xf32>
    %1765 = vector.extract_strided_slice %1301 {offsets = [0, 64], sizes = [1, 32], strides = [1, 1]} : vector<1x96xf32> to vector<1x32xf32>
    %1766 = vector.extract_strided_slice %1748 {offsets = [0, 64], sizes = [1, 32], strides = [1, 1]} : vector<1x96xf32> to vector<1x32xf32>
    %1767 = arith.mulf %1756, %1766 : vector<1x32xf32>
    %1768 = arith.addf %1765, %1767 : vector<1x32xf32>
    %1769 = math.tanh %1768 : vector<1x32xf32>
    %cst_340 = arith.constant 1.000000e+00 : f32
    %1770 = vector.broadcast %cst_340 : f32 to vector<1x32xf32>
    %1771 = arith.subf %1770, %1764 : vector<1x32xf32>
    %1772 = arith.mulf %1771, %1769 : vector<1x32xf32>
    %1773 = arith.mulf %1764, %1745 : vector<1x32xf32>
    %1774 = arith.addf %1772, %1773 : vector<1x32xf32>
    %c24 = arith.constant 24 : index
    %c0_341 = arith.constant 0 : index
    %1775 = vector.load %arg22[%c24, %c0_341] : memref<32x32xf32, #tpu.memory_space<vmem>>, vector<1x32xf32>
    tpu.vector_store %arg22[%c24, %c0_341], %1774 {strides = array<i32>} : memref<32x32xf32, #tpu.memory_space<vmem>>, vector<1x32xf32>,
    %cst_342 = arith.constant dense<0.000000e+00> : vector<1x96xf32>
    %1776 = tpu.matmul %1774, %10, %cst_342 {dimension_numbers = #tpu.dot_dimension_numbers<[1], [0], [0], [1], [0, 0, 1, 1], [], []>} : vector<1x32xf32>, vector<32x96xf32>, vector<1x96xf32> -> vector<1x96xf32>
    %1777 = arith.addf %1776, %12 : vector<1x96xf32>
    %1778 = vector.extract_strided_slice %1331 {offsets = [0, 0], sizes = [1, 32], strides = [1, 1]} : vector<1x96xf32> to vector<1x32xf32>
    %1779 = vector.extract_strided_slice %1777 {offsets = [0, 0], sizes = [1, 32], strides = [1, 1]} : vector<1x96xf32> to vector<1x32xf32>
    %1780 = arith.addf %1778, %1779 : vector<1x32xf32>
    %1781 = arith.negf %1780 : vector<1x32xf32>
    %1782 = math.exp %1781 : vector<1x32xf32>
    %cst_343 = arith.constant 1.000000e+00 : f32
    %1783 = vector.broadcast %cst_343 : f32 to vector<1x32xf32>
    %1784 = arith.addf %1783, %1782 : vector<1x32xf32>
    %1785 = arith.divf %1783, %1784 : vector<1x32xf32>
    %1786 = vector.extract_strided_slice %1331 {offsets = [0, 32], sizes = [1, 32], strides = [1, 1]} : vector<1x96xf32> to vector<1x32xf32>
    %1787 = vector.extract_strided_slice %1777 {offsets = [0, 32], sizes = [1, 32], strides = [1, 1]} : vector<1x96xf32> to vector<1x32xf32>
    %1788 = arith.addf %1786, %1787 : vector<1x32xf32>
    %1789 = arith.negf %1788 : vector<1x32xf32>
    %1790 = math.exp %1789 : vector<1x32xf32>
    %cst_344 = arith.constant 1.000000e+00 : f32
    %1791 = vector.broadcast %cst_344 : f32 to vector<1x32xf32>
    %1792 = arith.addf %1791, %1790 : vector<1x32xf32>
    %1793 = arith.divf %1791, %1792 : vector<1x32xf32>
    %1794 = vector.extract_strided_slice %1331 {offsets = [0, 64], sizes = [1, 32], strides = [1, 1]} : vector<1x96xf32> to vector<1x32xf32>
    %1795 = vector.extract_strided_slice %1777 {offsets = [0, 64], sizes = [1, 32], strides = [1, 1]} : vector<1x96xf32> to vector<1x32xf32>
    %1796 = arith.mulf %1785, %1795 : vector<1x32xf32>
    %1797 = arith.addf %1794, %1796 : vector<1x32xf32>
    %1798 = math.tanh %1797 : vector<1x32xf32>
    %cst_345 = arith.constant 1.000000e+00 : f32
    %1799 = vector.broadcast %cst_345 : f32 to vector<1x32xf32>
    %1800 = arith.subf %1799, %1793 : vector<1x32xf32>
    %1801 = arith.mulf %1800, %1798 : vector<1x32xf32>
    %1802 = arith.mulf %1793, %1774 : vector<1x32xf32>
    %1803 = arith.addf %1801, %1802 : vector<1x32xf32>
    %c25 = arith.constant 25 : index
    %c0_346 = arith.constant 0 : index
    %1804 = vector.load %arg22[%c25, %c0_346] : memref<32x32xf32, #tpu.memory_space<vmem>>, vector<1x32xf32>
    tpu.vector_store %arg22[%c25, %c0_346], %1803 {strides = array<i32>} : memref<32x32xf32, #tpu.memory_space<vmem>>, vector<1x32xf32>,
    %cst_347 = arith.constant dense<0.000000e+00> : vector<1x96xf32>
    %1805 = tpu.matmul %1803, %10, %cst_347 {dimension_numbers = #tpu.dot_dimension_numbers<[1], [0], [0], [1], [0, 0, 1, 1], [], []>} : vector<1x32xf32>, vector<32x96xf32>, vector<1x96xf32> -> vector<1x96xf32>
    %1806 = arith.addf %1805, %12 : vector<1x96xf32>
    %1807 = vector.extract_strided_slice %1361 {offsets = [0, 0], sizes = [1, 32], strides = [1, 1]} : vector<1x96xf32> to vector<1x32xf32>
    %1808 = vector.extract_strided_slice %1806 {offsets = [0, 0], sizes = [1, 32], strides = [1, 1]} : vector<1x96xf32> to vector<1x32xf32>
    %1809 = arith.addf %1807, %1808 : vector<1x32xf32>
    %1810 = arith.negf %1809 : vector<1x32xf32>
    %1811 = math.exp %1810 : vector<1x32xf32>
    %cst_348 = arith.constant 1.000000e+00 : f32
    %1812 = vector.broadcast %cst_348 : f32 to vector<1x32xf32>
    %1813 = arith.addf %1812, %1811 : vector<1x32xf32>
    %1814 = arith.divf %1812, %1813 : vector<1x32xf32>
    %1815 = vector.extract_strided_slice %1361 {offsets = [0, 32], sizes = [1, 32], strides = [1, 1]} : vector<1x96xf32> to vector<1x32xf32>
    %1816 = vector.extract_strided_slice %1806 {offsets = [0, 32], sizes = [1, 32], strides = [1, 1]} : vector<1x96xf32> to vector<1x32xf32>
    %1817 = arith.addf %1815, %1816 : vector<1x32xf32>
    %1818 = arith.negf %1817 : vector<1x32xf32>
    %1819 = math.exp %1818 : vector<1x32xf32>
    %cst_349 = arith.constant 1.000000e+00 : f32
    %1820 = vector.broadcast %cst_349 : f32 to vector<1x32xf32>
    %1821 = arith.addf %1820, %1819 : vector<1x32xf32>
    %1822 = arith.divf %1820, %1821 : vector<1x32xf32>
    %1823 = vector.extract_strided_slice %1361 {offsets = [0, 64], sizes = [1, 32], strides = [1, 1]} : vector<1x96xf32> to vector<1x32xf32>
    %1824 = vector.extract_strided_slice %1806 {offsets = [0, 64], sizes = [1, 32], strides = [1, 1]} : vector<1x96xf32> to vector<1x32xf32>
    %1825 = arith.mulf %1814, %1824 : vector<1x32xf32>
    %1826 = arith.addf %1823, %1825 : vector<1x32xf32>
    %1827 = math.tanh %1826 : vector<1x32xf32>
    %cst_350 = arith.constant 1.000000e+00 : f32
    %1828 = vector.broadcast %cst_350 : f32 to vector<1x32xf32>
    %1829 = arith.subf %1828, %1822 : vector<1x32xf32>
    %1830 = arith.mulf %1829, %1827 : vector<1x32xf32>
    %1831 = arith.mulf %1822, %1803 : vector<1x32xf32>
    %1832 = arith.addf %1830, %1831 : vector<1x32xf32>
    %c26 = arith.constant 26 : index
    %c0_351 = arith.constant 0 : index
    %1833 = vector.load %arg22[%c26, %c0_351] : memref<32x32xf32, #tpu.memory_space<vmem>>, vector<1x32xf32>
    tpu.vector_store %arg22[%c26, %c0_351], %1832 {strides = array<i32>} : memref<32x32xf32, #tpu.memory_space<vmem>>, vector<1x32xf32>,
    %cst_352 = arith.constant dense<0.000000e+00> : vector<1x96xf32>
    %1834 = tpu.matmul %1832, %10, %cst_352 {dimension_numbers = #tpu.dot_dimension_numbers<[1], [0], [0], [1], [0, 0, 1, 1], [], []>} : vector<1x32xf32>, vector<32x96xf32>, vector<1x96xf32> -> vector<1x96xf32>
    %1835 = arith.addf %1834, %12 : vector<1x96xf32>
    %1836 = vector.extract_strided_slice %1391 {offsets = [0, 0], sizes = [1, 32], strides = [1, 1]} : vector<1x96xf32> to vector<1x32xf32>
    %1837 = vector.extract_strided_slice %1835 {offsets = [0, 0], sizes = [1, 32], strides = [1, 1]} : vector<1x96xf32> to vector<1x32xf32>
    %1838 = arith.addf %1836, %1837 : vector<1x32xf32>
    %1839 = arith.negf %1838 : vector<1x32xf32>
    %1840 = math.exp %1839 : vector<1x32xf32>
    %cst_353 = arith.constant 1.000000e+00 : f32
    %1841 = vector.broadcast %cst_353 : f32 to vector<1x32xf32>
    %1842 = arith.addf %1841, %1840 : vector<1x32xf32>
    %1843 = arith.divf %1841, %1842 : vector<1x32xf32>
    %1844 = vector.extract_strided_slice %1391 {offsets = [0, 32], sizes = [1, 32], strides = [1, 1]} : vector<1x96xf32> to vector<1x32xf32>
    %1845 = vector.extract_strided_slice %1835 {offsets = [0, 32], sizes = [1, 32], strides = [1, 1]} : vector<1x96xf32> to vector<1x32xf32>
    %1846 = arith.addf %1844, %1845 : vector<1x32xf32>
    %1847 = arith.negf %1846 : vector<1x32xf32>
    %1848 = math.exp %1847 : vector<1x32xf32>
    %cst_354 = arith.constant 1.000000e+00 : f32
    %1849 = vector.broadcast %cst_354 : f32 to vector<1x32xf32>
    %1850 = arith.addf %1849, %1848 : vector<1x32xf32>
    %1851 = arith.divf %1849, %1850 : vector<1x32xf32>
    %1852 = vector.extract_strided_slice %1391 {offsets = [0, 64], sizes = [1, 32], strides = [1, 1]} : vector<1x96xf32> to vector<1x32xf32>
    %1853 = vector.extract_strided_slice %1835 {offsets = [0, 64], sizes = [1, 32], strides = [1, 1]} : vector<1x96xf32> to vector<1x32xf32>
    %1854 = arith.mulf %1843, %1853 : vector<1x32xf32>
    %1855 = arith.addf %1852, %1854 : vector<1x32xf32>
    %1856 = math.tanh %1855 : vector<1x32xf32>
    %cst_355 = arith.constant 1.000000e+00 : f32
    %1857 = vector.broadcast %cst_355 : f32 to vector<1x32xf32>
    %1858 = arith.subf %1857, %1851 : vector<1x32xf32>
    %1859 = arith.mulf %1858, %1856 : vector<1x32xf32>
    %1860 = arith.mulf %1851, %1832 : vector<1x32xf32>
    %1861 = arith.addf %1859, %1860 : vector<1x32xf32>
    %c27 = arith.constant 27 : index
    %c0_356 = arith.constant 0 : index
    %1862 = vector.load %arg22[%c27, %c0_356] : memref<32x32xf32, #tpu.memory_space<vmem>>, vector<1x32xf32>
    tpu.vector_store %arg22[%c27, %c0_356], %1861 {strides = array<i32>} : memref<32x32xf32, #tpu.memory_space<vmem>>, vector<1x32xf32>,
    %cst_357 = arith.constant dense<0.000000e+00> : vector<1x96xf32>
    %1863 = tpu.matmul %1861, %10, %cst_357 {dimension_numbers = #tpu.dot_dimension_numbers<[1], [0], [0], [1], [0, 0, 1, 1], [], []>} : vector<1x32xf32>, vector<32x96xf32>, vector<1x96xf32> -> vector<1x96xf32>
    %1864 = arith.addf %1863, %12 : vector<1x96xf32>
    %1865 = vector.extract_strided_slice %1421 {offsets = [0, 0], sizes = [1, 32], strides = [1, 1]} : vector<1x96xf32> to vector<1x32xf32>
    %1866 = vector.extract_strided_slice %1864 {offsets = [0, 0], sizes = [1, 32], strides = [1, 1]} : vector<1x96xf32> to vector<1x32xf32>
    %1867 = arith.addf %1865, %1866 : vector<1x32xf32>
    %1868 = arith.negf %1867 : vector<1x32xf32>
    %1869 = math.exp %1868 : vector<1x32xf32>
    %cst_358 = arith.constant 1.000000e+00 : f32
    %1870 = vector.broadcast %cst_358 : f32 to vector<1x32xf32>
    %1871 = arith.addf %1870, %1869 : vector<1x32xf32>
    %1872 = arith.divf %1870, %1871 : vector<1x32xf32>
    %1873 = vector.extract_strided_slice %1421 {offsets = [0, 32], sizes = [1, 32], strides = [1, 1]} : vector<1x96xf32> to vector<1x32xf32>
    %1874 = vector.extract_strided_slice %1864 {offsets = [0, 32], sizes = [1, 32], strides = [1, 1]} : vector<1x96xf32> to vector<1x32xf32>
    %1875 = arith.addf %1873, %1874 : vector<1x32xf32>
    %1876 = arith.negf %1875 : vector<1x32xf32>
    %1877 = math.exp %1876 : vector<1x32xf32>
    %cst_359 = arith.constant 1.000000e+00 : f32
    %1878 = vector.broadcast %cst_359 : f32 to vector<1x32xf32>
    %1879 = arith.addf %1878, %1877 : vector<1x32xf32>
    %1880 = arith.divf %1878, %1879 : vector<1x32xf32>
    %1881 = vector.extract_strided_slice %1421 {offsets = [0, 64], sizes = [1, 32], strides = [1, 1]} : vector<1x96xf32> to vector<1x32xf32>
    %1882 = vector.extract_strided_slice %1864 {offsets = [0, 64], sizes = [1, 32], strides = [1, 1]} : vector<1x96xf32> to vector<1x32xf32>
    %1883 = arith.mulf %1872, %1882 : vector<1x32xf32>
    %1884 = arith.addf %1881, %1883 : vector<1x32xf32>
    %1885 = math.tanh %1884 : vector<1x32xf32>
    %cst_360 = arith.constant 1.000000e+00 : f32
    %1886 = vector.broadcast %cst_360 : f32 to vector<1x32xf32>
    %1887 = arith.subf %1886, %1880 : vector<1x32xf32>
    %1888 = arith.mulf %1887, %1885 : vector<1x32xf32>
    %1889 = arith.mulf %1880, %1861 : vector<1x32xf32>
    %1890 = arith.addf %1888, %1889 : vector<1x32xf32>
    %c28 = arith.constant 28 : index
    %c0_361 = arith.constant 0 : index
    %1891 = vector.load %arg22[%c28, %c0_361] : memref<32x32xf32, #tpu.memory_space<vmem>>, vector<1x32xf32>
    tpu.vector_store %arg22[%c28, %c0_361], %1890 {strides = array<i32>} : memref<32x32xf32, #tpu.memory_space<vmem>>, vector<1x32xf32>,
    %cst_362 = arith.constant dense<0.000000e+00> : vector<1x96xf32>
    %1892 = tpu.matmul %1890, %10, %cst_362 {dimension_numbers = #tpu.dot_dimension_numbers<[1], [0], [0], [1], [0, 0, 1, 1], [], []>} : vector<1x32xf32>, vector<32x96xf32>, vector<1x96xf32> -> vector<1x96xf32>
    %1893 = arith.addf %1892, %12 : vector<1x96xf32>
    %1894 = vector.extract_strided_slice %1451 {offsets = [0, 0], sizes = [1, 32], strides = [1, 1]} : vector<1x96xf32> to vector<1x32xf32>
    %1895 = vector.extract_strided_slice %1893 {offsets = [0, 0], sizes = [1, 32], strides = [1, 1]} : vector<1x96xf32> to vector<1x32xf32>
    %1896 = arith.addf %1894, %1895 : vector<1x32xf32>
    %1897 = arith.negf %1896 : vector<1x32xf32>
    %1898 = math.exp %1897 : vector<1x32xf32>
    %cst_363 = arith.constant 1.000000e+00 : f32
    %1899 = vector.broadcast %cst_363 : f32 to vector<1x32xf32>
    %1900 = arith.addf %1899, %1898 : vector<1x32xf32>
    %1901 = arith.divf %1899, %1900 : vector<1x32xf32>
    %1902 = vector.extract_strided_slice %1451 {offsets = [0, 32], sizes = [1, 32], strides = [1, 1]} : vector<1x96xf32> to vector<1x32xf32>
    %1903 = vector.extract_strided_slice %1893 {offsets = [0, 32], sizes = [1, 32], strides = [1, 1]} : vector<1x96xf32> to vector<1x32xf32>
    %1904 = arith.addf %1902, %1903 : vector<1x32xf32>
    %1905 = arith.negf %1904 : vector<1x32xf32>
    %1906 = math.exp %1905 : vector<1x32xf32>
    %cst_364 = arith.constant 1.000000e+00 : f32
    %1907 = vector.broadcast %cst_364 : f32 to vector<1x32xf32>
    %1908 = arith.addf %1907, %1906 : vector<1x32xf32>
    %1909 = arith.divf %1907, %1908 : vector<1x32xf32>
    %1910 = vector.extract_strided_slice %1451 {offsets = [0, 64], sizes = [1, 32], strides = [1, 1]} : vector<1x96xf32> to vector<1x32xf32>
    %1911 = vector.extract_strided_slice %1893 {offsets = [0, 64], sizes = [1, 32], strides = [1, 1]} : vector<1x96xf32> to vector<1x32xf32>
    %1912 = arith.mulf %1901, %1911 : vector<1x32xf32>
    %1913 = arith.addf %1910, %1912 : vector<1x32xf32>
    %1914 = math.tanh %1913 : vector<1x32xf32>
    %cst_365 = arith.constant 1.000000e+00 : f32
    %1915 = vector.broadcast %cst_365 : f32 to vector<1x32xf32>
    %1916 = arith.subf %1915, %1909 : vector<1x32xf32>
    %1917 = arith.mulf %1916, %1914 : vector<1x32xf32>
    %1918 = arith.mulf %1909, %1890 : vector<1x32xf32>
    %1919 = arith.addf %1917, %1918 : vector<1x32xf32>
    %c29 = arith.constant 29 : index
    %c0_366 = arith.constant 0 : index
    %1920 = vector.load %arg22[%c29, %c0_366] : memref<32x32xf32, #tpu.memory_space<vmem>>, vector<1x32xf32>
    tpu.vector_store %arg22[%c29, %c0_366], %1919 {strides = array<i32>} : memref<32x32xf32, #tpu.memory_space<vmem>>, vector<1x32xf32>,
    %cst_367 = arith.constant dense<0.000000e+00> : vector<1x96xf32>
    %1921 = tpu.matmul %1919, %10, %cst_367 {dimension_numbers = #tpu.dot_dimension_numbers<[1], [0], [0], [1], [0, 0, 1, 1], [], []>} : vector<1x32xf32>, vector<32x96xf32>, vector<1x96xf32> -> vector<1x96xf32>
    %1922 = arith.addf %1921, %12 : vector<1x96xf32>
    %1923 = vector.extract_strided_slice %1481 {offsets = [0, 0], sizes = [1, 32], strides = [1, 1]} : vector<1x96xf32> to vector<1x32xf32>
    %1924 = vector.extract_strided_slice %1922 {offsets = [0, 0], sizes = [1, 32], strides = [1, 1]} : vector<1x96xf32> to vector<1x32xf32>
    %1925 = arith.addf %1923, %1924 : vector<1x32xf32>
    %1926 = arith.negf %1925 : vector<1x32xf32>
    %1927 = math.exp %1926 : vector<1x32xf32>
    %cst_368 = arith.constant 1.000000e+00 : f32
    %1928 = vector.broadcast %cst_368 : f32 to vector<1x32xf32>
    %1929 = arith.addf %1928, %1927 : vector<1x32xf32>
    %1930 = arith.divf %1928, %1929 : vector<1x32xf32>
    %1931 = vector.extract_strided_slice %1481 {offsets = [0, 32], sizes = [1, 32], strides = [1, 1]} : vector<1x96xf32> to vector<1x32xf32>
    %1932 = vector.extract_strided_slice %1922 {offsets = [0, 32], sizes = [1, 32], strides = [1, 1]} : vector<1x96xf32> to vector<1x32xf32>
    %1933 = arith.addf %1931, %1932 : vector<1x32xf32>
    %1934 = arith.negf %1933 : vector<1x32xf32>
    %1935 = math.exp %1934 : vector<1x32xf32>
    %cst_369 = arith.constant 1.000000e+00 : f32
    %1936 = vector.broadcast %cst_369 : f32 to vector<1x32xf32>
    %1937 = arith.addf %1936, %1935 : vector<1x32xf32>
    %1938 = arith.divf %1936, %1937 : vector<1x32xf32>
    %1939 = vector.extract_strided_slice %1481 {offsets = [0, 64], sizes = [1, 32], strides = [1, 1]} : vector<1x96xf32> to vector<1x32xf32>
    %1940 = vector.extract_strided_slice %1922 {offsets = [0, 64], sizes = [1, 32], strides = [1, 1]} : vector<1x96xf32> to vector<1x32xf32>
    %1941 = arith.mulf %1930, %1940 : vector<1x32xf32>
    %1942 = arith.addf %1939, %1941 : vector<1x32xf32>
    %1943 = math.tanh %1942 : vector<1x32xf32>
    %cst_370 = arith.constant 1.000000e+00 : f32
    %1944 = vector.broadcast %cst_370 : f32 to vector<1x32xf32>
    %1945 = arith.subf %1944, %1938 : vector<1x32xf32>
    %1946 = arith.mulf %1945, %1943 : vector<1x32xf32>
    %1947 = arith.mulf %1938, %1919 : vector<1x32xf32>
    %1948 = arith.addf %1946, %1947 : vector<1x32xf32>
    %c30 = arith.constant 30 : index
    %c0_371 = arith.constant 0 : index
    %1949 = vector.load %arg22[%c30, %c0_371] : memref<32x32xf32, #tpu.memory_space<vmem>>, vector<1x32xf32>
    tpu.vector_store %arg22[%c30, %c0_371], %1948 {strides = array<i32>} : memref<32x32xf32, #tpu.memory_space<vmem>>, vector<1x32xf32>,
    %cst_372 = arith.constant dense<0.000000e+00> : vector<1x96xf32>
    %1950 = tpu.matmul %1948, %10, %cst_372 {dimension_numbers = #tpu.dot_dimension_numbers<[1], [0], [0], [1], [0, 0, 1, 1], [], []>} : vector<1x32xf32>, vector<32x96xf32>, vector<1x96xf32> -> vector<1x96xf32>
    %1951 = arith.addf %1950, %12 : vector<1x96xf32>
    %1952 = vector.extract_strided_slice %1511 {offsets = [0, 0], sizes = [1, 32], strides = [1, 1]} : vector<1x96xf32> to vector<1x32xf32>
    %1953 = vector.extract_strided_slice %1951 {offsets = [0, 0], sizes = [1, 32], strides = [1, 1]} : vector<1x96xf32> to vector<1x32xf32>
    %1954 = arith.addf %1952, %1953 : vector<1x32xf32>
    %1955 = arith.negf %1954 : vector<1x32xf32>
    %1956 = math.exp %1955 : vector<1x32xf32>
    %cst_373 = arith.constant 1.000000e+00 : f32
    %1957 = vector.broadcast %cst_373 : f32 to vector<1x32xf32>
    %1958 = arith.addf %1957, %1956 : vector<1x32xf32>
    %1959 = arith.divf %1957, %1958 : vector<1x32xf32>
    %1960 = vector.extract_strided_slice %1511 {offsets = [0, 32], sizes = [1, 32], strides = [1, 1]} : vector<1x96xf32> to vector<1x32xf32>
    %1961 = vector.extract_strided_slice %1951 {offsets = [0, 32], sizes = [1, 32], strides = [1, 1]} : vector<1x96xf32> to vector<1x32xf32>
    %1962 = arith.addf %1960, %1961 : vector<1x32xf32>
    %1963 = arith.negf %1962 : vector<1x32xf32>
    %1964 = math.exp %1963 : vector<1x32xf32>
    %cst_374 = arith.constant 1.000000e+00 : f32
    %1965 = vector.broadcast %cst_374 : f32 to vector<1x32xf32>
    %1966 = arith.addf %1965, %1964 : vector<1x32xf32>
    %1967 = arith.divf %1965, %1966 : vector<1x32xf32>
    %1968 = vector.extract_strided_slice %1511 {offsets = [0, 64], sizes = [1, 32], strides = [1, 1]} : vector<1x96xf32> to vector<1x32xf32>
    %1969 = vector.extract_strided_slice %1951 {offsets = [0, 64], sizes = [1, 32], strides = [1, 1]} : vector<1x96xf32> to vector<1x32xf32>
    %1970 = arith.mulf %1959, %1969 : vector<1x32xf32>
    %1971 = arith.addf %1968, %1970 : vector<1x32xf32>
    %1972 = math.tanh %1971 : vector<1x32xf32>
    %cst_375 = arith.constant 1.000000e+00 : f32
    %1973 = vector.broadcast %cst_375 : f32 to vector<1x32xf32>
    %1974 = arith.subf %1973, %1967 : vector<1x32xf32>
    %1975 = arith.mulf %1974, %1972 : vector<1x32xf32>
    %1976 = arith.mulf %1967, %1948 : vector<1x32xf32>
    %1977 = arith.addf %1975, %1976 : vector<1x32xf32>
    %c31 = arith.constant 31 : index
    %c0_376 = arith.constant 0 : index
    %1978 = vector.load %arg22[%c31, %c0_376] : memref<32x32xf32, #tpu.memory_space<vmem>>, vector<1x32xf32>
    tpu.vector_store %arg22[%c31, %c0_376], %1977 {strides = array<i32>} : memref<32x32xf32, #tpu.memory_space<vmem>>, vector<1x32xf32>,
    %c0_377 = arith.constant 0 : index
    %c0_378 = arith.constant 0 : index
    %1979 = vector.load %arg22[%c0_377, %c0_378] : memref<32x32xf32, #tpu.memory_space<vmem>>, vector<32x32xf32>
    %c0_379 = arith.constant 0 : index
    %c0_380 = arith.constant 0 : index
    %1980 = vector.load %arg15[%c0_379, %c0_380] : memref<32x128xf32, #tpu.memory_space<vmem>>, vector<32x128xf32>
    %cst_381 = arith.constant dense<0.000000e+00> : vector<32x128xf32>
    %1981 = tpu.matmul %1979, %1980, %cst_381 {dimension_numbers = #tpu.dot_dimension_numbers<[1], [0], [0], [1], [0, 0, 1, 1], [], []>} : vector<32x32xf32>, vector<32x128xf32>, vector<32x128xf32> -> vector<32x128xf32>
    %c0_382 = arith.constant 0 : index
    %c0_383 = arith.constant 0 : index
    %1982 = vector.load %arg16[%c0_382, %c0_383] : memref<1x128xf32, #tpu.memory_space<vmem>>, vector<1x128xf32>
    %1983 = vector.broadcast %1982 : vector<1x128xf32> to vector<32x128xf32>
    %1984 = arith.addf %1981, %1983 : vector<32x128xf32>
    %cst_384 = arith.constant 0.000000e+00 : f32
    %1985 = vector.broadcast %cst_384 : f32 to vector<32x128xf32>
    %1986 = arith.maximumf %1984, %1985 : vector<32x128xf32>
    %c0_385 = arith.constant 0 : index
    %c0_386 = arith.constant 0 : index
    %1987 = vector.load %arg17[%c0_385, %c0_386] : memref<128x32xf32, #tpu.memory_space<vmem>>, vector<128x32xf32>
    %cst_387 = arith.constant dense<0.000000e+00> : vector<32x32xf32>
    %1988 = tpu.matmul %1986, %1987, %cst_387 {dimension_numbers = #tpu.dot_dimension_numbers<[1], [0], [0], [1], [0, 0, 1, 1], [], []>} : vector<32x128xf32>, vector<128x32xf32>, vector<32x32xf32> -> vector<32x32xf32>
    %c0_388 = arith.constant 0 : index
    %c0_389 = arith.constant 0 : index
    %1989 = vector.load %arg18[%c0_388, %c0_389] : memref<1x32xf32, #tpu.memory_space<vmem>>, vector<1x32xf32>
    %1990 = vector.broadcast %1989 : vector<1x32xf32> to vector<32x32xf32>
    %1991 = arith.addf %1988, %1990 : vector<32x32xf32>
    %cst_390 = arith.constant 0.000000e+00 : f32
    %1992 = vector.broadcast %cst_390 : f32 to vector<32x32xf32>
    %1993 = arith.maximumf %1991, %1992 : vector<32x32xf32>
    %c0_391 = arith.constant 0 : index
    %c0_392 = arith.constant 0 : index
    %1994 = vector.load %arg19[%c0_391, %c0_392] : memref<32x4xf32, #tpu.memory_space<vmem>>, vector<32x4xf32>
    %cst_393 = arith.constant dense<0.000000e+00> : vector<32x4xf32>
    %1995 = tpu.matmul %1993, %1994, %cst_393 {dimension_numbers = #tpu.dot_dimension_numbers<[1], [0], [0], [1], [0, 0, 1, 1], [], []>} : vector<32x32xf32>, vector<32x4xf32>, vector<32x4xf32> -> vector<32x4xf32>
    %c0_394 = arith.constant 0 : index
    %c0_395 = arith.constant 0 : index
    %1996 = vector.load %arg20[%c0_394, %c0_395] : memref<1x4xf32, #tpu.memory_space<vmem>>, vector<1x4xf32>
    %1997 = vector.broadcast %1996 : vector<1x4xf32> to vector<32x4xf32>
    %1998 = arith.addf %1995, %1997 : vector<32x4xf32>
    %c0_396 = arith.constant 0 : index
    %c0_397 = arith.constant 0 : index
    %1999 = vector.load %arg21[%c0_396, %c0_397] : memref<32x4xf32, #tpu.memory_space<vmem>>, vector<32x4xf32>
    tpu.vector_store %arg21[%c0_396, %c0_397], %1998 {strides = array<i32>} : memref<32x4xf32, #tpu.memory_space<vmem>>, vector<32x4xf32>,
    return
  }
}

</mosaic_0001>

<bundles_post_ra>
// kernel: gcngru_forward.1
= control target key start
LH: loop header
LB: loop body
LE: loop exit
PB: predicated region body
PF: predicated region fallthrough
CT: control target
= control target key end

     0   :  { %vm100_vm0 = vcmask 64512   ;;  %v6254_v4 = vmov 0   ;;  %vm150_vm1 = vcmask 130048   ;;  %vm247_vm2 = vcmask 261120   ;;  %s6256_s24 = smov 32   ;;  %s6257_s30 = smov 96   ;;  %s7997_s0 = inlined_call_operand.vmem [shape: f32[8,8], index: 0, kind: input, shape index: {}]   ;;  %s7998_s1 = inlined_call_operand.vmem [shape: f32[2,16,8], index: 1, kind: input, shape index: {}]   ;;  %s7999_s3 = inlined_call_operand.vmem [shape: f32[32,1], index: 3, kind: input, shape index: {}]   ;;  %s8000_s2 = inlined_call_operand.vmem [shape: f32[32,16], index: 2, kind: input, shape index: {}]   ;;  %s8001_s5 = inlined_call_operand.vmem [shape: f32[16,1], index: 5, kind: input, shape index: {}]   ;;  %s8002_s7 = inlined_call_operand.vmem [shape: f32[32,96], index: 7, kind: input, shape index: {}]   ;;  %s8003_s4 = inlined_call_operand.vmem [shape: f32[16,32], index: 4, kind: input, shape index: {}]   ;;  %s8004_s14 = inlined_call_operand.vmem [shape: f32[2,2,32], index: 14, kind: input, shape index: {}]   ;;  %s8005_s8 = inlined_call_operand.vmem [shape: f32[1,96], index: 8, kind: input, shape index: {}]   ;;  %s8006_s6 = inlined_call_operand.vmem [shape: f32[8,96], index: 6, kind: input, shape index: {}]   ;;  %s8007_s9 = inlined_call_operand.vmem [shape: f32[1,96], index: 9, kind: input, shape index: {}]   ;;  %s8008_s10 = inlined_call_operand.vmem [shape: f32[32,96], index: 10, kind: input, shape index: {}]   ;;  %s8009_s11 = inlined_call_operand.vmem [shape: f32[32,96], index: 11, kind: input, shape index: {}]   ;;  %s8010_s13 = inlined_call_operand.vmem [shape: f32[1,96], index: 13, kind: input, shape index: {}]   ;;  %s8011_s12 = inlined_call_operand.vmem [shape: f32[1,96], index: 12, kind: input, shape index: {}]   ;;  %s8012_s15 = inlined_call_operand.vmem [shape: f32[32,128], index: 15, kind: input, shape index: {}]   ;;  %s8013_s16 = inlined_call_operand.vmem [shape: f32[1,128], index: 16, kind: input, shape index: {}]   ;;  %s8014_s17 = inlined_call_operand.vmem [shape: f32[128,32], index: 17, kind: input, shape index: {}]   ;;  %s8015_s18 = inlined_call_operand.vmem [shape: f32[1,32], index: 18, kind: input, shape index: {}]   ;;  %s8016_s19 = inlined_call_operand.vmem [shape: f32[32,4], index: 19, kind: input, shape index: {}]   ;;  %s8017_s20 = inlined_call_operand.vmem [shape: f32[1,4], index: 20, kind: input, shape index: {}]   ;;  %s8018_s21 = inlined_call_operand.vmem [shape: f32[32,4], index: 21, kind: output, shape index: {}]  }
   0x1   :  { %8025 = sst [smem:[#allocation3_spill]] %s7997_s0  ;;  %5813 = vset.pattern.permute.xlu0 %v6254_v4  ;;  %5814 = vset.pattern.permute.xlu1 %v6254_v4  ;;  %v77_v39 = vld [vmem:[%s8003_s4] sm:$0xff]  ;;  %v78_v40 = vld [vmem:[%s8003_s4 + $0x8] sm:$0xff] }
   0x2   :  { %8026 = sst [smem:[#allocation4_spill]] %s7998_s1  ;;  %5815 = vset.pattern.permute.xlu2 %v6254_v4  ;;  %v311_v41 = vld [vmem:[%s8004_s14] sm:$0x3]  ;;  %s6255_s1 = smov 64  }
   0x3   :  { %8027 = sst [smem:[#allocation5_spill]] %s7999_s3  ;;  %v81_v42 = vld [vmem:[%s8006_s6] sm:$0xff] }
   0x4   :  { %8028 = sst [smem:[#allocation6_spill]] %s8000_s2  ;;  %v6488_v48 = vld [vmem:[%s8007_s9] sm:$0x1] }
   0x5   :  { %8029 = sst [smem:[#allocation7_spill]] %s8001_s5  ;;  %v6496_v51 = vld [vmem:[%s8005_s8] ss:$0 sm:$0xff] }
   0x6   :  { %8030 = sst [smem:[#allocation8_spill]] %s8002_s7 }
   0x7   :  { %s8031_s26 = sld [smem:[#allocation3_spill]] }
   0x8   :  { %s8032_s28 = sld [smem:[#allocation4_spill]] }
   0x9   :  { %s8033_s7 = sld [smem:[#allocation5_spill]] }
   0xa   :  { %s8034_s29 = sld [smem:[#allocation6_spill]] }
   0xb   :  { %s8035_s3 = sld [smem:[#allocation7_spill]] }
   0xc   :  { %s8036_s2 = sld [smem:[#allocation8_spill]] }
   0xd   :  { %v68_v0 = vld [vmem:[%s8031_s26] sm:$0xff] }
   0xe   :  { %v98_v1 = vld [vmem:[%s8032_s28] sm:$0xff]  ;;  %122 = vmatpush.msra.mxu0 %v68_v0  ;;  %223 = vmatpush.msra.mxu3 %v68_v0  ;;  %v99_v2 = vld [vmem:[%s8032_s28 + $0x8] sm:$0xff] }
   0xf   :  { %5609 = vmatmul.msk.f32.vlgmr.msra.gmra.mxu0 %vm100_vm0, %v98_v1  ;;  %v73_v3 = vld [vmem:[%s8033_s7] sm:$0xff]  ;;  %v74_v5 = vld [vmem:[%s8033_s7 + $0x8] sm:$0xff]  ;;  %v75_v6 = vld [vmem:[%s8033_s7 + $0x10] sm:$0xff] }
  0x10   :  { %132 = vperm.xlu0 %5813, %v73_v3   ;;  %142 = vperm.xlu1 %5814, %v75_v6   ;;  %v76_v8 = vld [vmem:[%s8033_s7 + $0x18] sm:$0xff]  ;;  %v69_v10 = vld [vmem:[%s8034_s29] sm:$0xff]  ;;  %v70_v11 = vld [vmem:[%s8034_s29 + $0x8] sm:$0xff] }
  0x11   :  { %v71_v12 = vld [vmem:[%s8034_s29 + $0x10] sm:$0xff]  ;;  %v72_v13 = vld [vmem:[%s8034_s29 + $0x18] sm:$0xff]  ;;  %v79_v31 = vld [vmem:[%s8035_s3] sm:$0xff]  ;;  %303 = vmatpush.msrb.mxu0 %v81_v42 }
  0x12   :  { %239 = vperm.xlu2 %5815, %v79_v31   ;;  %v6429_v33 = vld [vmem:[%s8036_s2 + $0x18] sm:$0xff]  ;;  %v6435_v34 = vld [vmem:[%s8036_s2 + $0x10] sm:$0xff]  ;;  %v6441_v35 = vld [vmem:[%s8036_s2 + $0x8] sm:$0xff] }
  0x13   :  { %v6447_v36 = vld [vmem:[%s8036_s2] sm:$0xff]  ;;  %414 = vmatpush.msra.mxu0 %v6429_v33  ;;  %v80_v6 = vld [vmem:[%s8035_s3 + $0x8] sm:$0xff] }
  0x15   :  { %415 = vmatpush.msra.mxu0 %v6435_v34 }
  0x17   :  { %5610 = vmatmul.msk.f32.gmra.mxu0 %vm100_vm0, %v99_v2 }
  0x18   :  { %137 = vperm.xlu0 %5813, %v74_v5   ;;  %147 = vperm.xlu1 %5814, %v76_v8  }
  0x19   :  { %416 = vmatpush.msra.mxu0 %v6441_v35 }
  0x1b   :  { %417 = vmatpush.msra.mxu0 %v6447_v36 }
  0x6c   :  { %v6477_v43 = vpop.permute.xlu2 %239 }
  0x82   :  { %v6407_v14 = vpop.permute.xlu0 %132  ;;  %v6415_v22 = vpop.permute.xlu1 %142 }
  0x8a   :  { %v6411_v18 = vpop.permute.xlu0 %137  ;;  %v6419_v26 = vpop.permute.xlu1 %147 }
  0x8c   :  { %v124_v7 = vpop.f32.mrf.mxu0 }
  0x94   :  { %v127_v9 = vpop.f32.mrf.mxu0 }
  0x95   :  { %177 = vmatpush.msra.mxu1 %v127_v9 }
  0x97   :  { %178 = vmatpush.msra.mxu1 %v124_v7 }
  0x98   :  { %5611 = vmatmul.msk.f32.vlgmr.msra.gmra.mxu1 %vm150_vm1, %v69_v10 }
  0x99   :  { %503 = vmatpush.msrb.mxu1 %v6429_v33 }
  0x9b   :  { %504 = vmatpush.msrb.mxu1 %v6435_v34 }
  0x9d   :  { %505 = vmatpush.msrb.mxu1 %v6441_v35 }
  0x9f   :  { %506 = vmatpush.msrb.mxu1 %v6447_v36 }
  0xa0   :  { %5612 = vmatmul.msk.f32.gmra.mxu1 %vm150_vm1, %v70_v11 }
  0xa1   :  { %681 = vmatpush.msra.mxu1 %v6429_v33 }
  0xa3   :  { %682 = vmatpush.msra.mxu1 %v6435_v34 }
  0xa5   :  { %683 = vmatpush.msra.mxu1 %v6441_v35 }
  0xa7   :  { %684 = vmatpush.msra.mxu1 %v6447_v36 }
  0xa8   :  { %5613 = vmatmul.msk.f32.gmra.mxu1 %vm150_vm1, %v71_v12 }
  0xb0   :  { %5614 = vmatmul.msk.f32.gmra.mxu1 %vm150_vm1, %v72_v13  ;;  %v6515_v13 = vld [vmem:[%s8008_s10 + $0x18] sm:$0xff] }
  0xb1   :  { %483 = vmatpush.msra.mxu2 %v6515_v13 }
 0x115   :  { %v180_v15 = vpop.f32.mrf.mxu1 }
 0x116   :  { %v181_v16 = vadd.f32 %v180_v15, %v6407_v14  ;;  %v6520_v15 = vld [vmem:[%s8008_s10 + $0x10] sm:$0xff] }
 0x117   :  { %484 = vmatpush.msra.mxu2 %v6520_v15 }
 0x118   :  { %v192_v17 = vmax.f32 %v181_v16, 0.0  ;;  %v6527_v16 = vld [vmem:[%s8008_s10 + $0x8] sm:$0xff] }
 0x119   :  { %485 = vmatpush.msra.mxu2 %v6527_v16 }
 0x11a   :  { %5615 = vmatmul.msk.f32.vlgmr.msra.gmra.mxu3 %vm100_vm0, %v192_v17  ;;  %v6534_v17 = vld [vmem:[%s8008_s10] sm:$0xff] }
 0x11b   :  { %486 = vmatpush.msra.mxu2 %v6534_v17 }
 0x11d   :  { %v183_v19 = vpop.f32.mrf.mxu1  ;;  %661 = vmatpush.msrb.mxu2 %v6515_v13 }
 0x11e   :  { %v184_v20 = vadd.f32 %v183_v19, %v6411_v18 }
 0x11f   :  { %662 = vmatpush.msrb.mxu2 %v6520_v15 }
 0x120   :  { %v193_v21 = vmax.f32 %v184_v20, 0.0 }
 0x121   :  { %663 = vmatpush.msrb.mxu2 %v6527_v16 }
 0x122   :  { %5616 = vmatmul.msk.f32.gmra.mxu3 %vm100_vm0, %v193_v21 }
 0x123   :  { %664 = vmatpush.msrb.mxu2 %v6534_v17 }
 0x125   :  { %v186_v23 = vpop.f32.mrf.mxu1 }
 0x126   :  { %v187_v24 = vadd.f32 %v186_v23, %v6415_v22 }
 0x128   :  { %v194_v25 = vmax.f32 %v187_v24, 0.0 }
 0x12a   :  { %5617 = vmatmul.msk.f32.gmra.mxu3 %vm100_vm0, %v194_v25 }
 0x12d   :  { %v189_v27 = vpop.f32.mrf.mxu1 }
 0x12e   :  { %v190_v28 = vadd.f32 %v189_v27, %v6419_v26 }
 0x130   :  { %v195_v29 = vmax.f32 %v190_v28, 0.0 }
 0x132   :  { %5618 = vmatmul.msk.f32.gmra.mxu3 %vm100_vm0, %v195_v29 }
 0x19d   :  { %v225_v30 = vpop.f32.mrf.mxu3 }
 0x1a5   :  { %v228_v32 = vpop.f32.mrf.mxu3 }
 0x1ad   :  { %v231_v37 = vpop.f32.mrf.mxu3 }
 0x1b5   :  { %v234_v38 = vpop.f32.mrf.mxu3 }
 0x1b6   :  { %266 = vmatpush.msrb.mxu3 %v234_v38 }
 0x1b8   :  { %267 = vmatpush.msrb.mxu3 %v231_v37 }
 0x1ba   :  { %268 = vmatpush.msrb.mxu3 %v228_v32 }
 0x1bc   :  { %269 = vmatpush.msrb.mxu3 %v225_v30 }
 0x1bd   :  { %5619 = vmatmul.msk.f32.vlgmr.msrb.gmra.mxu3 %vm247_vm2, %v77_v39 }
 0x1be   :  { %327 = vmatpush.msra.mxu3 %v6429_v33 }
 0x1c0   :  { %328 = vmatpush.msra.mxu3 %v6435_v34 }
 0x1c2   :  { %329 = vmatpush.msra.mxu3 %v6441_v35 }
 0x1c4   :  { %330 = vmatpush.msra.mxu3 %v6447_v36 }
 0x1c5   :  { %5620 = vmatmul.msk.f32.gmra.mxu3 %vm247_vm2, %v78_v40 }
 0x1c6   :  { %394 = vmatpush.msrb.mxu3 %v6515_v13 }
 0x1c8   :  { %395 = vmatpush.msrb.mxu3 %v6520_v15 }
 0x1ca   :  { %396 = vmatpush.msrb.mxu3 %v6527_v16 }
 0x1cc   :  { %397 = vmatpush.msrb.mxu3 %v6534_v17 }
 0x1cd   :  { %5623 = vmatmul.msk.f32.vlgmr.msra.gmra.mxu3 %vm247_vm2, %v311_v41 }
 0x1ce   :  { %572 = vmatpush.msra.mxu3 %v6515_v13 }
 0x1d0   :  { %573 = vmatpush.msra.mxu3 %v6520_v15 }
 0x1d2   :  { %574 = vmatpush.msra.mxu3 %v6527_v16 }
 0x1d4   :  { %575 = vmatpush.msra.mxu3 %v6534_v17 }
 0x240   :  { %v271_v44 = vpop.f32.mrf.mxu3 }
 0x241   :  { %v272_v45 = vadd.f32 %v271_v44, %v6477_v43 }
 0x243   :  { %v277_v46 = vmax.f32 %v272_v45, 0.0 }
 0x245   :  { %5621 = vmatmul.msk.f32.vlgmr.msrb.gmra.mxu0 %vm100_vm0, %v277_v46 }
 0x246   :  { %592 = vmatpush.msrb.mxu0 %v6429_v33 }
 0x248   :  { %v274_v47 = vpop.f32.mrf.mxu3  ;;  %593 = vmatpush.msrb.mxu0 %v6435_v34 }
 0x24a   :  { %594 = vmatpush.msrb.mxu0 %v6441_v35 }
 0x24c   :  { %595 = vmatpush.msrb.mxu0 %v6447_v36 }
 0x250   :  { %v332_v49 = vpop.f32.mrf.mxu3 }
 0x251   :  { %v333_v50 = vadd.f32 %v332_v49, %v6488_v48 }
 0x253   :  { %356 = vrot.lane.b32.xlu2 %v333_v50, %s6255_s1 }
 0x25b   :  { %372 = vrot.lane.b32.xlu2 %v311_v41, %s6256_s24 }
 0x2ad   :  { %v357_v3 = vpop.permute.xlu2 %356 }
 0x2b5   :  { %v373_v19 = vpop.permute.xlu2 %372 }
 0x2c2   :  { %v305_v52 = vpop.f32.mrf.mxu0 }
 0x2c3   :  { %v6499_v53 = vadd.f32 %v6496_v51, %v305_v52 }
 0x2c5   :  { %v335_v54 = vadd.f32 %v333_v50, %v6499_v53 }
 0x2c7   :  { %v5624_v55 = vmul.f32 -1.442695, %v335_v54 }
 0x2c9   :  { %5820 = vpow2.f32 %v5624_v55 }
 0x2cf   :  { %v5821_v56 = vpop.eup %5820 }
 0x2d0   :  { %v339_v57 = vadd.f32 1.0, %v5821_v56 }
 0x2d2   :  { %5822 = vrcp.f32 %v339_v57  ;;  %v351_v61 = vand.u32 2147483648, %v339_v57  ;;  %v349_v63 = vand.u32 2147483647, %v339_v57  ;;  %vm345_vm4 = vweird.f32 %v339_v57 }
 0x2d4   :  { %v352_v1 = vor.u32 1.1754944e-38, %v351_v61  ;;  %vm350_vm6 = vcmp.eq.f32.partialorder %v349_v63, 8.507059e+37 }
 0x2d8   :  { %v5823_v58 = vpop.eup %5822 }
 0x2d9   :  { %v341_v59 = vmul.f32 %v5823_v58, %v339_v57  ;;  %vm346_vm3 = vweird.f32 %v5823_v58 }
 0x2da   :  { %vm347_vm5 = vmor %vm345_vm4, %vm346_vm3 }
 0x2db   :  { %v342_v60 = vsub.f32 1.0, %v341_v59 }
 0x2dd   :  { %v343_v62 = vmul.f32 %v5823_v58, %v342_v60 }
 0x2df   :  { %v344_v0 = vadd.f32 %v5823_v58, %v343_v62 }
 0x2e1   :  { %v348_v2 = vsel %vm347_vm5, %v5823_v58, %v344_v0 }
 0x2e2   :  { %v353_v4 = vsel %vm350_vm6, %v352_v1, %v348_v2 }
 0x2e3   :  { %v359_v5 = vmul.f32 %v357_v3, %v353_v4  ;;  %v366_v20 = vsub.f32 1.0, %v353_v4  ;;  %v375_v23 = vmul.f32 %v373_v19, %v353_v4 }
 0x2e5   :  { %361 = vrot.lane.b32.xlu0 %v359_v5, %s6255_s1 }
 0x2ed   :  { %244 = vperm.xlu0 %5813, %v80_v6  }
 0x357   :  { %v362_v7 = vpop.permute.xlu0 %361 }
 0x358   :  { %v364_v8 = vadd.f32 %v362_v7, %v6499_v53 }
 0x35a   :  { %5824 = vtanh.f32 %v364_v8 }
 0x35f   :  { %v6507_v9 = vpop.permute.xlu0 %244 }
 0x360   :  { %v5825_v10 = vpop.eup %5824  ;;  %v275_v11 = vadd.f32 %v274_v47, %v6507_v9 }
 0x361   :  { %368 = vrot.lane.b32.xlu1 %v5825_v10, %s6257_s30 }
 0x362   :  { %v278_v12 = vmax.f32 %v275_v11, 0.0 }
 0x364   :  { %5622 = vmatmul.msk.f32.gmra.mxu0 %vm100_vm0, %v278_v12 }
 0x3d3   :  { %v369_v21 = vpop.permute.xlu1 %368 }
 0x3d4   :  { %v371_v24 = vmul.f32 %v369_v21, %v366_v20 }
 0x3d6   :  { %v376_v25 = vadd.f32 %v375_v23, %v371_v24 }
 0x3d8   :  { %378 = vrot.lane.b32.xlu1 %v376_v25, %s6257_s30  ;;  %v461_v50 = vrot.slane %v376_v25, 7 }
 0x3e1   :  { %v6559_v28 = vpop.f32.mrf.mxu0 }
 0x44a   :  { %v379_v27 = vpop.permute.xlu1 %378 }
 0x44b   :  { %5625 = vmatmul.msk.f32.vlgmr.msrb.gmra.mxu3 %vm247_vm2, %v379_v27  ;;  %5626 = vmatmul.msk.f32.vlgmr.msra.gmra.mxu0 %vm247_vm2, %v379_v27 }
 0x44c   :  { %750 = vmatpush.msrb.mxu3 %v6515_v13  ;;  %770 = vmatpush.msra.mxu0 %v6429_v33 }
 0x44e   :  { %751 = vmatpush.msrb.mxu3 %v6520_v15  ;;  %771 = vmatpush.msra.mxu0 %v6435_v34 }
 0x450   :  { %752 = vmatpush.msrb.mxu3 %v6527_v16  ;;  %772 = vmatpush.msra.mxu0 %v6441_v35 }
 0x452   :  { %753 = vmatpush.msrb.mxu3 %v6534_v17  ;;  %773 = vmatpush.msra.mxu0 %v6447_v36 }
 0x4c8   :  { %v419_v29 = vpop.f32.mrf.mxu0 }
 0x4c9   :  { %v420_v30 = vadd.f32 %v419_v29, %v6488_v48 }
 0x4cb   :  { %v423_v31 = vrot.slane %v420_v30, 7 }
 0x4cd   :  { %v425_v32 = vadd.f32 %v423_v31, %v6499_v53  ;;  %445 = vrot.lane.b32.xlu2 %v423_v31, %s6255_s1 }
 0x4cf   :  { %v5627_v37 = vmul.f32 -1.442695, %v425_v32 }
 0x4d1   :  { %5826 = vpow2.f32 %v5627_v37 }
 0x4d7   :  { %v5827_v38 = vpop.eup %5826 }
 0x4d8   :  { %v429_v39 = vadd.f32 1.0, %v5827_v38 }
 0x4da   :  { %5828 = vrcp.f32 %v429_v39  ;;  %v441_v44 = vand.u32 2147483648, %v429_v39  ;;  %v439_v46 = vand.u32 2147483647, %v429_v39  ;;  %vm435_vm8 = vweird.f32 %v429_v39 }
 0x4dc   :  { %v442_v49 = vor.u32 1.1754944e-38, %v441_v44  ;;  %vm440_vm10 = vcmp.eq.f32.partialorder %v439_v46, 8.507059e+37 }
 0x4e0   :  { %v5829_v40 = vpop.eup %5828 }
 0x4e1   :  { %v431_v41 = vmul.f32 %v5829_v40, %v429_v39  ;;  %vm436_vm7 = vweird.f32 %v5829_v40 }
 0x4e2   :  { %vm437_vm9 = vmor %vm435_vm8, %vm436_vm7 }
 0x4e3   :  { %v432_v42 = vsub.f32 1.0, %v431_v41 }
 0x4e5   :  { %v433_v45 = vmul.f32 %v5829_v40, %v432_v42 }
 0x4e7   :  { %v434_v47 = vadd.f32 %v5829_v40, %v433_v45 }
 0x4e9   :  { %v438_v52 = vsel %vm437_vm9, %v5829_v40, %v434_v47 }
 0x4ea   :  { %v443_v54 = vsel %vm440_vm10, %v442_v49, %v438_v52 }
 0x4eb   :  { %v463_v55 = vmul.f32 %v461_v50, %v443_v54  ;;  %v455_v61 = vsub.f32 1.0, %v443_v54 }
 0x527   :  { %v446_v56 = vpop.permute.xlu2 %445 }
 0x528   :  { %v448_v57 = vmul.f32 %v446_v56, %v443_v54 }
 0x52a   :  { %450 = vrot.lane.b32.xlu0 %v448_v57, %s6255_s1 }
 0x59c   :  { %v451_v58 = vpop.permute.xlu0 %450 }
 0x59d   :  { %v453_v59 = vadd.f32 %v451_v58, %v6499_v53 }
 0x59f   :  { %5830 = vtanh.f32 %v453_v59 }
 0x5a5   :  { %v5831_v60 = vpop.eup %5830 }
 0x5a6   :  { %457 = vrot.lane.b32.xlu1 %v5831_v60, %s6257_s30 }
 0x618   :  { %v458_v62 = vpop.permute.xlu1 %457 }
 0x619   :  { %v460_v63 = vmul.f32 %v458_v62, %v455_v61 }
 0x61b   :  { %v464_v0 = vadd.f32 %v463_v55, %v460_v63 }
 0x61d   :  { %v466_v1 = vrot.slane %v464_v0, 1  ;;  %v550_v39 = vrot.slane %v464_v0, 7 }
 0x61f   :  { %467 = vrot.lane.b32.xlu2 %v466_v1, %s6257_s30 }
 0x679   :  { %v468_v2 = vpop.permute.xlu2 %467 }
 0x67a   :  { %5628 = vmatmul.msk.f32.vlgmr.msra.gmra.mxu2 %vm247_vm2, %v468_v2  ;;  %5629 = vmatmul.msk.f32.vlgmr.msrb.gmra.mxu1 %vm247_vm2, %v468_v2 }
 0x67b   :  { %839 = vmatpush.msra.mxu2 %v6515_v13  ;;  %859 = vmatpush.msrb.mxu1 %v6429_v33 }
 0x67d   :  { %840 = vmatpush.msra.mxu2 %v6520_v15  ;;  %860 = vmatpush.msrb.mxu1 %v6435_v34 }
 0x67f   :  { %841 = vmatpush.msra.mxu2 %v6527_v16  ;;  %861 = vmatpush.msrb.mxu1 %v6441_v35 }
 0x681   :  { %862 = vmatpush.msrb.mxu1 %v6447_v36  ;;  %842 = vmatpush.msra.mxu2 %v6534_v17 }
 0x6f7   :  { %v508_v3 = vpop.f32.mrf.mxu1 }
 0x6f8   :  { %v509_v4 = vadd.f32 %v508_v3, %v6488_v48 }
 0x6fa   :  { %v512_v5 = vrot.slane %v509_v4, 6 }
 0x6fc   :  { %534 = vrot.lane.b32.xlu0 %v512_v5, %s6255_s1  ;;  %v514_v6 = vadd.f32 %v512_v5, %v6499_v53 }
 0x6fe   :  { %v5630_v7 = vmul.f32 -1.442695, %v514_v6 }
 0x700   :  { %5832 = vpow2.f32 %v5630_v7 }
 0x706   :  { %v5833_v8 = vpop.eup %5832 }
 0x707   :  { %v518_v10 = vadd.f32 1.0, %v5833_v8 }
 0x709   :  { %5834 = vrcp.f32 %v518_v10  ;;  %v530_v23 = vand.u32 2147483648, %v518_v10  ;;  %vm524_vm12 = vweird.f32 %v518_v10  ;;  %v528_v24 = vand.u32 2147483647, %v518_v10 }
 0x70b   :  { %v531_v27 = vor.u32 1.1754944e-38, %v530_v23  ;;  %vm529_vm14 = vcmp.eq.f32.partialorder %v528_v24, 8.507059e+37 }
 0x70f   :  { %v5835_v11 = vpop.eup %5834 }
 0x710   :  { %v520_v12 = vmul.f32 %v5835_v11, %v518_v10  ;;  %vm525_vm11 = vweird.f32 %v5835_v11 }
 0x711   :  { %vm526_vm13 = vmor %vm524_vm12, %vm525_vm11 }
 0x712   :  { %v521_v19 = vsub.f32 1.0, %v520_v12 }
 0x714   :  { %v522_v20 = vmul.f32 %v5835_v11, %v521_v19 }
 0x716   :  { %v523_v21 = vadd.f32 %v5835_v11, %v522_v20 }
 0x718   :  { %v527_v25 = vsel %vm526_vm13, %v5835_v11, %v523_v21 }
 0x719   :  { %v532_v30 = vsel %vm529_vm14, %v531_v27, %v527_v25 }
 0x71a   :  { %v544_v40 = vsub.f32 1.0, %v532_v30  ;;  %v552_v42 = vmul.f32 %v550_v39, %v532_v30 }
 0x76e   :  { %v535_v29 = vpop.permute.xlu0 %534 }
 0x76f   :  { %v537_v31 = vmul.f32 %v535_v29, %v532_v30 }
 0x771   :  { %539 = vrot.lane.b32.xlu1 %v537_v31, %s6255_s1 }
 0x7e3   :  { %v540_v32 = vpop.permute.xlu1 %539 }
 0x7e4   :  { %v542_v37 = vadd.f32 %v540_v32, %v6499_v53 }
 0x7e6   :  { %5836 = vtanh.f32 %v542_v37 }
 0x7ec   :  { %v5837_v38 = vpop.eup %5836 }
 0x7ed   :  { %546 = vrot.lane.b32.xlu2 %v5837_v38, %s6257_s30 }
 0x847   :  { %v547_v41 = vpop.permute.xlu2 %546 }
 0x848   :  { %v549_v44 = vmul.f32 %v547_v41, %v544_v40 }
 0x84a   :  { %v553_v45 = vadd.f32 %v552_v42, %v549_v44 }
 0x84c   :  { %v555_v46 = vrot.slane %v553_v45, 2  ;;  %v639_v10 = vrot.slane %v553_v45, 7 }
 0x84e   :  { %556 = vrot.lane.b32.xlu0 %v555_v46, %s6257_s30 }
 0x8c0   :  { %v557_v47 = vpop.permute.xlu0 %556 }
 0x8c1   :  { %5631 = vmatmul.msk.f32.vlgmr.msra.gmra.mxu3 %vm247_vm2, %v557_v47  ;;  %5632 = vmatmul.msk.f32.vlgmr.msrb.gmra.mxu0 %vm247_vm2, %v557_v47 }
 0x8c2   :  { %928 = vmatpush.msra.mxu3 %v6515_v13  ;;  %948 = vmatpush.msrb.mxu0 %v6429_v33 }
 0x8c4   :  { %929 = vmatpush.msra.mxu3 %v6520_v15  ;;  %949 = vmatpush.msrb.mxu0 %v6435_v34 }
 0x8c6   :  { %930 = vmatpush.msra.mxu3 %v6527_v16  ;;  %950 = vmatpush.msrb.mxu0 %v6441_v35 }
 0x8c8   :  { %951 = vmatpush.msrb.mxu0 %v6447_v36  ;;  %931 = vmatpush.msra.mxu3 %v6534_v17 }
 0x93e   :  { %v597_v49 = vpop.f32.mrf.mxu0 }
 0x93f   :  { %v598_v50 = vadd.f32 %v597_v49, %v6488_v48 }
 0x941   :  { %v601_v52 = vrot.slane %v598_v50, 5 }
 0x943   :  { %623 = vrot.lane.b32.xlu1 %v601_v52, %s6255_s1  ;;  %v603_v54 = vadd.f32 %v601_v52, %v6499_v53 }
 0x945   :  { %v5633_v55 = vmul.f32 -1.442695, %v603_v54 }
 0x947   :  { %5838 = vpow2.f32 %v5633_v55 }
 0x94d   :  { %v5839_v56 = vpop.eup %5838 }
 0x94e   :  { %v607_v57 = vadd.f32 1.0, %v5839_v56 }
 0x950   :  { %5840 = vrcp.f32 %v607_v57  ;;  %v619_v63 = vand.u32 2147483648, %v607_v57  ;;  %vm613_vm3 = vweird.f32 %v607_v57  ;;  %v617_v0 = vand.u32 2147483647, %v607_v57 }
 0x952   :  { %v620_v2 = vor.u32 1.1754944e-38, %v619_v63  ;;  %vm618_vm5 = vcmp.eq.f32.partialorder %v617_v0, 8.507059e+37 }
 0x956   :  { %v5841_v58 = vpop.eup %5840 }
 0x957   :  { %v609_v59 = vmul.f32 %v5841_v58, %v607_v57  ;;  %vm614_vm15 = vweird.f32 %v5841_v58 }
 0x958   :  { %vm615_vm4 = vmor %vm613_vm3, %vm614_vm15 }
 0x959   :  { %v610_v60 = vsub.f32 1.0, %v609_v59 }
 0x95b   :  { %v611_v61 = vmul.f32 %v5841_v58, %v610_v60 }
 0x95d   :  { %v612_v62 = vadd.f32 %v5841_v58, %v611_v61 }
 0x95f   :  { %v616_v1 = vsel %vm615_vm4, %v5841_v58, %v612_v62 }
 0x960   :  { %v621_v4 = vsel %vm618_vm5, %v620_v2, %v616_v1 }
 0x961   :  { %v633_v11 = vsub.f32 1.0, %v621_v4  ;;  %v641_v19 = vmul.f32 %v639_v10, %v621_v4 }
 0x9b5   :  { %v624_v3 = vpop.permute.xlu1 %623 }
 0x9b6   :  { %v626_v5 = vmul.f32 %v624_v3, %v621_v4 }
 0x9b8   :  { %628 = vrot.lane.b32.xlu2 %v626_v5, %s6255_s1 }
 0xa12   :  { %v629_v6 = vpop.permute.xlu2 %628 }
 0xa13   :  { %v631_v7 = vadd.f32 %v629_v6, %v6499_v53 }
 0xa15   :  { %5842 = vtanh.f32 %v631_v7 }
 0xa1b   :  { %v5843_v8 = vpop.eup %5842 }
 0xa1c   :  { %635 = vrot.lane.b32.xlu0 %v5843_v8, %s6257_s30 }
 0xa8e   :  { %v636_v12 = vpop.permute.xlu0 %635 }
 0xa8f   :  { %v638_v20 = vmul.f32 %v636_v12, %v633_v11 }
 0xa91   :  { %v642_v21 = vadd.f32 %v641_v19, %v638_v20 }
 0xa93   :  { %v644_v23 = vrot.slane %v642_v21, 3  ;;  %v728_v47 = vrot.slane %v642_v21, 7 }
 0xa95   :  { %645 = vrot.lane.b32.xlu1 %v644_v23, %s6257_s30 }
 0xb07   :  { %v646_v24 = vpop.permute.xlu1 %645 }
 0xb08   :  { %5634 = vmatmul.msk.f32.vlgmr.msrb.gmra.mxu2 %vm247_vm2, %v646_v24  ;;  %5635 = vmatmul.msk.f32.vlgmr.msra.gmra.mxu1 %vm247_vm2, %v646_v24 }
 0xb09   :  { %1017 = vmatpush.msrb.mxu2 %v6515_v13  ;;  %1037 = vmatpush.msra.mxu1 %v6429_v33 }
 0xb0b   :  { %1018 = vmatpush.msrb.mxu2 %v6520_v15  ;;  %1038 = vmatpush.msra.mxu1 %v6435_v34 }
 0xb0d   :  { %1019 = vmatpush.msrb.mxu2 %v6527_v16  ;;  %1039 = vmatpush.msra.mxu1 %v6441_v35 }
 0xb0f   :  { %1040 = vmatpush.msra.mxu1 %v6447_v36  ;;  %1020 = vmatpush.msrb.mxu2 %v6534_v17 }
 0xb85   :  { %v686_v25 = vpop.f32.mrf.mxu1 }
 0xb86   :  { %v687_v27 = vadd.f32 %v686_v25, %v6488_v48 }
 0xb88   :  { %v690_v29 = vrot.slane %v687_v27, 4 }
 0xb8a   :  { %v692_v30 = vadd.f32 %v690_v29, %v6499_v53  ;;  %712 = vrot.lane.b32.xlu2 %v690_v29, %s6255_s1 }
 0xb8c   :  { %v5636_v31 = vmul.f32 -1.442695, %v692_v30 }
 0xb8e   :  { %5844 = vpow2.f32 %v5636_v31 }
 0xb94   :  { %v5845_v32 = vpop.eup %5844 }
 0xb95   :  { %v696_v37 = vadd.f32 1.0, %v5845_v32 }
 0xb97   :  { %5846 = vrcp.f32 %v696_v37  ;;  %v708_v41 = vand.u32 2147483648, %v696_v37  ;;  %v706_v44 = vand.u32 2147483647, %v696_v37  ;;  %vm702_vm7 = vweird.f32 %v696_v37 }
 0xb99   :  { %v709_v46 = vor.u32 1.1754944e-38, %v708_v41  ;;  %vm707_vm9 = vcmp.eq.f32.partialorder %v706_v44, 8.507059e+37 }
 0xb9d   :  { %v5847_v38 = vpop.eup %5846 }
 0xb9e   :  { %v698_v39 = vmul.f32 %v5847_v38, %v696_v37  ;;  %vm703_vm6 = vweird.f32 %v5847_v38 }
 0xb9f   :  { %vm704_vm8 = vmor %vm702_vm7, %vm703_vm6 }
 0xba0   :  { %v699_v40 = vsub.f32 1.0, %v698_v39 }
 0xba2   :  { %v700_v42 = vmul.f32 %v5847_v38, %v699_v40 }
 0xba4   :  { %v701_v45 = vadd.f32 %v5847_v38, %v700_v42 }
 0xba6   :  { %v705_v49 = vsel %vm704_vm8, %v5847_v38, %v701_v45 }
 0xba7   :  { %v710_v50 = vsel %vm707_vm9, %v709_v46, %v705_v49 }
 0xba8   :  { %v730_v52 = vmul.f32 %v728_v47, %v710_v50  ;;  %v722_v59 = vsub.f32 1.0, %v710_v50 }
 0xbe4   :  { %v713_v54 = vpop.permute.xlu2 %712 }
 0xbe5   :  { %v715_v55 = vmul.f32 %v713_v54, %v710_v50 }
 0xbe7   :  { %717 = vrot.lane.b32.xlu0 %v715_v55, %s6255_s1 }
 0xc59   :  { %v718_v56 = vpop.permute.xlu0 %717 }
 0xc5a   :  { %v720_v57 = vadd.f32 %v718_v56, %v6499_v53 }
 0xc5c   :  { %5848 = vtanh.f32 %v720_v57 }
 0xc62   :  { %v5849_v58 = vpop.eup %5848 }
 0xc63   :  { %724 = vrot.lane.b32.xlu1 %v5849_v58, %s6257_s30 }
 0xcd5   :  { %v725_v60 = vpop.permute.xlu1 %724 }
 0xcd6   :  { %v727_v61 = vmul.f32 %v725_v60, %v722_v59 }
 0xcd8   :  { %v731_v62 = vadd.f32 %v730_v52, %v727_v61 }
 0xcda   :  { %v733_v63 = vrot.slane %v731_v62, 4  ;;  %v817_v37 = vrot.slane %v731_v62, 7 }
 0xcdc   :  { %734 = vrot.lane.b32.xlu2 %v733_v63, %s6257_s30 }
 0xd36   :  { %v735_v0 = vpop.permute.xlu2 %734 }
 0xd37   :  { %5637 = vmatmul.msk.f32.vlgmr.msrb.gmra.mxu3 %vm247_vm2, %v735_v0  ;;  %5638 = vmatmul.msk.f32.vlgmr.msra.gmra.mxu0 %vm247_vm2, %v735_v0 }
 0xd38   :  { %1102 = vmatpush.msrb.mxu3 %v6515_v13  ;;  %1122 = vmatpush.msra.mxu0 %v6429_v33 }
 0xd3a   :  { %1103 = vmatpush.msrb.mxu3 %v6520_v15  ;;  %1123 = vmatpush.msra.mxu0 %v6435_v34 }
 0xd3c   :  { %1104 = vmatpush.msrb.mxu3 %v6527_v16  ;;  %1124 = vmatpush.msra.mxu0 %v6441_v35 }
 0xd3e   :  { %1105 = vmatpush.msrb.mxu3 %v6534_v17  ;;  %1125 = vmatpush.msra.mxu0 %v6447_v36 }
 0xdb4   :  { %v775_v1 = vpop.f32.mrf.mxu0 }
 0xdb5   :  { %v776_v2 = vadd.f32 %v775_v1, %v6488_v48 }
 0xdb7   :  { %v779_v3 = vrot.slane %v776_v2, 3 }
 0xdb9   :  { %801 = vrot.lane.b32.xlu0 %v779_v3, %s6255_s1  ;;  %v781_v4 = vadd.f32 %v779_v3, %v6499_v53 }
 0xdbb   :  { %v5639_v5 = vmul.f32 -1.442695, %v781_v4 }
 0xdbd   :  { %5850 = vpow2.f32 %v5639_v5 }
 0xdc3   :  { %v5851_v6 = vpop.eup %5850 }
 0xdc4   :  { %v785_v7 = vadd.f32 1.0, %v5851_v6 }
 0xdc6   :  { %5852 = vrcp.f32 %v785_v7  ;;  %v797_v20 = vand.u32 2147483648, %v785_v7  ;;  %vm791_vm11 = vweird.f32 %v785_v7  ;;  %v795_v21 = vand.u32 2147483647, %v785_v7 }
 0xdc8   :  { %v798_v24 = vor.u32 1.1754944e-38, %v797_v20  ;;  %vm796_vm13 = vcmp.eq.f32.partialorder %v795_v21, 8.507059e+37 }
 0xdcc   :  { %v5853_v8 = vpop.eup %5852 }
 0xdcd   :  { %v787_v10 = vmul.f32 %v5853_v8, %v785_v7  ;;  %vm792_vm10 = vweird.f32 %v5853_v8 }
 0xdce   :  { %vm793_vm12 = vmor %vm791_vm11, %vm792_vm10 }
 0xdcf   :  { %v788_v11 = vsub.f32 1.0, %v787_v10 }
 0xdd1   :  { %v789_v12 = vmul.f32 %v5853_v8, %v788_v11 }
 0xdd3   :  { %v790_v19 = vadd.f32 %v5853_v8, %v789_v12 }
 0xdd5   :  { %v794_v23 = vsel %vm793_vm12, %v5853_v8, %v790_v19 }
 0xdd6   :  { %v799_v27 = vsel %vm796_vm13, %v798_v24, %v794_v23 }
 0xdd7   :  { %v811_v38 = vsub.f32 1.0, %v799_v27  ;;  %v819_v40 = vmul.f32 %v817_v37, %v799_v27 }
 0xe2b   :  { %v802_v25 = vpop.permute.xlu0 %801 }
 0xe2c   :  { %v804_v29 = vmul.f32 %v802_v25, %v799_v27 }
 0xe2e   :  { %806 = vrot.lane.b32.xlu1 %v804_v29, %s6255_s1 }
 0xea0   :  { %v807_v30 = vpop.permute.xlu1 %806 }
 0xea1   :  { %v809_v31 = vadd.f32 %v807_v30, %v6499_v53 }
 0xea3   :  { %5854 = vtanh.f32 %v809_v31 }
 0xea9   :  { %v5855_v32 = vpop.eup %5854 }
 0xeaa   :  { %813 = vrot.lane.b32.xlu2 %v5855_v32, %s6257_s30 }
 0xf04   :  { %v814_v39 = vpop.permute.xlu2 %813 }
 0xf05   :  { %v816_v41 = vmul.f32 %v814_v39, %v811_v38 }
 0xf07   :  { %v820_v42 = vadd.f32 %v819_v40, %v816_v41 }
 0xf09   :  { %v822_v44 = vrot.slane %v820_v42, 5  ;;  %v906_v7 = vrot.slane %v820_v42, 7 }
 0xf0b   :  { %823 = vrot.lane.b32.xlu0 %v822_v44, %s6257_s30 }
 0xf7d   :  { %v824_v45 = vpop.permute.xlu0 %823 }
 0xf7e   :  { %5640 = vmatmul.msk.f32.vlgmr.msra.gmra.mxu2 %vm247_vm2, %v824_v45  ;;  %5641 = vmatmul.msk.f32.vlgmr.msrb.gmra.mxu1 %vm247_vm2, %v824_v45 }
 0xf7f   :  { %1191 = vmatpush.msra.mxu2 %v6515_v13  ;;  %1211 = vmatpush.msrb.mxu1 %v6429_v33 }
 0xf81   :  { %1192 = vmatpush.msra.mxu2 %v6520_v15  ;;  %1212 = vmatpush.msrb.mxu1 %v6435_v34 }
 0xf83   :  { %1193 = vmatpush.msra.mxu2 %v6527_v16  ;;  %1213 = vmatpush.msrb.mxu1 %v6441_v35 }
 0xf85   :  { %1194 = vmatpush.msra.mxu2 %v6534_v17  ;;  %1214 = vmatpush.msrb.mxu1 %v6447_v36 }
 0xffb   :  { %v864_v46 = vpop.f32.mrf.mxu1 }
 0xffc   :  { %v865_v47 = vadd.f32 %v864_v46, %v6488_v48 }
 0xffe   :  { %v868_v49 = vrot.slane %v865_v47, 2 }
0x1000   :  { %890 = vrot.lane.b32.xlu1 %v868_v49, %s6255_s1  ;;  %v870_v50 = vadd.f32 %v868_v49, %v6499_v53 }
0x1002   :  { %v5642_v52 = vmul.f32 -1.442695, %v870_v50 }
0x1004   :  { %5856 = vpow2.f32 %v5642_v52 }
0x100a   :  { %v5857_v54 = vpop.eup %5856 }
0x100b   :  { %v874_v55 = vadd.f32 1.0, %v5857_v54 }
0x100d   :  { %5858 = vrcp.f32 %v874_v55  ;;  %v886_v61 = vand.u32 2147483648, %v874_v55  ;;  %vm880_vm15 = vweird.f32 %v874_v55  ;;  %v884_v62 = vand.u32 2147483647, %v874_v55 }
0x100f   :  { %v887_v0 = vor.u32 1.1754944e-38, %v886_v61  ;;  %vm885_vm4 = vcmp.eq.f32.partialorder %v884_v62, 8.507059e+37 }
0x1013   :  { %v5859_v56 = vpop.eup %5858 }
0x1014   :  { %v876_v57 = vmul.f32 %v5859_v56, %v874_v55  ;;  %vm881_vm14 = vweird.f32 %v5859_v56 }
0x1015   :  { %vm882_vm3 = vmor %vm880_vm15, %vm881_vm14 }
0x1016   :  { %v877_v58 = vsub.f32 1.0, %v876_v57 }
0x1018   :  { %v878_v59 = vmul.f32 %v5859_v56, %v877_v58 }
0x101a   :  { %v879_v60 = vadd.f32 %v5859_v56, %v878_v59 }
0x101c   :  { %v883_v63 = vsel %vm882_vm3, %v5859_v56, %v879_v60 }
0x101d   :  { %v888_v2 = vsel %vm885_vm4, %v887_v0, %v883_v63 }
0x101e   :  { %v900_v8 = vsub.f32 1.0, %v888_v2  ;;  %v908_v11 = vmul.f32 %v906_v7, %v888_v2 }
0x1072   :  { %v891_v1 = vpop.permute.xlu1 %890 }
0x1073   :  { %v893_v3 = vmul.f32 %v891_v1, %v888_v2 }
0x1075   :  { %895 = vrot.lane.b32.xlu2 %v893_v3, %s6255_s1 }
0x10cf   :  { %v896_v4 = vpop.permute.xlu2 %895 }
0x10d0   :  { %v898_v5 = vadd.f32 %v896_v4, %v6499_v53 }
0x10d2   :  { %5860 = vtanh.f32 %v898_v5 }
0x10d8   :  { %v5861_v6 = vpop.eup %5860 }
0x10d9   :  { %902 = vrot.lane.b32.xlu0 %v5861_v6, %s6257_s30 }
0x114b   :  { %v903_v10 = vpop.permute.xlu0 %902 }
0x114c   :  { %v905_v12 = vmul.f32 %v903_v10, %v900_v8 }
0x114e   :  { %v909_v19 = vadd.f32 %v908_v11, %v905_v12 }
0x1150   :  { %v911_v20 = vrot.slane %v909_v19, 6  ;;  %v995_v45 = vrot.slane %v909_v19, 7 }
0x1152   :  { %912 = vrot.lane.b32.xlu1 %v911_v20, %s6257_s30 }
0x11c4   :  { %v913_v21 = vpop.permute.xlu1 %912 }
0x11c5   :  { %5643 = vmatmul.msk.f32.vlgmr.msra.gmra.mxu3 %vm247_vm2, %v913_v21  ;;  %5644 = vmatmul.msk.f32.vlgmr.msrb.gmra.mxu0 %vm247_vm2, %v913_v21 }
0x11c6   :  { %1280 = vmatpush.msra.mxu3 %v6515_v13  ;;  %1300 = vmatpush.msrb.mxu0 %v6429_v33 }
0x11c8   :  { %1281 = vmatpush.msra.mxu3 %v6520_v15  ;;  %1301 = vmatpush.msrb.mxu0 %v6435_v34 }
0x11ca   :  { %1282 = vmatpush.msra.mxu3 %v6527_v16  ;;  %1302 = vmatpush.msrb.mxu0 %v6441_v35 }
0x11cc   :  { %1283 = vmatpush.msra.mxu3 %v6534_v17  ;;  %1303 = vmatpush.msrb.mxu0 %v6447_v36 }
0x1242   :  { %v953_v23 = vpop.f32.mrf.mxu0 }
0x1243   :  { %v954_v24 = vadd.f32 %v953_v23, %v6488_v48 }
0x1245   :  { %v957_v25 = vrot.slane %v954_v24, 1 }
0x1247   :  { %v959_v27 = vadd.f32 %v957_v25, %v6499_v53  ;;  %979 = vrot.lane.b32.xlu2 %v957_v25, %s6255_s1 }
0x1249   :  { %v5645_v29 = vmul.f32 -1.442695, %v959_v27 }
0x124b   :  { %5862 = vpow2.f32 %v5645_v29 }
0x1251   :  { %v5863_v30 = vpop.eup %5862 }
0x1252   :  { %v963_v31 = vadd.f32 1.0, %v5863_v30  ;;  %v6697_v30 = vld [vmem:[%s8036_s2 + $0x18] sm:$0xff] }
0x1254   :  { %5864 = vrcp.f32 %v963_v31  ;;  %v975_v39 = vand.u32 2147483648, %v963_v31  ;;  %v973_v41 = vand.u32 2147483647, %v963_v31  ;;  %vm969_vm6 = vweird.f32 %v963_v31 }
0x1256   :  { %v976_v44 = vor.u32 1.1754944e-38, %v975_v39  ;;  %vm974_vm8 = vcmp.eq.f32.partialorder %v973_v41, 8.507059e+37 }
0x125a   :  { %v5865_v32 = vpop.eup %5864 }
0x125b   :  { %v965_v37 = vmul.f32 %v5865_v32, %v963_v31  ;;  %vm970_vm5 = vweird.f32 %v5865_v32  ;;  %v6704_v31 = vld [vmem:[%s8036_s2 + $0x10] sm:$0xff] }
0x125c   :  { %vm971_vm7 = vmor %vm969_vm6, %vm970_vm5 }
0x125d   :  { %v966_v38 = vsub.f32 1.0, %v965_v37  ;;  %v6718_v37 = vld [vmem:[%s8036_s2] sm:$0xff] }
0x125f   :  { %v967_v40 = vmul.f32 %v5865_v32, %v966_v38 }
0x1261   :  { %v968_v42 = vadd.f32 %v5865_v32, %v967_v40 }
0x1263   :  { %v972_v46 = vsel %vm971_vm7, %v5865_v32, %v968_v42  ;;  %v6711_v32 = vld [vmem:[%s8036_s2 + $0x8] sm:$0xff] }
0x1264   :  { %v977_v47 = vsel %vm974_vm8, %v976_v44, %v972_v46 }
0x1265   :  { %v997_v49 = vmul.f32 %v995_v45, %v977_v47  ;;  %v989_v57 = vsub.f32 1.0, %v977_v47 }
0x12a1   :  { %v980_v50 = vpop.permute.xlu2 %979 }
0x12a2   :  { %v982_v52 = vmul.f32 %v980_v50, %v977_v47 }
0x12a4   :  { %984 = vrot.lane.b32.xlu0 %v982_v52, %s6255_s1 }
0x1316   :  { %v985_v54 = vpop.permute.xlu0 %984 }
0x1317   :  { %v987_v55 = vadd.f32 %v985_v54, %v6499_v53 }
0x1319   :  { %5866 = vtanh.f32 %v987_v55 }
0x131f   :  { %v5867_v56 = vpop.eup %5866 }
0x1320   :  { %991 = vrot.lane.b32.xlu1 %v5867_v56, %s6257_s30 }
0x1392   :  { %v992_v58 = vpop.permute.xlu1 %991 }
0x1393   :  { %v994_v59 = vmul.f32 %v992_v58, %v989_v57 }
0x1395   :  { %v998_v60 = vadd.f32 %v997_v49, %v994_v59 }
0x1397   :  { %v1000_v61 = vrot.slane %v998_v60, 7 }
0x1399   :  { %1001 = vrot.lane.b32.xlu2 %v1000_v61, %s6257_s30 }
0x13f3   :  { %v1002_v62 = vpop.permute.xlu2 %1001 }
0x13f4   :  { %5646 = vmatmul.msk.f32.vlgmr.msrb.gmra.mxu2 %vm247_vm2, %v1002_v62  ;;  %5647 = vmatmul.msk.f32.vlgmr.msra.gmra.mxu1 %vm247_vm2, %v1002_v62 }
0x13f5   :  { %1369 = vmatpush.msrb.mxu2 %v6515_v13  ;;  %1389 = vmatpush.msra.mxu1 %v6429_v33  ;;  %v6684_v33 = vadd.f32 %v6496_v51, %v6559_v28 }
0x13f7   :  { %1370 = vmatpush.msrb.mxu2 %v6520_v15  ;;  %1390 = vmatpush.msra.mxu1 %v6435_v34 }
0x13f9   :  { %1371 = vmatpush.msrb.mxu2 %v6527_v16  ;;  %1391 = vmatpush.msra.mxu1 %v6441_v35 }
0x13fb   :  { %1372 = vmatpush.msrb.mxu2 %v6534_v17  ;;  %1392 = vmatpush.msra.mxu1 %v6447_v36 }
0x1471   :  { %v1042_v53 = vpop.f32.mrf.mxu1 }
0x1472   :  { %v1043_v63 = vadd.f32 %v1042_v53, %v6488_v48 }
0x1474   :  { %1066 = vrot.lane.b32.xlu0 %v1043_v63, %s6255_s1  ;;  %v1045_v0 = vadd.f32 %v1043_v63, %v6684_v33 }
0x1476   :  { %v5648_v34 = vmul.f32 -1.442695, %v1045_v0 }
0x1478   :  { %5868 = vpow2.f32 %v5648_v34 }
0x147e   :  { %v5869_v1 = vpop.eup %5868 }
0x147f   :  { %v1049_v2 = vadd.f32 1.0, %v5869_v1 }
0x1481   :  { %5870 = vrcp.f32 %v1049_v2  ;;  %v1061_v6 = vand.u32 2147483648, %v1049_v2  ;;  %vm1055_vm10 = vweird.f32 %v1049_v2  ;;  %v1059_v7 = vand.u32 2147483647, %v1049_v2 }
0x1483   :  { %v1062_v51 = vor.u32 1.1754944e-38, %v1061_v6  ;;  %vm1060_vm12 = vcmp.eq.f32.partialorder %v1059_v7, 8.507059e+37 }
0x1487   :  { %v5871_v35 = vpop.eup %5870 }
0x1488   :  { %v1051_v3 = vmul.f32 %v5871_v35, %v1049_v2  ;;  %vm1056_vm9 = vweird.f32 %v5871_v35 }
0x1489   :  { %vm1057_vm11 = vmor %vm1055_vm10, %vm1056_vm9 }
0x148a   :  { %v1052_v4 = vsub.f32 1.0, %v1051_v3 }
0x148c   :  { %v1053_v36 = vmul.f32 %v5871_v35, %v1052_v4 }
0x148e   :  { %v1054_v5 = vadd.f32 %v5871_v35, %v1053_v36  ;;  %v6741_v36 = vld [vmem:[%s8007_s9] sm:$0x1] }
0x1490   :  { %v1058_v8 = vsel %vm1057_vm11, %v5871_v35, %v1054_v5 }
0x1491   :  { %v1063_v10 = vsel %vm1060_vm12, %v1062_v51, %v1058_v8 }
0x1492   :  { %v1076_v21 = vsub.f32 1.0, %v1063_v10  ;;  %v1083_v24 = vmul.f32 %v1063_v10, %v1000_v61 }
0x14e6   :  { %v1067_v28 = vpop.permute.xlu0 %1066 }
0x14e7   :  { %v1069_v11 = vmul.f32 %v1067_v28, %v1063_v10 }
0x14e9   :  { %1071 = vrot.lane.b32.xlu1 %v1069_v11, %s6255_s1 }
0x155b   :  { %v1072_v12 = vpop.permute.xlu1 %1071 }
0x155c   :  { %v1074_v19 = vadd.f32 %v1072_v12, %v6684_v33 }
0x155e   :  { %5872 = vtanh.f32 %v1074_v19 }
0x1564   :  { %v5873_v20 = vpop.eup %5872 }
0x1565   :  { %1078 = vrot.lane.b32.xlu2 %v5873_v20, %s6257_s30 }
0x15bf   :  { %v1079_v23 = vpop.permute.xlu2 %1078 }
0x15c0   :  { %v1081_v25 = vmul.f32 %v1079_v23, %v1076_v21 }
0x15c2   :  { %v1084_v27 = vadd.f32 %v1083_v24, %v1081_v25 }
0x15c4   :  { %1086 = vrot.lane.b32.xlu0 %v1084_v27, %s6257_s30  ;;  %v1169_v53 = vrot.slane %v1084_v27, 7 }
0x1636   :  { %v1087_v29 = vpop.permute.xlu0 %1086 }
0x1637   :  { %5649 = vmatmul.msk.f32.vlgmr.msrb.gmra.mxu3 %vm247_vm2, %v1087_v29  ;;  %5650 = vmatmul.msk.f32.vlgmr.msra.gmra.mxu0 %vm247_vm2, %v1087_v29 }
0x1638   :  { %1458 = vmatpush.msrb.mxu3 %v6515_v13  ;;  %1478 = vmatpush.msra.mxu0 %v6697_v30 }
0x163a   :  { %1459 = vmatpush.msrb.mxu3 %v6520_v15  ;;  %1479 = vmatpush.msra.mxu0 %v6704_v31 }
0x163c   :  { %1460 = vmatpush.msrb.mxu3 %v6527_v16  ;;  %1480 = vmatpush.msra.mxu0 %v6711_v32 }
0x163e   :  { %1461 = vmatpush.msrb.mxu3 %v6534_v17  ;;  %1481 = vmatpush.msra.mxu0 %v6718_v37 }
0x16b4   :  { %v1127_v38 = vpop.f32.mrf.mxu0 }
0x16b5   :  { %v1128_v39 = vadd.f32 %v1127_v38, %v6488_v48 }
0x16b7   :  { %v1131_v40 = vrot.slane %v1128_v39, 7 }
0x16b9   :  { %1153 = vrot.lane.b32.xlu1 %v1131_v40, %s6255_s1  ;;  %v1133_v41 = vadd.f32 %v1131_v40, %v6684_v33 }
0x16bb   :  { %v5651_v42 = vmul.f32 -1.442695, %v1133_v41 }
0x16bd   :  { %5874 = vpow2.f32 %v5651_v42 }
0x16c3   :  { %v5875_v44 = vpop.eup %5874 }
0x16c4   :  { %v1137_v45 = vadd.f32 1.0, %v5875_v44 }
0x16c6   :  { %5876 = vrcp.f32 %v1137_v45  ;;  %v1149_v54 = vand.u32 2147483648, %v1137_v45  ;;  %vm1143_vm14 = vweird.f32 %v1137_v45  ;;  %v1147_v55 = vand.u32 2147483647, %v1137_v45 }
0x16c8   :  { %v1150_v56 = vor.u32 1.1754944e-38, %v1149_v54  ;;  %vm1148_vm3 = vcmp.eq.f32.partialorder %v1147_v55, 8.507059e+37 }
0x16cc   :  { %v5877_v46 = vpop.eup %5876 }
0x16cd   :  { %v1139_v47 = vmul.f32 %v5877_v46, %v1137_v45  ;;  %vm1144_vm13 = vweird.f32 %v5877_v46 }
0x16ce   :  { %vm1145_vm15 = vmor %vm1143_vm14, %vm1144_vm13 }
0x16cf   :  { %v1140_v49 = vsub.f32 1.0, %v1139_v47  ;;  %v6209_v47 = vld [vmem:[%s8008_s10 + $0x18] sm:$0xff] }
0x16d1   :  { %v1141_v50 = vmul.f32 %v5877_v46, %v1140_v49  ;;  %v6210_v49 = vld [vmem:[%s8008_s10 + $0x10] sm:$0xff] }
0x16d3   :  { %v1142_v52 = vadd.f32 %v5877_v46, %v1141_v50  ;;  %v6211_v50 = vld [vmem:[%s8008_s10 + $0x8] sm:$0xff] }
0x16d5   :  { %v1146_v48 = vsel %vm1145_vm15, %v5877_v46, %v1142_v52 }
0x16d6   :  { %v1151_v58 = vsel %vm1148_vm3, %v1150_v56, %v1146_v48 }
0x16d7   :  { %v1163_v63 = vsub.f32 1.0, %v1151_v58  ;;  %v1171_v1 = vmul.f32 %v1169_v53, %v1151_v58 }
0x172b   :  { %v1154_v57 = vpop.permute.xlu1 %1153 }
0x172c   :  { %v1156_v59 = vmul.f32 %v1154_v57, %v1151_v58 }
0x172e   :  { %1158 = vrot.lane.b32.xlu2 %v1156_v59, %s6255_s1 }
0x1788   :  { %v1159_v60 = vpop.permute.xlu2 %1158 }
0x1789   :  { %v1161_v61 = vadd.f32 %v1159_v60, %v6684_v33 }
0x178b   :  { %5878 = vtanh.f32 %v1161_v61 }
0x1791   :  { %v5879_v62 = vpop.eup %5878 }
0x1792   :  { %1165 = vrot.lane.b32.xlu0 %v5879_v62, %s6257_s30 }
0x1804   :  { %v1166_v0 = vpop.permute.xlu0 %1165 }
0x1805   :  { %v1168_v34 = vmul.f32 %v1166_v0, %v1163_v63 }
0x1807   :  { %v1172_v2 = vadd.f32 %v1171_v1, %v1168_v34 }
0x1809   :  { %v1174_v35 = vrot.slane %v1172_v2, 1  ;;  %v1258_v20 = vrot.slane %v1172_v2, 7 }
0x180b   :  { %1175 = vrot.lane.b32.xlu1 %v1174_v35, %s6257_s30 }
0x187d   :  { %v1176_v3 = vpop.permute.xlu1 %1175 }
0x187e   :  { %5652 = vmatmul.msk.f32.vlgmr.msra.gmra.mxu2 %vm247_vm2, %v1176_v3  ;;  %5653 = vmatmul.msk.f32.vlgmr.msrb.gmra.mxu1 %vm247_vm2, %v1176_v3 }
0x187f   :  { %1547 = vmatpush.msra.mxu2 %v6515_v13  ;;  %1567 = vmatpush.msrb.mxu1 %v6697_v30 }
0x1881   :  { %1548 = vmatpush.msra.mxu2 %v6520_v15  ;;  %1568 = vmatpush.msrb.mxu1 %v6704_v31 }
0x1883   :  { %1549 = vmatpush.msra.mxu2 %v6527_v16  ;;  %1569 = vmatpush.msrb.mxu1 %v6711_v32 }
0x1885   :  { %1570 = vmatpush.msrb.mxu1 %v6718_v37  ;;  %1550 = vmatpush.msra.mxu2 %v6534_v17 }
0x18fb   :  { %v1216_v4 = vpop.f32.mrf.mxu1 }
0x18fc   :  { %v1217_v13 = vadd.f32 %v6741_v36, %v1216_v4 }
0x18fe   :  { %v1220_v5 = vrot.slane %v1217_v13, 6 }
0x1900   :  { %v1222_v15 = vadd.f32 %v1220_v5, %v6684_v33  ;;  %1242 = vrot.lane.b32.xlu2 %v1220_v5, %s6255_s1 }
0x1902   :  { %v5654_v16 = vmul.f32 -1.442695, %v1222_v15 }
0x1904   :  { %5880 = vpow2.f32 %v5654_v16 }
0x190a   :  { %v5881_v6 = vpop.eup %5880 }
0x190b   :  { %v1226_v7 = vadd.f32 1.0, %v5881_v6 }
0x190d   :  { %5882 = vrcp.f32 %v1226_v7  ;;  %v1238_v28 = vand.u32 2147483648, %v1226_v7  ;;  %v1236_v11 = vand.u32 2147483647, %v1226_v7  ;;  %vm1232_vm5 = vweird.f32 %v1226_v7 }
0x190f   :  { %v1239_v19 = vor.u32 1.1754944e-38, %v1238_v28  ;;  %vm1237_vm7 = vcmp.eq.f32.partialorder %v1236_v11, 8.507059e+37 }
0x1913   :  { %v5883_v8 = vpop.eup %5882 }
0x1914   :  { %v1228_v17 = vmul.f32 %v5883_v8, %v1226_v7  ;;  %vm1233_vm4 = vweird.f32 %v5883_v8 }
0x1915   :  { %vm1234_vm6 = vmor %vm1232_vm5, %vm1233_vm4 }
0x1916   :  { %v1229_v51 = vsub.f32 1.0, %v1228_v17 }
0x1918   :  { %v1230_v10 = vmul.f32 %v5883_v8, %v1229_v51 }
0x191a   :  { %v1231_v12 = vadd.f32 %v5883_v8, %v1230_v10 }
0x191c   :  { %v1235_v21 = vsel %vm1234_vm6, %v5883_v8, %v1231_v12 }
0x191d   :  { %v1240_v23 = vsel %vm1237_vm7, %v1239_v19, %v1235_v21 }
0x191e   :  { %v1260_v24 = vmul.f32 %v1258_v20, %v1240_v23  ;;  %v1252_v40 = vsub.f32 1.0, %v1240_v23 }
0x195a   :  { %v1243_v25 = vpop.permute.xlu2 %1242 }
0x195b   :  { %v1245_v27 = vmul.f32 %v1243_v25, %v1240_v23 }
0x195d   :  { %1247 = vrot.lane.b32.xlu0 %v1245_v27, %s6255_s1 }
0x19cf   :  { %v1248_v29 = vpop.permute.xlu0 %1247 }
0x19d0   :  { %v1250_v38 = vadd.f32 %v1248_v29, %v6684_v33 }
0x19d2   :  { %5884 = vtanh.f32 %v1250_v38 }
0x19d8   :  { %v5885_v39 = vpop.eup %5884 }
0x19d9   :  { %1254 = vrot.lane.b32.xlu1 %v5885_v39, %s6257_s30 }
0x1a4b   :  { %v1255_v41 = vpop.permute.xlu1 %1254 }
0x1a4c   :  { %v1257_v42 = vmul.f32 %v1255_v41, %v1252_v40 }
0x1a4e   :  { %v1261_v44 = vadd.f32 %v1260_v24, %v1257_v42 }
0x1a50   :  { %v1263_v45 = vrot.slane %v1261_v44, 2  ;;  %v1347_v4 = vrot.slane %v1261_v44, 7 }
0x1a52   :  { %1264 = vrot.lane.b32.xlu2 %v1263_v45, %s6257_s30 }
0x1aac   :  { %v1265_v46 = vpop.permute.xlu2 %1264 }
0x1aad   :  { %5655 = vmatmul.msk.f32.vlgmr.msra.gmra.mxu3 %vm247_vm2, %v1265_v46  ;;  %5656 = vmatmul.msk.f32.vlgmr.msrb.gmra.mxu0 %vm247_vm2, %v1265_v46 }
0x1aae   :  { %1636 = vmatpush.msra.mxu3 %v6209_v47  ;;  %1656 = vmatpush.msrb.mxu0 %v6697_v30  ;;  %v6212_v30 = vld [vmem:[%s8008_s10] sm:$0xff] }
0x1ab0   :  { %1637 = vmatpush.msra.mxu3 %v6210_v49  ;;  %1657 = vmatpush.msrb.mxu0 %v6704_v31 }
0x1ab2   :  { %1638 = vmatpush.msra.mxu3 %v6211_v50  ;;  %1658 = vmatpush.msrb.mxu0 %v6711_v32 }
0x1ab4   :  { %1659 = vmatpush.msrb.mxu0 %v6718_v37  ;;  %1639 = vmatpush.msra.mxu3 %v6212_v30 }
0x1b2a   :  { %v1305_v52 = vpop.f32.mrf.mxu0 }
0x1b2b   :  { %v1306_v54 = vadd.f32 %v6741_v36, %v1305_v52 }
0x1b2d   :  { %v1309_v55 = vrot.slane %v1306_v54, 5 }
0x1b2f   :  { %1331 = vrot.lane.b32.xlu0 %v1309_v55, %s6255_s1  ;;  %v1311_v31 = vadd.f32 %v1309_v55, %v6684_v33 }
0x1b31   :  { %v5657_v48 = vmul.f32 -1.442695, %v1311_v31 }
0x1b33   :  { %5886 = vpow2.f32 %v5657_v48 }
0x1b39   :  { %v5887_v56 = vpop.eup %5886 }
0x1b3a   :  { %v1315_v57 = vadd.f32 1.0, %v5887_v56 }
0x1b3c   :  { %5888 = vrcp.f32 %v1315_v57  ;;  %v1327_v61 = vand.u32 2147483648, %v1315_v57  ;;  %vm1321_vm9 = vweird.f32 %v1315_v57  ;;  %v1325_v62 = vand.u32 2147483647, %v1315_v57 }
0x1b3e   :  { %v1328_v63 = vor.u32 1.1754944e-38, %v1327_v61  ;;  %vm1326_vm11 = vcmp.eq.f32.partialorder %v1325_v62, 8.507059e+37 }
0x1b42   :  { %v5889_v32 = vpop.eup %5888 }
0x1b43   :  { %v1317_v37 = vmul.f32 %v5889_v32, %v1315_v57  ;;  %vm1322_vm8 = vweird.f32 %v5889_v32 }
0x1b44   :  { %vm1323_vm10 = vmor %vm1321_vm9, %vm1322_vm8 }
0x1b45   :  { %v1318_v58 = vsub.f32 1.0, %v1317_v37 }
0x1b47   :  { %v1319_v59 = vmul.f32 %v5889_v32, %v1318_v58 }
0x1b49   :  { %v1320_v60 = vadd.f32 %v5889_v32, %v1319_v59 }
0x1b4b   :  { %v1324_v53 = vsel %vm1323_vm10, %v5889_v32, %v1320_v60 }
0x1b4c   :  { %v1329_v34 = vsel %vm1326_vm11, %v1328_v63, %v1324_v53 }
0x1b4d   :  { %v1341_v13 = vsub.f32 1.0, %v1329_v34  ;;  %v1349_v15 = vmul.f32 %v1347_v4, %v1329_v34 }
0x1ba1   :  { %v1332_v0 = vpop.permute.xlu0 %1331 }
0x1ba2   :  { %v1334_v1 = vmul.f32 %v1332_v0, %v1329_v34 }
0x1ba4   :  { %1336 = vrot.lane.b32.xlu1 %v1334_v1, %s6255_s1 }
0x1c16   :  { %v1337_v2 = vpop.permute.xlu1 %1336 }
0x1c17   :  { %v1339_v35 = vadd.f32 %v1337_v2, %v6684_v33 }
0x1c19   :  { %5890 = vtanh.f32 %v1339_v35 }
0x1c1f   :  { %v5891_v3 = vpop.eup %5890 }
0x1c20   :  { %1343 = vrot.lane.b32.xlu2 %v5891_v3, %s6257_s30 }
0x1c7a   :  { %v1344_v5 = vpop.permute.xlu2 %1343 }
0x1c7b   :  { %v1346_v16 = vmul.f32 %v1344_v5, %v1341_v13 }
0x1c7d   :  { %v1350_v6 = vadd.f32 %v1349_v15, %v1346_v16 }
0x1c7f   :  { %v1352_v7 = vrot.slane %v1350_v6, 3 }
0x1c81   :  { %1353 = vrot.lane.b32.xlu0 %v1352_v7, %s6257_s30 }
0x1cf3   :  { %v1354_v8 = vpop.permute.xlu0 %1353 }
0x1cf4   :  { %5658 = vmatmul.msk.f32.vlgmr.msrb.gmra.mxu2 %vm247_vm2, %v1354_v8  ;;  %5659 = vmatmul.msk.f32.vlgmr.msra.gmra.mxu1 %vm247_vm2, %v1354_v8 }
0x1cf5   :  { %1725 = vmatpush.msrb.mxu2 %v6209_v47  ;;  %v1436_v47 = vrot.slane %v1350_v6, 7 }
0x1cf7   :  { %1726 = vmatpush.msrb.mxu2 %v6210_v49 }
0x1cf9   :  { %1727 = vmatpush.msrb.mxu2 %v6211_v50 }
0x1cfb   :  { %1728 = vmatpush.msrb.mxu2 %v6212_v30 }
0x1d71   :  { %v1394_v17 = vpop.f32.mrf.mxu1 }
0x1d72   :  { %v1395_v51 = vadd.f32 %v6741_v36, %v1394_v17 }
0x1d74   :  { %v1398_v28 = vrot.slane %v1395_v51, 4 }
0x1d76   :  { %1420 = vrot.lane.b32.xlu1 %v1398_v28, %s6255_s1  ;;  %v1400_v10 = vadd.f32 %v1398_v28, %v6684_v33 }
0x1d78   :  { %v5660_v11 = vmul.f32 -1.442695, %v1400_v10  ;;  %v6799_v10 = vld [vmem:[%s8009_s11 + $0x18] sm:$0xff] }
0x1d79   :  { %1750 = vmatpush.msra.mxu1 %v6799_v10 }
0x1d7a   :  { %5892 = vpow2.f32 %v5660_v11  ;;  %v6804_v11 = vld [vmem:[%s8009_s11 + $0x10] sm:$0xff] }
0x1d7b   :  { %1751 = vmatpush.msra.mxu1 %v6804_v11 }
0x1d80   :  { %v5893_v12 = vpop.eup %5892 }
0x1d81   :  { %v1404_v19 = vadd.f32 1.0, %v5893_v12  ;;  %v6811_v12 = vld [vmem:[%s8009_s11 + $0x8] sm:$0xff] }
0x1d82   :  { %1752 = vmatpush.msra.mxu1 %v6811_v12 }
0x1d83   :  { %5894 = vrcp.f32 %v1404_v19  ;;  %v1416_v27 = vand.u32 2147483648, %v1404_v19  ;;  %vm1410_vm13 = vweird.f32 %v1404_v19  ;;  %v1414_v29 = vand.u32 2147483647, %v1404_v19 }
0x1d85   :  { %v1417_v39 = vor.u32 1.1754944e-38, %v1416_v27  ;;  %vm1415_vm15 = vcmp.eq.f32.partialorder %v1414_v29, 8.507059e+37  ;;  %v6854_v27 = vld [vmem:[%s8010_s13] sm:$0x1] }
0x1d89   :  { %v5895_v20 = vpop.eup %5894 }
0x1d8a   :  { %v1406_v21 = vmul.f32 %v5895_v20, %v1404_v19  ;;  %vm1411_vm12 = vweird.f32 %v5895_v20  ;;  %v6819_v19 = vld [vmem:[%s8009_s11] sm:$0xff] }
0x1d8b   :  { %vm1412_vm14 = vmor %vm1410_vm13, %vm1411_vm12  ;;  %1753 = vmatpush.msra.mxu1 %v6819_v19 }
0x1d8c   :  { %v1407_v23 = vsub.f32 1.0, %v1406_v21  ;;  %v6837_v21 = vld [vmem:[%s8004_s14 + $0x2] sm:$0x3] }
0x1d8e   :  { %v1408_v24 = vmul.f32 %v5895_v20, %v1407_v23 }
0x1d90   :  { %v1409_v25 = vadd.f32 %v5895_v20, %v1408_v24 }
0x1d92   :  { %v1413_v38 = vsel %vm1412_vm14, %v5895_v20, %v1409_v25 }
0x1d93   :  { %v1418_v41 = vsel %vm1415_vm15, %v1417_v39, %v1413_v38  ;;  %vm1804_vm15 = vcmask 253952  }
0x1d94   :  { %v1430_v49 = vsub.f32 1.0, %v1418_v41  ;;  %v1438_v30 = vmul.f32 %v1436_v47, %v1418_v41 }
0x1de8   :  { %v1421_v40 = vpop.permute.xlu1 %1420 }
0x1de9   :  { %v1423_v42 = vmul.f32 %v1421_v40, %v1418_v41  ;;  %v6862_v40 = vld [vmem:[%s8011_s12] sm:$0x1]  ;;  %v399_v41 = vpop.f32.mrf.mxu3 }
0x1deb   :  { %1425 = vrot.lane.b32.xlu2 %v1423_v42, %s6255_s1  ;;  %v400_v42 = vadd.f32 %v399_v41, %v6862_v40 }
0x1e45   :  { %v1426_v44 = vpop.permute.xlu2 %1425 }
0x1e46   :  { %v1428_v45 = vadd.f32 %v1426_v44, %v6684_v33 }
0x1e48   :  { %5896 = vtanh.f32 %v1428_v45 }
0x1e4e   :  { %v5897_v46 = vpop.eup %5896 }
0x1e4f   :  { %1432 = vrot.lane.b32.xlu0 %v5897_v46, %s6257_s30 }
0x1ec1   :  { %v1433_v50 = vpop.permute.xlu0 %1432 }
0x1ec2   :  { %v1435_v52 = vmul.f32 %v1433_v50, %v1430_v49 }
0x1ec4   :  { %v1439_v54 = vadd.f32 %v1438_v30, %v1435_v52 }
0x1ec6   :  { %v1441_v55 = vrot.slane %v1439_v54, 4  ;;  %v1525_v2 = vrot.slane %v1439_v54, 7 }
0x1ec8   :  { %1442 = vrot.lane.b32.xlu1 %v1441_v55, %s6257_s30 }
0x1f3a   :  { %v1443_v31 = vpop.permute.xlu1 %1442 }
0x1f3b   :  { %5661 = vmatmul.msk.f32.vlgmr.msrb.gmra.mxu3 %vm247_vm2, %v1443_v31  ;;  %5662 = vmatmul.msk.f32.vlgmr.msra.gmra.mxu0 %vm247_vm2, %v1443_v31 }
0x1f3c   :  { %1820 = vmatpush.msrb.mxu3 %v6799_v10  ;;  %1886 = vmatpush.msra.mxu0 %v6799_v10 }
0x1f3e   :  { %1821 = vmatpush.msrb.mxu3 %v6804_v11  ;;  %1887 = vmatpush.msra.mxu0 %v6804_v11 }
0x1f40   :  { %1822 = vmatpush.msrb.mxu3 %v6811_v12  ;;  %1888 = vmatpush.msra.mxu0 %v6811_v12 }
0x1f42   :  { %1823 = vmatpush.msrb.mxu3 %v6819_v19  ;;  %1889 = vmatpush.msra.mxu0 %v6819_v19 }
0x1fb8   :  { %v1483_v48 = vpop.f32.mrf.mxu0 }
0x1fb9   :  { %v1484_v56 = vadd.f32 %v6741_v36, %v1483_v48 }
0x1fbb   :  { %v1487_v57 = vrot.slane %v1484_v56, 3 }
0x1fbd   :  { %v1489_v32 = vadd.f32 %v1487_v57, %v6684_v33  ;;  %1509 = vrot.lane.b32.xlu2 %v1487_v57, %s6255_s1 }
0x1fbf   :  { %v5663_v37 = vmul.f32 -1.442695, %v1489_v32 }
0x1fc1   :  { %5898 = vpow2.f32 %v5663_v37 }
0x1fc7   :  { %v5899_v58 = vpop.eup %5898 }
0x1fc8   :  { %v1493_v59 = vadd.f32 1.0, %v5899_v58 }
0x1fca   :  { %5900 = vrcp.f32 %v1493_v59  ;;  %v1505_v53 = vand.u32 2147483648, %v1493_v59  ;;  %v1503_v0 = vand.u32 2147483647, %v1493_v59  ;;  %vm1499_vm4 = vweird.f32 %v1493_v59 }
0x1fcc   :  { %v1506_v1 = vor.u32 1.1754944e-38, %v1505_v53  ;;  %vm1504_vm6 = vcmp.eq.f32.partialorder %v1503_v0, 8.507059e+37 }
0x1fd0   :  { %v5901_v60 = vpop.eup %5900 }
0x1fd1   :  { %v1495_v61 = vmul.f32 %v5901_v60, %v1493_v59  ;;  %vm1500_vm3 = vweird.f32 %v5901_v60 }
0x1fd2   :  { %vm1501_vm5 = vmor %vm1499_vm4, %vm1500_vm3 }
0x1fd3   :  { %v1496_v62 = vsub.f32 1.0, %v1495_v61 }
0x1fd5   :  { %v1497_v63 = vmul.f32 %v5901_v60, %v1496_v62 }
0x1fd7   :  { %v1498_v34 = vadd.f32 %v5901_v60, %v1497_v63 }
0x1fd9   :  { %v1502_v35 = vsel %vm1501_vm5, %v5901_v60, %v1498_v34 }
0x1fda   :  { %v1507_v3 = vsel %vm1504_vm6, %v1506_v1, %v1502_v35 }
0x1fdb   :  { %v1527_v4 = vmul.f32 %v1525_v2, %v1507_v3  ;;  %v1519_v7 = vsub.f32 1.0, %v1507_v3 }
0x2017   :  { %v1510_v13 = vpop.permute.xlu2 %1509 }
0x2018   :  { %v1512_v5 = vmul.f32 %v1510_v13, %v1507_v3 }
0x201a   :  { %1514 = vrot.lane.b32.xlu0 %v1512_v5, %s6255_s1 }
0x208c   :  { %v1515_v15 = vpop.permute.xlu0 %1514 }
0x208d   :  { %v1517_v16 = vadd.f32 %v1515_v15, %v6684_v33 }
0x208f   :  { %5902 = vtanh.f32 %v1517_v16 }
0x2095   :  { %v5903_v6 = vpop.eup %5902 }
0x2096   :  { %1521 = vrot.lane.b32.xlu1 %v5903_v6, %s6257_s30 }
0x2108   :  { %v1522_v8 = vpop.permute.xlu1 %1521 }
0x2109   :  { %v1524_v17 = vmul.f32 %v1522_v8, %v1519_v7 }
0x210b   :  { %v6792_v51 = vadd.f32 %v1527_v4, %v1524_v17 }
0x210d   :  { %v1530_v28 = vrot.slane %v6792_v51, 5  ;;  %v1614_v17 = vrot.slane %v6792_v51, 7 }
0x210f   :  { %1531 = vrot.lane.b32.xlu2 %v1530_v28, %s6257_s30 }
0x2169   :  { %v1532_v20 = vpop.permute.xlu2 %1531 }
0x216a   :  { %5664 = vmatmul.msk.f32.vlgmr.msra.gmra.mxu2 %vm247_vm2, %v1532_v20  ;;  %5665 = vmatmul.msk.f32.vlgmr.msrb.gmra.mxu1 %vm247_vm2, %v1532_v20 }
0x216b   :  { %1952 = vmatpush.msra.mxu2 %v6799_v10  ;;  %2018 = vmatpush.msrb.mxu1 %v6799_v10 }
0x216d   :  { %1953 = vmatpush.msra.mxu2 %v6804_v11  ;;  %2019 = vmatpush.msrb.mxu1 %v6804_v11 }
0x216f   :  { %1954 = vmatpush.msra.mxu2 %v6811_v12  ;;  %2020 = vmatpush.msrb.mxu1 %v6811_v12 }
0x2171   :  { %1955 = vmatpush.msra.mxu2 %v6819_v19  ;;  %2021 = vmatpush.msrb.mxu1 %v6819_v19 }
0x2172   :  { %5672 = vmatmul.msk.f32.vlgmr.msra.gmra.mxu1 %vm247_vm2, %v6837_v21 }
0x2173   :  { %2282 = vmatpush.msra.mxu1 %v6799_v10 }
0x2175   :  { %2283 = vmatpush.msra.mxu1 %v6804_v11 }
0x2177   :  { %2284 = vmatpush.msra.mxu1 %v6811_v12 }
0x2179   :  { %2285 = vmatpush.msra.mxu1 %v6819_v19 }
0x21e7   :  { %v1572_v23 = vpop.f32.mrf.mxu1 }
0x21e8   :  { %v1573_v24 = vadd.f32 %v6741_v36, %v1572_v23 }
0x21ea   :  { %v1576_v25 = vrot.slane %v1573_v24, 2 }
0x21ec   :  { %1598 = vrot.lane.b32.xlu0 %v1576_v25, %s6255_s1  ;;  %v1578_v39 = vadd.f32 %v1576_v25, %v6684_v33 }
0x21ee   :  { %v5666_v44 = vmul.f32 -1.442695, %v1578_v39 }
0x21ef   :  { %v1755_v29 = vpop.f32.mrf.mxu1 }
0x21f0   :  { %v1756_v38 = vadd.f32 %v1755_v29, %v6854_v27  ;;  %5904 = vpow2.f32 %v5666_v44 }
0x21f2   :  { %1779 = vrot.lane.b32.xlu1 %v1756_v38, %s6255_s1  ;;  %v1758_v45 = vadd.f32 %v1756_v38, %v400_v42 }
0x21f4   :  { %v5673_v46 = vmul.f32 -1.442695, %v1758_v45 }
0x21f6   :  { %v5905_v47 = vpop.eup %5904  ;;  %5906 = vpow2.f32 %v5673_v46  ;;  %v6897_v46 = vpop.f32.mrf.mxu3 }
0x21f7   :  { %v1582_v49 = vadd.f32 1.0, %v5905_v47 }
0x21f9   :  { %5908 = vrcp.f32 %v1582_v49  ;;  %v1594_v37 = vand.u32 2147483648, %v1582_v49  ;;  %vm1588_vm8 = vweird.f32 %v1582_v49  ;;  %v1592_v58 = vand.u32 2147483647, %v1582_v49 }
0x21fb   :  { %v1595_v61 = vor.u32 1.1754944e-38, %v1594_v37  ;;  %vm1593_vm10 = vcmp.eq.f32.partialorder %v1592_v58, 8.507059e+37 }
0x21fc   :  { %v5907_v50 = vpop.eup %5906 }
0x21fd   :  { %v1762_v30 = vadd.f32 1.0, %v5907_v50 }
0x21fe   :  { %v6899_v47 = vpop.f32.mrf.mxu3 }
0x21ff   :  { %v5909_v52 = vpop.eup %5908  ;;  %5910 = vrcp.f32 %v1762_v30  ;;  %v1774_v0 = vand.u32 2147483648, %v1762_v30  ;;  %vm1768_vm12 = vweird.f32 %v1762_v30  ;;  %v1772_v1 = vand.u32 2147483647, %v1762_v30 }
0x2200   :  { %v1584_v54 = vmul.f32 %v5909_v52, %v1582_v49  ;;  %vm1589_vm7 = vweird.f32 %v5909_v52 }
0x2201   :  { %vm1590_vm9 = vmor %vm1588_vm8, %vm1589_vm7  ;;  %v1775_v35 = vor.u32 1.1754944e-38, %v1774_v0  ;;  %vm1773_vm14 = vcmp.eq.f32.partialorder %v1772_v1, 8.507059e+37 }
0x2202   :  { %v1585_v31 = vsub.f32 1.0, %v1584_v54 }
0x2204   :  { %v1586_v56 = vmul.f32 %v5909_v52, %v1585_v31 }
0x2205   :  { %v5911_v55 = vpop.eup %5910 }
0x2206   :  { %v1764_v48 = vmul.f32 %v5911_v55, %v1762_v30  ;;  %v1587_v32 = vadd.f32 %v5909_v52, %v1586_v56  ;;  %vm1769_vm11 = vweird.f32 %v5911_v55  ;;  %v6901_v49 = vpop.f32.mrf.mxu3 }
0x2207   :  { %vm1770_vm13 = vmor %vm1768_vm12, %vm1769_vm11 }
0x2208   :  { %v1765_v57 = vsub.f32 1.0, %v1764_v48  ;;  %v1591_v60 = vsel %vm1590_vm9, %v5909_v52, %v1587_v32  ;;  %v488_v48 = vpop.f32.mrf.mxu2 }
0x2209   :  { %v1596_v63 = vsel %vm1593_vm10, %v1595_v61, %v1591_v60  ;;  %v489_v56 = vadd.f32 %v488_v48, %v6862_v40 }
0x220a   :  { %v1766_v59 = vmul.f32 %v5911_v55, %v1765_v57  ;;  %v1608_v28 = vsub.f32 1.0, %v1596_v63  ;;  %v1616_v23 = vmul.f32 %v1614_v17, %v1596_v63 }
0x220c   :  { %v1767_v62 = vadd.f32 %v5911_v55, %v1766_v59 }
0x220e   :  { %v1771_v2 = vsel %vm1770_vm13, %v5911_v55, %v1767_v62  ;;  %v6903_v50 = vpop.f32.mrf.mxu3 }
0x220f   :  { %v1776_v4 = vsel %vm1773_vm14, %v1775_v35, %v1771_v2 }
0x2210   :  { %v1789_v29 = vsub.f32 1.0, %v1776_v4 }
0x2216   :  { %v6905_v30 = vpop.f32.mrf.mxu3 }
0x221e   :  { %v6907_v52 = vpop.f32.mrf.mxu3 }
0x225e   :  { %v1599_v53 = vpop.permute.xlu0 %1598 }
0x225f   :  { %v1601_v34 = vmul.f32 %v1599_v53, %v1596_v63 }
0x2261   :  { %1603 = vrot.lane.b32.xlu2 %v1601_v34, %s6255_s1 }
0x2264   :  { %v1780_v3 = vpop.permute.xlu1 %1779 }
0x2265   :  { %v1782_v13 = vmul.f32 %v1780_v3, %v1776_v4 }
0x2267   :  { %1784 = vrot.lane.b32.xlu0 %v1782_v13, %s6255_s1 }
0x226f   :  { %1795 = vrot.lane.b32.xlu0 %v6837_v21, %s6256_s24 }
0x22bb   :  { %v1604_v5 = vpop.permute.xlu2 %1603 }
0x22bc   :  { %v1606_v15 = vadd.f32 %v1604_v5, %v6684_v33 }
0x22be   :  { %5912 = vtanh.f32 %v1606_v15 }
0x22c4   :  { %v5913_v16 = vpop.eup %5912 }
0x22c5   :  { %1610 = vrot.lane.b32.xlu1 %v5913_v16, %s6257_s30 }
0x22d9   :  { %v1785_v6 = vpop.permute.xlu0 %1784 }
0x22da   :  { %v1787_v7 = vadd.f32 %v1785_v6, %v400_v42 }
0x22dc   :  { %5914 = vtanh.f32 %v1787_v7 }
0x22e1   :  { %v1796_v25 = vpop.permute.xlu0 %1795 }
0x22e2   :  { %v5915_v8 = vpop.eup %5914  ;;  %v1798_v41 = vmul.f32 %v1796_v25, %v1776_v4 }
0x22e3   :  { %1791 = vrot.lane.b32.xlu2 %v5915_v8, %s6257_s30 }
0x2337   :  { %v1611_v20 = vpop.permute.xlu1 %1610 }
0x2338   :  { %v1613_v24 = vmul.f32 %v1611_v20, %v1608_v28 }
0x233a   :  { %v6873_v21 = vadd.f32 %v1616_v23, %v1613_v24 }
0x233c   :  { %v1619_v38 = vrot.slane %v6873_v21, 6 }
0x233d   :  { %v1792_v39 = vpop.permute.xlu2 %1791 }
0x233e   :  { %v1794_v44 = vmul.f32 %v1792_v39, %v1789_v29  ;;  %1620 = vrot.lane.b32.xlu1 %v1619_v38, %s6257_s30 }
0x2340   :  { %v6877_v42 = vadd.f32 %v1798_v41, %v1794_v44 }
0x2342   :  { %1801 = vrot.lane.b32.xlu2 %v6877_v42, %s6257_s30 }
0x239c   :  { %v1802_v51 = vpop.permute.xlu2 %1801 }
0x239d   :  { %1805 = vst.msk [vmem:[#allocation2] sm:$0x1] %vm1804_vm15, %v1802_v51 }
0x23b0   :  { %v1621_v45 = vpop.permute.xlu1 %1620 }
0x23b1   :  { %5667 = vmatmul.msk.f32.vlgmr.msra.gmra.mxu3 %vm247_vm2, %v1621_v45  ;;  %5668 = vmatmul.msk.f32.vlgmr.msrb.gmra.mxu0 %vm247_vm2, %v1621_v45 }
0x23b2   :  { %2084 = vmatpush.msra.mxu3 %v6799_v10  ;;  %2150 = vmatpush.msrb.mxu0 %v6799_v10 }
0x23b4   :  { %2085 = vmatpush.msra.mxu3 %v6804_v11  ;;  %2151 = vmatpush.msrb.mxu0 %v6804_v11 }
0x23b6   :  { %2086 = vmatpush.msra.mxu3 %v6811_v12  ;;  %2152 = vmatpush.msrb.mxu0 %v6811_v12 }
0x23b8   :  { %2087 = vmatpush.msra.mxu3 %v6819_v19  ;;  %2153 = vmatpush.msrb.mxu0 %v6819_v19 }
0x23b9   :  { %5674 = vmatmul.msk.f32.vlgmr.msrb.gmra.mxu3 %vm247_vm2, %v1802_v51 }
0x23ba   :  { %2348 = vmatpush.msrb.mxu3 %v6799_v10 }
0x23bc   :  { %2349 = vmatpush.msrb.mxu3 %v6804_v11 }
0x23be   :  { %2350 = vmatpush.msrb.mxu3 %v6811_v12 }
0x23c0   :  { %2351 = vmatpush.msrb.mxu3 %v6819_v19 }
0x242e   :  { %v1661_v4 = vpop.f32.mrf.mxu0 }
0x242f   :  { %v1662_v13 = vadd.f32 %v6741_v36, %v1661_v4 }
0x2431   :  { %v1665_v5 = vrot.slane %v1662_v13, 1 }
0x2433   :  { %v1667_v7 = vadd.f32 %v1665_v5, %v6684_v33 }
0x2434   :  { %v6909_v54 = vpop.f32.mrf.mxu3 }
0x2435   :  { %v5669_v8 = vmul.f32 -1.442695, %v1667_v7 }
0x243c   :  { %v1825_v55 = vpop.f32.mrf.mxu3 }
0x243d   :  { %v1826_v31 = vadd.f32 %v1825_v55, %v6854_v27 }
0x243f   :  { %1849 = vrot.lane.b32.xlu0 %v1826_v31, %s6255_s1  ;;  %v1828_v57 = vadd.f32 %v1826_v31, %v489_v56 }
0x2441   :  { %v5675_v32 = vmul.f32 -1.442695, %v1828_v57 }
0x2443   :  { %5916 = vpow2.f32 %v5675_v32 }
0x2449   :  { %v5917_v37 = vpop.eup %5916 }
0x244a   :  { %v1832_v58 = vadd.f32 1.0, %v5917_v37 }
0x244c   :  { %5918 = vrcp.f32 %v1832_v58  ;;  %v1844_v63 = vand.u32 2147483648, %v1832_v58  ;;  %vm1838_vm4 = vweird.f32 %v1832_v58  ;;  %v1842_v0 = vand.u32 2147483647, %v1832_v58 }
0x244e   :  { %v1845_v1 = vor.u32 1.1754944e-38, %v1844_v63  ;;  %vm1843_vm6 = vcmp.eq.f32.partialorder %v1842_v0, 8.507059e+37 }
0x2452   :  { %v5919_v59 = vpop.eup %5918 }
0x2453   :  { %v1834_v60 = vmul.f32 %v5919_v59, %v1832_v58  ;;  %vm1839_vm3 = vweird.f32 %v5919_v59 }
0x2454   :  { %vm1840_vm5 = vmor %vm1838_vm4, %vm1839_vm3 }
0x2455   :  { %v1835_v61 = vsub.f32 1.0, %v1834_v60 }
0x2457   :  { %v1836_v62 = vmul.f32 %v5919_v59, %v1835_v61  ;;  %v578_v61 = vadd.f32 %v6897_v46, %v6862_v40 }
0x2459   :  { %v1837_v53 = vadd.f32 %v5919_v59, %v1836_v62 }
0x245b   :  { %v1841_v34 = vsel %vm1840_vm5, %v5919_v59, %v1837_v53 }
0x245c   :  { %v1846_v35 = vsel %vm1843_vm6, %v1845_v1, %v1841_v34 }
0x245d   :  { %v1859_v25 = vsub.f32 1.0, %v1846_v35  ;;  %v1865_v38 = vmul.f32 %v1846_v35, %v6877_v42 }
0x24b1   :  { %v1850_v2 = vpop.permute.xlu0 %1849 }
0x24b2   :  { %v1852_v3 = vmul.f32 %v1850_v2, %v1846_v35 }
0x24b4   :  { %1854 = vrot.lane.b32.xlu1 %v1852_v3, %s6255_s1 }
0x24bc   :  { %1687 = vrot.lane.b32.xlu1 %v1665_v5, %s6255_s1 }
0x2526   :  { %v1855_v15 = vpop.permute.xlu1 %1854 }
0x2527   :  { %v1857_v16 = vadd.f32 %v1855_v15, %v489_v56 }
0x2529   :  { %5920 = vtanh.f32 %v1857_v16 }
0x252a   :  { %5922 = vpow2.f32 %v5669_v8 }
0x252e   :  { %v1688_v48 = vpop.permute.xlu1 %1687 }
0x252f   :  { %v5921_v6 = vpop.eup %5920 }
0x2530   :  { %1861 = vrot.lane.b32.xlu2 %v5921_v6, %s6257_s30  ;;  %v5923_v17 = vpop.eup %5922  ;;  %v1703_v6 = vrot.slane %v6873_v21, 7 }
0x2531   :  { %v1671_v28 = vadd.f32 1.0, %v5923_v17 }
0x2533   :  { %5924 = vrcp.f32 %v1671_v28  ;;  %v1683_v51 = vand.u32 2147483648, %v1671_v28  ;;  %vm1677_vm8 = vweird.f32 %v1671_v28  ;;  %v1681_v45 = vand.u32 2147483647, %v1671_v28 }
0x2535   :  { %v1684_v31 = vor.u32 1.1754944e-38, %v1683_v51  ;;  %vm1682_vm10 = vcmp.eq.f32.partialorder %v1681_v45, 8.507059e+37 }
0x2539   :  { %v5925_v20 = vpop.eup %5924 }
0x253a   :  { %v1673_v23 = vmul.f32 %v5925_v20, %v1671_v28  ;;  %vm1678_vm7 = vweird.f32 %v5925_v20 }
0x253b   :  { %vm1679_vm9 = vmor %vm1677_vm8, %vm1678_vm7 }
0x253c   :  { %v1674_v24 = vsub.f32 1.0, %v1673_v23 }
0x253e   :  { %v1675_v36 = vmul.f32 %v5925_v20, %v1674_v24 }
0x2540   :  { %v1676_v41 = vadd.f32 %v5925_v20, %v1675_v36 }
0x2542   :  { %v1680_v55 = vsel %vm1679_vm9, %v5925_v20, %v1676_v41 }
0x2543   :  { %v1685_v56 = vsel %vm1682_vm10, %v1684_v31, %v1680_v55  ;;  %v666_v55 = vpop.f32.mrf.mxu2 }
0x2544   :  { %v1690_v57 = vmul.f32 %v1688_v48, %v1685_v56  ;;  %v1697_v7 = vsub.f32 1.0, %v1685_v56  ;;  %v1705_v17 = vmul.f32 %v1703_v6, %v1685_v56 }
0x254b   :  { %v6954_v31 = vpop.f32.mrf.mxu2 }
0x258a   :  { %v1862_v29 = vpop.permute.xlu2 %1861 }
0x258b   :  { %v1864_v39 = vmul.f32 %v1862_v29, %v1859_v25 }
0x258d   :  { %v6920_v44 = vadd.f32 %v1865_v38, %v1864_v39 }
0x258f   :  { %1868 = vrot.lane.b32.xlu0 %v6920_v44, %s6257_s30 }
0x2597   :  { %1692 = vrot.lane.b32.xlu0 %v1690_v57, %s6255_s1 }
0x2601   :  { %v1869_v42 = vpop.permute.xlu0 %1868 }
0x2602   :  { %1871 = vst.msk [vmem:[#allocation2 + $0x1] sm:$0x1] %vm1804_vm15, %v1869_v42  ;;  %5676 = vmatmul.msk.f32.vlgmr.msra.gmra.mxu0 %vm247_vm2, %v1869_v42 }
0x2603   :  { %2414 = vmatpush.msra.mxu0 %v6799_v10 }
0x2605   :  { %2415 = vmatpush.msra.mxu0 %v6804_v11 }
0x2607   :  { %2416 = vmatpush.msra.mxu0 %v6811_v12 }
0x2609   :  { %2417 = vmatpush.msra.mxu0 %v6819_v19  ;;  %v1693_v32 = vpop.permute.xlu0 %1692 }
0x260a   :  { %v1695_v37 = vadd.f32 %v1693_v32, %v6684_v33 }
0x260c   :  { %5926 = vtanh.f32 %v1695_v37 }
0x2612   :  { %v5927_v60 = vpop.eup %5926 }
0x267f   :  { %v1891_v58 = vpop.f32.mrf.mxu0 }
0x2680   :  { %v1892_v59 = vadd.f32 %v1891_v58, %v6854_v27  ;;  %v667_v58 = vadd.f32 %v666_v55, %v6862_v40 }
0x2682   :  { %1915 = vrot.lane.b32.xlu2 %v1892_v59, %s6255_s1  ;;  %v1894_v62 = vadd.f32 %v1892_v59, %v578_v61 }
0x2684   :  { %v5677_v53 = vmul.f32 -1.442695, %v1894_v62 }
0x2686   :  { %5928 = vpow2.f32 %v5677_v53 }
0x268a   :  { %1699 = vrot.lane.b32.xlu2 %v5927_v60, %s6257_s30 }
0x268c   :  { %v5929_v63 = vpop.eup %5928 }
0x268d   :  { %v1898_v0 = vadd.f32 1.0, %v5929_v63 }
0x268f   :  { %5930 = vrcp.f32 %v1898_v0  ;;  %v1910_v3 = vand.u32 2147483648, %v1898_v0  ;;  %vm1904_vm12 = vweird.f32 %v1898_v0  ;;  %v1908_v4 = vand.u32 2147483647, %v1898_v0 }
0x2691   :  { %v1911_v5 = vor.u32 1.1754944e-38, %v1910_v3  ;;  %vm1909_vm14 = vcmp.eq.f32.partialorder %v1908_v4, 8.507059e+37 }
0x2695   :  { %v5931_v34 = vpop.eup %5930 }
0x2696   :  { %v1900_v33 = vmul.f32 %v5931_v34, %v1898_v0  ;;  %vm1905_vm11 = vweird.f32 %v5931_v34 }
0x2697   :  { %vm1906_vm13 = vmor %vm1904_vm12, %vm1905_vm11 }
0x2698   :  { %v1901_v1 = vsub.f32 1.0, %v1900_v33 }
0x269a   :  { %v1902_v2 = vmul.f32 %v5931_v34, %v1901_v1 }
0x269c   :  { %v1903_v35 = vadd.f32 %v5931_v34, %v1902_v2 }
0x269e   :  { %v1907_v13 = vsel %vm1906_vm13, %v5931_v34, %v1903_v35 }
0x269f   :  { %v1912_v15 = vsel %vm1909_vm14, %v1911_v5, %v1907_v13 }
0x26a0   :  { %v1925_v21 = vsub.f32 1.0, %v1912_v15  ;;  %v1931_v39 = vmul.f32 %v1912_v15, %v6920_v44  ;;  %v6956_v44 = vpop.f32.mrf.mxu2 }
0x26a8   :  { %v6958_v48 = vpop.f32.mrf.mxu2 }
0x26b0   :  { %v6960_v56 = vpop.f32.mrf.mxu2 }
0x26b8   :  { %v6962_v57 = vpop.f32.mrf.mxu2 }
0x26dc   :  { %v1916_v46 = vpop.permute.xlu2 %1915 }
0x26dd   :  { %v1918_v16 = vmul.f32 %v1916_v46, %v1912_v15 }
0x26df   :  { %1920 = vrot.lane.b32.xlu1 %v1918_v16, %s6255_s1 }
0x26e4   :  { %v1700_v8 = vpop.permute.xlu2 %1699 }
0x26e5   :  { %v1702_v28 = vmul.f32 %v1700_v8, %v1697_v7 }
0x26e7   :  { %v1706_v20 = vadd.f32 %v1705_v17, %v1702_v28 }
0x26e9   :  { %v1708_v23 = vrot.slane %v1706_v20, 7 }
0x26eb   :  { %1709 = vrot.lane.b32.xlu1 %v1708_v23, %s6257_s30 }
0x2751   :  { %v1921_v24 = vpop.permute.xlu1 %1920 }
0x2752   :  { %v1923_v36 = vadd.f32 %v1921_v24, %v578_v61 }
0x2754   :  { %5932 = vtanh.f32 %v1923_v36  ;;  %v756_v36 = vadd.f32 %v6899_v47, %v6862_v40 }
0x275a   :  { %v5933_v25 = vpop.eup %5932 }
0x275b   :  { %1927 = vrot.lane.b32.xlu0 %v5933_v25, %s6257_s30 }
0x275d   :  { %v1710_v29 = vpop.permute.xlu1 %1709 }
0x275e   :  { %5670 = vmatmul.msk.f32.vlgmr.msrb.gmra.mxu2 %vm247_vm2, %v1710_v29 }
0x275f   :  { %2216 = vmatpush.msrb.mxu2 %v6799_v10 }
0x2761   :  { %2217 = vmatpush.msrb.mxu2 %v6804_v11 }
0x2763   :  { %2218 = vmatpush.msrb.mxu2 %v6811_v12 }
0x2765   :  { %2219 = vmatpush.msrb.mxu2 %v6819_v19 }
0x27cd   :  { %v1928_v38 = vpop.permute.xlu0 %1927 }
0x27ce   :  { %v1930_v41 = vmul.f32 %v1928_v38, %v1925_v21 }
0x27d0   :  { %v1932_v51 = vadd.f32 %v1931_v39, %v1930_v41 }
0x27d2   :  { %1934 = vrot.lane.b32.xlu2 %v1932_v51, %s6257_s30 }
0x27e1   :  { %v6964_v42 = vpop.f32.mrf.mxu2 }
0x282c   :  { %v1935_v45 = vpop.permute.xlu2 %1934 }
0x282d   :  { %1937 = vst.msk [vmem:[#allocation2 + $0x2] sm:$0x1] %vm1804_vm15, %v1935_v45  ;;  %5678 = vmatmul.msk.f32.vlgmr.msra.gmra.mxu2 %vm247_vm2, %v1935_v45 }
0x282e   :  { %2480 = vmatpush.msra.mxu2 %v6799_v10 }
0x2830   :  { %2481 = vmatpush.msra.mxu2 %v6804_v11 }
0x2832   :  { %2482 = vmatpush.msra.mxu2 %v6811_v12 }
0x2834   :  { %2483 = vmatpush.msra.mxu2 %v6819_v19 }
0x28b0   :  { %v1957_v32 = vpop.f32.mrf.mxu2 }
0x28b1   :  { %v1958_v37 = vadd.f32 %v1957_v32, %v6854_v27 }
0x28b3   :  { %1981 = vrot.lane.b32.xlu0 %v1958_v37, %s6255_s1  ;;  %v1960_v59 = vadd.f32 %v1958_v37, %v667_v58 }
0x28b5   :  { %v5679_v60 = vmul.f32 -1.442695, %v1960_v59 }
0x28b7   :  { %5934 = vpow2.f32 %v5679_v60 }
0x28bd   :  { %v5935_v61 = vpop.eup %5934 }
0x28be   :  { %v1964_v62 = vadd.f32 1.0, %v5935_v61 }
0x28c0   :  { %5936 = vrcp.f32 %v1964_v62  ;;  %v1976_v1 = vand.u32 2147483648, %v1964_v62  ;;  %vm1970_vm4 = vweird.f32 %v1964_v62  ;;  %v1974_v2 = vand.u32 2147483647, %v1964_v62 }
0x28c2   :  { %v1977_v3 = vor.u32 1.1754944e-38, %v1976_v1  ;;  %vm1975_vm6 = vcmp.eq.f32.partialorder %v1974_v2, 8.507059e+37 }
0x28c6   :  { %v5937_v53 = vpop.eup %5936 }
0x28c7   :  { %v1966_v63 = vmul.f32 %v5937_v53, %v1964_v62  ;;  %vm1971_vm3 = vweird.f32 %v5937_v53 }
0x28c8   :  { %vm1972_vm5 = vmor %vm1970_vm4, %vm1971_vm3 }
0x28c9   :  { %v1967_v0 = vsub.f32 1.0, %v1966_v63 }
0x28cb   :  { %v1968_v34 = vmul.f32 %v5937_v53, %v1967_v0 }
0x28cd   :  { %v1969_v33 = vadd.f32 %v5937_v53, %v1968_v34 }
0x28cf   :  { %v1973_v35 = vsel %vm1972_vm5, %v5937_v53, %v1969_v33 }
0x28d0   :  { %v1978_v13 = vsel %vm1975_vm6, %v1977_v3, %v1973_v35 }
0x28d1   :  { %v1991_v6 = vsub.f32 1.0, %v1978_v13  ;;  %v1997_v8 = vmul.f32 %v1978_v13, %v1932_v51 }
0x2925   :  { %v1982_v4 = vpop.permute.xlu0 %1981 }
0x2926   :  { %v1984_v5 = vmul.f32 %v1982_v4, %v1978_v13  ;;  %v845_v13 = vadd.f32 %v6954_v31, %v6862_v40 }
0x2928   :  { %1986 = vrot.lane.b32.xlu1 %v1984_v5, %s6255_s1 }
0x299a   :  { %v1987_v46 = vpop.permute.xlu1 %1986 }
0x299b   :  { %v1989_v15 = vadd.f32 %v1987_v46, %v667_v58 }
0x299d   :  { %5938 = vtanh.f32 %v1989_v15 }
0x29a3   :  { %v5939_v16 = vpop.eup %5938 }
0x29a4   :  { %1993 = vrot.lane.b32.xlu2 %v5939_v16, %s6257_s30 }
0x29fe   :  { %v1994_v7 = vpop.permute.xlu2 %1993 }
0x29ff   :  { %v1996_v17 = vmul.f32 %v1994_v7, %v1991_v6 }
0x2a01   :  { %v1998_v28 = vadd.f32 %v1997_v8, %v1996_v17 }
0x2a03   :  { %2000 = vrot.lane.b32.xlu0 %v1998_v28, %s6257_s30 }
0x2a75   :  { %v2001_v20 = vpop.permute.xlu0 %2000 }
0x2a76   :  { %2003 = vst.msk [vmem:[#allocation2 + $0x3] sm:$0x1] %vm1804_vm15, %v2001_v20  ;;  %5680 = vmatmul.msk.f32.vlgmr.msrb.gmra.mxu1 %vm247_vm2, %v2001_v20 }
0x2a77   :  { %2546 = vmatpush.msrb.mxu1 %v6799_v10 }
0x2a79   :  { %2547 = vmatpush.msrb.mxu1 %v6804_v11 }
0x2a7b   :  { %2548 = vmatpush.msrb.mxu1 %v6811_v12 }
0x2a7d   :  { %2549 = vmatpush.msrb.mxu1 %v6819_v19 }
0x2af3   :  { %v2023_v23 = vpop.f32.mrf.mxu1 }
0x2af4   :  { %v2024_v24 = vadd.f32 %v2023_v23, %v6854_v27 }
0x2af6   :  { %2047 = vrot.lane.b32.xlu1 %v2024_v24, %s6255_s1  ;;  %v2026_v25 = vadd.f32 %v2024_v24, %v756_v36 }
0x2af8   :  { %v5681_v29 = vmul.f32 -1.442695, %v2026_v25 }
0x2afa   :  { %5940 = vpow2.f32 %v5681_v29 }
0x2b00   :  { %v5941_v21 = vpop.eup %5940 }
0x2b01   :  { %v2030_v38 = vadd.f32 1.0, %v5941_v21 }
0x2b03   :  { %5942 = vrcp.f32 %v2030_v38  ;;  %v2042_v32 = vand.u32 2147483648, %v2030_v38  ;;  %vm2036_vm8 = vweird.f32 %v2030_v38  ;;  %v2040_v37 = vand.u32 2147483647, %v2030_v38 }
0x2b05   :  { %v2043_v59 = vor.u32 1.1754944e-38, %v2042_v32  ;;  %vm2041_vm10 = vcmp.eq.f32.partialorder %v2040_v37, 8.507059e+37 }
0x2b09   :  { %v5943_v39 = vpop.eup %5942 }
0x2b0a   :  { %v2032_v41 = vmul.f32 %v5943_v39, %v2030_v38  ;;  %vm2037_vm7 = vweird.f32 %v5943_v39 }
0x2b0b   :  { %vm2038_vm9 = vmor %vm2036_vm8, %vm2037_vm7 }
0x2b0c   :  { %v2033_v51 = vsub.f32 1.0, %v2032_v41 }
0x2b0e   :  { %v2034_v45 = vmul.f32 %v5943_v39, %v2033_v51 }
0x2b10   :  { %v2035_v55 = vadd.f32 %v5943_v39, %v2034_v45 }
0x2b12   :  { %v2039_v58 = vsel %vm2038_vm9, %v5943_v39, %v2035_v55 }
0x2b13   :  { %v2044_v60 = vsel %vm2041_vm10, %v2043_v59, %v2039_v58 }
0x2b14   :  { %v2057_v0 = vsub.f32 1.0, %v2044_v60  ;;  %v2063_v33 = vmul.f32 %v2044_v60, %v1998_v28 }
0x2b68   :  { %v2048_v47 = vpop.permute.xlu1 %2047 }
0x2b69   :  { %v2050_v61 = vmul.f32 %v2048_v47, %v2044_v60  ;;  %v934_v47 = vadd.f32 %v6901_v49, %v6862_v40 }
0x2b6b   :  { %2052 = vrot.lane.b32.xlu2 %v2050_v61, %s6255_s1 }
0x2bc5   :  { %v2053_v62 = vpop.permute.xlu2 %2052 }
0x2bc6   :  { %v2055_v53 = vadd.f32 %v2053_v62, %v756_v36 }
0x2bc8   :  { %5944 = vtanh.f32 %v2055_v53 }
0x2bce   :  { %v5945_v63 = vpop.eup %5944 }
0x2bcf   :  { %2059 = vrot.lane.b32.xlu0 %v5945_v63, %s6257_s30 }
0x2c41   :  { %v2060_v34 = vpop.permute.xlu0 %2059 }
0x2c42   :  { %v2062_v1 = vmul.f32 %v2060_v34, %v2057_v0 }
0x2c44   :  { %v2064_v2 = vadd.f32 %v2063_v33, %v2062_v1 }
0x2c46   :  { %2066 = vrot.lane.b32.xlu1 %v2064_v2, %s6257_s30 }
0x2cb8   :  { %v2067_v35 = vpop.permute.xlu1 %2066 }
0x2cb9   :  { %2069 = vst.msk [vmem:[#allocation2 + $0x4] sm:$0x1] %vm1804_vm15, %v2067_v35  ;;  %5682 = vmatmul.msk.f32.vlgmr.msra.gmra.mxu3 %vm247_vm2, %v2067_v35 }
0x2cba   :  { %2612 = vmatpush.msra.mxu3 %v6799_v10 }
0x2cbc   :  { %2613 = vmatpush.msra.mxu3 %v6804_v11 }
0x2cbe   :  { %2614 = vmatpush.msra.mxu3 %v6811_v12 }
0x2cc0   :  { %2615 = vmatpush.msra.mxu3 %v6819_v19 }
0x2d3c   :  { %v2089_v3 = vpop.f32.mrf.mxu3 }
0x2d3d   :  { %v2090_v4 = vadd.f32 %v2089_v3, %v6854_v27 }
0x2d3f   :  { %2113 = vrot.lane.b32.xlu2 %v2090_v4, %s6255_s1  ;;  %v2092_v5 = vadd.f32 %v2090_v4, %v845_v13 }
0x2d41   :  { %v5683_v46 = vmul.f32 -1.442695, %v2092_v5 }
0x2d43   :  { %5946 = vpow2.f32 %v5683_v46 }
0x2d49   :  { %v5947_v15 = vpop.eup %5946 }
0x2d4a   :  { %v2096_v16 = vadd.f32 1.0, %v5947_v15 }
0x2d4c   :  { %5948 = vrcp.f32 %v2096_v16  ;;  %v2108_v20 = vand.u32 2147483648, %v2096_v16  ;;  %vm2102_vm12 = vweird.f32 %v2096_v16  ;;  %v2106_v23 = vand.u32 2147483647, %v2096_v16 }
0x2d4e   :  { %v2109_v36 = vor.u32 1.1754944e-38, %v2108_v20  ;;  %vm2107_vm14 = vcmp.eq.f32.partialorder %v2106_v23, 8.507059e+37 }
0x2d52   :  { %v5949_v6 = vpop.eup %5948 }
0x2d53   :  { %v2098_v7 = vmul.f32 %v5949_v6, %v2096_v16  ;;  %vm2103_vm11 = vweird.f32 %v5949_v6 }
0x2d54   :  { %vm2104_vm13 = vmor %vm2102_vm12, %vm2103_vm11 }
0x2d55   :  { %v2099_v8 = vsub.f32 1.0, %v2098_v7 }
0x2d57   :  { %v2100_v17 = vmul.f32 %v5949_v6, %v2099_v8 }
0x2d59   :  { %v2101_v28 = vadd.f32 %v5949_v6, %v2100_v17 }
0x2d5b   :  { %v2105_v24 = vsel %vm2104_vm13, %v5949_v6, %v2101_v28 }
0x2d5c   :  { %v2110_v25 = vsel %vm2107_vm14, %v2109_v36, %v2105_v24  ;;  %v1023_v36 = vadd.f32 %v6956_v44, %v6862_v40 }
0x2d5d   :  { %v2123_v41 = vsub.f32 1.0, %v2110_v25  ;;  %v2129_v45 = vmul.f32 %v2110_v25, %v2064_v2 }
0x2d99   :  { %v2114_v31 = vpop.permute.xlu2 %2113 }
0x2d9a   :  { %v2116_v29 = vmul.f32 %v2114_v31, %v2110_v25 }
0x2d9c   :  { %2118 = vrot.lane.b32.xlu0 %v2116_v29, %s6255_s1 }
0x2e0e   :  { %v2119_v21 = vpop.permute.xlu0 %2118 }
0x2e0f   :  { %v2121_v38 = vadd.f32 %v2119_v21, %v845_v13 }
0x2e11   :  { %5950 = vtanh.f32 %v2121_v38 }
0x2e17   :  { %v5951_v39 = vpop.eup %5950 }
0x2e18   :  { %2125 = vrot.lane.b32.xlu1 %v5951_v39, %s6257_s30 }
0x2e8a   :  { %v2126_v51 = vpop.permute.xlu1 %2125 }
0x2e8b   :  { %v2128_v55 = vmul.f32 %v2126_v51, %v2123_v41 }
0x2e8d   :  { %v2130_v32 = vadd.f32 %v2129_v45, %v2128_v55 }
0x2e8f   :  { %2132 = vrot.lane.b32.xlu2 %v2130_v32, %s6257_s30 }
0x2ee9   :  { %v2133_v37 = vpop.permute.xlu2 %2132 }
0x2eea   :  { %2135 = vst.msk [vmem:[#allocation2 + $0x5] sm:$0x1] %vm1804_vm15, %v2133_v37  ;;  %5684 = vmatmul.msk.f32.vlgmr.msrb.gmra.mxu0 %vm247_vm2, %v2133_v37 }
0x2eeb   :  { %2678 = vmatpush.msrb.mxu0 %v6799_v10 }
0x2eed   :  { %2679 = vmatpush.msrb.mxu0 %v6804_v11 }
0x2eef   :  { %2680 = vmatpush.msrb.mxu0 %v6811_v12 }
0x2ef1   :  { %2681 = vmatpush.msrb.mxu0 %v6819_v19 }
0x2f67   :  { %v2155_v58 = vpop.f32.mrf.mxu0 }
0x2f68   :  { %v2156_v59 = vadd.f32 %v2155_v58, %v6854_v27 }
0x2f6a   :  { %2179 = vrot.lane.b32.xlu0 %v2156_v59, %s6255_s1  ;;  %v2158_v60 = vadd.f32 %v2156_v59, %v934_v47 }
0x2f6c   :  { %v5685_v61 = vmul.f32 -1.442695, %v2158_v60 }
0x2f6e   :  { %5952 = vpow2.f32 %v5685_v61 }
0x2f74   :  { %v5953_v62 = vpop.eup %5952 }
0x2f75   :  { %v2162_v53 = vadd.f32 1.0, %v5953_v62 }
0x2f77   :  { %5954 = vrcp.f32 %v2162_v53  ;;  %v2174_v2 = vand.u32 2147483648, %v2162_v53  ;;  %vm2168_vm4 = vweird.f32 %v2162_v53  ;;  %v2172_v35 = vand.u32 2147483647, %v2162_v53 }
0x2f79   :  { %v2175_v4 = vor.u32 1.1754944e-38, %v2174_v2  ;;  %vm2173_vm6 = vcmp.eq.f32.partialorder %v2172_v35, 8.507059e+37 }
0x2f7d   :  { %v5955_v63 = vpop.eup %5954 }
0x2f7e   :  { %v2164_v0 = vmul.f32 %v5955_v63, %v2162_v53  ;;  %vm2169_vm3 = vweird.f32 %v5955_v63 }
0x2f7f   :  { %vm2170_vm5 = vmor %vm2168_vm4, %vm2169_vm3 }
0x2f80   :  { %v2165_v34 = vsub.f32 1.0, %v2164_v0  ;;  %v7029_v0 = vld [vmem:[%s8031_s26] sm:$0xff] }
0x2f82   :  { %v2166_v33 = vmul.f32 %v5955_v63, %v2165_v34 }
0x2f84   :  { %v2167_v1 = vadd.f32 %v5955_v63, %v2166_v33 }
0x2f86   :  { %v2171_v3 = vsel %vm2170_vm5, %v5955_v63, %v2167_v1  ;;  %v1108_v1 = vadd.f32 %v6903_v50, %v6862_v40 }
0x2f87   :  { %v2176_v13 = vsel %vm2173_vm6, %v2175_v4, %v2171_v3 }
0x2f88   :  { %v2189_v6 = vsub.f32 1.0, %v2176_v13  ;;  %v2195_v8 = vmul.f32 %v2176_v13, %v2130_v32 }
0x2fdc   :  { %v2180_v49 = vpop.permute.xlu0 %2179 }
0x2fdd   :  { %v2182_v5 = vmul.f32 %v2180_v49, %v2176_v13 }
0x2fdf   :  { %2184 = vrot.lane.b32.xlu1 %v2182_v5, %s6255_s1 }
0x3051   :  { %v2185_v46 = vpop.permute.xlu1 %2184 }
0x3052   :  { %v2187_v15 = vadd.f32 %v2185_v46, %v934_v47 }
0x3054   :  { %5956 = vtanh.f32 %v2187_v15 }
0x305a   :  { %v5957_v16 = vpop.eup %5956 }
0x305b   :  { %2191 = vrot.lane.b32.xlu2 %v5957_v16, %s6257_s30 }
0x30b5   :  { %v2192_v7 = vpop.permute.xlu2 %2191 }
0x30b6   :  { %v2194_v17 = vmul.f32 %v2192_v7, %v2189_v6 }
0x30b8   :  { %v2196_v28 = vadd.f32 %v2195_v8, %v2194_v17 }
0x30ba   :  { %2198 = vrot.lane.b32.xlu0 %v2196_v28, %s6257_s30 }
0x312c   :  { %v2199_v20 = vpop.permute.xlu0 %2198 }
0x312d   :  { %2201 = vst.msk [vmem:[#allocation2 + $0x6] sm:$0x1] %vm1804_vm15, %v2199_v20  ;;  %5686 = vmatmul.msk.f32.vlgmr.msrb.gmra.mxu2 %vm247_vm2, %v2199_v20 }
0x312e   :  { %2744 = vmatpush.msrb.mxu2 %v6799_v10 }
0x3130   :  { %2745 = vmatpush.msrb.mxu2 %v6804_v11 }
0x3132   :  { %2746 = vmatpush.msrb.mxu2 %v6811_v12 }
0x3134   :  { %2747 = vmatpush.msrb.mxu2 %v6819_v19 }
0x31b0   :  { %v2221_v23 = vpop.f32.mrf.mxu2 }
0x31b1   :  { %v2222_v24 = vadd.f32 %v2221_v23, %v6854_v27 }
0x31b3   :  { %2245 = vrot.lane.b32.xlu1 %v2222_v24, %s6255_s1  ;;  %v2224_v31 = vadd.f32 %v2222_v24, %v1023_v36 }
0x31b5   :  { %v5687_v25 = vmul.f32 -1.442695, %v2224_v31 }
0x31b7   :  { %5958 = vpow2.f32 %v5687_v25 }
0x31bd   :  { %v5959_v29 = vpop.eup %5958 }
0x31be   :  { %v2228_v21 = vadd.f32 1.0, %v5959_v29 }
0x31c0   :  { %5960 = vrcp.f32 %v2228_v21  ;;  %v2240_v19 = vand.u32 2147483648, %v2228_v21  ;;  %vm2234_vm8 = vweird.f32 %v2228_v21  ;;  %v2238_v41 = vand.u32 2147483647, %v2228_v21 }
0x31c2   :  { %v2241_v45 = vor.u32 1.1754944e-38, %v2240_v19  ;;  %vm2239_vm10 = vcmp.eq.f32.partialorder %v2238_v41, 8.507059e+37 }
0x31c6   :  { %v5961_v10 = vpop.eup %5960 }
0x31c7   :  { %v2230_v11 = vmul.f32 %v5961_v10, %v2228_v21  ;;  %vm2235_vm7 = vweird.f32 %v5961_v10 }
0x31c8   :  { %vm2236_vm9 = vmor %vm2234_vm8, %vm2235_vm7 }
0x31c9   :  { %v2231_v38 = vsub.f32 1.0, %v2230_v11  ;;  %v7044_v11 = vld [vmem:[%s8010_s13] sm:$0x1] }
0x31cb   :  { %v2232_v12 = vmul.f32 %v5961_v10, %v2231_v38 }
0x31cd   :  { %v2233_v39 = vadd.f32 %v5961_v10, %v2232_v12  ;;  %v1197_v12 = vadd.f32 %v6958_v48, %v6862_v40 }
0x31cf   :  { %v2237_v51 = vsel %vm2236_vm9, %v5961_v10, %v2233_v39 }
0x31d0   :  { %v2242_v55 = vsel %vm2239_vm10, %v2241_v45, %v2237_v51 }
0x31d1   :  { %v2255_v47 = vsub.f32 1.0, %v2242_v55  ;;  %v2261_v61 = vmul.f32 %v2242_v55, %v2196_v28 }
0x3225   :  { %v2246_v44 = vpop.permute.xlu1 %2245 }
0x3226   :  { %v2248_v32 = vmul.f32 %v2246_v44, %v2242_v55 }
0x3228   :  { %2250 = vrot.lane.b32.xlu2 %v2248_v32, %s6255_s1 }
0x3282   :  { %v2251_v37 = vpop.permute.xlu2 %2250 }
0x3283   :  { %v2253_v58 = vadd.f32 %v2251_v37, %v1023_v36 }
0x3285   :  { %5962 = vtanh.f32 %v2253_v58 }
0x328b   :  { %v5963_v59 = vpop.eup %5962 }
0x328c   :  { %2257 = vrot.lane.b32.xlu0 %v5963_v59, %s6257_s30 }
0x32fe   :  { %v2258_v60 = vpop.permute.xlu0 %2257 }
0x32ff   :  { %v2260_v62 = vmul.f32 %v2258_v60, %v2255_v47 }
0x3301   :  { %v2262_v53 = vadd.f32 %v2261_v61, %v2260_v62 }
0x3303   :  { %2264 = vrot.lane.b32.xlu1 %v2262_v53, %s6257_s30 }
0x3375   :  { %v2265_v63 = vpop.permute.xlu1 %2264 }
0x3376   :  { %2267 = vst.msk [vmem:[#allocation2 + $0x7] sm:$0x1] %vm1804_vm15, %v2265_v63  ;;  %5688 = vmatmul.msk.f32.vlgmr.msra.gmra.mxu1 %vm247_vm2, %v2265_v63 }
0x3377   :  { %2820 = vmatpush.msra.mxu1 %v7029_v0 }
0x33f3   :  { %v2287_v34 = vpop.f32.mrf.mxu1 }
0x33f4   :  { %v2288_v33 = vadd.f32 %v2287_v34, %v6854_v27 }
0x33f6   :  { %2311 = vrot.lane.b32.xlu2 %v2288_v33, %s6255_s1  ;;  %v2290_v2 = vadd.f32 %v2288_v33, %v1108_v1 }
0x33f8   :  { %v5689_v35 = vmul.f32 -1.442695, %v2290_v2 }
0x33fa   :  { %5964 = vpow2.f32 %v5689_v35 }
0x3400   :  { %v5965_v3 = vpop.eup %5964 }
0x3401   :  { %v2294_v4 = vadd.f32 1.0, %v5965_v3 }
0x3403   :  { %5966 = vrcp.f32 %v2294_v4  ;;  %v2306_v16 = vand.u32 2147483648, %v2294_v4  ;;  %vm2300_vm12 = vweird.f32 %v2294_v4  ;;  %v2304_v27 = vand.u32 2147483647, %v2294_v4 }
0x3405   :  { %v2307_v7 = vor.u32 1.1754944e-38, %v2306_v16  ;;  %vm2305_vm14 = vcmp.eq.f32.partialorder %v2304_v27, 8.507059e+37 }
0x3409   :  { %v5967_v49 = vpop.eup %5966 }
0x340a   :  { %v2296_v13 = vmul.f32 %v5967_v49, %v2294_v4  ;;  %vm2301_vm11 = vweird.f32 %v5967_v49 }
0x340b   :  { %vm2302_vm13 = vmor %vm2300_vm12, %vm2301_vm11 }
0x340c   :  { %v2297_v5 = vsub.f32 1.0, %v2296_v13  ;;  %v7061_v13 = vld [vmem:[%s8011_s12] sm:$0x1] }
0x340e   :  { %v2298_v46 = vmul.f32 %v5967_v49, %v2297_v5  ;;  %v1286_v5 = vadd.f32 %v7061_v13, %v6905_v30 }
0x3410   :  { %v2299_v15 = vadd.f32 %v5967_v49, %v2298_v46 }
0x3412   :  { %v2303_v6 = vsel %vm2302_vm13, %v5967_v49, %v2299_v15 }
0x3413   :  { %v2308_v8 = vsel %vm2305_vm14, %v2307_v7, %v2303_v6 }
0x3414   :  { %v2321_v24 = vsub.f32 1.0, %v2308_v8  ;;  %v2327_v31 = vmul.f32 %v2308_v8, %v2262_v53 }
0x3450   :  { %v2312_v50 = vpop.permute.xlu2 %2311 }
0x3451   :  { %v2314_v17 = vmul.f32 %v2312_v50, %v2308_v8 }
0x3453   :  { %2316 = vrot.lane.b32.xlu0 %v2314_v17, %s6255_s1 }
0x34c5   :  { %v2317_v28 = vpop.permute.xlu0 %2316 }
0x34c6   :  { %v2319_v20 = vadd.f32 %v2317_v28, %v1108_v1 }
0x34c8   :  { %5968 = vtanh.f32 %v2319_v20 }
0x34ce   :  { %v5969_v23 = vpop.eup %5968 }
0x34cf   :  { %2323 = vrot.lane.b32.xlu1 %v5969_v23, %s6257_s30 }
0x3541   :  { %v2324_v36 = vpop.permute.xlu1 %2323 }
0x3542   :  { %v2326_v25 = vmul.f32 %v2324_v36, %v2321_v24 }
0x3544   :  { %v2328_v29 = vadd.f32 %v2327_v31, %v2326_v25 }
0x3546   :  { %2330 = vrot.lane.b32.xlu2 %v2328_v29, %s6257_s30 }
0x35a0   :  { %v2331_v21 = vpop.permute.xlu2 %2330 }
0x35a1   :  { %2333 = vst.msk [vmem:[#allocation2 + $0x8] sm:$0x1] %vm1804_vm15, %v2331_v21  ;;  %5690 = vmatmul.msk.f32.vlgmr.msrb.gmra.mxu3 %vm247_vm2, %v2331_v21 }
0x3624   :  { %v2353_v10 = vpop.f32.mrf.mxu3 }
0x3625   :  { %v2354_v38 = vadd.f32 %v7044_v11, %v2353_v10 }
0x3627   :  { %2377 = vrot.lane.b32.xlu0 %v2354_v38, %s6255_s1  ;;  %v2356_v39 = vadd.f32 %v2354_v38, %v1197_v12 }
0x3629   :  { %v5691_v19 = vmul.f32 -1.442695, %v2356_v39 }
0x362b   :  { %5970 = vpow2.f32 %v5691_v19 }
0x3631   :  { %v5971_v41 = vpop.eup %5970 }
0x3632   :  { %v2360_v51 = vadd.f32 1.0, %v5971_v41 }
0x3634   :  { %5972 = vrcp.f32 %v2360_v51  ;;  %v2372_v58 = vand.u32 2147483648, %v2360_v51  ;;  %vm2366_vm4 = vweird.f32 %v2360_v51  ;;  %v2370_v59 = vand.u32 2147483647, %v2360_v51 }
0x3636   :  { %v2373_v60 = vor.u32 1.1754944e-38, %v2372_v58  ;;  %vm2371_vm6 = vcmp.eq.f32.partialorder %v2370_v59, 8.507059e+37 }
0x363a   :  { %v5973_v45 = vpop.eup %5972 }
0x363b   :  { %v2362_v44 = vmul.f32 %v5973_v45, %v2360_v51  ;;  %vm2367_vm3 = vweird.f32 %v5973_v45 }
0x363c   :  { %vm2368_vm5 = vmor %vm2366_vm4, %vm2367_vm3 }
0x363d   :  { %v2363_v55 = vsub.f32 1.0, %v2362_v44 }
0x363f   :  { %v2364_v32 = vmul.f32 %v5973_v45, %v2363_v55 }
0x3641   :  { %v2365_v37 = vadd.f32 %v5973_v45, %v2364_v32 }
0x3643   :  { %v2369_v47 = vsel %vm2368_vm5, %v5973_v45, %v2365_v37  ;;  %v1375_v45 = vadd.f32 %v7061_v13, %v6960_v56 }
0x3644   :  { %v2374_v48 = vsel %vm2371_vm6, %v2373_v60, %v2369_v47 }
0x3645   :  { %v2387_v34 = vsub.f32 1.0, %v2374_v48  ;;  %v2393_v1 = vmul.f32 %v2374_v48, %v2328_v29 }
0x3699   :  { %v2378_v40 = vpop.permute.xlu0 %2377 }
0x369a   :  { %v2380_v61 = vmul.f32 %v2378_v40, %v2374_v48 }
0x369c   :  { %2382 = vrot.lane.b32.xlu1 %v2380_v61, %s6255_s1 }
0x370e   :  { %v2383_v62 = vpop.permute.xlu1 %2382 }
0x370f   :  { %v2385_v53 = vadd.f32 %v2383_v62, %v1197_v12 }
0x3711   :  { %5974 = vtanh.f32 %v2385_v53 }
0x3717   :  { %v5975_v63 = vpop.eup %5974 }
0x3718   :  { %2389 = vrot.lane.b32.xlu2 %v5975_v63, %s6257_s30 }
0x3772   :  { %v2390_v33 = vpop.permute.xlu2 %2389 }
0x3773   :  { %v2392_v2 = vmul.f32 %v2390_v33, %v2387_v34 }
0x3775   :  { %v2394_v35 = vadd.f32 %v2393_v1, %v2392_v2 }
0x3777   :  { %2396 = vrot.lane.b32.xlu0 %v2394_v35, %s6257_s30 }
0x37e9   :  { %v2397_v3 = vpop.permute.xlu0 %2396 }
0x37ea   :  { %2399 = vst.msk [vmem:[#allocation2 + $0x9] sm:$0x1] %vm1804_vm15, %v2397_v3  ;;  %5692 = vmatmul.msk.f32.vlgmr.msra.gmra.mxu0 %vm247_vm2, %v2397_v3 }
0x37eb   :  { %2888 = vmatpush.msra.mxu0 %v7029_v0 }
0x3867   :  { %v2419_v4 = vpop.f32.mrf.mxu0 }
0x3868   :  { %v2420_v49 = vadd.f32 %v7044_v11, %v2419_v4 }
0x386a   :  { %2443 = vrot.lane.b32.xlu1 %v2420_v49, %s6255_s1  ;;  %v2422_v46 = vadd.f32 %v2420_v49, %v1286_v5 }
0x386c   :  { %v5693_v15 = vmul.f32 -1.442695, %v2422_v46 }
0x386e   :  { %5976 = vpow2.f32 %v5693_v15  ;;  %v6216_v15 = vld [vmem:[%s8006_s6] sm:$0xff] }
0x3874   :  { %v5977_v16 = vpop.eup %5976 }
0x3875   :  { %v2426_v27 = vadd.f32 1.0, %v5977_v16 }
0x3877   :  { %5978 = vrcp.f32 %v2426_v27  ;;  %v2438_v17 = vand.u32 2147483648, %v2426_v27  ;;  %vm2432_vm8 = vweird.f32 %v2426_v27  ;;  %v2436_v28 = vand.u32 2147483647, %v2426_v27 }
0x3879   :  { %v2439_v23 = vor.u32 1.1754944e-38, %v2438_v17  ;;  %vm2437_vm10 = vcmp.eq.f32.partialorder %v2436_v28, 8.507059e+37 }
0x387d   :  { %v5979_v0 = vpop.eup %5978 }
0x387e   :  { %v2428_v6 = vmul.f32 %v5979_v0, %v2426_v27  ;;  %vm2433_vm7 = vweird.f32 %v5979_v0 }
0x387f   :  { %vm2434_vm9 = vmor %vm2432_vm8, %vm2433_vm7 }
0x3880   :  { %v2429_v7 = vsub.f32 1.0, %v2428_v6 }
0x3882   :  { %v2430_v50 = vmul.f32 %v5979_v0, %v2429_v7 }
0x3884   :  { %v2431_v8 = vadd.f32 %v5979_v0, %v2430_v50 }
0x3886   :  { %v2435_v20 = vsel %vm2434_vm9, %v5979_v0, %v2431_v8  ;;  %v1464_v0 = vadd.f32 %v7061_v13, %v6907_v52 }
0x3887   :  { %v2440_v24 = vsel %vm2437_vm10, %v2439_v23, %v2435_v20 }
0x3888   :  { %v2453_v21 = vsub.f32 1.0, %v2440_v24  ;;  %v2459_v38 = vmul.f32 %v2440_v24, %v2394_v35 }
0x38dc   :  { %v2444_v30 = vpop.permute.xlu1 %2443 }
0x38dd   :  { %v2446_v36 = vmul.f32 %v2444_v30, %v2440_v24 }
0x38df   :  { %2448 = vrot.lane.b32.xlu2 %v2446_v36, %s6255_s1 }
0x3939   :  { %v2449_v31 = vpop.permute.xlu2 %2448 }
0x393a   :  { %v2451_v25 = vadd.f32 %v2449_v31, %v1286_v5 }
0x393c   :  { %5980 = vtanh.f32 %v2451_v25 }
0x3942   :  { %v5981_v29 = vpop.eup %5980 }
0x3943   :  { %2455 = vrot.lane.b32.xlu0 %v5981_v29, %s6257_s30 }
0x39b5   :  { %v2456_v10 = vpop.permute.xlu0 %2455 }
0x39b6   :  { %v2458_v12 = vmul.f32 %v2456_v10, %v2453_v21  ;;  %v5704_v10 = vld [vmem:[%s8032_s28 + $0x10] sm:$0xff] }
0x39b8   :  { %v2460_v39 = vadd.f32 %v2459_v38, %v2458_v12  ;;  %v7094_v38 = vld [vmem:[%s8036_s2 + $0x18] sm:$0xff]  ;;  %v7100_v12 = vld [vmem:[%s8036_s2 + $0x10] sm:$0xff] }
0x39ba   :  { %2462 = vrot.lane.b32.xlu1 %v2460_v39, %s6257_s30 }
0x3a2c   :  { %v2463_v19 = vpop.permute.xlu1 %2462 }
0x3a2d   :  { %2465 = vst.msk [vmem:[#allocation2 + $0xa] sm:$0x1] %vm1804_vm15, %v2463_v19  ;;  %5694 = vmatmul.msk.f32.vlgmr.msra.gmra.mxu2 %vm247_vm2, %v2463_v19  ;;  %v7109_v19 = vld [vmem:[%s8036_s2 + $0x8] sm:$0xff] }
0x3ab0   :  { %v2485_v41 = vpop.f32.mrf.mxu2 }
0x3ab1   :  { %v2486_v51 = vadd.f32 %v7044_v11, %v2485_v41  ;;  %v7115_v41 = vld [vmem:[%s8036_s2] sm:$0xff] }
0x3ab3   :  { %2509 = vrot.lane.b32.xlu2 %v2486_v51, %s6255_s1  ;;  %v2488_v44 = vadd.f32 %v2486_v51, %v1375_v45 }
0x3ab5   :  { %v5695_v55 = vmul.f32 -1.442695, %v2488_v44 }
0x3ab7   :  { %5982 = vpow2.f32 %v5695_v55 }
0x3abd   :  { %v5983_v32 = vpop.eup %5982 }
0x3abe   :  { %v2492_v37 = vadd.f32 1.0, %v5983_v32 }
0x3ac0   :  { %5984 = vrcp.f32 %v2492_v37  ;;  %v2504_v48 = vand.u32 2147483648, %v2492_v37  ;;  %vm2498_vm12 = vweird.f32 %v2492_v37  ;;  %v2502_v61 = vand.u32 2147483647, %v2492_v37 }
0x3ac2   :  { %v2505_v53 = vor.u32 1.1754944e-38, %v2504_v48  ;;  %vm2503_vm14 = vcmp.eq.f32.partialorder %v2502_v61, 8.507059e+37  ;;  %v7129_v48 = vld [vmem:[%s8008_s10 + $0x18] sm:$0xff]  ;;  %v7135_v61 = vld [vmem:[%s8008_s10 + $0x10] sm:$0xff] }
0x3ac6   :  { %v5985_v58 = vpop.eup %5984 }
0x3ac7   :  { %v2494_v59 = vmul.f32 %v5985_v58, %v2492_v37  ;;  %vm2499_vm11 = vweird.f32 %v5985_v58 }
0x3ac8   :  { %vm2500_vm13 = vmor %vm2498_vm12, %vm2499_vm11 }
0x3ac9   :  { %v2495_v47 = vsub.f32 1.0, %v2494_v59 }
0x3acb   :  { %v2496_v60 = vmul.f32 %v5985_v58, %v2495_v47 }
0x3acd   :  { %v2497_v40 = vadd.f32 %v5985_v58, %v2496_v60 }
0x3acf   :  { %v2501_v62 = vsel %vm2500_vm13, %v5985_v58, %v2497_v40 }
0x3ad0   :  { %v2506_v63 = vsel %vm2503_vm14, %v2505_v53, %v2501_v62  ;;  %v7141_v62 = vld [vmem:[%s8008_s10 + $0x8] sm:$0xff]  ;;  %v7147_v53 = vld [vmem:[%s8008_s10] sm:$0xff] }
0x3ad1   :  { %v2519_v35 = vsub.f32 1.0, %v2506_v63  ;;  %v2525_v4 = vmul.f32 %v2506_v63, %v2460_v39  ;;  %v5705_v39 = vld [vmem:[%s8032_s28 + $0x18] sm:$0xff] }
0x3b0d   :  { %v2510_v56 = vpop.permute.xlu2 %2509 }
0x3b0e   :  { %v2512_v34 = vmul.f32 %v2510_v56, %v2506_v63  ;;  %v6225_v56 = vld [vmem:[%s8034_s29] sm:$0xff]  ;;  %v6226_v63 = vld [vmem:[%s8034_s29 + $0x8] sm:$0xff] }
0x3b10   :  { %2514 = vrot.lane.b32.xlu0 %v2512_v34, %s6255_s1  ;;  %v6227_v34 = vld [vmem:[%s8034_s29 + $0x10] sm:$0xff] }
0x3b82   :  { %v2515_v33 = vpop.permute.xlu0 %2514 }
0x3b83   :  { %v2517_v1 = vadd.f32 %v2515_v33, %v1375_v45  ;;  %v6228_v33 = vld [vmem:[%s8034_s29 + $0x18] sm:$0xff] }
0x3b85   :  { %5986 = vtanh.f32 %v2517_v1 }
0x3b8b   :  { %v5987_v2 = vpop.eup %5986 }
0x3b8c   :  { %2521 = vrot.lane.b32.xlu1 %v5987_v2, %s6257_s30 }
0x3bfe   :  { %v2522_v3 = vpop.permute.xlu1 %2521 }
0x3bff   :  { %v2524_v49 = vmul.f32 %v2522_v3, %v2519_v35  ;;  %v1553_v35 = vadd.f32 %v7061_v13, %v6962_v57 }
0x3c01   :  { %v2526_v5 = vadd.f32 %v2525_v4, %v2524_v49 }
0x3c03   :  { %2528 = vrot.lane.b32.xlu2 %v2526_v5, %s6257_s30 }
0x3c5d   :  { %v2529_v46 = vpop.permute.xlu2 %2528 }
0x3c5e   :  { %2531 = vst.msk [vmem:[#allocation2 + $0xb] sm:$0x1] %vm1804_vm15, %v2529_v46  ;;  %5696 = vmatmul.msk.f32.vlgmr.msrb.gmra.mxu1 %vm247_vm2, %v2529_v46 }
0x3c5f   :  { %2948 = vmatpush.msrb.mxu1 %v6216_v15 }
0x3c66   :  { %5706 = vmatmul.msk.f32.vlgmr.msra.gmra.mxu1 %vm100_vm0, %v5704_v10 }
0x3c67   :  { %3060 = vmatpush.msra.mxu1 %v7094_v38 }
0x3c69   :  { %3061 = vmatpush.msra.mxu1 %v7100_v12 }
0x3c6b   :  { %3062 = vmatpush.msra.mxu1 %v7109_v19 }
0x3c6d   :  { %3063 = vmatpush.msra.mxu1 %v7115_v41 }
0x3c6e   :  { %5707 = vmatmul.msk.f32.gmra.mxu1 %vm100_vm0, %v5705_v39 }
0x3cdb   :  { %v2551_v16 = vpop.f32.mrf.mxu1 }
0x3cdc   :  { %v2552_v27 = vadd.f32 %v7044_v11, %v2551_v16 }
0x3cde   :  { %2575 = vrot.lane.b32.xlu0 %v2552_v27, %s6255_s1  ;;  %v2554_v6 = vadd.f32 %v2552_v27, %v1464_v0 }
0x3ce0   :  { %v5697_v7 = vmul.f32 -1.442695, %v2554_v6 }
0x3ce2   :  { %5988 = vpow2.f32 %v5697_v7 }
0x3ce3   :  { %v2822_v47 = vpop.f32.mrf.mxu1 }
0x3ce8   :  { %v5989_v50 = vpop.eup %5988 }
0x3ce9   :  { %v2558_v8 = vadd.f32 1.0, %v5989_v50 }
0x3ceb   :  { %5990 = vrcp.f32 %v2558_v8  ;;  %v2570_v24 = vand.u32 2147483648, %v2558_v8  ;;  %vm2564_vm4 = vweird.f32 %v2558_v8  ;;  %v2568_v36 = vand.u32 2147483647, %v2558_v8  ;;  %v2825_v60 = vpop.f32.mrf.mxu1 }
0x3cec   :  { %2842 = vmatpush.msrb.mxu3 %v2825_v60 }
0x3ced   :  { %v2571_v25 = vor.u32 1.1754944e-38, %v2570_v24  ;;  %vm2569_vm6 = vcmp.eq.f32.partialorder %v2568_v36, 8.507059e+37 }
0x3cee   :  { %2843 = vmatpush.msrb.mxu3 %v2822_v47 }
0x3cf1   :  { %v5991_v17 = vpop.eup %5990 }
0x3cf2   :  { %v2560_v28 = vmul.f32 %v5991_v17, %v2558_v8  ;;  %vm2565_vm3 = vweird.f32 %v5991_v17 }
0x3cf3   :  { %vm2566_vm5 = vmor %vm2564_vm4, %vm2565_vm3 }
0x3cf4   :  { %v2561_v20 = vsub.f32 1.0, %v2560_v28 }
0x3cf6   :  { %v2562_v23 = vmul.f32 %v5991_v17, %v2561_v20 }
0x3cf8   :  { %v2563_v30 = vadd.f32 %v5991_v17, %v2562_v23 }
0x3cfa   :  { %v2567_v31 = vsel %vm2566_vm5, %v5991_v17, %v2563_v30 }
0x3cfb   :  { %v2572_v29 = vsel %vm2569_vm6, %v2571_v25, %v2567_v31 }
0x3cfc   :  { %v2585_v55 = vsub.f32 1.0, %v2572_v29  ;;  %v2591_v37 = vmul.f32 %v2572_v29, %v2526_v5 }
0x3d50   :  { %v2576_v52 = vpop.permute.xlu0 %2575 }
0x3d51   :  { %v2578_v21 = vmul.f32 %v2576_v52, %v2572_v29 }
0x3d53   :  { %2580 = vrot.lane.b32.xlu1 %v2578_v21, %s6255_s1 }
0x3dc5   :  { %v2581_v51 = vpop.permute.xlu1 %2580 }
0x3dc6   :  { %v2583_v45 = vadd.f32 %v2581_v51, %v1464_v0 }
0x3dc8   :  { %5992 = vtanh.f32 %v2583_v45 }
0x3dce   :  { %v5993_v44 = vpop.eup %5992 }
0x3dcf   :  { %2587 = vrot.lane.b32.xlu2 %v5993_v44, %s6257_s30 }
0x3e29   :  { %v2588_v32 = vpop.permute.xlu2 %2587 }
0x3e2a   :  { %v2590_v58 = vmul.f32 %v2588_v32, %v2585_v55 }
0x3e2c   :  { %v7120_v59 = vadd.f32 %v2591_v37, %v2590_v58 }
0x3e2e   :  { %2594 = vrot.lane.b32.xlu0 %v7120_v59, %s6257_s30 }
0x3ea0   :  { %v2595_v40 = vpop.permute.xlu0 %2594 }
0x3ea1   :  { %2597 = vst.msk [vmem:[#allocation2 + $0xc] sm:$0x1] %vm1804_vm15, %v2595_v40  ;;  %5698 = vmatmul.msk.f32.vlgmr.msra.gmra.mxu3 %vm247_vm2, %v2595_v40 }
0x3ea2   :  { %3129 = vmatpush.msra.mxu3 %v7129_v48 }
0x3ea4   :  { %3130 = vmatpush.msra.mxu3 %v7135_v61 }
0x3ea6   :  { %3131 = vmatpush.msra.mxu3 %v7141_v62 }
0x3ea8   :  { %3132 = vmatpush.msra.mxu3 %v7147_v53 }
0x3ea9   :  { %5708 = vmatmul.msk.f32.vlgmr.msrb.gmra.mxu3 %vm150_vm1, %v6225_v56 }
0x3eaa   :  { %3307 = vmatpush.msrb.mxu3 %v7129_v48 }
0x3eac   :  { %3308 = vmatpush.msrb.mxu3 %v7135_v61 }
0x3eae   :  { %3309 = vmatpush.msrb.mxu3 %v7141_v62 }
0x3eb0   :  { %3310 = vmatpush.msrb.mxu3 %v7147_v53 }
0x3eb1   :  { %5709 = vmatmul.msk.f32.gmra.mxu3 %vm150_vm1, %v6226_v63 }
0x3eb9   :  { %5710 = vmatmul.msk.f32.gmra.mxu3 %vm150_vm1, %v6227_v34 }
0x3ec1   :  { %5711 = vmatmul.msk.f32.gmra.mxu3 %vm150_vm1, %v6228_v33 }
0x3f24   :  { %v2617_v1 = vpop.f32.mrf.mxu3 }
0x3f25   :  { %v2618_v2 = vadd.f32 %v7044_v11, %v2617_v1 }
0x3f27   :  { %2641 = vrot.lane.b32.xlu1 %v2618_v2, %s6255_s1  ;;  %v2620_v3 = vadd.f32 %v2618_v2, %v1553_v35 }
0x3f29   :  { %v5699_v4 = vmul.f32 -1.442695, %v2620_v3 }
0x3f2b   :  { %5994 = vpow2.f32 %v5699_v4 }
0x3f2c   :  { %v2845_v29 = vpop.f32.mrf.mxu3 }
0x3f2d   :  { %v2846_v10 = vadd.f32 %v2845_v29, %v6407_v14 }
0x3f2f   :  { %v2857_v51 = vmax.f32 %v2846_v10, 0.0 }
0x3f31   :  { %v5995_v49 = vpop.eup %5994 }
0x3f32   :  { %v2624_v5 = vadd.f32 1.0, %v5995_v49 }
0x3f34   :  { %5996 = vrcp.f32 %v2624_v5  ;;  %v2636_v6 = vand.u32 2147483648, %v2624_v5  ;;  %vm2630_vm7 = vweird.f32 %v2624_v5  ;;  %v2634_v7 = vand.u32 2147483647, %v2624_v5  ;;  %v2848_v39 = vpop.f32.mrf.mxu3 }
0x3f35   :  { %v2849_v45 = vadd.f32 %v2848_v39, %v6411_v18 }
0x3f36   :  { %v2637_v8 = vor.u32 1.1754944e-38, %v2636_v6  ;;  %vm2635_vm9 = vcmp.eq.f32.partialorder %v2634_v7, 8.507059e+37 }
0x3f37   :  { %v2858_v14 = vmax.f32 %v2849_v45, 0.0  ;;  %v7257_v45 = vld [vmem:[%s8005_s8] ss:$0 sm:$0xff] }
0x3f3a   :  { %v5997_v46 = vpop.eup %5996 }
0x3f3b   :  { %v2626_v15 = vmul.f32 %v5997_v46, %v2624_v5  ;;  %vm2631_vm1 = vweird.f32 %v5997_v46 }
0x3f3c   :  { %vm2632_vm8 = vmor %vm2630_vm7, %vm2631_vm1  ;;  %v2851_v44 = vpop.f32.mrf.mxu3 }
0x3f3d   :  { %v2627_v16 = vsub.f32 1.0, %v2626_v15  ;;  %v2852_v55 = vadd.f32 %v2851_v44, %v6415_v22  ;;  %v1642_v22 = vadd.f32 %v7061_v13, %v6909_v54 }
0x3f3f   :  { %v2628_v27 = vmul.f32 %v5997_v46, %v2627_v16  ;;  %v2859_v32 = vmax.f32 %v2852_v55, 0.0 }
0x3f41   :  { %v2629_v0 = vadd.f32 %v5997_v46, %v2628_v27 }
0x3f43   :  { %v2633_v50 = vsel %vm2632_vm8, %v5997_v46, %v2629_v0 }
0x3f44   :  { %v2638_v17 = vsel %vm2635_vm9, %v2637_v8, %v2633_v50  ;;  %v2854_v37 = vpop.f32.mrf.mxu3 }
0x3f45   :  { %v2651_v24 = vsub.f32 1.0, %v2638_v17  ;;  %v2657_v31 = vmul.f32 %v2638_v17, %v7120_v59  ;;  %v2855_v58 = vadd.f32 %v2854_v37, %v6419_v26 }
0x3f47   :  { %v2860_v59 = vmax.f32 %v2855_v58, 0.0 }
0x3f99   :  { %v2642_v57 = vpop.permute.xlu1 %2641 }
0x3f9a   :  { %v2644_v28 = vmul.f32 %v2642_v57, %v2638_v17 }
0x3f9c   :  { %2646 = vrot.lane.b32.xlu2 %v2644_v28, %s6255_s1 }
0x3ff6   :  { %v2647_v20 = vpop.permute.xlu2 %2646 }
0x3ff7   :  { %v2649_v23 = vadd.f32 %v2647_v20, %v1553_v35  ;;  %v6229_v20 = vld [vmem:[%s8003_s4] sm:$0xff] }
0x3ff9   :  { %5998 = vtanh.f32 %v2649_v23  ;;  %v6230_v23 = vld [vmem:[%s8003_s4 + $0x8] sm:$0xff] }
0x3fff   :  { %v5999_v30 = vpop.eup %5998 }
0x4000   :  { %2653 = vrot.lane.b32.xlu0 %v5999_v30, %s6257_s30  ;;  %v2956_v30 = vld [vmem:[%s8004_s14] sm:$0x3] }
0x4072   :  { %v2654_v36 = vpop.permute.xlu0 %2653 }
0x4073   :  { %v2656_v25 = vmul.f32 %v2654_v36, %v2651_v24  ;;  %v2958_v24 = vrot.slane %v2956_v30, 1 }
0x4075   :  { %v7177_v52 = vadd.f32 %v2657_v31, %v2656_v25 }
0x4077   :  { %2660 = vrot.lane.b32.xlu1 %v7177_v52, %s6257_s30 }
0x40e9   :  { %v2661_v21 = vpop.permute.xlu1 %2660 }
0x40ea   :  { %2663 = vst.msk [vmem:[#allocation2 + $0xd] sm:$0x1] %vm1804_vm15, %v2661_v21  ;;  %5700 = vmatmul.msk.f32.vlgmr.msrb.gmra.mxu0 %vm247_vm2, %v2661_v21 }
0x40eb   :  { %3149 = vmatpush.msrb.mxu0 %v7094_v38 }
0x40ed   :  { %3150 = vmatpush.msrb.mxu0 %v7100_v12 }
0x40ef   :  { %3151 = vmatpush.msrb.mxu0 %v7109_v19 }
0x40f1   :  { %3152 = vmatpush.msrb.mxu0 %v7115_v41 }
0x40f2   :  { %5712 = vmatmul.msk.f32.vlgmr.msra.gmra.mxu0 %vm100_vm0, %v2857_v51 }
0x40f3   :  { %3327 = vmatpush.msra.mxu0 %v7094_v38 }
0x40f5   :  { %3328 = vmatpush.msra.mxu0 %v7100_v12 }
0x40f7   :  { %3329 = vmatpush.msra.mxu0 %v7109_v19 }
0x40f9   :  { %3330 = vmatpush.msra.mxu0 %v7115_v41 }
0x40fa   :  { %5713 = vmatmul.msk.f32.gmra.mxu0 %vm100_vm0, %v2858_v14 }
0x4102   :  { %5714 = vmatmul.msk.f32.gmra.mxu0 %vm100_vm0, %v2859_v32 }
0x410a   :  { %5715 = vmatmul.msk.f32.gmra.mxu0 %vm100_vm0, %v2860_v59 }
0x4167   :  { %v2683_v18 = vpop.f32.mrf.mxu0 }
0x4168   :  { %v2684_v47 = vadd.f32 %v7044_v11, %v2683_v18 }
0x416a   :  { %2707 = vrot.lane.b32.xlu2 %v2684_v47, %s6255_s1  ;;  %v2686_v26 = vadd.f32 %v2684_v47, %v1642_v22 }
0x416c   :  { %v5701_v34 = vmul.f32 -1.442695, %v2686_v26 }
0x416e   :  { %6000 = vpow2.f32 %v5701_v34 }
0x416f   :  { %v2890_v60 = vpop.f32.mrf.mxu0 }
0x4174   :  { %v6001_v33 = vpop.eup %6000 }
0x4175   :  { %v2690_v1 = vadd.f32 1.0, %v6001_v33 }
0x4177   :  { %v2893_v40 = vpop.f32.mrf.mxu0  ;;  %6002 = vrcp.f32 %v2690_v1  ;;  %v2702_v49 = vand.u32 2147483648, %v2690_v1  ;;  %vm2696_vm11 = vweird.f32 %v2690_v1  ;;  %v2700_v5 = vand.u32 2147483647, %v2690_v1 }
0x4179   :  { %v2703_v15 = vor.u32 1.1754944e-38, %v2702_v49  ;;  %vm2701_vm13 = vcmp.eq.f32.partialorder %v2700_v5, 8.507059e+37 }
0x417d   :  { %v6003_v11 = vpop.eup %6002 }
0x417e   :  { %v2692_v2 = vmul.f32 %v6003_v11, %v2690_v1  ;;  %vm2697_vm10 = vweird.f32 %v6003_v11 }
0x417f   :  { %v2896_v56 = vpop.f32.mrf.mxu0  ;;  %vm2698_vm12 = vmor %vm2696_vm11, %vm2697_vm10 }
0x4180   :  { %v2693_v35 = vsub.f32 1.0, %v2692_v2 }
0x4182   :  { %v2694_v3 = vmul.f32 %v6003_v11, %v2693_v35 }
0x4184   :  { %v2695_v4 = vadd.f32 %v6003_v11, %v2694_v3 }
0x4186   :  { %v2699_v46 = vsel %vm2698_vm12, %v6003_v11, %v2695_v4 }
0x4187   :  { %v2899_v63 = vpop.f32.mrf.mxu0  ;;  %v2704_v13 = vsel %vm2701_vm13, %v2703_v15, %v2699_v46 }
0x4188   :  { %2914 = vmatpush.msra.mxu2 %v2899_v63  ;;  %v2717_v7 = vsub.f32 1.0, %v2704_v13  ;;  %v2723_v8 = vmul.f32 %v2704_v13, %v7177_v52 }
0x418a   :  { %2915 = vmatpush.msra.mxu2 %v2896_v56 }
0x418c   :  { %2916 = vmatpush.msra.mxu2 %v2893_v40 }
0x418e   :  { %2917 = vmatpush.msra.mxu2 %v2890_v60 }
0x41c4   :  { %v2708_v54 = vpop.permute.xlu2 %2707 }
0x41c5   :  { %v2710_v16 = vmul.f32 %v2708_v54, %v2704_v13 }
0x41c7   :  { %2712 = vrot.lane.b32.xlu0 %v2710_v16, %s6255_s1 }
0x4239   :  { %v2713_v27 = vpop.permute.xlu0 %2712 }
0x423a   :  { %v2715_v0 = vadd.f32 %v2713_v27, %v1642_v22 }
0x423c   :  { %6004 = vtanh.f32 %v2715_v0 }
0x4242   :  { %v6005_v6 = vpop.eup %6004 }
0x4243   :  { %2719 = vrot.lane.b32.xlu1 %v6005_v6, %s6257_s30 }
0x42b5   :  { %v2720_v50 = vpop.permute.xlu1 %2719 }
0x42b6   :  { %v2722_v57 = vmul.f32 %v2720_v50, %v2717_v7 }
0x42b8   :  { %v7206_v17 = vadd.f32 %v2723_v8, %v2722_v57 }
0x42ba   :  { %2726 = vrot.lane.b32.xlu2 %v7206_v17, %s6257_s30 }
0x4314   :  { %v2727_v28 = vpop.permute.xlu2 %2726 }
0x4315   :  { %2729 = vst.msk [vmem:[#allocation2 + $0xe] sm:$0x1] %vm1804_vm15, %v2727_v28  ;;  %5702 = vmatmul.msk.f32.vlgmr.msrb.gmra.mxu2 %vm247_vm2, %v2727_v28 }
0x4316   :  { %2973 = vmatpush.msrb.mxu2 %v7094_v38 }
0x4318   :  { %2974 = vmatpush.msrb.mxu2 %v7100_v12 }
0x431a   :  { %2975 = vmatpush.msrb.mxu2 %v7109_v19 }
0x431c   :  { %2976 = vmatpush.msrb.mxu2 %v7115_v41 }
0x431d   :  { %5716 = vmatmul.msk.f32.vlgmr.msra.gmra.mxu2 %vm247_vm2, %v6229_v20 }
0x431e   :  { %3040 = vmatpush.msra.mxu2 %v7129_v48 }
0x4320   :  { %3041 = vmatpush.msra.mxu2 %v7135_v61 }
0x4322   :  { %3042 = vmatpush.msra.mxu2 %v7141_v62 }
0x4324   :  { %3043 = vmatpush.msra.mxu2 %v7147_v53 }
0x4325   :  { %5717 = vmatmul.msk.f32.gmra.mxu2 %vm247_vm2, %v6230_v23 }
0x432d   :  { %5720 = vmatmul.msk.f32.vlgmr.msrb.gmra.mxu2 %vm247_vm2, %v2958_v24 }
0x432e   :  { %3218 = vmatpush.msrb.mxu2 %v7129_v48 }
0x4330   :  { %3219 = vmatpush.msrb.mxu2 %v7135_v61 }
0x4332   :  { %3220 = vmatpush.msrb.mxu2 %v7141_v62 }
0x4334   :  { %3221 = vmatpush.msrb.mxu2 %v7147_v53 }
0x4398   :  { %v7236_v36 = vpop.f32.mrf.mxu2 }
0x43a0   :  { %v2919_v31 = vpop.f32.mrf.mxu2 }
0x43a1   :  { %v2920_v25 = vadd.f32 %v2919_v31, %v6477_v43  ;;  %v7249_v43 = vld [vmem:[%s8007_s9] sm:$0x1] }
0x43a3   :  { %v2925_v52 = vmax.f32 %v2920_v25, 0.0 }
0x43a5   :  { %5718 = vmatmul.msk.f32.vlgmr.msrb.gmra.mxu1 %vm100_vm0, %v2925_v52 }
0x43a6   :  { %3238 = vmatpush.msrb.mxu1 %v7094_v38 }
0x43a8   :  { %v2922_v29 = vpop.f32.mrf.mxu2  ;;  %3239 = vmatpush.msrb.mxu1 %v7100_v12 }
0x43a9   :  { %v2923_v21 = vadd.f32 %v2922_v29, %v6507_v9 }
0x43aa   :  { %3240 = vmatpush.msrb.mxu1 %v7109_v19 }
0x43ab   :  { %v2926_v10 = vmax.f32 %v2923_v21, 0.0 }
0x43ac   :  { %3241 = vmatpush.msrb.mxu1 %v7115_v41 }
0x43ad   :  { %5719 = vmatmul.msk.f32.gmra.mxu1 %vm100_vm0, %v2926_v10 }
0x43b0   :  { %v2978_v39 = vpop.f32.mrf.mxu2 }
0x43b1   :  { %v2979_v51 = vadd.f32 %v7249_v43, %v2978_v39 }
0x43b3   :  { %3002 = vrot.lane.b32.xlu0 %v2979_v51, %s6255_s1 }
0x43bb   :  { %3018 = vrot.lane.b32.xlu0 %v2958_v24, %s6256_s24 }
0x4422   :  { %v2950_v9 = vpop.f32.mrf.mxu1 }
0x4423   :  { %v7260_v44 = vadd.f32 %v7257_v45, %v2950_v9 }
0x4425   :  { %v2981_v14 = vadd.f32 %v2979_v51, %v7260_v44  ;;  %v3003_v26 = vpop.permute.xlu0 %3002 }
0x4427   :  { %v5721_v55 = vmul.f32 -1.442695, %v2981_v14 }
0x4429   :  { %6006 = vpow2.f32 %v5721_v55 }
0x442a   :  { %v7277_v54 = vpop.f32.mrf.mxu1 }
0x442d   :  { %v3019_v35 = vpop.permute.xlu0 %3018 }
0x442f   :  { %v6007_v32 = vpop.eup %6006 }
0x4430   :  { %v2985_v37 = vadd.f32 1.0, %v6007_v32 }
0x4432   :  { %6008 = vrcp.f32 %v2985_v37  ;;  %v2997_v47 = vand.u32 2147483648, %v2985_v37  ;;  %v2995_v40 = vand.u32 2147483647, %v2985_v37  ;;  %vm2991_vm14 = vweird.f32 %v2985_v37 }
0x4434   :  { %v2998_v63 = vor.u32 1.1754944e-38, %v2997_v47  ;;  %vm2996_vm4 = vcmp.eq.f32.partialorder %v2995_v40, 8.507059e+37 }
0x4438   :  { %v6009_v58 = vpop.eup %6008 }
0x4439   :  { %v2987_v59 = vmul.f32 %v6009_v58, %v2985_v37  ;;  %vm2992_vm0 = vweird.f32 %v6009_v58 }
0x443a   :  { %vm2993_vm3 = vmor %vm2991_vm14, %vm2992_vm0 }
0x443b   :  { %v2988_v18 = vsub.f32 1.0, %v2987_v59 }
0x443d   :  { %v2989_v60 = vmul.f32 %v6009_v58, %v2988_v18 }
0x443f   :  { %v2990_v56 = vadd.f32 %v6009_v58, %v2989_v60 }
0x4441   :  { %v2994_v22 = vsel %vm2993_vm3, %v6009_v58, %v2990_v56 }
0x4442   :  { %v2999_v34 = vsel %vm2996_vm4, %v2998_v63, %v2994_v22 }
0x4443   :  { %v3005_v33 = vmul.f32 %v3003_v26, %v2999_v34  ;;  %v3012_v3 = vsub.f32 1.0, %v2999_v34  ;;  %v3021_v49 = vmul.f32 %v3019_v35, %v2999_v34 }
0x4445   :  { %3007 = vrot.lane.b32.xlu1 %v3005_v33, %s6255_s1 }
0x44b7   :  { %v3008_v1 = vpop.permute.xlu1 %3007 }
0x44b8   :  { %v3010_v11 = vadd.f32 %v3008_v1, %v7260_v44 }
0x44ba   :  { %6010 = vtanh.f32 %v3010_v11 }
0x44c0   :  { %v6011_v2 = vpop.eup %6010 }
0x44c1   :  { %3014 = vrot.lane.b32.xlu2 %v6011_v2, %s6257_s30 }
0x451b   :  { %v3015_v4 = vpop.permute.xlu2 %3014 }
0x451c   :  { %v3017_v5 = vmul.f32 %v3015_v4, %v3012_v3 }
0x451e   :  { %v3022_v46 = vadd.f32 %v3021_v49, %v3017_v5 }
0x4520   :  { %3024 = vrot.lane.b32.xlu1 %v3022_v46, %s6257_s30  ;;  %v3107_v25 = vrot.slane %v3022_v46, 7 }
0x4592   :  { %v3025_v15 = vpop.permute.xlu1 %3024 }
0x4593   :  { %5722 = vmatmul.msk.f32.vlgmr.msra.gmra.mxu2 %vm247_vm2, %v3025_v15  ;;  %5723 = vmatmul.msk.f32.vlgmr.msra.gmra.mxu1 %vm247_vm2, %v3025_v15 }
0x4594   :  { %3396 = vmatpush.msra.mxu2 %v7129_v48  ;;  %3416 = vmatpush.msra.mxu1 %v7094_v38 }
0x4596   :  { %3397 = vmatpush.msra.mxu2 %v7135_v61  ;;  %3417 = vmatpush.msra.mxu1 %v7100_v12 }
0x4598   :  { %3398 = vmatpush.msra.mxu2 %v7141_v62  ;;  %3418 = vmatpush.msra.mxu1 %v7109_v19 }
0x459a   :  { %3399 = vmatpush.msra.mxu2 %v7147_v53  ;;  %3419 = vmatpush.msra.mxu1 %v7115_v41 }
0x4610   :  { %v3065_v13 = vpop.f32.mrf.mxu1 }
0x4611   :  { %v3066_v16 = vadd.f32 %v7249_v43, %v3065_v13 }
0x4613   :  { %v3069_v27 = vrot.slane %v3066_v16, 7 }
0x4615   :  { %v3071_v0 = vadd.f32 %v3069_v27, %v7260_v44  ;;  %3091 = vrot.lane.b32.xlu2 %v3069_v27, %s6255_s1 }
0x4617   :  { %v5724_v6 = vmul.f32 -1.442695, %v3071_v0 }
0x4619   :  { %6012 = vpow2.f32 %v5724_v6 }
0x461f   :  { %v6013_v7 = vpop.eup %6012 }
0x4620   :  { %v3075_v50 = vadd.f32 1.0, %v6013_v7 }
0x4622   :  { %6014 = vrcp.f32 %v3075_v50  ;;  %v3087_v20 = vand.u32 2147483648, %v3075_v50  ;;  %v3085_v30 = vand.u32 2147483647, %v3075_v50  ;;  %vm3081_vm6 = vweird.f32 %v3075_v50 }
0x4624   :  { %v3088_v31 = vor.u32 1.1754944e-38, %v3087_v20  ;;  %vm3086_vm7 = vcmp.eq.f32.partialorder %v3085_v30, 8.507059e+37 }
0x4628   :  { %v6015_v8 = vpop.eup %6014 }
0x4629   :  { %v3077_v57 = vmul.f32 %v6015_v8, %v3075_v50  ;;  %vm3082_vm5 = vweird.f32 %v6015_v8 }
0x462a   :  { %vm3083_vm1 = vmor %vm3081_vm6, %vm3082_vm5 }
0x462b   :  { %v3078_v28 = vsub.f32 1.0, %v3077_v57 }
0x462d   :  { %v3079_v23 = vmul.f32 %v6015_v8, %v3078_v28 }
0x462f   :  { %v3080_v24 = vadd.f32 %v6015_v8, %v3079_v23 }
0x4631   :  { %v3084_v52 = vsel %vm3083_vm1, %v6015_v8, %v3080_v24 }
0x4632   :  { %v3089_v29 = vsel %vm3086_vm7, %v3088_v31, %v3084_v52 }
0x4633   :  { %v3109_v21 = vmul.f32 %v3107_v25, %v3089_v29  ;;  %v3101_v55 = vsub.f32 1.0, %v3089_v29 }
0x466f   :  { %v3092_v10 = vpop.permute.xlu2 %3091 }
0x4670   :  { %v3094_v39 = vmul.f32 %v3092_v10, %v3089_v29 }
0x4672   :  { %3096 = vrot.lane.b32.xlu0 %v3094_v39, %s6255_s1 }
0x46e4   :  { %v3097_v51 = vpop.permute.xlu0 %3096 }
0x46e5   :  { %v3099_v9 = vadd.f32 %v3097_v51, %v7260_v44 }
0x46e7   :  { %6016 = vtanh.f32 %v3099_v9 }
0x46ed   :  { %v6017_v14 = vpop.eup %6016 }
0x46ee   :  { %3103 = vrot.lane.b32.xlu1 %v6017_v14, %s6257_s30 }
0x4760   :  { %v3104_v32 = vpop.permute.xlu1 %3103 }
0x4761   :  { %v3106_v37 = vmul.f32 %v3104_v32, %v3101_v55 }
0x4763   :  { %v3110_v58 = vadd.f32 %v3109_v21, %v3106_v37 }
0x4765   :  { %v3112_v59 = vrot.slane %v3110_v58, 1  ;;  %v3196_v0 = vrot.slane %v3110_v58, 7 }
0x4767   :  { %3113 = vrot.lane.b32.xlu2 %v3112_v59, %s6257_s30 }
0x47c1   :  { %v3114_v18 = vpop.permute.xlu2 %3113 }
0x47c2   :  { %5725 = vmatmul.msk.f32.vlgmr.msra.gmra.mxu3 %vm247_vm2, %v3114_v18  ;;  %5726 = vmatmul.msk.f32.vlgmr.msrb.gmra.mxu0 %vm247_vm2, %v3114_v18 }
0x47c3   :  { %3485 = vmatpush.msra.mxu3 %v7129_v48  ;;  %3505 = vmatpush.msrb.mxu0 %v7094_v38 }
0x47c5   :  { %3486 = vmatpush.msra.mxu3 %v7135_v61  ;;  %3506 = vmatpush.msrb.mxu0 %v7100_v12 }
0x47c7   :  { %3487 = vmatpush.msra.mxu3 %v7141_v62  ;;  %3507 = vmatpush.msrb.mxu0 %v7109_v19 }
0x47c9   :  { %3508 = vmatpush.msrb.mxu0 %v7115_v41  ;;  %3488 = vmatpush.msra.mxu3 %v7147_v53 }
0x483f   :  { %v3154_v47 = vpop.f32.mrf.mxu0 }
0x4840   :  { %v3155_v60 = vadd.f32 %v7249_v43, %v3154_v47 }
0x4842   :  { %v3158_v40 = vrot.slane %v3155_v60, 6 }
0x4844   :  { %3180 = vrot.lane.b32.xlu0 %v3158_v40, %s6255_s1  ;;  %v3160_v56 = vadd.f32 %v3158_v40, %v7260_v44 }
0x4846   :  { %v5727_v63 = vmul.f32 -1.442695, %v3160_v56 }
0x4848   :  { %6018 = vpow2.f32 %v5727_v63 }
0x484e   :  { %v6019_v22 = vpop.eup %6018 }
0x484f   :  { %v3164_v26 = vadd.f32 1.0, %v6019_v22 }
0x4851   :  { %6020 = vrcp.f32 %v3164_v26  ;;  %v3176_v35 = vand.u32 2147483648, %v3164_v26  ;;  %vm3170_vm9 = vweird.f32 %v3164_v26  ;;  %v3174_v3 = vand.u32 2147483647, %v3164_v26 }
0x4853   :  { %v3177_v49 = vor.u32 1.1754944e-38, %v3176_v35  ;;  %vm3175_vm11 = vcmp.eq.f32.partialorder %v3174_v3, 8.507059e+37 }
0x4857   :  { %v6021_v34 = vpop.eup %6020 }
0x4858   :  { %v3166_v33 = vmul.f32 %v6021_v34, %v3164_v26  ;;  %vm3171_vm8 = vweird.f32 %v6021_v34 }
0x4859   :  { %vm3172_vm10 = vmor %vm3170_vm9, %vm3171_vm8 }
0x485a   :  { %v3167_v1 = vsub.f32 1.0, %v3166_v33 }
0x485c   :  { %v3168_v11 = vmul.f32 %v6021_v34, %v3167_v1 }
0x485e   :  { %v3169_v2 = vadd.f32 %v6021_v34, %v3168_v11 }
0x4860   :  { %v3173_v4 = vsel %vm3172_vm10, %v6021_v34, %v3169_v2 }
0x4861   :  { %v3178_v46 = vsel %vm3175_vm11, %v3177_v49, %v3173_v4 }
0x4862   :  { %v3190_v6 = vsub.f32 1.0, %v3178_v46  ;;  %v3198_v50 = vmul.f32 %v3196_v0, %v3178_v46 }
0x48b6   :  { %v3181_v5 = vpop.permute.xlu0 %3180 }
0x48b7   :  { %v3183_v15 = vmul.f32 %v3181_v5, %v3178_v46 }
0x48b9   :  { %3185 = vrot.lane.b32.xlu1 %v3183_v15, %s6255_s1 }
0x492b   :  { %v3186_v13 = vpop.permute.xlu1 %3185 }
0x492c   :  { %v3188_v16 = vadd.f32 %v3186_v13, %v7260_v44 }
0x492e   :  { %6022 = vtanh.f32 %v3188_v16 }
0x4934   :  { %v6023_v27 = vpop.eup %6022 }
0x4935   :  { %3192 = vrot.lane.b32.xlu2 %v6023_v27, %s6257_s30 }
0x498f   :  { %v3193_v7 = vpop.permute.xlu2 %3192 }
0x4990   :  { %v3195_v8 = vmul.f32 %v3193_v7, %v3190_v6 }
0x4992   :  { %v3199_v57 = vadd.f32 %v3198_v50, %v3195_v8 }
0x4994   :  { %v3201_v28 = vrot.slane %v3199_v57, 2  ;;  %v3285_v56 = vrot.slane %v3199_v57, 7 }
0x4996   :  { %3202 = vrot.lane.b32.xlu0 %v3201_v28, %s6257_s30 }
0x4a08   :  { %v3203_v20 = vpop.permute.xlu0 %3202 }
0x4a09   :  { %5728 = vmatmul.msk.f32.vlgmr.msrb.gmra.mxu2 %vm247_vm2, %v3203_v20  ;;  %5729 = vmatmul.msk.f32.vlgmr.msrb.gmra.mxu1 %vm247_vm2, %v3203_v20 }
0x4a0a   :  { %3574 = vmatpush.msrb.mxu2 %v7129_v48  ;;  %3594 = vmatpush.msrb.mxu1 %v7094_v38 }
0x4a0c   :  { %3575 = vmatpush.msrb.mxu2 %v7135_v61  ;;  %3595 = vmatpush.msrb.mxu1 %v7100_v12 }
0x4a0e   :  { %3576 = vmatpush.msrb.mxu2 %v7141_v62  ;;  %3596 = vmatpush.msrb.mxu1 %v7109_v19 }
0x4a10   :  { %3597 = vmatpush.msrb.mxu1 %v7115_v41  ;;  %3577 = vmatpush.msrb.mxu2 %v7147_v53 }
0x4a86   :  { %v3243_v23 = vpop.f32.mrf.mxu1 }
0x4a87   :  { %v3244_v30 = vadd.f32 %v7249_v43, %v3243_v23 }
0x4a89   :  { %v3247_v24 = vrot.slane %v3244_v30, 5 }
0x4a8b   :  { %3269 = vrot.lane.b32.xlu1 %v3247_v24, %s6255_s1  ;;  %v3249_v31 = vadd.f32 %v3247_v24, %v7260_v44 }
0x4a8d   :  { %v5730_v25 = vmul.f32 -1.442695, %v3249_v31 }
0x4a8f   :  { %6024 = vpow2.f32 %v5730_v25 }
0x4a95   :  { %v6025_v52 = vpop.eup %6024 }
0x4a96   :  { %v3253_v29 = vadd.f32 1.0, %v6025_v52 }
0x4a98   :  { %6026 = vrcp.f32 %v3253_v29  ;;  %v3265_v14 = vand.u32 2147483648, %v3253_v29  ;;  %vm3259_vm13 = vweird.f32 %v3253_v29  ;;  %v3263_v55 = vand.u32 2147483647, %v3253_v29 }
0x4a9a   :  { %v3266_v37 = vor.u32 1.1754944e-38, %v3265_v14  ;;  %vm3264_vm14 = vcmp.eq.f32.partialorder %v3263_v55, 8.507059e+37 }
0x4a9e   :  { %v6027_v21 = vpop.eup %6026 }
0x4a9f   :  { %v3255_v10 = vmul.f32 %v6027_v21, %v3253_v29  ;;  %vm3260_vm12 = vweird.f32 %v6027_v21 }
0x4aa0   :  { %vm3261_vm0 = vmor %vm3259_vm13, %vm3260_vm12 }
0x4aa1   :  { %v3256_v39 = vsub.f32 1.0, %v3255_v10 }
0x4aa3   :  { %v3257_v51 = vmul.f32 %v6027_v21, %v3256_v39 }
0x4aa5   :  { %v3258_v9 = vadd.f32 %v6027_v21, %v3257_v51 }
0x4aa7   :  { %v3262_v32 = vsel %vm3261_vm0, %v6027_v21, %v3258_v9 }
0x4aa8   :  { %v3267_v59 = vsel %vm3264_vm14, %v3266_v37, %v3262_v32 }
0x4aa9   :  { %v3279_v63 = vsub.f32 1.0, %v3267_v59  ;;  %v3287_v26 = vmul.f32 %v3285_v56, %v3267_v59 }
0x4afd   :  { %v3270_v58 = vpop.permute.xlu1 %3269 }
0x4afe   :  { %v3272_v18 = vmul.f32 %v3270_v58, %v3267_v59 }
0x4b00   :  { %3274 = vrot.lane.b32.xlu2 %v3272_v18, %s6255_s1 }
0x4b5a   :  { %v3275_v47 = vpop.permute.xlu2 %3274 }
0x4b5b   :  { %v3277_v60 = vadd.f32 %v3275_v47, %v7260_v44 }
0x4b5d   :  { %6028 = vtanh.f32 %v3277_v60 }
0x4b63   :  { %v6029_v40 = vpop.eup %6028 }
0x4b64   :  { %3281 = vrot.lane.b32.xlu0 %v6029_v40, %s6257_s30 }
0x4bd6   :  { %v3282_v22 = vpop.permute.xlu0 %3281 }
0x4bd7   :  { %v3284_v34 = vmul.f32 %v3282_v22, %v3279_v63 }
0x4bd9   :  { %v3288_v33 = vadd.f32 %v3287_v26, %v3284_v34 }
0x4bdb   :  { %v3290_v1 = vrot.slane %v3288_v33, 3  ;;  %v3374_v8 = vrot.slane %v3288_v33, 7 }
0x4bdd   :  { %3291 = vrot.lane.b32.xlu1 %v3290_v1, %s6257_s30 }
0x4c4f   :  { %v3292_v11 = vpop.permute.xlu1 %3291 }
0x4c50   :  { %5731 = vmatmul.msk.f32.vlgmr.msrb.gmra.mxu3 %vm247_vm2, %v3292_v11  ;;  %5732 = vmatmul.msk.f32.vlgmr.msra.gmra.mxu0 %vm247_vm2, %v3292_v11 }
0x4c51   :  { %3663 = vmatpush.msrb.mxu3 %v7129_v48  ;;  %3683 = vmatpush.msra.mxu0 %v7094_v38 }
0x4c53   :  { %3664 = vmatpush.msrb.mxu3 %v7135_v61  ;;  %3684 = vmatpush.msra.mxu0 %v7100_v12 }
0x4c55   :  { %3665 = vmatpush.msrb.mxu3 %v7141_v62  ;;  %3685 = vmatpush.msra.mxu0 %v7109_v19 }
0x4c57   :  { %3686 = vmatpush.msra.mxu0 %v7115_v41  ;;  %3666 = vmatpush.msrb.mxu3 %v7147_v53 }
0x4ccd   :  { %v3332_v2 = vpop.f32.mrf.mxu0 }
0x4cce   :  { %v3333_v35 = vadd.f32 %v7249_v43, %v3332_v2 }
0x4cd0   :  { %v3336_v3 = vrot.slane %v3333_v35, 4 }
0x4cd2   :  { %v3338_v4 = vadd.f32 %v3336_v3, %v7260_v44  ;;  %3358 = vrot.lane.b32.xlu2 %v3336_v3, %s6255_s1 }
0x4cd4   :  { %v5733_v49 = vmul.f32 -1.442695, %v3338_v4 }
0x4cd6   :  { %6030 = vpow2.f32 %v5733_v49 }
0x4cdc   :  { %v6031_v5 = vpop.eup %6030 }
0x4cdd   :  { %v3342_v46 = vadd.f32 1.0, %v6031_v5 }
0x4cdf   :  { %6032 = vrcp.f32 %v3342_v46  ;;  %v3354_v27 = vand.u32 2147483648, %v3342_v46  ;;  %v3352_v6 = vand.u32 2147483647, %v3342_v46  ;;  %vm3348_vm4 = vweird.f32 %v3342_v46 }
0x4ce1   :  { %v3355_v50 = vor.u32 1.1754944e-38, %v3354_v27  ;;  %vm3353_vm6 = vcmp.eq.f32.partialorder %v3352_v6, 8.507059e+37 }
0x4ce5   :  { %v6033_v15 = vpop.eup %6032 }
0x4ce6   :  { %v3344_v13 = vmul.f32 %v6033_v15, %v3342_v46  ;;  %vm3349_vm3 = vweird.f32 %v6033_v15 }
0x4ce7   :  { %vm3350_vm5 = vmor %vm3348_vm4, %vm3349_vm3 }
0x4ce8   :  { %v3345_v16 = vsub.f32 1.0, %v3344_v13 }
0x4cea   :  { %v3346_v0 = vmul.f32 %v6033_v15, %v3345_v16 }
0x4cec   :  { %v3347_v7 = vadd.f32 %v6033_v15, %v3346_v0 }
0x4cee   :  { %v3351_v57 = vsel %vm3350_vm5, %v6033_v15, %v3347_v7 }
0x4cef   :  { %v3356_v28 = vsel %vm3353_vm6, %v3355_v50, %v3351_v57 }
0x4cf0   :  { %v3376_v20 = vmul.f32 %v3374_v8, %v3356_v28  ;;  %v3368_v52 = vsub.f32 1.0, %v3356_v28 }
0x4d2c   :  { %v3359_v23 = vpop.permute.xlu2 %3358 }
0x4d2d   :  { %v3361_v30 = vmul.f32 %v3359_v23, %v3356_v28 }
0x4d2f   :  { %3363 = vrot.lane.b32.xlu0 %v3361_v30, %s6255_s1 }
0x4da1   :  { %v3364_v24 = vpop.permute.xlu0 %3363 }
0x4da2   :  { %v3366_v31 = vadd.f32 %v3364_v24, %v7260_v44 }
0x4da4   :  { %6034 = vtanh.f32 %v3366_v31 }
0x4daa   :  { %v6035_v25 = vpop.eup %6034 }
0x4dab   :  { %3370 = vrot.lane.b32.xlu1 %v6035_v25, %s6257_s30 }
0x4e1d   :  { %v3371_v29 = vpop.permute.xlu1 %3370 }
0x4e1e   :  { %v3373_v21 = vmul.f32 %v3371_v29, %v3368_v52 }
0x4e20   :  { %v3377_v10 = vadd.f32 %v3376_v20, %v3373_v21 }
0x4e22   :  { %v3379_v39 = vrot.slane %v3377_v10, 4  ;;  %v3463_v4 = vrot.slane %v3377_v10, 7 }
0x4e24   :  { %3380 = vrot.lane.b32.xlu2 %v3379_v39, %s6257_s30 }
0x4e7e   :  { %v3381_v51 = vpop.permute.xlu2 %3380 }
0x4e7f   :  { %5734 = vmatmul.msk.f32.vlgmr.msra.gmra.mxu2 %vm247_vm2, %v3381_v51  ;;  %5735 = vmatmul.msk.f32.vlgmr.msra.gmra.mxu1 %vm247_vm2, %v3381_v51 }
0x4e80   :  { %3748 = vmatpush.msra.mxu2 %v7129_v48  ;;  %3768 = vmatpush.msra.mxu1 %v7094_v38 }
0x4e82   :  { %3749 = vmatpush.msra.mxu2 %v7135_v61  ;;  %3769 = vmatpush.msra.mxu1 %v7100_v12 }
0x4e84   :  { %3750 = vmatpush.msra.mxu2 %v7141_v62  ;;  %3770 = vmatpush.msra.mxu1 %v7109_v19 }
0x4e86   :  { %3771 = vmatpush.msra.mxu1 %v7115_v41  ;;  %3751 = vmatpush.msra.mxu2 %v7147_v53 }
0x4efc   :  { %v3421_v9 = vpop.f32.mrf.mxu1 }
0x4efd   :  { %v3422_v14 = vadd.f32 %v7249_v43, %v3421_v9 }
0x4eff   :  { %v3425_v55 = vrot.slane %v3422_v14, 3 }
0x4f01   :  { %3447 = vrot.lane.b32.xlu0 %v3425_v55, %s6255_s1  ;;  %v3427_v32 = vadd.f32 %v3425_v55, %v7260_v44 }
0x4f03   :  { %v5736_v37 = vmul.f32 -1.442695, %v3427_v32 }
0x4f05   :  { %6036 = vpow2.f32 %v5736_v37 }
0x4f0b   :  { %v6037_v58 = vpop.eup %6036 }
0x4f0c   :  { %v3431_v59 = vadd.f32 1.0, %v6037_v58 }
0x4f0e   :  { %6038 = vrcp.f32 %v3431_v59  ;;  %v3443_v63 = vand.u32 2147483648, %v3431_v59  ;;  %vm3437_vm7 = vweird.f32 %v3431_v59  ;;  %v3441_v22 = vand.u32 2147483647, %v3431_v59 }
0x4f10   :  { %v3444_v34 = vor.u32 1.1754944e-38, %v3443_v63  ;;  %vm3442_vm9 = vcmp.eq.f32.partialorder %v3441_v22, 8.507059e+37 }
0x4f14   :  { %v6039_v18 = vpop.eup %6038 }
0x4f15   :  { %v3433_v47 = vmul.f32 %v6039_v18, %v3431_v59  ;;  %vm3438_vm1 = vweird.f32 %v6039_v18 }
0x4f16   :  { %vm3439_vm8 = vmor %vm3437_vm7, %vm3438_vm1 }
0x4f17   :  { %v3434_v60 = vsub.f32 1.0, %v3433_v47  ;;  %v7384_v47 = vld [vmem:[%s8036_s2 + $0x10] sm:$0xff] }
0x4f19   :  { %v3435_v40 = vmul.f32 %v6039_v18, %v3434_v60 }
0x4f1b   :  { %v3436_v56 = vadd.f32 %v6039_v18, %v3435_v40 }
0x4f1d   :  { %v3440_v26 = vsel %vm3439_vm8, %v6039_v18, %v3436_v56  ;;  %v7377_v18 = vld [vmem:[%s8036_s2 + $0x18] sm:$0xff] }
0x4f1e   :  { %v3445_v1 = vsel %vm3442_vm9, %v3444_v34, %v3440_v26 }
0x4f1f   :  { %v3457_v49 = vsub.f32 1.0, %v3445_v1  ;;  %v3465_v46 = vmul.f32 %v3463_v4, %v3445_v1 }
0x4f73   :  { %v3448_v33 = vpop.permute.xlu0 %3447 }
0x4f74   :  { %v3450_v11 = vmul.f32 %v3448_v33, %v3445_v1 }
0x4f76   :  { %3452 = vrot.lane.b32.xlu1 %v3450_v11, %s6255_s1 }
0x4fe8   :  { %v3453_v2 = vpop.permute.xlu1 %3452 }
0x4fe9   :  { %v3455_v35 = vadd.f32 %v3453_v2, %v7260_v44 }
0x4feb   :  { %6040 = vtanh.f32 %v3455_v35 }
0x4ff1   :  { %v6041_v3 = vpop.eup %6040 }
0x4ff2   :  { %3459 = vrot.lane.b32.xlu2 %v6041_v3, %s6257_s30 }
0x504c   :  { %v3460_v5 = vpop.permute.xlu2 %3459 }
0x504d   :  { %v3462_v15 = vmul.f32 %v3460_v5, %v3457_v49 }
0x504f   :  { %v3466_v13 = vadd.f32 %v3465_v46, %v3462_v15 }
0x5051   :  { %v3468_v16 = vrot.slane %v3466_v13, 5  ;;  %v3552_v51 = vrot.slane %v3466_v13, 7 }
0x5053   :  { %3469 = vrot.lane.b32.xlu0 %v3468_v16, %s6257_s30 }
0x50c5   :  { %v3470_v27 = vpop.permute.xlu0 %3469 }
0x50c6   :  { %5737 = vmatmul.msk.f32.vlgmr.msra.gmra.mxu3 %vm247_vm2, %v3470_v27  ;;  %5738 = vmatmul.msk.f32.vlgmr.msrb.gmra.mxu0 %vm247_vm2, %v3470_v27 }
0x50c7   :  { %3837 = vmatpush.msra.mxu3 %v7129_v48  ;;  %3857 = vmatpush.msrb.mxu0 %v7094_v38 }
0x50c9   :  { %3838 = vmatpush.msra.mxu3 %v7135_v61  ;;  %3858 = vmatpush.msrb.mxu0 %v7100_v12 }
0x50cb   :  { %3839 = vmatpush.msra.mxu3 %v7141_v62  ;;  %3859 = vmatpush.msrb.mxu0 %v7109_v19 }
0x50cd   :  { %3860 = vmatpush.msrb.mxu0 %v7115_v41  ;;  %3840 = vmatpush.msra.mxu3 %v7147_v53 }
0x5143   :  { %v3510_v0 = vpop.f32.mrf.mxu0 }
0x5144   :  { %v3511_v6 = vadd.f32 %v7249_v43, %v3510_v0 }
0x5146   :  { %v3514_v7 = vrot.slane %v3511_v6, 2 }
0x5148   :  { %3536 = vrot.lane.b32.xlu1 %v3514_v7, %s6255_s1  ;;  %v3516_v38 = vadd.f32 %v3514_v7, %v7260_v44 }
0x514a   :  { %v5739_v50 = vmul.f32 -1.442695, %v3516_v38 }
0x514c   :  { %6042 = vpow2.f32 %v5739_v50 }
0x5152   :  { %v6043_v8 = vpop.eup %6042 }
0x5153   :  { %v3520_v12 = vadd.f32 1.0, %v6043_v8 }
0x5155   :  { %6044 = vrcp.f32 %v3520_v12  ;;  %v3532_v23 = vand.u32 2147483648, %v3520_v12  ;;  %vm3526_vm11 = vweird.f32 %v3520_v12  ;;  %v3530_v30 = vand.u32 2147483647, %v3520_v12 }
0x5157   :  { %v3533_v31 = vor.u32 1.1754944e-38, %v3532_v23  ;;  %vm3531_vm13 = vcmp.eq.f32.partialorder %v3530_v30, 8.507059e+37  ;;  %v7442_v23 = vadd.f32 %v7257_v45, %v7277_v54 }
0x515b   :  { %v6045_v57 = vpop.eup %6044 }
0x515c   :  { %v3522_v28 = vmul.f32 %v6045_v57, %v3520_v12  ;;  %vm3527_vm10 = vweird.f32 %v6045_v57 }
0x515d   :  { %vm3528_vm12 = vmor %vm3526_vm11, %vm3527_vm10 }
0x515e   :  { %v3523_v19 = vsub.f32 1.0, %v3522_v28  ;;  %v7427_v28 = vld [vmem:[%s8008_s10 + $0x8] sm:$0xff] }
0x5160   :  { %v3524_v20 = vmul.f32 %v6045_v57, %v3523_v19  ;;  %v7435_v19 = vld [vmem:[%s8008_s10] sm:$0xff] }
0x5162   :  { %v3525_v41 = vadd.f32 %v6045_v57, %v3524_v20 }
0x5164   :  { %v3529_v24 = vsel %vm3528_vm12, %v6045_v57, %v3525_v41  ;;  %v7420_v57 = vld [vmem:[%s8008_s10 + $0x10] sm:$0xff] }
0x5165   :  { %v3534_v52 = vsel %vm3531_vm13, %v3533_v31, %v3529_v24 }
0x5166   :  { %v3546_v9 = vsub.f32 1.0, %v3534_v52  ;;  %v3554_v55 = vmul.f32 %v3552_v51, %v3534_v52 }
0x51ba   :  { %v3537_v25 = vpop.permute.xlu1 %3536 }
0x51bb   :  { %v3539_v29 = vmul.f32 %v3537_v25, %v3534_v52 }
0x51bd   :  { %3541 = vrot.lane.b32.xlu2 %v3539_v29, %s6255_s1 }
0x5217   :  { %v3542_v21 = vpop.permute.xlu2 %3541 }
0x5218   :  { %v3544_v10 = vadd.f32 %v3542_v21, %v7260_v44 }
0x521a   :  { %6046 = vtanh.f32 %v3544_v10 }
0x5220   :  { %v6047_v39 = vpop.eup %6046 }
0x5221   :  { %3548 = vrot.lane.b32.xlu0 %v6047_v39, %s6257_s30 }
0x5293   :  { %v3549_v14 = vpop.permute.xlu0 %3548 }
0x5294   :  { %v3551_v32 = vmul.f32 %v3549_v14, %v3546_v9 }
0x5296   :  { %v3555_v37 = vadd.f32 %v3554_v55, %v3551_v32 }
0x5298   :  { %v3557_v58 = vrot.slane %v3555_v37, 6  ;;  %v3641_v4 = vrot.slane %v3555_v37, 7 }
0x529a   :  { %3558 = vrot.lane.b32.xlu1 %v3557_v58, %s6257_s30 }
0x530c   :  { %v3559_v59 = vpop.permute.xlu1 %3558 }
0x530d   :  { %5740 = vmatmul.msk.f32.vlgmr.msrb.gmra.mxu2 %vm247_vm2, %v3559_v59  ;;  %5741 = vmatmul.msk.f32.vlgmr.msrb.gmra.mxu1 %vm247_vm2, %v3559_v59 }
0x530e   :  { %3926 = vmatpush.msrb.mxu2 %v7129_v48  ;;  %3946 = vmatpush.msrb.mxu1 %v7377_v18  ;;  %v7391_v48 = vld [vmem:[%s8036_s2 + $0x8] sm:$0xff] }
0x5310   :  { %3927 = vmatpush.msrb.mxu2 %v7135_v61  ;;  %3947 = vmatpush.msrb.mxu1 %v7384_v47  ;;  %v7397_v61 = vld [vmem:[%s8036_s2] sm:$0xff] }
0x5312   :  { %3928 = vmatpush.msrb.mxu2 %v7141_v62  ;;  %3948 = vmatpush.msrb.mxu1 %v7391_v48 }
0x5314   :  { %3949 = vmatpush.msrb.mxu1 %v7397_v61  ;;  %3929 = vmatpush.msrb.mxu2 %v7147_v53 }
0x538a   :  { %v3599_v60 = vpop.f32.mrf.mxu1 }
0x538b   :  { %v3600_v40 = vadd.f32 %v7249_v43, %v3599_v60 }
0x538d   :  { %v3603_v62 = vrot.slane %v3600_v40, 1 }
0x538f   :  { %v3605_v56 = vadd.f32 %v3603_v62, %v7260_v44  ;;  %3625 = vrot.lane.b32.xlu2 %v3603_v62, %s6255_s1 }
0x5391   :  { %v5742_v63 = vmul.f32 -1.442695, %v3605_v56 }
0x5393   :  { %6048 = vpow2.f32 %v5742_v63 }
0x5399   :  { %v6049_v22 = vpop.eup %6048 }
0x539a   :  { %v3609_v26 = vadd.f32 1.0, %v6049_v22 }
0x539c   :  { %6050 = vrcp.f32 %v3609_v26  ;;  %v3621_v11 = vand.u32 2147483648, %v3609_v26  ;;  %v3619_v53 = vand.u32 2147483647, %v3609_v26  ;;  %vm3615_vm14 = vweird.f32 %v3609_v26 }
0x539e   :  { %v3622_v3 = vor.u32 1.1754944e-38, %v3621_v11  ;;  %vm3620_vm4 = vcmp.eq.f32.partialorder %v3619_v53, 8.507059e+37 }
0x53a2   :  { %v6051_v34 = vpop.eup %6050 }
0x53a3   :  { %v3611_v33 = vmul.f32 %v6051_v34, %v3609_v26  ;;  %vm3616_vm0 = vweird.f32 %v6051_v34 }
0x53a4   :  { %vm3617_vm3 = vmor %vm3615_vm14, %vm3616_vm0 }
0x53a5   :  { %v3612_v1 = vsub.f32 1.0, %v3611_v33 }
0x53a7   :  { %v3613_v2 = vmul.f32 %v6051_v34, %v3612_v1 }
0x53a9   :  { %v3614_v35 = vadd.f32 %v6051_v34, %v3613_v2 }
0x53ab   :  { %v3618_v49 = vsel %vm3617_vm3, %v6051_v34, %v3614_v35 }
0x53ac   :  { %v3623_v5 = vsel %vm3620_vm4, %v3622_v3, %v3618_v49 }
0x53ad   :  { %v3643_v46 = vmul.f32 %v3641_v4, %v3623_v5  ;;  %v3635_v6 = vsub.f32 1.0, %v3623_v5 }
0x53e9   :  { %v3626_v15 = vpop.permute.xlu2 %3625 }
0x53ea   :  { %v3628_v13 = vmul.f32 %v3626_v15, %v3623_v5 }
0x53ec   :  { %3630 = vrot.lane.b32.xlu0 %v3628_v13, %s6255_s1 }
0x545e   :  { %v3631_v16 = vpop.permute.xlu0 %3630 }
0x545f   :  { %v3633_v27 = vadd.f32 %v3631_v16, %v7260_v44  ;;  %v7413_v44 = vld [vmem:[%s8008_s10 + $0x18] sm:$0xff] }
0x5461   :  { %6052 = vtanh.f32 %v3633_v27 }
0x5467   :  { %v6053_v0 = vpop.eup %6052 }
0x5468   :  { %3637 = vrot.lane.b32.xlu1 %v6053_v0, %s6257_s30 }
0x54da   :  { %v3638_v7 = vpop.permute.xlu1 %3637 }
0x54db   :  { %v3640_v38 = vmul.f32 %v3638_v7, %v3635_v6 }
0x54dd   :  { %v3644_v50 = vadd.f32 %v3643_v46, %v3640_v38 }
0x54df   :  { %v3646_v8 = vrot.slane %v3644_v50, 7 }
0x54e1   :  { %3647 = vrot.lane.b32.xlu2 %v3646_v8, %s6257_s30 }
0x553b   :  { %v3648_v12 = vpop.permute.xlu2 %3647 }
0x553c   :  { %5743 = vmatmul.msk.f32.vlgmr.msrb.gmra.mxu3 %vm247_vm2, %v3648_v12  ;;  %5744 = vmatmul.msk.f32.vlgmr.msra.gmra.mxu0 %vm247_vm2, %v3648_v12 }
0x553d   :  { %4015 = vmatpush.msrb.mxu3 %v7413_v44  ;;  %4035 = vmatpush.msra.mxu0 %v7377_v18 }
0x553f   :  { %4016 = vmatpush.msrb.mxu3 %v7420_v57  ;;  %4036 = vmatpush.msra.mxu0 %v7384_v47 }
0x5541   :  { %4017 = vmatpush.msrb.mxu3 %v7427_v28  ;;  %4037 = vmatpush.msra.mxu0 %v7391_v48 }
0x5543   :  { %4038 = vmatpush.msra.mxu0 %v7397_v61  ;;  %4018 = vmatpush.msrb.mxu3 %v7435_v19 }
0x55b9   :  { %v3688_v20 = vpop.f32.mrf.mxu0 }
0x55ba   :  { %v3689_v41 = vadd.f32 %v7249_v43, %v3688_v20 }
0x55bc   :  { %3712 = vrot.lane.b32.xlu0 %v3689_v41, %s6255_s1  ;;  %v3691_v30 = vadd.f32 %v3689_v41, %v7442_v23 }
0x55be   :  { %v5745_v24 = vmul.f32 -1.442695, %v3691_v30 }
0x55c0   :  { %6054 = vpow2.f32 %v5745_v24 }
0x55c6   :  { %v6055_v31 = vpop.eup %6054 }
0x55c7   :  { %v3695_v25 = vadd.f32 1.0, %v6055_v31 }
0x55c9   :  { %6056 = vrcp.f32 %v3695_v25  ;;  %v3707_v51 = vand.u32 2147483648, %v3695_v25  ;;  %vm3701_vm6 = vweird.f32 %v3695_v25  ;;  %v3705_v9 = vand.u32 2147483647, %v3695_v25 }
0x55cb   :  { %v3708_v45 = vor.u32 1.1754944e-38, %v3707_v51  ;;  %vm3706_vm7 = vcmp.eq.f32.partialorder %v3705_v9, 8.507059e+37 }
0x55cf   :  { %v6057_v52 = vpop.eup %6056 }
0x55d0   :  { %v3697_v29 = vmul.f32 %v6057_v52, %v3695_v25  ;;  %vm3702_vm5 = vweird.f32 %v6057_v52 }
0x55d1   :  { %vm3703_vm1 = vmor %vm3701_vm6, %vm3702_vm5 }
0x55d2   :  { %v3698_v21 = vsub.f32 1.0, %v3697_v29 }
0x55d4   :  { %v3699_v10 = vmul.f32 %v6057_v52, %v3698_v21 }
0x55d6   :  { %v3700_v39 = vadd.f32 %v6057_v52, %v3699_v10 }
0x55d8   :  { %v3704_v14 = vsel %vm3703_vm1, %v6057_v52, %v3700_v39 }
0x55d9   :  { %v3709_v55 = vsel %vm3706_vm7, %v3708_v45, %v3704_v14 }
0x55da   :  { %v3722_v60 = vsub.f32 1.0, %v3709_v55  ;;  %v3729_v62 = vmul.f32 %v3709_v55, %v3646_v8 }
0x562e   :  { %v3713_v54 = vpop.permute.xlu0 %3712 }
0x562f   :  { %v3715_v32 = vmul.f32 %v3713_v54, %v3709_v55 }
0x5631   :  { %3717 = vrot.lane.b32.xlu1 %v3715_v32, %s6255_s1 }
0x56a3   :  { %v3718_v37 = vpop.permute.xlu1 %3717 }
0x56a4   :  { %v3720_v58 = vadd.f32 %v3718_v37, %v7442_v23 }
0x56a6   :  { %6058 = vtanh.f32 %v3720_v58 }
0x56ac   :  { %v6059_v59 = vpop.eup %6058 }
0x56ad   :  { %3724 = vrot.lane.b32.xlu2 %v6059_v59, %s6257_s30 }
0x5707   :  { %v3725_v40 = vpop.permute.xlu2 %3724 }
0x5708   :  { %v3727_v56 = vmul.f32 %v3725_v40, %v3722_v60 }
0x570a   :  { %v3730_v63 = vadd.f32 %v3729_v62, %v3727_v56 }
0x570c   :  { %3732 = vrot.lane.b32.xlu0 %v3730_v63, %s6257_s30  ;;  %v3815_v8 = vrot.slane %v3730_v63, 7 }
0x577e   :  { %v3733_v22 = vpop.permute.xlu0 %3732 }
0x577f   :  { %5746 = vmatmul.msk.f32.vlgmr.msra.gmra.mxu2 %vm247_vm2, %v3733_v22  ;;  %5747 = vmatmul.msk.f32.vlgmr.msra.gmra.mxu1 %vm247_vm2, %v3733_v22 }
0x5780   :  { %4104 = vmatpush.msra.mxu2 %v7413_v44  ;;  %4124 = vmatpush.msra.mxu1 %v7377_v18 }
0x5782   :  { %4105 = vmatpush.msra.mxu2 %v7420_v57  ;;  %4125 = vmatpush.msra.mxu1 %v7384_v47 }
0x5784   :  { %4106 = vmatpush.msra.mxu2 %v7427_v28  ;;  %4126 = vmatpush.msra.mxu1 %v7391_v48 }
0x5786   :  { %4127 = vmatpush.msra.mxu1 %v7397_v61  ;;  %4107 = vmatpush.msra.mxu2 %v7435_v19 }
0x57fc   :  { %v3773_v26 = vpop.f32.mrf.mxu1 }
0x57fd   :  { %v3774_v34 = vadd.f32 %v7249_v43, %v3773_v26 }
0x57ff   :  { %v3777_v33 = vrot.slane %v3774_v34, 7 }
0x5801   :  { %3799 = vrot.lane.b32.xlu1 %v3777_v33, %s6255_s1  ;;  %v3779_v1 = vadd.f32 %v3777_v33, %v7442_v23 }
0x5803   :  { %v5748_v11 = vmul.f32 -1.442695, %v3779_v1 }
0x5805   :  { %6060 = vpow2.f32 %v5748_v11 }
0x580b   :  { %v6061_v2 = vpop.eup %6060 }
0x580c   :  { %v3783_v53 = vadd.f32 1.0, %v6061_v2 }
0x580e   :  { %6062 = vrcp.f32 %v3783_v53  ;;  %v3795_v46 = vand.u32 2147483648, %v3783_v53  ;;  %vm3789_vm9 = vweird.f32 %v3783_v53  ;;  %v3793_v15 = vand.u32 2147483647, %v3783_v53 }
0x5810   :  { %v3796_v16 = vor.u32 1.1754944e-38, %v3795_v46  ;;  %vm3794_vm11 = vcmp.eq.f32.partialorder %v3793_v15, 8.507059e+37 }
0x5814   :  { %v6063_v35 = vpop.eup %6062 }
0x5815   :  { %v3785_v3 = vmul.f32 %v6063_v35, %v3783_v53  ;;  %vm3790_vm8 = vweird.f32 %v6063_v35 }
0x5816   :  { %vm3791_vm10 = vmor %vm3789_vm9, %vm3790_vm8 }
0x5817   :  { %v3786_v4 = vsub.f32 1.0, %v3785_v3 }
0x5819   :  { %v3787_v49 = vmul.f32 %v6063_v35, %v3786_v4  ;;  %v7496_v4 = vld [vmem:[%s8007_s9] sm:$0x1] }
0x581b   :  { %v3788_v5 = vadd.f32 %v6063_v35, %v3787_v49 }
0x581d   :  { %v3792_v13 = vsel %vm3791_vm10, %v6063_v35, %v3788_v5 }
0x581e   :  { %v3797_v0 = vsel %vm3794_vm11, %v3796_v16, %v3792_v13 }
0x581f   :  { %v3809_v12 = vsub.f32 1.0, %v3797_v0  ;;  %v3817_v30 = vmul.f32 %v3815_v8, %v3797_v0 }
0x5873   :  { %v3800_v27 = vpop.permute.xlu1 %3799 }
0x5874   :  { %v3802_v6 = vmul.f32 %v3800_v27, %v3797_v0 }
0x5876   :  { %3804 = vrot.lane.b32.xlu2 %v3802_v6, %s6255_s1 }
0x58d0   :  { %v3805_v7 = vpop.permute.xlu2 %3804 }
0x58d1   :  { %v3807_v38 = vadd.f32 %v3805_v7, %v7442_v23 }
0x58d3   :  { %6064 = vtanh.f32 %v3807_v38 }
0x58d9   :  { %v6065_v50 = vpop.eup %6064 }
0x58da   :  { %3811 = vrot.lane.b32.xlu0 %v6065_v50, %s6257_s30 }
0x594c   :  { %v3812_v20 = vpop.permute.xlu0 %3811 }
0x594d   :  { %v3814_v41 = vmul.f32 %v3812_v20, %v3809_v12 }
0x594f   :  { %v3818_v24 = vadd.f32 %v3817_v30, %v3814_v41 }
0x5951   :  { %v3820_v31 = vrot.slane %v3818_v24, 1  ;;  %v3904_v59 = vrot.slane %v3818_v24, 7 }
0x5953   :  { %3821 = vrot.lane.b32.xlu1 %v3820_v31, %s6257_s30 }
0x59c5   :  { %v3822_v25 = vpop.permute.xlu1 %3821 }
0x59c6   :  { %5749 = vmatmul.msk.f32.vlgmr.msra.gmra.mxu3 %vm247_vm2, %v3822_v25  ;;  %5750 = vmatmul.msk.f32.vlgmr.msrb.gmra.mxu0 %vm247_vm2, %v3822_v25 }
0x59c7   :  { %4193 = vmatpush.msra.mxu3 %v7413_v44  ;;  %4213 = vmatpush.msrb.mxu0 %v7377_v18 }
0x59c9   :  { %4194 = vmatpush.msra.mxu3 %v7420_v57  ;;  %4214 = vmatpush.msrb.mxu0 %v7384_v47 }
0x59cb   :  { %4195 = vmatpush.msra.mxu3 %v7427_v28  ;;  %4215 = vmatpush.msrb.mxu0 %v7391_v48 }
0x59cd   :  { %4216 = vmatpush.msrb.mxu0 %v7397_v61  ;;  %4196 = vmatpush.msra.mxu3 %v7435_v19 }
0x5a43   :  { %v3862_v52 = vpop.f32.mrf.mxu0 }
0x5a44   :  { %v3863_v29 = vadd.f32 %v7249_v43, %v3862_v52 }
0x5a46   :  { %v3866_v21 = vrot.slane %v3863_v29, 6 }
0x5a48   :  { %v3868_v10 = vadd.f32 %v3866_v21, %v7442_v23  ;;  %3888 = vrot.lane.b32.xlu2 %v3866_v21, %s6255_s1 }
0x5a4a   :  { %v5751_v39 = vmul.f32 -1.442695, %v3868_v10 }
0x5a4c   :  { %6066 = vpow2.f32 %v5751_v39 }
0x5a52   :  { %v6067_v51 = vpop.eup %6066 }
0x5a53   :  { %v3872_v9 = vadd.f32 1.0, %v6067_v51  ;;  %v7510_v51 = vld [vmem:[%s8009_s11 + $0x18] sm:$0xff] }
0x5a55   :  { %6068 = vrcp.f32 %v3872_v9  ;;  %v3884_v55 = vand.u32 2147483648, %v3872_v9  ;;  %v3882_v37 = vand.u32 2147483647, %v3872_v9  ;;  %vm3878_vm13 = vweird.f32 %v3872_v9 }
0x5a57   :  { %v3885_v43 = vor.u32 1.1754944e-38, %v3884_v55  ;;  %vm3883_vm14 = vcmp.eq.f32.partialorder %v3882_v37, 8.507059e+37 }
0x5a5b   :  { %v6069_v14 = vpop.eup %6068 }
0x5a5c   :  { %v3874_v45 = vmul.f32 %v6069_v14, %v3872_v9  ;;  %vm3879_vm12 = vweird.f32 %v6069_v14  ;;  %v7517_v9 = vld [vmem:[%s8009_s11 + $0x10] sm:$0xff] }
0x5a5d   :  { %vm3880_vm0 = vmor %vm3878_vm13, %vm3879_vm12 }
0x5a5e   :  { %v3875_v54 = vsub.f32 1.0, %v3874_v45 }
0x5a60   :  { %v3876_v32 = vmul.f32 %v6069_v14, %v3875_v54 }
0x5a62   :  { %v3877_v58 = vadd.f32 %v6069_v14, %v3876_v32 }
0x5a64   :  { %v3881_v60 = vsel %vm3880_vm0, %v6069_v14, %v3877_v58  ;;  %v7524_v14 = vld [vmem:[%s8009_s11 + $0x8] sm:$0xff] }
0x5a65   :  { %v3886_v40 = vsel %vm3883_vm14, %v3885_v43, %v3881_v60 }
0x5a66   :  { %v3906_v62 = vmul.f32 %v3904_v59, %v3886_v40  ;;  %v3898_v33 = vsub.f32 1.0, %v3886_v40 }
0x5aa2   :  { %v3889_v56 = vpop.permute.xlu2 %3888 }
0x5aa3   :  { %v3891_v63 = vmul.f32 %v3889_v56, %v3886_v40 }
0x5aa5   :  { %3893 = vrot.lane.b32.xlu0 %v3891_v63, %s6255_s1 }
0x5b17   :  { %v3894_v22 = vpop.permute.xlu0 %3893 }
0x5b18   :  { %v3896_v26 = vadd.f32 %v3894_v22, %v7442_v23 }
0x5b1a   :  { %6070 = vtanh.f32 %v3896_v26 }
0x5b20   :  { %v6071_v34 = vpop.eup %6070 }
0x5b21   :  { %3900 = vrot.lane.b32.xlu1 %v6071_v34, %s6257_s30 }
0x5b93   :  { %v3901_v1 = vpop.permute.xlu1 %3900 }
0x5b94   :  { %v3903_v11 = vmul.f32 %v3901_v1, %v3898_v33 }
0x5b96   :  { %v3907_v2 = vadd.f32 %v3906_v62, %v3903_v11 }
0x5b98   :  { %v3909_v53 = vrot.slane %v3907_v2, 2  ;;  %v3993_v24 = vrot.slane %v3907_v2, 7 }
0x5b9a   :  { %3910 = vrot.lane.b32.xlu2 %v3909_v53, %s6257_s30 }
0x5bf4   :  { %v3911_v35 = vpop.permute.xlu2 %3910 }
0x5bf5   :  { %5752 = vmatmul.msk.f32.vlgmr.msrb.gmra.mxu2 %vm247_vm2, %v3911_v35  ;;  %5753 = vmatmul.msk.f32.vlgmr.msrb.gmra.mxu1 %vm247_vm2, %v3911_v35 }
0x5bf6   :  { %4282 = vmatpush.msrb.mxu2 %v7413_v44  ;;  %4302 = vmatpush.msrb.mxu1 %v7377_v18 }
0x5bf8   :  { %4283 = vmatpush.msrb.mxu2 %v7420_v57  ;;  %4303 = vmatpush.msrb.mxu1 %v7384_v47 }
0x5bfa   :  { %4284 = vmatpush.msrb.mxu2 %v7427_v28  ;;  %4304 = vmatpush.msrb.mxu1 %v7391_v48 }
0x5bfc   :  { %4305 = vmatpush.msrb.mxu1 %v7397_v61  ;;  %4285 = vmatpush.msrb.mxu2 %v7435_v19 }
0x5c72   :  { %v3951_v3 = vpop.f32.mrf.mxu1 }
0x5c73   :  { %v3952_v18 = vadd.f32 %v7496_v4, %v3951_v3 }
0x5c75   :  { %v3955_v49 = vrot.slane %v3952_v18, 5 }
0x5c77   :  { %3977 = vrot.lane.b32.xlu0 %v3955_v49, %s6255_s1  ;;  %v3957_v47 = vadd.f32 %v3955_v49, %v7442_v23 }
0x5c79   :  { %v5754_v5 = vmul.f32 -1.442695, %v3957_v47 }
0x5c7b   :  { %6072 = vpow2.f32 %v5754_v5 }
0x5c81   :  { %v6073_v48 = vpop.eup %6072 }
0x5c82   :  { %v3961_v46 = vadd.f32 1.0, %v6073_v48 }
0x5c84   :  { %6074 = vrcp.f32 %v3961_v46  ;;  %v3973_v0 = vand.u32 2147483648, %v3961_v46  ;;  %vm3967_vm4 = vweird.f32 %v3961_v46  ;;  %v3971_v6 = vand.u32 2147483647, %v3961_v46 }
0x5c86   :  { %v3974_v38 = vor.u32 1.1754944e-38, %v3973_v0  ;;  %vm3972_vm6 = vcmp.eq.f32.partialorder %v3971_v6, 8.507059e+37 }
0x5c8a   :  { %v6075_v61 = vpop.eup %6074 }
0x5c8b   :  { %v3963_v15 = vmul.f32 %v6075_v61, %v3961_v46  ;;  %vm3968_vm3 = vweird.f32 %v6075_v61 }
0x5c8c   :  { %vm3969_vm5 = vmor %vm3967_vm4, %vm3968_vm3 }
0x5c8d   :  { %v3964_v13 = vsub.f32 1.0, %v3963_v15 }
0x5c8f   :  { %v3965_v16 = vmul.f32 %v6075_v61, %v3964_v13 }
0x5c91   :  { %v3966_v27 = vadd.f32 %v6075_v61, %v3965_v16 }
0x5c93   :  { %v3970_v7 = vsel %vm3969_vm5, %v6075_v61, %v3966_v27 }
0x5c94   :  { %v3975_v8 = vsel %vm3972_vm6, %v3974_v38, %v3970_v7 }
0x5c95   :  { %v3987_v31 = vsub.f32 1.0, %v3975_v8  ;;  %v3995_v52 = vmul.f32 %v3993_v24, %v3975_v8 }
0x5ce9   :  { %v3978_v50 = vpop.permute.xlu0 %3977 }
0x5cea   :  { %v3980_v12 = vmul.f32 %v3978_v50, %v3975_v8 }
0x5cec   :  { %3982 = vrot.lane.b32.xlu1 %v3980_v12, %s6255_s1 }
0x5d5e   :  { %v3983_v20 = vpop.permute.xlu1 %3982 }
0x5d5f   :  { %v3985_v41 = vadd.f32 %v3983_v20, %v7442_v23 }
0x5d61   :  { %6076 = vtanh.f32 %v3985_v41 }
0x5d67   :  { %v6077_v30 = vpop.eup %6076 }
0x5d68   :  { %3989 = vrot.lane.b32.xlu2 %v6077_v30, %s6257_s30 }
0x5dc2   :  { %v3990_v25 = vpop.permute.xlu2 %3989 }
0x5dc3   :  { %v3992_v29 = vmul.f32 %v3990_v25, %v3987_v31 }
0x5dc5   :  { %v3996_v21 = vadd.f32 %v3995_v52, %v3992_v29 }
0x5dc7   :  { %v3998_v10 = vrot.slane %v3996_v21, 3  ;;  %v4082_v2 = vrot.slane %v3996_v21, 7 }
0x5dc9   :  { %3999 = vrot.lane.b32.xlu0 %v3998_v10, %s6257_s30 }
0x5e3b   :  { %v4000_v39 = vpop.permute.xlu0 %3999 }
0x5e3c   :  { %5755 = vmatmul.msk.f32.vlgmr.msrb.gmra.mxu3 %vm247_vm2, %v4000_v39  ;;  %5756 = vmatmul.msk.f32.vlgmr.msra.gmra.mxu0 %vm247_vm2, %v4000_v39 }
0x5e3d   :  { %4396 = vmatpush.msra.mxu0 %v7510_v51  ;;  %4371 = vmatpush.msrb.mxu3 %v7413_v44  ;;  %v7531_v44 = vld [vmem:[%s8009_s11] sm:$0xff] }
0x5e3f   :  { %4397 = vmatpush.msra.mxu0 %v7517_v9  ;;  %4372 = vmatpush.msrb.mxu3 %v7420_v57 }
0x5e41   :  { %4398 = vmatpush.msra.mxu0 %v7524_v14  ;;  %4373 = vmatpush.msrb.mxu3 %v7427_v28 }
0x5e43   :  { %4399 = vmatpush.msra.mxu0 %v7531_v44  ;;  %4374 = vmatpush.msrb.mxu3 %v7435_v19 }
0x5eb9   :  { %v4040_v45 = vpop.f32.mrf.mxu0 }
0x5eba   :  { %v4041_v57 = vadd.f32 %v7496_v4, %v4040_v45 }
0x5ebc   :  { %v4044_v54 = vrot.slane %v4041_v57, 4 }
0x5ebe   :  { %4066 = vrot.lane.b32.xlu1 %v4044_v54, %s6255_s1  ;;  %v4046_v55 = vadd.f32 %v4044_v54, %v7442_v23 }
0x5ec0   :  { %v5757_v32 = vmul.f32 -1.442695, %v4046_v55 }
0x5ec2   :  { %6078 = vpow2.f32 %v5757_v32 }
0x5ec8   :  { %v6079_v28 = vpop.eup %6078 }
0x5ec9   :  { %v4050_v37 = vadd.f32 1.0, %v6079_v28  ;;  %v7567_v28 = vld [vmem:[%s8004_s14 + $0x2] sm:$0x3] }
0x5ecb   :  { %6080 = vrcp.f32 %v4050_v37  ;;  %v4062_v19 = vand.u32 2147483648, %v4050_v37  ;;  %vm4056_vm7 = vweird.f32 %v4050_v37  ;;  %v4060_v62 = vand.u32 2147483647, %v4050_v37 }
0x5ecd   :  { %v4063_v63 = vor.u32 1.1754944e-38, %v4062_v19  ;;  %vm4061_vm9 = vcmp.eq.f32.partialorder %v4060_v62, 8.507059e+37 }
0x5ed1   :  { %v6081_v58 = vpop.eup %6080 }
0x5ed2   :  { %v4052_v43 = vmul.f32 %v6081_v58, %v4050_v37  ;;  %vm4057_vm1 = vweird.f32 %v6081_v58  ;;  %v4381_v37 = vrot.slane %v7567_v28, 1 }
0x5ed3   :  { %vm4058_vm8 = vmor %vm4056_vm7, %vm4057_vm1 }
0x5ed4   :  { %v4053_v59 = vsub.f32 1.0, %v4052_v43 }
0x5ed6   :  { %v4054_v60 = vmul.f32 %v6081_v58, %v4053_v59 }
0x5ed8   :  { %v4055_v40 = vadd.f32 %v6081_v58, %v4054_v60 }
0x5eda   :  { %v4059_v56 = vsel %vm4058_vm8, %v6081_v58, %v4055_v40  ;;  %v7590_v40 = vld [vmem:[%s8010_s13] sm:$0x1] }
0x5edb   :  { %v4064_v26 = vsel %vm4061_vm9, %v4063_v63, %v4059_v56  ;;  %v3045_v56 = vpop.f32.mrf.mxu2  ;;  %v7598_v63 = vld [vmem:[%s8011_s12] sm:$0x1] }
0x5edc   :  { %v4076_v53 = vsub.f32 1.0, %v4064_v26  ;;  %v4084_v3 = vmul.f32 %v4082_v2, %v4064_v26 }
0x5f30   :  { %v4067_v22 = vpop.permute.xlu1 %4066 }
0x5f31   :  { %v4069_v34 = vmul.f32 %v4067_v22, %v4064_v26  ;;  %v3046_v22 = vadd.f32 %v7598_v63, %v3045_v56 }
0x5f33   :  { %4071 = vrot.lane.b32.xlu2 %v4069_v34, %s6255_s1 }
0x5f8d   :  { %v4072_v33 = vpop.permute.xlu2 %4071 }
0x5f8e   :  { %v4074_v1 = vadd.f32 %v4072_v33, %v7442_v23 }
0x5f90   :  { %6082 = vtanh.f32 %v4074_v1 }
0x5f96   :  { %v6083_v11 = vpop.eup %6082 }
0x5f97   :  { %4078 = vrot.lane.b32.xlu0 %v6083_v11, %s6257_s30 }
0x6009   :  { %v4079_v35 = vpop.permute.xlu0 %4078 }
0x600a   :  { %v4081_v18 = vmul.f32 %v4079_v35, %v4076_v53 }
0x600c   :  { %v4085_v49 = vadd.f32 %v4084_v3, %v4081_v18 }
0x600e   :  { %v4087_v47 = vrot.slane %v4085_v49, 4  ;;  %v4171_v41 = vrot.slane %v4085_v49, 7 }
0x6010   :  { %4088 = vrot.lane.b32.xlu1 %v4087_v47, %s6257_s30 }
0x6082   :  { %v4089_v5 = vpop.permute.xlu1 %4088 }
0x6083   :  { %5758 = vmatmul.msk.f32.vlgmr.msra.gmra.mxu2 %vm247_vm2, %v4089_v5  ;;  %5759 = vmatmul.msk.f32.vlgmr.msra.gmra.mxu1 %vm247_vm2, %v4089_v5 }
0x6084   :  { %4465 = vmatpush.msra.mxu2 %v7510_v51  ;;  %4531 = vmatpush.msra.mxu1 %v7510_v51 }
0x6086   :  { %4466 = vmatpush.msra.mxu2 %v7517_v9  ;;  %4532 = vmatpush.msra.mxu1 %v7517_v9 }
0x6088   :  { %4467 = vmatpush.msra.mxu2 %v7524_v14  ;;  %4533 = vmatpush.msra.mxu1 %v7524_v14 }
0x608a   :  { %4468 = vmatpush.msra.mxu2 %v7531_v44  ;;  %4534 = vmatpush.msra.mxu1 %v7531_v44 }
0x6100   :  { %v4129_v48 = vpop.f32.mrf.mxu1 }
0x6101   :  { %v4130_v46 = vadd.f32 %v7496_v4, %v4129_v48 }
0x6103   :  { %v4133_v61 = vrot.slane %v4130_v46, 3 }
0x6105   :  { %v4135_v15 = vadd.f32 %v4133_v61, %v7442_v23  ;;  %4155 = vrot.lane.b32.xlu2 %v4133_v61, %s6255_s1 }
0x6107   :  { %v5760_v13 = vmul.f32 -1.442695, %v4135_v15 }
0x6109   :  { %6084 = vpow2.f32 %v5760_v13 }
0x610f   :  { %v6085_v16 = vpop.eup %6084 }
0x6110   :  { %v4139_v27 = vadd.f32 1.0, %v6085_v16 }
0x6112   :  { %6086 = vrcp.f32 %v4139_v27  ;;  %v4151_v38 = vand.u32 2147483648, %v4139_v27  ;;  %v4149_v8 = vand.u32 2147483647, %v4139_v27  ;;  %vm4145_vm11 = vweird.f32 %v4139_v27 }
0x6114   :  { %v4152_v20 = vor.u32 1.1754944e-38, %v4151_v38  ;;  %vm4150_vm13 = vcmp.eq.f32.partialorder %v4149_v8, 8.507059e+37 }
0x6118   :  { %v6087_v0 = vpop.eup %6086 }
0x6119   :  { %v4141_v6 = vmul.f32 %v6087_v0, %v4139_v27  ;;  %vm4146_vm10 = vweird.f32 %v6087_v0 }
0x611a   :  { %vm4147_vm12 = vmor %vm4145_vm11, %vm4146_vm10 }
0x611b   :  { %v4142_v7 = vsub.f32 1.0, %v4141_v6 }
0x611d   :  { %v4143_v50 = vmul.f32 %v6087_v0, %v4142_v7 }
0x611f   :  { %v4144_v12 = vadd.f32 %v6087_v0, %v4143_v50 }
0x6121   :  { %v4148_v30 = vsel %vm4147_vm12, %v6087_v0, %v4144_v12 }
0x6122   :  { %v4153_v24 = vsel %vm4150_vm13, %v4152_v20, %v4148_v30 }
0x6123   :  { %v4173_v31 = vmul.f32 %v4171_v41, %v4153_v24  ;;  %v4165_v39 = vsub.f32 1.0, %v4153_v24 }
0x615f   :  { %v4156_v25 = vpop.permute.xlu2 %4155 }
0x6160   :  { %v4158_v52 = vmul.f32 %v4156_v25, %v4153_v24 }
0x6162   :  { %4160 = vrot.lane.b32.xlu0 %v4158_v52, %s6255_s1 }
0x61d4   :  { %v4161_v29 = vpop.permute.xlu0 %4160 }
0x61d5   :  { %v4163_v21 = vadd.f32 %v4161_v29, %v7442_v23 }
0x61d7   :  { %6088 = vtanh.f32 %v4163_v21 }
0x61dd   :  { %v6089_v10 = vpop.eup %6088 }
0x61de   :  { %4167 = vrot.lane.b32.xlu1 %v6089_v10, %s6257_s30 }
0x6250   :  { %v4168_v45 = vpop.permute.xlu1 %4167 }
0x6251   :  { %v4170_v57 = vmul.f32 %v4168_v45, %v4165_v39 }
0x6253   :  { %v7558_v54 = vadd.f32 %v4173_v31, %v4170_v57 }
0x6255   :  { %v4176_v55 = vrot.slane %v7558_v54, 5  ;;  %v4260_v39 = vrot.slane %v7558_v54, 7 }
0x6257   :  { %4177 = vrot.lane.b32.xlu2 %v4176_v55, %s6257_s30 }
0x62b1   :  { %v4178_v32 = vpop.permute.xlu2 %4177 }
0x62b2   :  { %5761 = vmatmul.msk.f32.vlgmr.msra.gmra.mxu3 %vm247_vm2, %v4178_v32  ;;  %5762 = vmatmul.msk.f32.vlgmr.msrb.gmra.mxu0 %vm247_vm2, %v4178_v32 }
0x62b3   :  { %4597 = vmatpush.msra.mxu3 %v7510_v51  ;;  %4663 = vmatpush.msrb.mxu0 %v7510_v51 }
0x62b5   :  { %4598 = vmatpush.msra.mxu3 %v7517_v9  ;;  %4664 = vmatpush.msrb.mxu0 %v7517_v9 }
0x62b7   :  { %4599 = vmatpush.msra.mxu3 %v7524_v14  ;;  %4665 = vmatpush.msrb.mxu0 %v7524_v14 }
0x62b9   :  { %4600 = vmatpush.msra.mxu3 %v7531_v44  ;;  %4666 = vmatpush.msrb.mxu0 %v7531_v44 }
0x62ba   :  { %5769 = vmatmul.msk.f32.vlgmr.msra.gmra.mxu0 %vm247_vm2, %v4381_v37 }
0x62bb   :  { %4927 = vmatpush.msra.mxu0 %v7510_v51 }
0x62bd   :  { %4928 = vmatpush.msra.mxu0 %v7517_v9 }
0x62bf   :  { %4929 = vmatpush.msra.mxu0 %v7524_v14 }
0x62c1   :  { %4930 = vmatpush.msra.mxu0 %v7531_v44 }
0x632f   :  { %v4218_v58 = vpop.f32.mrf.mxu0 }
0x6330   :  { %v4219_v43 = vadd.f32 %v7496_v4, %v4218_v58 }
0x6332   :  { %v4222_v59 = vrot.slane %v4219_v43, 2 }
0x6334   :  { %4244 = vrot.lane.b32.xlu0 %v4222_v59, %s6255_s1  ;;  %v4224_v62 = vadd.f32 %v4222_v59, %v7442_v23 }
0x6336   :  { %v5763_v26 = vmul.f32 -1.442695, %v4224_v62 }
0x6337   :  { %v4401_v60 = vpop.f32.mrf.mxu0 }
0x6338   :  { %v4402_v19 = vadd.f32 %v7590_v40, %v4401_v60  ;;  %6090 = vpow2.f32 %v5763_v26 }
0x633a   :  { %4425 = vrot.lane.b32.xlu1 %v4402_v19, %s6255_s1  ;;  %v4404_v34 = vadd.f32 %v4402_v19, %v3046_v22 }
0x633c   :  { %v5770_v33 = vmul.f32 -1.442695, %v4404_v34 }
0x633e   :  { %v6091_v1 = vpop.eup %6090  ;;  %6092 = vpow2.f32 %v5770_v33 }
0x633f   :  { %v4228_v11 = vadd.f32 1.0, %v6091_v1 }
0x6341   :  { %6094 = vrcp.f32 %v4228_v11  ;;  %v4240_v61 = vand.u32 2147483648, %v4228_v11  ;;  %vm4234_vm14 = vweird.f32 %v4228_v11  ;;  %v4238_v15 = vand.u32 2147483647, %v4228_v11 }
0x6343   :  { %v4241_v27 = vor.u32 1.1754944e-38, %v4240_v61  ;;  %vm4239_vm4 = vcmp.eq.f32.partialorder %v4238_v15, 8.507059e+37 }
0x6344   :  { %v6093_v2 = vpop.eup %6092 }
0x6345   :  { %v4408_v53 = vadd.f32 1.0, %v6093_v2 }
0x6347   :  { %v6095_v35 = vpop.eup %6094  ;;  %6096 = vrcp.f32 %v4408_v53  ;;  %v4420_v38 = vand.u32 2147483648, %v4408_v53  ;;  %vm4414_vm6 = vweird.f32 %v4408_v53  ;;  %v4418_v8 = vand.u32 2147483647, %v4408_v53 }
0x6348   :  { %v4230_v3 = vmul.f32 %v6095_v35, %v4228_v11  ;;  %vm4235_vm0 = vweird.f32 %v6095_v35 }
0x6349   :  { %vm4236_vm3 = vmor %vm4234_vm14, %vm4235_vm0  ;;  %v4421_v20 = vor.u32 1.1754944e-38, %v4420_v38  ;;  %vm4419_vm7 = vcmp.eq.f32.partialorder %v4418_v8, 8.507059e+37 }
0x634a   :  { %v4231_v49 = vsub.f32 1.0, %v4230_v3  ;;  %v3134_v3 = vpop.f32.mrf.mxu3 }
0x634c   :  { %v4232_v5 = vmul.f32 %v6095_v35, %v4231_v49 }
0x634d   :  { %v6097_v18 = vpop.eup %6096 }
0x634e   :  { %v4410_v47 = vmul.f32 %v6097_v18, %v4408_v53  ;;  %v4233_v46 = vadd.f32 %v6095_v35, %v4232_v5  ;;  %vm4415_vm5 = vweird.f32 %v6097_v18 }
0x634f   :  { %vm4416_vm1 = vmor %vm4414_vm6, %vm4415_vm5 }
0x6350   :  { %v4411_v48 = vsub.f32 1.0, %v4410_v47  ;;  %v4237_v16 = vsel %vm4236_vm3, %v6095_v35, %v4233_v46 }
0x6351   :  { %v4242_v7 = vsel %vm4239_vm4, %v4241_v27, %v4237_v16 }
0x6352   :  { %v4412_v13 = vmul.f32 %v6097_v18, %v4411_v48  ;;  %v4254_v45 = vsub.f32 1.0, %v4242_v7  ;;  %v4262_v55 = vmul.f32 %v4260_v39, %v4242_v7 }
0x6354   :  { %v4413_v0 = vadd.f32 %v6097_v18, %v4412_v13 }
0x6356   :  { %v4417_v12 = vsel %vm4416_vm1, %v6097_v18, %v4413_v0  ;;  %v3135_v18 = vadd.f32 %v7598_v63, %v3134_v3 }
0x6357   :  { %v4422_v30 = vsel %vm4419_vm7, %v4421_v20, %v4417_v12 }
0x6358   :  { %v4435_v43 = vsub.f32 1.0, %v4422_v30 }
0x63a6   :  { %v4245_v6 = vpop.permute.xlu0 %4244 }
0x63a7   :  { %v4247_v50 = vmul.f32 %v4245_v6, %v4242_v7 }
0x63a9   :  { %4249 = vrot.lane.b32.xlu2 %v4247_v50, %s6255_s1 }
0x63ac   :  { %v4426_v41 = vpop.permute.xlu1 %4425 }
0x63ad   :  { %v4428_v24 = vmul.f32 %v4426_v41, %v4422_v30 }
0x63af   :  { %4430 = vrot.lane.b32.xlu0 %v4428_v24, %s6255_s1 }
0x63b7   :  { %4441 = vrot.lane.b32.xlu0 %v4381_v37, %s6256_s24 }
0x6403   :  { %v4250_v31 = vpop.permute.xlu2 %4249 }
0x6404   :  { %v4252_v25 = vadd.f32 %v4250_v31, %v7442_v23 }
0x6406   :  { %6098 = vtanh.f32 %v4252_v25 }
0x640c   :  { %v6099_v52 = vpop.eup %6098 }
0x640d   :  { %4256 = vrot.lane.b32.xlu1 %v6099_v52, %s6257_s30 }
0x6421   :  { %v4431_v29 = vpop.permute.xlu0 %4430 }
0x6422   :  { %v4433_v21 = vadd.f32 %v4431_v29, %v3046_v22  ;;  %v7634_v22 = vpop.f32.mrf.mxu2 }
0x6424   :  { %6100 = vtanh.f32 %v4433_v21 }
0x6429   :  { %v4442_v37 = vpop.permute.xlu0 %4441 }
0x642a   :  { %v6101_v10 = vpop.eup %6100  ;;  %v4444_v60 = vmul.f32 %v4442_v37, %v4422_v30  ;;  %v7636_v26 = vpop.f32.mrf.mxu2 }
0x642b   :  { %4437 = vrot.lane.b32.xlu2 %v6101_v10, %s6257_s30 }
0x6432   :  { %v7638_v34 = vpop.f32.mrf.mxu2 }
0x643a   :  { %v7640_v33 = vpop.f32.mrf.mxu2 }
0x6442   :  { %v7642_v1 = vpop.f32.mrf.mxu2 }
0x644a   :  { %v7644_v11 = vpop.f32.mrf.mxu2 }
0x647f   :  { %v4257_v57 = vpop.permute.xlu1 %4256 }
0x6480   :  { %v4259_v32 = vmul.f32 %v4257_v57, %v4254_v45 }
0x6482   :  { %v7610_v28 = vadd.f32 %v4262_v55, %v4259_v32 }
0x6484   :  { %v4265_v58 = vrot.slane %v7610_v28, 6 }
0x6485   :  { %v4438_v59 = vpop.permute.xlu2 %4437 }
0x6486   :  { %v4440_v19 = vmul.f32 %v4438_v59, %v4435_v43  ;;  %4266 = vrot.lane.b32.xlu1 %v4265_v58, %s6257_s30 }
0x6488   :  { %v7614_v62 = vadd.f32 %v4444_v60, %v4440_v19 }
0x648a   :  { %4447 = vrot.lane.b32.xlu2 %v7614_v62, %s6257_s30 }
0x64e4   :  { %v4448_v54 = vpop.permute.xlu2 %4447 }
0x64e5   :  { %4450 = vst.msk [vmem:[#allocation2 + $0x10] sm:$0x1] %vm1804_vm15, %v4448_v54 }
0x64f8   :  { %v4267_v56 = vpop.permute.xlu1 %4266 }
0x64f9   :  { %5764 = vmatmul.msk.f32.vlgmr.msrb.gmra.mxu2 %vm247_vm2, %v4267_v56  ;;  %5765 = vmatmul.msk.f32.vlgmr.msrb.gmra.mxu1 %vm247_vm2, %v4267_v56 }
0x64fa   :  { %4729 = vmatpush.msrb.mxu2 %v7510_v51  ;;  %4795 = vmatpush.msrb.mxu1 %v7510_v51 }
0x64fc   :  { %4730 = vmatpush.msrb.mxu2 %v7517_v9  ;;  %4796 = vmatpush.msrb.mxu1 %v7517_v9 }
0x64fe   :  { %4731 = vmatpush.msrb.mxu2 %v7524_v14  ;;  %4797 = vmatpush.msrb.mxu1 %v7524_v14 }
0x6500   :  { %4732 = vmatpush.msrb.mxu2 %v7531_v44  ;;  %4798 = vmatpush.msrb.mxu1 %v7531_v44 }
0x6501   :  { %5771 = vmatmul.msk.f32.vlgmr.msra.gmra.mxu2 %vm247_vm2, %v4448_v54 }
0x6502   :  { %4993 = vmatpush.msra.mxu2 %v7510_v51 }
0x6504   :  { %4994 = vmatpush.msra.mxu2 %v7517_v9 }
0x6506   :  { %4995 = vmatpush.msra.mxu2 %v7524_v14 }
0x6508   :  { %4996 = vmatpush.msra.mxu2 %v7531_v44 }
0x6576   :  { %v4307_v12 = vpop.f32.mrf.mxu1 }
0x6577   :  { %v4308_v20 = vadd.f32 %v7496_v4, %v4307_v12 }
0x6579   :  { %v4311_v41 = vrot.slane %v4308_v20, 1 }
0x657b   :  { %v4313_v25 = vadd.f32 %v4311_v41, %v7442_v23 }
0x657c   :  { %v7646_v2 = vpop.f32.mrf.mxu2 }
0x657d   :  { %v5766_v52 = vmul.f32 -1.442695, %v4313_v25 }
0x6584   :  { %v4470_v53 = vpop.f32.mrf.mxu2 }
0x6585   :  { %v4471_v35 = vadd.f32 %v7590_v40, %v4470_v53 }
0x6587   :  { %4494 = vrot.lane.b32.xlu0 %v4471_v35, %s6255_s1  ;;  %v4473_v49 = vadd.f32 %v4471_v35, %v3135_v18 }
0x6589   :  { %v5772_v47 = vmul.f32 -1.442695, %v4473_v49 }
0x658b   :  { %6102 = vpow2.f32 %v5772_v47 }
0x6591   :  { %v6103_v5 = vpop.eup %6102 }
0x6592   :  { %v4477_v48 = vadd.f32 1.0, %v6103_v5 }
0x6594   :  { %6104 = vrcp.f32 %v4477_v48  ;;  %v4489_v27 = vand.u32 2147483648, %v4477_v48  ;;  %vm4483_vm9 = vweird.f32 %v4477_v48  ;;  %v4487_v0 = vand.u32 2147483647, %v4477_v48 }
0x6596   :  { %v4490_v7 = vor.u32 1.1754944e-38, %v4489_v27  ;;  %vm4488_vm11 = vcmp.eq.f32.partialorder %v4487_v0, 8.507059e+37 }
0x659a   :  { %v6105_v46 = vpop.eup %6104 }
0x659b   :  { %v4479_v61 = vmul.f32 %v6105_v46, %v4477_v48  ;;  %vm4484_vm8 = vweird.f32 %v6105_v46  ;;  %v3224_v48 = vadd.f32 %v7598_v63, %v7634_v22 }
0x659c   :  { %vm4485_vm10 = vmor %vm4483_vm9, %vm4484_vm8 }
0x659d   :  { %v4480_v15 = vsub.f32 1.0, %v4479_v61 }
0x659f   :  { %v4481_v13 = vmul.f32 %v6105_v46, %v4480_v15 }
0x65a1   :  { %v4482_v16 = vadd.f32 %v6105_v46, %v4481_v13 }
0x65a3   :  { %v4486_v6 = vsel %vm4485_vm10, %v6105_v46, %v4482_v16 }
0x65a4   :  { %v4491_v50 = vsel %vm4488_vm11, %v4490_v7, %v4486_v6 }
0x65a5   :  { %v4504_v57 = vsub.f32 1.0, %v4491_v50  ;;  %v4510_v32 = vmul.f32 %v4491_v50, %v7614_v62 }
0x65f9   :  { %v4495_v38 = vpop.permute.xlu0 %4494 }
0x65fa   :  { %v4497_v8 = vmul.f32 %v4495_v38, %v4491_v50 }
0x65fc   :  { %4499 = vrot.lane.b32.xlu1 %v4497_v8, %s6255_s1 }
0x6604   :  { %4333 = vrot.lane.b32.xlu1 %v4311_v41, %s6255_s1  ;;  %v4349_v41 = vrot.slane %v7610_v28, 7 }
0x666e   :  { %v4500_v30 = vpop.permute.xlu1 %4499 }
0x666f   :  { %v4502_v24 = vadd.f32 %v4500_v30, %v3135_v18 }
0x6671   :  { %6106 = vtanh.f32 %v4502_v24 }
0x6672   :  { %6108 = vpow2.f32 %v5766_v52 }
0x6676   :  { %v4334_v56 = vpop.permute.xlu1 %4333 }
0x6677   :  { %v6107_v31 = vpop.eup %6106 }
0x6678   :  { %4506 = vrot.lane.b32.xlu2 %v6107_v31, %s6257_s30  ;;  %v6109_v29 = vpop.eup %6108 }
0x6679   :  { %v4317_v21 = vadd.f32 1.0, %v6109_v29 }
0x667b   :  { %6110 = vrcp.f32 %v4317_v21  ;;  %v4329_v59 = vand.u32 2147483648, %v4317_v21  ;;  %vm4323_vm13 = vweird.f32 %v4317_v21  ;;  %v4327_v60 = vand.u32 2147483647, %v4317_v21 }
0x667d   :  { %v4330_v54 = vor.u32 1.1754944e-38, %v4329_v59  ;;  %vm4328_vm14 = vcmp.eq.f32.partialorder %v4327_v60, 8.507059e+37 }
0x6681   :  { %v6111_v10 = vpop.eup %6110 }
0x6682   :  { %v4319_v39 = vmul.f32 %v6111_v10, %v4317_v21  ;;  %vm4324_vm12 = vweird.f32 %v6111_v10 }
0x6683   :  { %vm4325_vm0 = vmor %vm4323_vm13, %vm4324_vm12 }
0x6684   :  { %v4320_v45 = vsub.f32 1.0, %v4319_v39 }
0x6686   :  { %v4321_v4 = vmul.f32 %v6111_v10, %v4320_v45 }
0x6688   :  { %v4322_v58 = vadd.f32 %v6111_v10, %v4321_v4 }
0x668a   :  { %v4326_v19 = vsel %vm4325_vm0, %v6111_v10, %v4322_v58  ;;  %v3312_v58 = vpop.f32.mrf.mxu3 }
0x668b   :  { %v4331_v53 = vsel %vm4328_vm14, %v4330_v54, %v4326_v19 }
0x668c   :  { %v4336_v35 = vmul.f32 %v4334_v56, %v4331_v53  ;;  %v4343_v30 = vsub.f32 1.0, %v4331_v53  ;;  %v4351_v31 = vmul.f32 %v4349_v41, %v4331_v53 }
0x6692   :  { %v7691_v59 = vpop.f32.mrf.mxu3 }
0x66d2   :  { %v4507_v55 = vpop.permute.xlu2 %4506 }
0x66d3   :  { %v4509_v37 = vmul.f32 %v4507_v55, %v4504_v57 }
0x66d5   :  { %v7657_v43 = vadd.f32 %v4510_v32, %v4509_v37 }
0x66d7   :  { %4513 = vrot.lane.b32.xlu0 %v7657_v43, %s6257_s30 }
0x66df   :  { %4338 = vrot.lane.b32.xlu0 %v4336_v35, %s6255_s1 }
0x6749   :  { %v4514_v62 = vpop.permute.xlu0 %4513 }
0x674a   :  { %4516 = vst.msk [vmem:[#allocation2 + $0x11] sm:$0x1] %vm1804_vm15, %v4514_v62  ;;  %5773 = vmatmul.msk.f32.vlgmr.msra.gmra.mxu1 %vm247_vm2, %v4514_v62  ;;  %v3313_v62 = vadd.f32 %v7598_v63, %v3312_v58 }
0x674b   :  { %5059 = vmatpush.msra.mxu1 %v7510_v51 }
0x674d   :  { %5060 = vmatpush.msra.mxu1 %v7517_v9 }
0x674f   :  { %5061 = vmatpush.msra.mxu1 %v7524_v14 }
0x6751   :  { %5062 = vmatpush.msra.mxu1 %v7531_v44  ;;  %v4339_v3 = vpop.permute.xlu0 %4338 }
0x6752   :  { %v4341_v18 = vadd.f32 %v4339_v3, %v7442_v23 }
0x6754   :  { %6112 = vtanh.f32 %v4341_v18 }
0x675a   :  { %v6113_v5 = vpop.eup %6112 }
0x67c7   :  { %v4536_v49 = vpop.f32.mrf.mxu1 }
0x67c8   :  { %v4537_v47 = vadd.f32 %v7590_v40, %v4536_v49 }
0x67ca   :  { %4560 = vrot.lane.b32.xlu2 %v4537_v47, %s6255_s1  ;;  %v4539_v46 = vadd.f32 %v4537_v47, %v3224_v48 }
0x67cc   :  { %v5774_v61 = vmul.f32 -1.442695, %v4539_v46 }
0x67ce   :  { %6114 = vpow2.f32 %v5774_v61 }
0x67d2   :  { %4345 = vrot.lane.b32.xlu2 %v6113_v5, %s6257_s30 }
0x67d4   :  { %v6115_v15 = vpop.eup %6114 }
0x67d5   :  { %v4543_v13 = vadd.f32 1.0, %v6115_v15 }
0x67d7   :  { %6116 = vrcp.f32 %v4543_v13  ;;  %v4555_v7 = vand.u32 2147483648, %v4543_v13  ;;  %vm4549_vm4 = vweird.f32 %v4543_v13  ;;  %v4553_v38 = vand.u32 2147483647, %v4543_v13 }
0x67d9   :  { %v4556_v8 = vor.u32 1.1754944e-38, %v4555_v7  ;;  %vm4554_vm6 = vcmp.eq.f32.partialorder %v4553_v38, 8.507059e+37 }
0x67dd   :  { %v6117_v16 = vpop.eup %6116 }
0x67de   :  { %v4545_v23 = vmul.f32 %v6117_v16, %v4543_v13  ;;  %vm4550_vm3 = vweird.f32 %v6117_v16 }
0x67df   :  { %vm4551_vm5 = vmor %vm4549_vm4, %vm4550_vm3 }
0x67e0   :  { %v4546_v27 = vsub.f32 1.0, %v4545_v23 }
0x67e2   :  { %v4547_v0 = vmul.f32 %v6117_v16, %v4546_v27 }
0x67e4   :  { %v4548_v6 = vadd.f32 %v6117_v16, %v4547_v0 }
0x67e6   :  { %v4552_v50 = vsel %vm4551_vm5, %v6117_v16, %v4548_v6 }
0x67e7   :  { %v4557_v12 = vsel %vm4554_vm6, %v4556_v8, %v4552_v50 }
0x67e8   :  { %v4570_v28 = vsub.f32 1.0, %v4557_v12  ;;  %v4576_v57 = vmul.f32 %v4557_v12, %v7657_v43  ;;  %v7693_v43 = vpop.f32.mrf.mxu3 }
0x67f0   :  { %v7695_v60 = vpop.f32.mrf.mxu3 }
0x67f8   :  { %v7697_v19 = vpop.f32.mrf.mxu3 }
0x6800   :  { %v7699_v54 = vpop.f32.mrf.mxu3 }
0x6824   :  { %v4561_v22 = vpop.permute.xlu2 %4560 }
0x6825   :  { %v4563_v20 = vmul.f32 %v4561_v22, %v4557_v12 }
0x6827   :  { %4565 = vrot.lane.b32.xlu1 %v4563_v20, %s6255_s1 }
0x682c   :  { %v4346_v24 = vpop.permute.xlu2 %4345 }
0x682d   :  { %v4348_v25 = vmul.f32 %v4346_v24, %v4343_v30 }
0x682f   :  { %v4352_v52 = vadd.f32 %v4351_v31, %v4348_v25 }
0x6831   :  { %v4354_v29 = vrot.slane %v4352_v52, 7  ;;  %v3402_v52 = vadd.f32 %v7598_v63, %v7636_v26 }
0x6833   :  { %4355 = vrot.lane.b32.xlu1 %v4354_v29, %s6257_s30 }
0x6899   :  { %v4566_v21 = vpop.permute.xlu1 %4565 }
0x689a   :  { %v4568_v10 = vadd.f32 %v4566_v21, %v3224_v48 }
0x689c   :  { %6118 = vtanh.f32 %v4568_v10 }
0x68a2   :  { %v6119_v39 = vpop.eup %6118 }
0x68a3   :  { %4572 = vrot.lane.b32.xlu0 %v6119_v39, %s6257_s30 }
0x68a5   :  { %v4356_v45 = vpop.permute.xlu1 %4355 }
0x68a6   :  { %5767 = vmatmul.msk.f32.vlgmr.msrb.gmra.mxu3 %vm247_vm2, %v4356_v45 }
0x68a7   :  { %4861 = vmatpush.msrb.mxu3 %v7510_v51 }
0x68a9   :  { %4862 = vmatpush.msrb.mxu3 %v7517_v9 }
0x68ab   :  { %4863 = vmatpush.msrb.mxu3 %v7524_v14 }
0x68ad   :  { %4864 = vmatpush.msrb.mxu3 %v7531_v44 }
0x6915   :  { %v4573_v4 = vpop.permute.xlu0 %4572 }
0x6916   :  { %v4575_v55 = vmul.f32 %v4573_v4, %v4570_v28 }
0x6918   :  { %v4577_v32 = vadd.f32 %v4576_v57, %v4575_v55 }
0x691a   :  { %4579 = vrot.lane.b32.xlu2 %v4577_v32, %s6257_s30 }
0x6929   :  { %v7701_v56 = vpop.f32.mrf.mxu3 }
0x6974   :  { %v4580_v37 = vpop.permute.xlu2 %4579 }
0x6975   :  { %4582 = vst.msk [vmem:[#allocation2 + $0x12] sm:$0x1] %vm1804_vm15, %v4580_v37  ;;  %5775 = vmatmul.msk.f32.vlgmr.msra.gmra.mxu3 %vm247_vm2, %v4580_v37 }
0x6976   :  { %5125 = vmatpush.msra.mxu3 %v7510_v51 }
0x6978   :  { %5126 = vmatpush.msra.mxu3 %v7517_v9 }
0x697a   :  { %5127 = vmatpush.msra.mxu3 %v7524_v14 }
0x697c   :  { %5128 = vmatpush.msra.mxu3 %v7531_v44 }
0x69f8   :  { %v4602_v53 = vpop.f32.mrf.mxu3 }
0x69f9   :  { %v4603_v35 = vadd.f32 %v7590_v40, %v4602_v53 }
0x69fb   :  { %4626 = vrot.lane.b32.xlu0 %v4603_v35, %s6255_s1  ;;  %v4605_v3 = vadd.f32 %v4603_v35, %v3313_v62 }
0x69fd   :  { %v5776_v18 = vmul.f32 -1.442695, %v4605_v3 }
0x69ff   :  { %6120 = vpow2.f32 %v5776_v18 }
0x6a05   :  { %v6121_v49 = vpop.eup %6120 }
0x6a06   :  { %v4609_v47 = vadd.f32 1.0, %v6121_v49 }
0x6a08   :  { %6122 = vrcp.f32 %v4609_v47  ;;  %v4621_v13 = vand.u32 2147483648, %v4609_v47  ;;  %vm4615_vm7 = vweird.f32 %v4609_v47  ;;  %v4619_v16 = vand.u32 2147483647, %v4609_v47 }
0x6a0a   :  { %v4622_v27 = vor.u32 1.1754944e-38, %v4621_v13  ;;  %vm4620_vm9 = vcmp.eq.f32.partialorder %v4619_v16, 8.507059e+37 }
0x6a0e   :  { %v6123_v5 = vpop.eup %6122 }
0x6a0f   :  { %v4611_v48 = vmul.f32 %v6123_v5, %v4609_v47  ;;  %vm4616_vm1 = vweird.f32 %v6123_v5 }
0x6a10   :  { %vm4617_vm8 = vmor %vm4615_vm7, %vm4616_vm1 }
0x6a11   :  { %v4612_v46 = vsub.f32 1.0, %v4611_v48 }
0x6a13   :  { %v4613_v61 = vmul.f32 %v6123_v5, %v4612_v46 }
0x6a15   :  { %v4614_v15 = vadd.f32 %v6123_v5, %v4613_v61 }
0x6a17   :  { %v4618_v23 = vsel %vm4617_vm8, %v6123_v5, %v4614_v15 }
0x6a18   :  { %v4623_v6 = vsel %vm4620_vm9, %v4622_v27, %v4618_v23  ;;  %v3491_v23 = vadd.f32 %v7598_v63, %v7691_v59 }
0x6a19   :  { %v4636_v22 = vsub.f32 1.0, %v4623_v6  ;;  %v4642_v20 = vmul.f32 %v4623_v6, %v4577_v32 }
0x6a6d   :  { %v4627_v0 = vpop.permute.xlu0 %4626 }
0x6a6e   :  { %v4629_v7 = vmul.f32 %v4627_v0, %v4623_v6 }
0x6a70   :  { %4631 = vrot.lane.b32.xlu1 %v4629_v7, %s6255_s1 }
0x6ae2   :  { %v4632_v38 = vpop.permute.xlu1 %4631 }
0x6ae3   :  { %v4634_v50 = vadd.f32 %v4632_v38, %v3313_v62 }
0x6ae5   :  { %6124 = vtanh.f32 %v4634_v50 }
0x6aeb   :  { %v6125_v8 = vpop.eup %6124 }
0x6aec   :  { %4638 = vrot.lane.b32.xlu2 %v6125_v8, %s6257_s30 }
0x6b46   :  { %v4639_v12 = vpop.permute.xlu2 %4638 }
0x6b47   :  { %v4641_v41 = vmul.f32 %v4639_v12, %v4636_v22 }
0x6b49   :  { %v4643_v30 = vadd.f32 %v4642_v20, %v4641_v41 }
0x6b4b   :  { %4645 = vrot.lane.b32.xlu0 %v4643_v30, %s6257_s30 }
0x6bbd   :  { %v4646_v24 = vpop.permute.xlu0 %4645 }
0x6bbe   :  { %4648 = vst.msk [vmem:[#allocation2 + $0x13] sm:$0x1] %vm1804_vm15, %v4646_v24  ;;  %5777 = vmatmul.msk.f32.vlgmr.msrb.gmra.mxu0 %vm247_vm2, %v4646_v24 }
0x6bbf   :  { %5191 = vmatpush.msrb.mxu0 %v7510_v51 }
0x6bc1   :  { %5192 = vmatpush.msrb.mxu0 %v7517_v9 }
0x6bc3   :  { %5193 = vmatpush.msrb.mxu0 %v7524_v14 }
0x6bc5   :  { %5194 = vmatpush.msrb.mxu0 %v7531_v44 }
0x6c3b   :  { %v4668_v31 = vpop.f32.mrf.mxu0 }
0x6c3c   :  { %v4669_v25 = vadd.f32 %v7590_v40, %v4668_v31 }
0x6c3e   :  { %4692 = vrot.lane.b32.xlu1 %v4669_v25, %s6255_s1  ;;  %v4671_v29 = vadd.f32 %v4669_v25, %v3402_v52 }
0x6c40   :  { %v5778_v21 = vmul.f32 -1.442695, %v4671_v29 }
0x6c42   :  { %6126 = vpow2.f32 %v5778_v21 }
0x6c48   :  { %v6127_v10 = vpop.eup %6126 }
0x6c49   :  { %v4675_v39 = vadd.f32 1.0, %v6127_v10 }
0x6c4b   :  { %6128 = vrcp.f32 %v4675_v39  ;;  %v4687_v32 = vand.u32 2147483648, %v4675_v39  ;;  %vm4681_vm11 = vweird.f32 %v4675_v39  ;;  %v4685_v37 = vand.u32 2147483647, %v4675_v39 }
0x6c4d   :  { %v4688_v53 = vor.u32 1.1754944e-38, %v4687_v32  ;;  %vm4686_vm13 = vcmp.eq.f32.partialorder %v4685_v37, 8.507059e+37  ;;  %v3580_v37 = vadd.f32 %v7598_v63, %v7638_v34 }
0x6c51   :  { %v6129_v45 = vpop.eup %6128 }
0x6c52   :  { %v4677_v28 = vmul.f32 %v6129_v45, %v4675_v39  ;;  %vm4682_vm10 = vweird.f32 %v6129_v45 }
0x6c53   :  { %vm4683_vm12 = vmor %vm4681_vm11, %vm4682_vm10 }
0x6c54   :  { %v4678_v4 = vsub.f32 1.0, %v4677_v28 }
0x6c56   :  { %v4679_v57 = vmul.f32 %v6129_v45, %v4678_v4 }
0x6c58   :  { %v4680_v55 = vadd.f32 %v6129_v45, %v4679_v57 }
0x6c5a   :  { %v4684_v58 = vsel %vm4683_vm12, %v6129_v45, %v4680_v55 }
0x6c5b   :  { %v4689_v35 = vsel %vm4686_vm13, %v4688_v53, %v4684_v58 }
0x6c5c   :  { %v4702_v47 = vsub.f32 1.0, %v4689_v35  ;;  %v4708_v48 = vmul.f32 %v4689_v35, %v4643_v30 }
0x6cb0   :  { %v4693_v26 = vpop.permute.xlu1 %4692 }
0x6cb1   :  { %v4695_v62 = vmul.f32 %v4693_v26, %v4689_v35 }
0x6cb3   :  { %4697 = vrot.lane.b32.xlu2 %v4695_v62, %s6255_s1 }
0x6d0d   :  { %v4698_v3 = vpop.permute.xlu2 %4697 }
0x6d0e   :  { %v4700_v18 = vadd.f32 %v4698_v3, %v3402_v52 }
0x6d10   :  { %6130 = vtanh.f32 %v4700_v18 }
0x6d16   :  { %v6131_v49 = vpop.eup %6130 }
0x6d17   :  { %4704 = vrot.lane.b32.xlu0 %v6131_v49, %s6257_s30 }
0x6d89   :  { %v4705_v5 = vpop.permute.xlu0 %4704 }
0x6d8a   :  { %v4707_v46 = vmul.f32 %v4705_v5, %v4702_v47 }
0x6d8c   :  { %v4709_v61 = vadd.f32 %v4708_v48, %v4707_v46 }
0x6d8e   :  { %4711 = vrot.lane.b32.xlu1 %v4709_v61, %s6257_s30 }
0x6e00   :  { %v4712_v15 = vpop.permute.xlu1 %4711 }
0x6e01   :  { %4714 = vst.msk [vmem:[#allocation2 + $0x14] sm:$0x1] %vm1804_vm15, %v4712_v15  ;;  %5779 = vmatmul.msk.f32.vlgmr.msrb.gmra.mxu2 %vm247_vm2, %v4712_v15 }
0x6e02   :  { %5257 = vmatpush.msrb.mxu2 %v7510_v51 }
0x6e04   :  { %5258 = vmatpush.msrb.mxu2 %v7517_v9 }
0x6e06   :  { %5259 = vmatpush.msrb.mxu2 %v7524_v14 }
0x6e08   :  { %5260 = vmatpush.msrb.mxu2 %v7531_v44 }
0x6e84   :  { %v4734_v13 = vpop.f32.mrf.mxu2 }
0x6e85   :  { %v4735_v16 = vadd.f32 %v7590_v40, %v4734_v13 }
0x6e87   :  { %4758 = vrot.lane.b32.xlu2 %v4735_v16, %s6255_s1  ;;  %v4737_v27 = vadd.f32 %v4735_v16, %v3491_v23 }
0x6e89   :  { %v5780_v0 = vmul.f32 -1.442695, %v4737_v27 }
0x6e8b   :  { %6132 = vpow2.f32 %v5780_v0 }
0x6e91   :  { %v6133_v6 = vpop.eup %6132 }
0x6e92   :  { %v4741_v7 = vadd.f32 1.0, %v6133_v6 }
0x6e94   :  { %6134 = vrcp.f32 %v4741_v7  ;;  %v4753_v20 = vand.u32 2147483648, %v4741_v7  ;;  %vm4747_vm14 = vweird.f32 %v4741_v7  ;;  %v4751_v41 = vand.u32 2147483647, %v4741_v7 }
0x6e96   :  { %v4754_v24 = vor.u32 1.1754944e-38, %v4753_v20  ;;  %vm4752_vm4 = vcmp.eq.f32.partialorder %v4751_v41, 8.507059e+37  ;;  %v3669_v20 = vadd.f32 %v7598_v63, %v7693_v43 }
0x6e9a   :  { %v6135_v38 = vpop.eup %6134 }
0x6e9b   :  { %v4743_v50 = vmul.f32 %v6135_v38, %v4741_v7  ;;  %vm4748_vm0 = vweird.f32 %v6135_v38  ;;  %v6248_v7 = vld [vmem:[%s8009_s11 + $0x18] sm:$0xff] }
0x6e9c   :  { %vm4749_vm3 = vmor %vm4747_vm14, %vm4748_vm0 }
0x6e9d   :  { %v4744_v8 = vsub.f32 1.0, %v4743_v50  ;;  %v6250_v50 = vld [vmem:[%s8009_s11 + $0x8] sm:$0xff] }
0x6e9f   :  { %v4745_v22 = vmul.f32 %v6135_v38, %v4744_v8  ;;  %v6251_v8 = vld [vmem:[%s8009_s11] sm:$0xff] }
0x6ea1   :  { %v4746_v12 = vadd.f32 %v6135_v38, %v4745_v22 }
0x6ea3   :  { %v4750_v30 = vsel %vm4749_vm3, %v6135_v38, %v4746_v12  ;;  %v6249_v38 = vld [vmem:[%s8009_s11 + $0x10] sm:$0xff] }
0x6ea4   :  { %v4755_v31 = vsel %vm4752_vm4, %v4754_v24, %v4750_v30 }
0x6ea5   :  { %v4768_v10 = vsub.f32 1.0, %v4755_v31  ;;  %v4774_v45 = vmul.f32 %v4755_v31, %v4709_v61 }
0x6ee1   :  { %v4759_v59 = vpop.permute.xlu2 %4758 }
0x6ee2   :  { %v4761_v25 = vmul.f32 %v4759_v59, %v4755_v31 }
0x6ee4   :  { %4763 = vrot.lane.b32.xlu0 %v4761_v25, %s6255_s1 }
0x6f56   :  { %v4764_v52 = vpop.permute.xlu0 %4763 }
0x6f57   :  { %v4766_v29 = vadd.f32 %v4764_v52, %v3491_v23 }
0x6f59   :  { %6136 = vtanh.f32 %v4766_v29 }
0x6f5f   :  { %v6137_v21 = vpop.eup %6136 }
0x6f60   :  { %4770 = vrot.lane.b32.xlu1 %v6137_v21, %s6257_s30 }
0x6fd2   :  { %v4771_v39 = vpop.permute.xlu1 %4770 }
0x6fd3   :  { %v4773_v28 = vmul.f32 %v4771_v39, %v4768_v10 }
0x6fd5   :  { %v4775_v4 = vadd.f32 %v4774_v45, %v4773_v28 }
0x6fd7   :  { %4777 = vrot.lane.b32.xlu2 %v4775_v4, %s6257_s30 }
0x7031   :  { %v4778_v57 = vpop.permute.xlu2 %4777 }
0x7032   :  { %4780 = vst.msk [vmem:[#allocation2 + $0x15] sm:$0x1] %vm1804_vm15, %v4778_v57  ;;  %5781 = vmatmul.msk.f32.vlgmr.msrb.gmra.mxu1 %vm247_vm2, %v4778_v57 }
0x7033   :  { %5323 = vmatpush.msrb.mxu1 %v7510_v51 }
0x7035   :  { %5324 = vmatpush.msrb.mxu1 %v7517_v9 }
0x7037   :  { %5325 = vmatpush.msrb.mxu1 %v7524_v14 }
0x7039   :  { %5326 = vmatpush.msrb.mxu1 %v7531_v44 }
0x70af   :  { %v4800_v55 = vpop.f32.mrf.mxu1 }
0x70b0   :  { %v4801_v32 = vadd.f32 %v7590_v40, %v4800_v55 }
0x70b2   :  { %4824 = vrot.lane.b32.xlu0 %v4801_v32, %s6255_s1  ;;  %v4803_v58 = vadd.f32 %v4801_v32, %v3580_v37 }
0x70b4   :  { %v5782_v53 = vmul.f32 -1.442695, %v4803_v58 }
0x70b6   :  { %6138 = vpow2.f32 %v5782_v53 }
0x70bc   :  { %v6139_v26 = vpop.eup %6138 }
0x70bd   :  { %v4807_v35 = vadd.f32 1.0, %v6139_v26 }
0x70bf   :  { %6140 = vrcp.f32 %v4807_v35  ;;  %v4819_v44 = vand.u32 2147483648, %v4807_v35  ;;  %vm4813_vm6 = vweird.f32 %v4807_v35  ;;  %v4817_v18 = vand.u32 2147483647, %v4807_v35 }
0x70c1   :  { %v4820_v47 = vor.u32 1.1754944e-38, %v4819_v44  ;;  %vm4818_vm7 = vcmp.eq.f32.partialorder %v4817_v18, 8.507059e+37 }
0x70c5   :  { %v6141_v51 = vpop.eup %6140 }
0x70c6   :  { %v4809_v9 = vmul.f32 %v6141_v51, %v4807_v35  ;;  %vm4814_vm5 = vweird.f32 %v6141_v51 }
0x70c7   :  { %vm4815_vm1 = vmor %vm4813_vm6, %vm4814_vm5 }
0x70c8   :  { %v4810_v62 = vsub.f32 1.0, %v4809_v9 }
0x70ca   :  { %v4811_v14 = vmul.f32 %v6141_v51, %v4810_v62 }
0x70cc   :  { %v4812_v3 = vadd.f32 %v6141_v51, %v4811_v14 }
0x70ce   :  { %v4816_v49 = vsel %vm4815_vm1, %v6141_v51, %v4812_v3  ;;  %v3754_v3 = vadd.f32 %v7598_v63, %v7640_v33 }
0x70cf   :  { %v4821_v5 = vsel %vm4818_vm7, %v4820_v47, %v4816_v49 }
0x70d0   :  { %v4834_v13 = vsub.f32 1.0, %v4821_v5  ;;  %v4840_v23 = vmul.f32 %v4821_v5, %v4775_v4 }
0x7124   :  { %v4825_v34 = vpop.permute.xlu0 %4824 }
0x7125   :  { %v4827_v48 = vmul.f32 %v4825_v34, %v4821_v5 }
0x7127   :  { %4829 = vrot.lane.b32.xlu1 %v4827_v48, %s6255_s1 }
0x7199   :  { %v4830_v46 = vpop.permute.xlu1 %4829 }
0x719a   :  { %v4832_v61 = vadd.f32 %v4830_v46, %v3580_v37 }
0x719c   :  { %6142 = vtanh.f32 %v4832_v61 }
0x71a2   :  { %v6143_v15 = vpop.eup %6142 }
0x71a3   :  { %4836 = vrot.lane.b32.xlu2 %v6143_v15, %s6257_s30 }
0x71fd   :  { %v4837_v16 = vpop.permute.xlu2 %4836 }
0x71fe   :  { %v4839_v27 = vmul.f32 %v4837_v16, %v4834_v13 }
0x7200   :  { %v4841_v0 = vadd.f32 %v4840_v23, %v4839_v27 }
0x7202   :  { %4843 = vrot.lane.b32.xlu0 %v4841_v0, %s6257_s30 }
0x7274   :  { %v4844_v6 = vpop.permute.xlu0 %4843 }
0x7275   :  { %4846 = vst.msk [vmem:[#allocation2 + $0x16] sm:$0x1] %vm1804_vm15, %v4844_v6  ;;  %5783 = vmatmul.msk.f32.vlgmr.msrb.gmra.mxu3 %vm247_vm2, %v4844_v6 }
0x7276   :  { %5389 = vmatpush.msrb.mxu3 %v6248_v7 }
0x7278   :  { %5390 = vmatpush.msrb.mxu3 %v6249_v38 }
0x727a   :  { %5391 = vmatpush.msrb.mxu3 %v6250_v50 }
0x727c   :  { %5392 = vmatpush.msrb.mxu3 %v6251_v8 }
0x72f8   :  { %v4866_v22 = vpop.f32.mrf.mxu3 }
0x72f9   :  { %v4867_v12 = vadd.f32 %v7590_v40, %v4866_v22 }
0x72fb   :  { %4890 = vrot.lane.b32.xlu1 %v4867_v12, %s6255_s1  ;;  %v4869_v41 = vadd.f32 %v4867_v12, %v3669_v20 }
0x72fd   :  { %v5784_v30 = vmul.f32 -1.442695, %v4869_v41 }
0x72ff   :  { %6144 = vpow2.f32 %v5784_v30 }
0x7305   :  { %v6145_v24 = vpop.eup %6144 }
0x7306   :  { %v4873_v59 = vadd.f32 1.0, %v6145_v24 }
0x7308   :  { %6146 = vrcp.f32 %v4873_v59  ;;  %v4885_v10 = vand.u32 2147483648, %v4873_v59  ;;  %vm4879_vm9 = vweird.f32 %v4873_v59  ;;  %v4883_v39 = vand.u32 2147483647, %v4873_v59 }
0x730a   :  { %v4886_v28 = vor.u32 1.1754944e-38, %v4885_v10  ;;  %vm4884_vm11 = vcmp.eq.f32.partialorder %v4883_v39, 8.507059e+37 }
0x730e   :  { %v6147_v31 = vpop.eup %6146 }
0x730f   :  { %v4875_v25 = vmul.f32 %v6147_v31, %v4873_v59  ;;  %vm4880_vm8 = vweird.f32 %v6147_v31  ;;  %v3843_v59 = vadd.f32 %v7598_v63, %v7695_v60 }
0x7310   :  { %vm4881_vm10 = vmor %vm4879_vm9, %vm4880_vm8 }
0x7311   :  { %v4876_v52 = vsub.f32 1.0, %v4875_v25 }
0x7313   :  { %v4877_v29 = vmul.f32 %v6147_v31, %v4876_v52 }
0x7315   :  { %v4878_v21 = vadd.f32 %v6147_v31, %v4877_v29 }
0x7317   :  { %v4882_v45 = vsel %vm4881_vm10, %v6147_v31, %v4878_v21 }
0x7318   :  { %v4887_v4 = vsel %vm4884_vm11, %v4886_v28, %v4882_v45 }
0x7319   :  { %v4900_v58 = vsub.f32 1.0, %v4887_v4  ;;  %v4906_v26 = vmul.f32 %v4887_v4, %v4841_v0 }
0x736d   :  { %v4891_v43 = vpop.permute.xlu1 %4890 }
0x736e   :  { %v4893_v57 = vmul.f32 %v4891_v43, %v4887_v4 }
0x7370   :  { %4895 = vrot.lane.b32.xlu2 %v4893_v57, %s6255_s1 }
0x73ca   :  { %v4896_v55 = vpop.permute.xlu2 %4895 }
0x73cb   :  { %v4898_v32 = vadd.f32 %v4896_v55, %v3669_v20 }
0x73cd   :  { %6148 = vtanh.f32 %v4898_v32 }
0x73d3   :  { %v6149_v37 = vpop.eup %6148 }
0x73d4   :  { %4902 = vrot.lane.b32.xlu0 %v6149_v37, %s6257_s30 }
0x7446   :  { %v4903_v53 = vpop.permute.xlu0 %4902 }
0x7447   :  { %v4905_v35 = vmul.f32 %v4903_v53, %v4900_v58 }
0x7449   :  { %v4907_v51 = vadd.f32 %v4906_v26, %v4905_v35 }
0x744b   :  { %4909 = vrot.lane.b32.xlu1 %v4907_v51, %s6257_s30 }
0x74bd   :  { %v4910_v9 = vpop.permute.xlu1 %4909 }
0x74be   :  { %4912 = vst.msk [vmem:[#allocation2 + $0x17] sm:$0x1] %vm1804_vm15, %v4910_v9  ;;  %5785 = vmatmul.msk.f32.vlgmr.msra.gmra.mxu0 %vm247_vm2, %v4910_v9 }
0x753b   :  { %v4932_v62 = vpop.f32.mrf.mxu0 }
0x753c   :  { %v4933_v14 = vadd.f32 %v7590_v40, %v4932_v62 }
0x753e   :  { %4956 = vrot.lane.b32.xlu2 %v4933_v14, %s6255_s1  ;;  %v4935_v44 = vadd.f32 %v4933_v14, %v3754_v3 }
0x7540   :  { %v5786_v18 = vmul.f32 -1.442695, %v4935_v44 }
0x7542   :  { %6150 = vpow2.f32 %v5786_v18  ;;  %v7799_v18 = vld [vmem:[%s8011_s12] sm:$0x1] }
0x7548   :  { %v6151_v49 = vpop.eup %6150 }
0x7549   :  { %v4939_v47 = vadd.f32 1.0, %v6151_v49  ;;  %v3932_v49 = vadd.f32 %v7799_v18, %v7642_v1 }
0x754b   :  { %6152 = vrcp.f32 %v4939_v47  ;;  %v4951_v15 = vand.u32 2147483648, %v4939_v47  ;;  %vm4945_vm13 = vweird.f32 %v4939_v47  ;;  %v4949_v13 = vand.u32 2147483647, %v4939_v47 }
0x754d   :  { %v4952_v23 = vor.u32 1.1754944e-38, %v4951_v15  ;;  %vm4950_vm14 = vcmp.eq.f32.partialorder %v4949_v13, 8.507059e+37 }
0x7551   :  { %v6153_v34 = vpop.eup %6152 }
0x7552   :  { %v4941_v5 = vmul.f32 %v6153_v34, %v4939_v47  ;;  %vm4946_vm12 = vweird.f32 %v6153_v34 }
0x7553   :  { %vm4947_vm0 = vmor %vm4945_vm13, %vm4946_vm12 }
0x7554   :  { %v4942_v48 = vsub.f32 1.0, %v4941_v5 }
0x7556   :  { %v4943_v46 = vmul.f32 %v6153_v34, %v4942_v48 }
0x7558   :  { %v4944_v61 = vadd.f32 %v6153_v34, %v4943_v46 }
0x755a   :  { %v4948_v16 = vsel %vm4947_vm0, %v6153_v34, %v4944_v61 }
0x755b   :  { %v4953_v27 = vsel %vm4950_vm14, %v4952_v23, %v4948_v16 }
0x755c   :  { %v4966_v50 = vsub.f32 1.0, %v4953_v27  ;;  %v4972_v22 = vmul.f32 %v4953_v27, %v4907_v51 }
0x7598   :  { %v4957_v33 = vpop.permute.xlu2 %4956 }
0x7599   :  { %v4959_v0 = vmul.f32 %v4957_v33, %v4953_v27 }
0x759b   :  { %4961 = vrot.lane.b32.xlu0 %v4959_v0, %s6255_s1 }
0x760d   :  { %v4962_v6 = vpop.permute.xlu0 %4961 }
0x760e   :  { %v4964_v7 = vadd.f32 %v4962_v6, %v3754_v3  ;;  %v7792_v3 = vld [vmem:[%s8010_s13] sm:$0x1] }
0x7610   :  { %6154 = vtanh.f32 %v4964_v7 }
0x7616   :  { %v6155_v38 = vpop.eup %6154 }
0x7617   :  { %4968 = vrot.lane.b32.xlu1 %v6155_v38, %s6257_s30 }
0x7689   :  { %v4969_v8 = vpop.permute.xlu1 %4968 }
0x768a   :  { %v4971_v12 = vmul.f32 %v4969_v8, %v4966_v50 }
0x768c   :  { %v4973_v20 = vadd.f32 %v4972_v22, %v4971_v12 }
0x768e   :  { %4975 = vrot.lane.b32.xlu2 %v4973_v20, %s6257_s30 }
0x76e8   :  { %v4976_v41 = vpop.permute.xlu2 %4975 }
0x76e9   :  { %4978 = vst.msk [vmem:[#allocation2 + $0x18] sm:$0x1] %vm1804_vm15, %v4976_v41  ;;  %5787 = vmatmul.msk.f32.vlgmr.msra.gmra.mxu2 %vm247_vm2, %v4976_v41 }
0x776c   :  { %v4998_v30 = vpop.f32.mrf.mxu2 }
0x776d   :  { %v4999_v24 = vadd.f32 %v7590_v40, %v4998_v30 }
0x776f   :  { %5022 = vrot.lane.b32.xlu0 %v4999_v24, %s6255_s1  ;;  %v5001_v31 = vadd.f32 %v4999_v24, %v3843_v59 }
0x7771   :  { %v5788_v25 = vmul.f32 -1.442695, %v5001_v31 }
0x7773   :  { %6156 = vpow2.f32 %v5788_v25  ;;  %v4021_v25 = vadd.f32 %v7799_v18, %v7697_v19 }
0x7779   :  { %v6157_v52 = vpop.eup %6156 }
0x777a   :  { %v5005_v29 = vadd.f32 1.0, %v6157_v52 }
0x777c   :  { %6158 = vrcp.f32 %v5005_v29  ;;  %v5017_v43 = vand.u32 2147483648, %v5005_v29  ;;  %vm5011_vm4 = vweird.f32 %v5005_v29  ;;  %v5015_v40 = vand.u32 2147483647, %v5005_v29 }
0x777e   :  { %v5018_v57 = vor.u32 1.1754944e-38, %v5017_v43  ;;  %vm5016_vm6 = vcmp.eq.f32.partialorder %v5015_v40, 8.507059e+37 }
0x7782   :  { %v6159_v21 = vpop.eup %6158 }
0x7783   :  { %v5007_v10 = vmul.f32 %v6159_v21, %v5005_v29  ;;  %vm5012_vm3 = vweird.f32 %v6159_v21 }
0x7784   :  { %vm5013_vm5 = vmor %vm5011_vm4, %vm5012_vm3 }
0x7785   :  { %v5008_v39 = vsub.f32 1.0, %v5007_v10 }
0x7787   :  { %v5009_v45 = vmul.f32 %v6159_v21, %v5008_v39 }
0x7789   :  { %v5010_v28 = vadd.f32 %v6159_v21, %v5009_v45 }
0x778b   :  { %v5014_v4 = vsel %vm5013_vm5, %v6159_v21, %v5010_v28 }
0x778c   :  { %v5019_v60 = vsel %vm5016_vm6, %v5018_v57, %v5014_v4 }
0x778d   :  { %v5032_v53 = vsub.f32 1.0, %v5019_v60  ;;  %v5038_v35 = vmul.f32 %v5019_v60, %v4973_v20 }
0x77e1   :  { %v5023_v63 = vpop.permute.xlu0 %5022 }
0x77e2   :  { %v5025_v55 = vmul.f32 %v5023_v63, %v5019_v60 }
0x77e4   :  { %5027 = vrot.lane.b32.xlu1 %v5025_v55, %s6255_s1 }
0x7856   :  { %v5028_v32 = vpop.permute.xlu1 %5027 }
0x7857   :  { %v5030_v37 = vadd.f32 %v5028_v32, %v3843_v59 }
0x7859   :  { %6160 = vtanh.f32 %v5030_v37 }
0x785f   :  { %v6161_v58 = vpop.eup %6160 }
0x7860   :  { %5034 = vrot.lane.b32.xlu2 %v6161_v58, %s6257_s30 }
0x78ba   :  { %v5035_v26 = vpop.permute.xlu2 %5034 }
0x78bb   :  { %v5037_v51 = vmul.f32 %v5035_v26, %v5032_v53 }
0x78bd   :  { %v5039_v9 = vadd.f32 %v5038_v35, %v5037_v51 }
0x78bf   :  { %5041 = vrot.lane.b32.xlu0 %v5039_v9, %s6257_s30 }
0x7931   :  { %v5042_v62 = vpop.permute.xlu0 %5041 }
0x7932   :  { %5044 = vst.msk [vmem:[#allocation2 + $0x19] sm:$0x1] %vm1804_vm15, %v5042_v62  ;;  %5789 = vmatmul.msk.f32.vlgmr.msra.gmra.mxu1 %vm247_vm2, %v5042_v62 }
0x79af   :  { %v5064_v14 = vpop.f32.mrf.mxu1 }
0x79b0   :  { %v5065_v44 = vadd.f32 %v7792_v3, %v5064_v14  ;;  %v5448_v14 = vld [vmem:[%s8012_s15 + $0x18] sm:$0xff] }
0x79b1   :  { %5477 = vmatpush.msra.mxu0 %v5448_v14  ;;  %v4199_v14 = vadd.f32 %v7799_v18, %v7699_v54 }
0x79b2   :  { %5088 = vrot.lane.b32.xlu1 %v5065_v44, %s6255_s1  ;;  %v5067_v47 = vadd.f32 %v5065_v44, %v3932_v49  ;;  %v5447_v44 = vld [vmem:[%s8012_s15 + $0x10] sm:$0xff] }
0x79b3   :  { %5478 = vmatpush.msra.mxu0 %v5447_v44 }
0x79b4   :  { %v5790_v34 = vmul.f32 -1.442695, %v5067_v47  ;;  %v5445_v47 = vld [vmem:[%s8012_s15] sm:$0xff] }
0x79b6   :  { %6162 = vpow2.f32 %v5790_v34 }
0x79bc   :  { %v6163_v5 = vpop.eup %6162 }
0x79bd   :  { %v5071_v48 = vadd.f32 1.0, %v6163_v5  ;;  %v5441_v5 = vld [vmem:[#allocation2] sm:$0xff] }
0x79bf   :  { %6164 = vrcp.f32 %v5071_v48  ;;  %v5083_v23 = vand.u32 2147483648, %v5071_v48  ;;  %vm5077_vm7 = vweird.f32 %v5071_v48  ;;  %v5081_v33 = vand.u32 2147483647, %v5071_v48 }
0x79c1   :  { %v5084_v0 = vor.u32 1.1754944e-38, %v5083_v23  ;;  %vm5082_vm9 = vcmp.eq.f32.partialorder %v5081_v33, 8.507059e+37 }
0x79c5   :  { %v6165_v46 = vpop.eup %6164 }
0x79c6   :  { %v5073_v61 = vmul.f32 %v6165_v46, %v5071_v48  ;;  %vm5078_vm1 = vweird.f32 %v6165_v46 }
0x79c7   :  { %vm5079_vm8 = vmor %vm5077_vm7, %vm5078_vm1 }
0x79c8   :  { %v5074_v15 = vsub.f32 1.0, %v5073_v61  ;;  %v4110_v61 = vadd.f32 %v7799_v18, %v7644_v11 }
0x79ca   :  { %v5075_v13 = vmul.f32 %v6165_v46, %v5074_v15 }
0x79cc   :  { %v5076_v16 = vadd.f32 %v6165_v46, %v5075_v13 }
0x79ce   :  { %v5080_v27 = vsel %vm5079_vm8, %v6165_v46, %v5076_v16  ;;  %vm5600_vm8 = vcmask 31744  }
0x79cf   :  { %v5085_v6 = vsel %vm5082_vm9, %v5084_v0, %v5080_v27 }
0x79d0   :  { %v5098_v22 = vsub.f32 1.0, %v5085_v6  ;;  %v5104_v20 = vmul.f32 %v5085_v6, %v5039_v9 }
0x7a24   :  { %v5089_v1 = vpop.permute.xlu1 %5088 }
0x7a25   :  { %v5091_v7 = vmul.f32 %v5089_v1, %v5085_v6 }
0x7a27   :  { %5093 = vrot.lane.b32.xlu2 %v5091_v7, %s6255_s1 }
0x7a81   :  { %v5094_v38 = vpop.permute.xlu2 %5093 }
0x7a82   :  { %v5096_v50 = vadd.f32 %v5094_v38, %v3932_v49  ;;  %v5446_v49 = vld [vmem:[%s8012_s15 + $0x8] sm:$0xff] }
0x7a83   :  { %5479 = vmatpush.msra.mxu0 %v5446_v49 }
0x7a84   :  { %6166 = vtanh.f32 %v5096_v50 }
0x7a85   :  { %5480 = vmatpush.msra.mxu0 %v5445_v47 }
0x7a8a   :  { %v6167_v8 = vpop.eup %6166 }
0x7a8b   :  { %5100 = vrot.lane.b32.xlu0 %v6167_v8, %s6257_s30 }
0x7afd   :  { %v5101_v12 = vpop.permute.xlu0 %5100 }
0x7afe   :  { %v5103_v41 = vmul.f32 %v5101_v12, %v5098_v22 }
0x7b00   :  { %v5105_v30 = vadd.f32 %v5104_v20, %v5103_v41 }
0x7b02   :  { %5107 = vrot.lane.b32.xlu1 %v5105_v30, %s6257_s30 }
0x7b74   :  { %v5108_v24 = vpop.permute.xlu1 %5107 }
0x7b75   :  { %5110 = vst.msk [vmem:[#allocation2 + $0x1a] sm:$0x1] %vm1804_vm15, %v5108_v24  ;;  %5791 = vmatmul.msk.f32.vlgmr.msra.gmra.mxu3 %vm247_vm2, %v5108_v24  ;;  %v5513_v24 = vld [vmem:[%s8014_s17 + $0x78] sm:$0xff] }
0x7b76   :  { %5518 = vmatpush.msra.mxu2 %v5513_v24  ;;  %v7922_v24 = vld [vmem:[%s8015_s18] ss:$0 sm:$0xff] }
0x7bf8   :  { %v5130_v59 = vpop.f32.mrf.mxu3 }
0x7bf9   :  { %v5131_v31 = vadd.f32 %v7792_v3, %v5130_v59  ;;  %v5512_v59 = vld [vmem:[%s8014_s17 + $0x70] sm:$0xff] }
0x7bfa   :  { %5519 = vmatpush.msra.mxu2 %v5512_v59 }
0x7bfb   :  { %5154 = vrot.lane.b32.xlu2 %v5131_v31, %s6255_s1  ;;  %v5133_v52 = vadd.f32 %v5131_v31, %v4021_v25  ;;  %v5511_v31 = vld [vmem:[%s8014_s17 + $0x68] sm:$0xff] }
0x7bfc   :  { %5520 = vmatpush.msra.mxu2 %v5511_v31 }
0x7bfd   :  { %v5792_v29 = vmul.f32 -1.442695, %v5133_v52  ;;  %v5509_v52 = vld [vmem:[%s8014_s17 + $0x58] sm:$0xff] }
0x7bff   :  { %6168 = vpow2.f32 %v5792_v29  ;;  %v5508_v29 = vld [vmem:[%s8014_s17 + $0x50] sm:$0xff] }
0x7c05   :  { %v6169_v21 = vpop.eup %6168 }
0x7c06   :  { %v5137_v10 = vadd.f32 1.0, %v6169_v21  ;;  %v5507_v21 = vld [vmem:[%s8014_s17 + $0x48] sm:$0xff] }
0x7c08   :  { %6170 = vrcp.f32 %v5137_v10  ;;  %v5149_v4 = vand.u32 2147483648, %v5137_v10  ;;  %vm5143_vm11 = vweird.f32 %v5137_v10  ;;  %v5147_v57 = vand.u32 2147483647, %v5137_v10 }
0x7c0a   :  { %v5150_v60 = vor.u32 1.1754944e-38, %v5149_v4  ;;  %vm5148_vm13 = vcmp.eq.f32.partialorder %v5147_v57, 8.507059e+37 }
0x7c0e   :  { %v6171_v39 = vpop.eup %6170 }
0x7c0f   :  { %v5139_v45 = vmul.f32 %v6171_v39, %v5137_v10  ;;  %vm5144_vm10 = vweird.f32 %v6171_v39  ;;  %v5506_v10 = vld [vmem:[%s8014_s17 + $0x40] sm:$0xff] }
0x7c10   :  { %vm5145_vm12 = vmor %vm5143_vm11, %vm5144_vm10 }
0x7c11   :  { %v5140_v28 = vsub.f32 1.0, %v5139_v45  ;;  %v5504_v45 = vld [vmem:[%s8014_s17 + $0x30] sm:$0xff] }
0x7c13   :  { %v5141_v43 = vmul.f32 %v6171_v39, %v5140_v28  ;;  %v5503_v28 = vld [vmem:[%s8014_s17 + $0x28] sm:$0xff] }
0x7c15   :  { %v5142_v40 = vadd.f32 %v6171_v39, %v5141_v43  ;;  %v5502_v43 = vld [vmem:[%s8014_s17 + $0x20] sm:$0xff] }
0x7c17   :  { %v5146_v63 = vsel %vm5145_vm12, %v6171_v39, %v5142_v40  ;;  %v5505_v39 = vld [vmem:[%s8014_s17 + $0x38] sm:$0xff] }
0x7c18   :  { %v5151_v55 = vsel %vm5148_vm13, %v5150_v60, %v5146_v63 }
0x7c19   :  { %v5164_v26 = vsub.f32 1.0, %v5151_v55  ;;  %v5170_v51 = vmul.f32 %v5151_v55, %v5105_v30 }
0x7c55   :  { %v5155_v19 = vpop.permute.xlu2 %5154 }
0x7c56   :  { %v5157_v32 = vmul.f32 %v5155_v19, %v5151_v55  ;;  %v5501_v19 = vld [vmem:[%s8014_s17 + $0x18] sm:$0xff]  ;;  %v5500_v55 = vld [vmem:[%s8014_s17 + $0x10] sm:$0xff] }
0x7c58   :  { %5159 = vrot.lane.b32.xlu0 %v5157_v32, %s6255_s1  ;;  %v5499_v32 = vld [vmem:[%s8014_s17 + $0x8] sm:$0xff] }
0x7cca   :  { %v5160_v37 = vpop.permute.xlu0 %5159 }
0x7ccb   :  { %v5162_v58 = vadd.f32 %v5160_v37, %v4021_v25  ;;  %v5510_v25 = vld [vmem:[%s8014_s17 + $0x60] sm:$0xff] }
0x7ccc   :  { %5521 = vmatpush.msra.mxu2 %v5510_v25  ;;  %v5498_v37 = vld [vmem:[%s8014_s17] sm:$0xff] }
0x7ccd   :  { %6172 = vtanh.f32 %v5162_v58  ;;  %v7892_v58 = vld [vmem:[%s8013_s16] ss:$0 sm:$0xff] }
0x7cce   :  { %5522 = vmatpush.msra.mxu2 %v5509_v52 }
0x7cd0   :  { %5523 = vmatpush.msra.mxu2 %v5508_v29 }
0x7cd2   :  { %5524 = vmatpush.msra.mxu2 %v5507_v21 }
0x7cd3   :  { %v6173_v53 = vpop.eup %6172 }
0x7cd4   :  { %5166 = vrot.lane.b32.xlu1 %v6173_v53, %s6257_s30  ;;  %5525 = vmatpush.msra.mxu2 %v5506_v10  ;;  %v7933_v10 = vld [vmem:[%s8017_s20] ss:$0 sm:$0xff] }
0x7cd6   :  { %5526 = vmatpush.msra.mxu2 %v5505_v39 }
0x7cd8   :  { %5527 = vmatpush.msra.mxu2 %v5504_v45 }
0x7cda   :  { %5528 = vmatpush.msra.mxu2 %v5503_v28  ;;  %v4288_v28 = vadd.f32 %v7799_v18, %v7646_v2 }
0x7cdc   :  { %5529 = vmatpush.msra.mxu2 %v5502_v43 }
0x7cde   :  { %5530 = vmatpush.msra.mxu2 %v5501_v19 }
0x7ce0   :  { %5531 = vmatpush.msra.mxu2 %v5500_v55 }
0x7ce2   :  { %5532 = vmatpush.msra.mxu2 %v5499_v32 }
0x7ce4   :  { %5533 = vmatpush.msra.mxu2 %v5498_v37 }
0x7d46   :  { %v5167_v35 = vpop.permute.xlu1 %5166 }
0x7d47   :  { %v5169_v9 = vmul.f32 %v5167_v35, %v5164_v26 }
0x7d49   :  { %v7814_v62 = vadd.f32 %v5170_v51, %v5169_v9 }
0x7d4b   :  { %5173 = vrot.lane.b32.xlu2 %v7814_v62, %s6257_s30 }
0x7da5   :  { %v5174_v34 = vpop.permute.xlu2 %5173 }
0x7da6   :  { %5176 = vst.msk [vmem:[#allocation2 + $0x1b] sm:$0x1] %vm1804_vm15, %v5174_v34  ;;  %5793 = vmatmul.msk.f32.vlgmr.msrb.gmra.mxu0 %vm247_vm2, %v5174_v34 }
0x7dae   :  { %5801 = vmatmul.msk.f32.vlgmr.msra.gmra.mxu0 %vm247_vm2, %v5441_v5 }
0x7e23   :  { %v5196_v48 = vpop.f32.mrf.mxu0 }
0x7e24   :  { %v5197_v46 = vadd.f32 %v7792_v3, %v5196_v48 }
0x7e26   :  { %5220 = vrot.lane.b32.xlu0 %v5197_v46, %s6255_s1  ;;  %v5199_v15 = vadd.f32 %v5197_v46, %v4110_v61 }
0x7e28   :  { %v5794_v13 = vmul.f32 -1.442695, %v5199_v15 }
0x7e2a   :  { %6174 = vpow2.f32 %v5794_v13 }
0x7e2b   :  { %v5482_v53 = vpop.f32.mrf.mxu0 }
0x7e2c   :  { %v5483_v35 = vadd.f32 %v7892_v58, %v5482_v53 }
0x7e2e   :  { %v5494_v51 = vmax.f32 %v5483_v35, 0.0 }
0x7e30   :  { %v6175_v16 = vpop.eup %6174 }
0x7e31   :  { %v5203_v23 = vadd.f32 1.0, %v6175_v16 }
0x7e33   :  { %6176 = vrcp.f32 %v5203_v23  ;;  %v5215_v7 = vand.u32 2147483648, %v5203_v23  ;;  %vm5209_vm14 = vweird.f32 %v5203_v23  ;;  %v5213_v38 = vand.u32 2147483647, %v5203_v23 }
0x7e35   :  { %v5216_v8 = vor.u32 1.1754944e-38, %v5215_v7  ;;  %vm5214_vm4 = vcmp.eq.f32.partialorder %v5213_v38, 8.507059e+37 }
0x7e39   :  { %v6177_v33 = vpop.eup %6176 }
0x7e3a   :  { %v5205_v27 = vmul.f32 %v6177_v33, %v5203_v23  ;;  %vm5210_vm0 = vweird.f32 %v6177_v33 }
0x7e3b   :  { %vm5211_vm3 = vmor %vm5209_vm14, %vm5210_vm0 }
0x7e3c   :  { %v5206_v0 = vsub.f32 1.0, %v5205_v27 }
0x7e3e   :  { %v5207_v1 = vmul.f32 %v6177_v33, %v5206_v0 }
0x7e40   :  { %v5208_v6 = vadd.f32 %v6177_v33, %v5207_v1 }
0x7e42   :  { %v5212_v50 = vsel %vm5211_vm3, %v6177_v33, %v5208_v6 }
0x7e43   :  { %v5217_v22 = vsel %vm5214_vm4, %v5216_v8, %v5212_v50 }
0x7e44   :  { %v5230_v40 = vsub.f32 1.0, %v5217_v22  ;;  %v5236_v57 = vmul.f32 %v5217_v22, %v7814_v62 }
0x7e98   :  { %v5221_v11 = vpop.permute.xlu0 %5220 }
0x7e99   :  { %v5223_v12 = vmul.f32 %v5221_v11, %v5217_v22 }
0x7e9b   :  { %5225 = vrot.lane.b32.xlu1 %v5223_v12, %s6255_s1  ;;  %v5554_v12 = vld [vmem:[%s8016_s19 + $0x18] sm:$0xff] }
0x7e9c   :  { %5583 = vmatpush.msra.mxu1 %v5554_v12 }
0x7f0d   :  { %v5226_v20 = vpop.permute.xlu1 %5225 }
0x7f0e   :  { %v5228_v41 = vadd.f32 %v5226_v20, %v4110_v61  ;;  %v5553_v20 = vld [vmem:[%s8016_s19 + $0x10] sm:$0xff] }
0x7f0f   :  { %5584 = vmatpush.msra.mxu1 %v5553_v20 }
0x7f10   :  { %6178 = vtanh.f32 %v5228_v41  ;;  %v5552_v41 = vld [vmem:[%s8016_s19 + $0x8] sm:$0xff] }
0x7f11   :  { %5585 = vmatpush.msra.mxu1 %v5552_v41 }
0x7f16   :  { %v6179_v30 = vpop.eup %6178 }
0x7f17   :  { %5232 = vrot.lane.b32.xlu2 %v6179_v30, %s6257_s30  ;;  %v5551_v30 = vld [vmem:[%s8016_s19] sm:$0xff] }
0x7f18   :  { %5586 = vmatpush.msra.mxu1 %v5551_v30 }
0x7f71   :  { %v5233_v4 = vpop.permute.xlu2 %5232 }
0x7f72   :  { %v5235_v63 = vmul.f32 %v5233_v4, %v5230_v40 }
0x7f74   :  { %v5237_v60 = vadd.f32 %v5236_v57, %v5235_v63 }
0x7f76   :  { %5239 = vrot.lane.b32.xlu0 %v5237_v60, %s6257_s30 }
0x7fe8   :  { %v5240_v26 = vpop.permute.xlu0 %5239 }
0x7fe9   :  { %5242 = vst.msk [vmem:[#allocation2 + $0x1c] sm:$0x1] %vm1804_vm15, %v5240_v26  ;;  %5795 = vmatmul.msk.f32.vlgmr.msrb.gmra.mxu2 %vm247_vm2, %v5240_v26 }
0x7ff1   :  { %5534 = vmatmul.f32.vlgmr.msra.gmra.mxu2 %v5494_v51 }
0x806c   :  { %v5262_v9 = vpop.f32.mrf.mxu2 }
0x806d   :  { %v5263_v62 = vadd.f32 %v7792_v3, %v5262_v9 }
0x806f   :  { %5286 = vrot.lane.b32.xlu1 %v5263_v62, %s6255_s1  ;;  %v5265_v44 = vadd.f32 %v5263_v62, %v4199_v14  ;;  %v2750_v62 = vadd.f32 %v7792_v3, %v7236_v36 }
0x8071   :  { %v5796_v49 = vmul.f32 -1.442695, %v5265_v44 }
0x8073   :  { %6180 = vpow2.f32 %v5796_v49 }
0x8074   :  { %v5535_v59 = vpop.f32.mrf.mxu2 }
0x8075   :  { %v5536_v25 = vadd.f32 %v7922_v24, %v5535_v59  ;;  %v4377_v59 = vadd.f32 %v7799_v18, %v7701_v56 }
0x8077   :  { %v5547_v52 = vmax.f32 %v5536_v25, 0.0 }
0x8079   :  { %v6181_v47 = vpop.eup %6180 }
0x807a   :  { %v5269_v34 = vadd.f32 1.0, %v6181_v47  ;;  %v1731_v47 = vadd.f32 %v7799_v18, %v6964_v42 }
0x807c   :  { %6182 = vrcp.f32 %v5269_v34  ;;  %v5281_v13 = vand.u32 2147483648, %v5269_v34  ;;  %vm5275_vm6 = vweird.f32 %v5269_v34  ;;  %v5279_v16 = vand.u32 2147483647, %v5269_v34 }
0x807e   :  { %v5282_v33 = vor.u32 1.1754944e-38, %v5281_v13  ;;  %vm5280_vm7 = vcmp.eq.f32.partialorder %v5279_v16, 8.507059e+37 }
0x8082   :  { %v6183_v5 = vpop.eup %6182 }
0x8083   :  { %v5271_v48 = vmul.f32 %v6183_v5, %v5269_v34  ;;  %vm5276_vm5 = vweird.f32 %v6183_v5  ;;  %v2752_v34 = vadd.f32 %v2750_v62, %v1731_v47 }
0x8084   :  { %vm5277_vm1 = vmor %vm5275_vm6, %vm5276_vm5 }
0x8085   :  { %v5272_v46 = vsub.f32 1.0, %v5271_v48 }
0x8087   :  { %v5273_v61 = vmul.f32 %v6183_v5, %v5272_v46 }
0x8089   :  { %v5274_v15 = vadd.f32 %v6183_v5, %v5273_v61 }
0x808b   :  { %v5278_v23 = vsel %vm5277_vm1, %v6183_v5, %v5274_v15  ;;  %v5703_v5 = vmul.f32 -1.442695, %v2752_v34 }
0x808c   :  { %v5283_v27 = vsel %vm5280_vm7, %v5282_v33, %v5278_v23 }
0x808d   :  { %v5296_v38 = vsub.f32 1.0, %v5283_v27  ;;  %v5302_v8 = vmul.f32 %v5283_v27, %v5237_v60 }
0x80e1   :  { %v5287_v54 = vpop.permute.xlu1 %5286 }
0x80e2   :  { %v5289_v0 = vmul.f32 %v5287_v54, %v5283_v27 }
0x80e4   :  { %5291 = vrot.lane.b32.xlu2 %v5289_v0, %s6255_s1 }
0x813e   :  { %v5292_v1 = vpop.permute.xlu2 %5291 }
0x813f   :  { %v5294_v6 = vadd.f32 %v5292_v1, %v4199_v14 }
0x8141   :  { %6184 = vtanh.f32 %v5294_v6 }
0x8147   :  { %v6185_v7 = vpop.eup %6184 }
0x8148   :  { %5298 = vrot.lane.b32.xlu0 %v6185_v7, %s6257_s30 }
0x81ba   :  { %v5299_v50 = vpop.permute.xlu0 %5298 }
0x81bb   :  { %v5301_v11 = vmul.f32 %v5299_v50, %v5296_v38 }
0x81bd   :  { %v7903_v22 = vadd.f32 %v5302_v8, %v5301_v11 }
0x81bf   :  { %5305 = vrot.lane.b32.xlu1 %v7903_v22, %s6257_s30 }
0x8231   :  { %v5306_v31 = vpop.permute.xlu1 %5305 }
0x8232   :  { %5308 = vst.msk [vmem:[#allocation2 + $0x1d] sm:$0x1] %vm1804_vm15, %v5306_v31  ;;  %5797 = vmatmul.msk.f32.vlgmr.msrb.gmra.mxu1 %vm247_vm2, %v5306_v31 }
0x823a   :  { %5805 = vmatmul.msk.f32.vlgmr.msra.gmra.mxu1 %vm247_vm2, %v5547_v52 }
0x82af   :  { %v5328_v29 = vpop.f32.mrf.mxu1 }
0x82b0   :  { %v5329_v21 = vadd.f32 %v7792_v3, %v5328_v29 }
0x82b2   :  { %5352 = vrot.lane.b32.xlu2 %v5329_v21, %s6255_s1  ;;  %v5331_v43 = vadd.f32 %v5329_v21, %v4288_v28 }
0x82b4   :  { %v5798_v40 = vmul.f32 -1.442695, %v5331_v43 }
0x82b6   :  { %6186 = vpow2.f32 %v5798_v40 }
0x82b7   :  { %v5588_v39 = vpop.f32.mrf.mxu1 }
0x82b8   :  { %v5589_v45 = vadd.f32 %v7933_v10, %v5588_v39 }
0x82ba   :  { %5601 = vst.msk [vmem:[%s8018_s21] sm:$0xff] %vm5600_vm8, %v5589_v45 }
0x82bc   :  { %v6187_v4 = vpop.eup %6186 }
0x82bd   :  { %v5335_v57 = vadd.f32 1.0, %v6187_v4 }
0x82bf   :  { %6188 = vrcp.f32 %v5335_v57  ;;  %v5347_v37 = vand.u32 2147483648, %v5335_v57  ;;  %vm5341_vm10 = vweird.f32 %v5335_v57  ;;  %v5345_v53 = vand.u32 2147483647, %v5335_v57 }
0x82c1   :  { %v5348_v35 = vor.u32 1.1754944e-38, %v5347_v37  ;;  %vm5346_vm12 = vcmp.eq.f32.partialorder %v5345_v53, 8.507059e+37 }
0x82c5   :  { %v6189_v63 = vpop.eup %6188 }
0x82c6   :  { %v5337_v60 = vmul.f32 %v6189_v63, %v5335_v57  ;;  %vm5342_vm9 = vweird.f32 %v6189_v63 }
0x82c7   :  { %vm5343_vm11 = vmor %vm5341_vm10, %vm5342_vm9 }
0x82c8   :  { %v5338_v19 = vsub.f32 1.0, %v5337_v60 }
0x82ca   :  { %v5339_v55 = vmul.f32 %v6189_v63, %v5338_v19 }
0x82cc   :  { %v5340_v32 = vadd.f32 %v6189_v63, %v5339_v55 }
0x82ce   :  { %v5344_v26 = vsel %vm5343_vm11, %v6189_v63, %v5340_v32 }
0x82cf   :  { %v5349_v51 = vsel %vm5346_vm12, %v5348_v35, %v5344_v26 }
0x82d0   :  { %v5362_v16 = vsub.f32 1.0, %v5349_v51  ;;  %v5368_v33 = vmul.f32 %v5349_v51, %v7903_v22 }
0x830c   :  { %v5353_v2 = vpop.permute.xlu2 %5352 }
0x830d   :  { %v5355_v9 = vmul.f32 %v5353_v2, %v5349_v51 }
0x830f   :  { %5357 = vrot.lane.b32.xlu0 %v5355_v9, %s6255_s1  ;;  %v5443_v9 = vld [vmem:[#allocation2 + $0x10] sm:$0xff] }
0x8317   :  { %2773 = vrot.lane.b32.xlu0 %v2750_v62, %s6255_s1 }
0x8381   :  { %v5358_v14 = vpop.permute.xlu0 %5357 }
0x8382   :  { %v5360_v44 = vadd.f32 %v5358_v14, %v4288_v28 }
0x8384   :  { %6190 = vtanh.f32 %v5360_v44 }
0x8385   :  { %6192 = vpow2.f32 %v5703_v5 }
0x8389   :  { %v2774_v7 = vpop.permute.xlu0 %2773 }
0x838a   :  { %v6191_v49 = vpop.eup %6190 }
0x838b   :  { %5364 = vrot.lane.b32.xlu1 %v6191_v49, %s6257_s30  ;;  %v6193_v48 = vpop.eup %6192 }
0x838c   :  { %v2756_v46 = vadd.f32 1.0, %v6193_v48 }
0x838e   :  { %6194 = vrcp.f32 %v2756_v46  ;;  %v2768_v42 = vand.u32 2147483648, %v2756_v46  ;;  %vm2762_vm0 = vweird.f32 %v2756_v46  ;;  %v2766_v1 = vand.u32 2147483647, %v2756_v46 }
0x8390   :  { %v2769_v38 = vor.u32 1.1754944e-38, %v2768_v42  ;;  %vm2767_vm3 = vcmp.eq.f32.partialorder %v2766_v1, 8.507059e+37 }
0x8394   :  { %v6195_v61 = vpop.eup %6194 }
0x8395   :  { %v2758_v15 = vmul.f32 %v6195_v61, %v2756_v46  ;;  %vm2763_vm13 = vweird.f32 %v6195_v61 }
0x8396   :  { %vm2764_vm14 = vmor %vm2762_vm0, %vm2763_vm13 }
0x8397   :  { %v2759_v36 = vsub.f32 1.0, %v2758_v15 }
0x8399   :  { %v2760_v13 = vmul.f32 %v6195_v61, %v2759_v36 }
0x839b   :  { %v2761_v27 = vadd.f32 %v6195_v61, %v2760_v13 }
0x839d   :  { %v2765_v6 = vsel %vm2764_vm14, %v6195_v61, %v2761_v27 }
0x839e   :  { %v2770_v50 = vsel %vm2767_vm3, %v2769_v38, %v2765_v6 }
0x839f   :  { %v2776_v8 = vmul.f32 %v2774_v7, %v2770_v50  ;;  %v2783_v60 = vsub.f32 1.0, %v2770_v50  ;;  %v2789_v55 = vmul.f32 %v2770_v50, %v7206_v17 }
0x83fd   :  { %v5365_v23 = vpop.permute.xlu1 %5364 }
0x83fe   :  { %v5367_v54 = vmul.f32 %v5365_v23, %v5362_v16 }
0x8400   :  { %v7950_v0 = vadd.f32 %v5368_v33, %v5367_v54 }
0x8402   :  { %5371 = vrot.lane.b32.xlu2 %v7950_v0, %s6257_s30 }
0x840a   :  { %2778 = vrot.lane.b32.xlu2 %v2776_v8, %s6255_s1 }
0x845c   :  { %v5372_v11 = vpop.permute.xlu2 %5371 }
0x845d   :  { %5374 = vst.msk [vmem:[#allocation2 + $0x1e] sm:$0x1] %vm1804_vm15, %v5372_v11  ;;  %5799 = vmatmul.msk.f32.vlgmr.msrb.gmra.mxu3 %vm247_vm2, %v5372_v11 }
0x8464   :  { %v2779_v22 = vpop.permute.xlu2 %2778 }
0x8465   :  { %v2781_v12 = vadd.f32 %v2779_v22, %v1731_v47 }
0x8467   :  { %6196 = vtanh.f32 %v2781_v12 }
0x846d   :  { %v6197_v30 = vpop.eup %6196 }
0x84e0   :  { %v5394_v20 = vpop.f32.mrf.mxu3 }
0x84e1   :  { %v5395_v41 = vadd.f32 %v7792_v3, %v5394_v20 }
0x84e3   :  { %5418 = vrot.lane.b32.xlu1 %v5395_v41, %s6255_s1  ;;  %v5397_v31 = vadd.f32 %v5395_v41, %v4377_v59 }
0x84e5   :  { %v5800_v25 = vmul.f32 -1.442695, %v5397_v31 }
0x84e7   :  { %6198 = vpow2.f32 %v5800_v25 }
0x84eb   :  { %2785 = vrot.lane.b32.xlu1 %v6197_v30, %s6257_s30 }
0x84ed   :  { %v6199_v52 = vpop.eup %6198 }
0x84ee   :  { %v5401_v29 = vadd.f32 1.0, %v6199_v52 }
0x84f0   :  { %6200 = vrcp.f32 %v5401_v29  ;;  %v5413_v43 = vand.u32 2147483648, %v5401_v29  ;;  %vm5407_vm5 = vweird.f32 %v5401_v29  ;;  %v5411_v40 = vand.u32 2147483647, %v5401_v29 }
0x84f2   :  { %v5414_v57 = vor.u32 1.1754944e-38, %v5413_v43  ;;  %vm5412_vm1 = vcmp.eq.f32.partialorder %v5411_v40, 8.507059e+37 }
0x84f6   :  { %v6201_v21 = vpop.eup %6200 }
0x84f7   :  { %v5403_v39 = vmul.f32 %v6201_v21, %v5401_v29  ;;  %vm5408_vm4 = vweird.f32 %v6201_v21 }
0x84f8   :  { %vm5409_vm6 = vmor %vm5407_vm5, %vm5408_vm4 }
0x84f9   :  { %v5404_v45 = vsub.f32 1.0, %v5403_v39 }
0x84fb   :  { %v5405_v28 = vmul.f32 %v6201_v21, %v5404_v45 }
0x84fd   :  { %v5406_v3 = vadd.f32 %v6201_v21, %v5405_v28 }
0x84ff   :  { %v5410_v4 = vsel %vm5409_vm6, %v6201_v21, %v5406_v3 }
0x8500   :  { %v5415_v18 = vsel %vm5412_vm1, %v5414_v57, %v5410_v4 }
0x8501   :  { %v5428_v17 = vsub.f32 1.0, %v5415_v18  ;;  %v5434_v14 = vmul.f32 %v5415_v18, %v7950_v0 }
0x8555   :  { %v5419_v56 = vpop.permute.xlu1 %5418 }
0x8556   :  { %v5421_v63 = vmul.f32 %v5419_v56, %v5415_v18 }
0x8558   :  { %5423 = vrot.lane.b32.xlu0 %v5421_v63, %s6255_s1 }
0x855d   :  { %v2786_v19 = vpop.permute.xlu1 %2785 }
0x855e   :  { %v2788_v32 = vmul.f32 %v2786_v19, %v2783_v60 }
0x8560   :  { %v2790_v37 = vadd.f32 %v2789_v55, %v2788_v32 }
0x8562   :  { %2792 = vrot.lane.b32.xlu0 %v2790_v37, %s6257_s30 }
0x85ca   :  { %v5424_v53 = vpop.permute.xlu0 %5423 }
0x85cb   :  { %v5426_v26 = vadd.f32 %v5424_v53, %v4377_v59 }
0x85cd   :  { %6202 = vtanh.f32 %v5426_v26 }
0x85d3   :  { %v6203_v35 = vpop.eup %6202 }
0x85d4   :  { %5430 = vrot.lane.b32.xlu2 %v6203_v35, %s6257_s30  ;;  %v2793_v2 = vpop.permute.xlu0 %2792 }
0x85d5   :  { %2795 = vst.msk [vmem:[#allocation2 + $0xf] sm:$0x1] %vm1804_vm15, %v2793_v2 }
0x85dc   :  { %v5442_v51 = vld [vmem:[#allocation2 + $0x8] sm:$0xff] }
0x85dd   :  { %5802 = vmatmul.msk.f32.gmra.mxu0 %vm247_vm2, %v5442_v51 }
0x85e5   :  { %5803 = vmatmul.msk.f32.gmra.mxu0 %vm247_vm2, %v5443_v9 }
0x862e   :  { %v5431_v62 = vpop.permute.xlu2 %5430 }
0x862f   :  { %v5433_v44 = vmul.f32 %v5431_v62, %v5428_v17 }
0x8631   :  { %v5435_v49 = vadd.f32 %v5434_v14, %v5433_v44 }
0x8633   :  { %5437 = vrot.lane.b32.xlu1 %v5435_v49, %s6257_s30 }
0x865a   :  { %v5485_v47 = vpop.f32.mrf.mxu0 }
0x865b   :  { %v5486_v34 = vadd.f32 %v7892_v58, %v5485_v47 }
0x865d   :  { %v5495_v5 = vmax.f32 %v5486_v34, 0.0 }
0x865f   :  { %5537 = vmatmul.f32.gmra.mxu2 %v5495_v5 }
0x8662   :  { %v5488_v48 = vpop.f32.mrf.mxu0 }
0x8663   :  { %v5489_v46 = vadd.f32 %v7892_v58, %v5488_v48 }
0x8665   :  { %v5496_v61 = vmax.f32 %v5489_v46, 0.0 }
0x8667   :  { %5540 = vmatmul.f32.gmra.mxu2 %v5496_v61 }
0x86a5   :  { %v5438_v15 = vpop.permute.xlu1 %5437 }
0x86a6   :  { %5440 = vst.msk [vmem:[#allocation2 + $0x1f] sm:$0x1] %vm1804_vm15, %v5438_v15 }
0x86ad   :  { %v5444_v36 = vld [vmem:[#allocation2 + $0x18] sm:$0xff] }
0x86ae   :  { %5804 = vmatmul.msk.f32.gmra.mxu0 %vm247_vm2, %v5444_v36 }
0x86e2   :  { %v5538_v13 = vpop.f32.mrf.mxu2 }
0x86e3   :  { %v5539_v16 = vadd.f32 %v7922_v24, %v5538_v13 }
0x86e5   :  { %v5548_v23 = vmax.f32 %v5539_v16, 0.0 }
0x86e7   :  { %5806 = vmatmul.msk.f32.gmra.mxu1 %vm247_vm2, %v5548_v23 }
0x86ea   :  { %v5541_v33 = vpop.f32.mrf.mxu2 }
0x86eb   :  { %v5542_v54 = vadd.f32 %v7922_v24, %v5541_v33 }
0x86ed   :  { %v5549_v27 = vmax.f32 %v5542_v54, 0.0 }
0x86ef   :  { %5807 = vmatmul.msk.f32.gmra.mxu1 %vm247_vm2, %v5549_v27 }
0x872b   :  { %v5491_v0 = vpop.f32.mrf.mxu0 }
0x872c   :  { %v5492_v42 = vadd.f32 %v7892_v58, %v5491_v0 }
0x872e   :  { %v5497_v1 = vmax.f32 %v5492_v42, 0.0 }
0x8730   :  { %5543 = vmatmul.f32.gmra.mxu2 %v5497_v1 }
0x8764   :  { %v5591_v6 = vpop.f32.mrf.mxu1 }
0x8765   :  { %v5592_v7 = vadd.f32 %v7933_v10, %v5591_v6 }
0x8767   :  { %5602 = vst.msk [vmem:[%s8018_s21 + $0x8] sm:$0xff] %vm5600_vm8, %v5592_v7 }
0x876c   :  { %v5594_v38 = vpop.f32.mrf.mxu1 }
0x876d   :  { %v5595_v50 = vadd.f32 %v7933_v10, %v5594_v38 }
0x876f   :  { %5603 = vst.msk [vmem:[%s8018_s21 + $0x10] sm:$0xff] %vm5600_vm8, %v5595_v50 }
0x87b3   :  { %v5544_v8 = vpop.f32.mrf.mxu2 }
0x87b4   :  { %v5545_v58 = vadd.f32 %v7922_v24, %v5544_v8 }
0x87b6   :  { %v5550_v11 = vmax.f32 %v5545_v58, 0.0 }
0x87b8   :  { %5808 = vmatmul.msk.f32.gmra.mxu1 %vm247_vm2, %v5550_v11 }
0x8835   :  { %v5597_v22 = vpop.f32.mrf.mxu1 }
0x8836   :  { %v5598_v12 = vadd.f32 %v7933_v10, %v5597_v22 }
0x8838   :  { %5604 = vst.msk [vmem:[%s8018_s21 + $0x18] sm:$0xff] %vm5600_vm8, %v5598_v12 }

</bundles_post_ra>
